<compile_context>
chip_gen: v7x
topology: tpu7x:2x2x1
jax: 0.10.0
libtpu: 0.0.40
codegen_flags: <defaults>
</compile_context>

<pallas_src>
import functools
import math

import numpy as np

import jax
import jax.numpy as jnp
from jax.experimental import pallas as pl
from jax.experimental.pallas import tpu as pltpu


def _gelu(x):
    return jax.nn.gelu(x, approximate=True)


# ----------------------------- fused Pallas kernel ---------------------------
def _fused_resconv_kernel(*refs, num_layers, N, H, W, Chid, Cout, K, pad,
                          hl, wl, Wp):
    """Whole ResConvLayers forward in a single kernel invocation.

    refs (in order):
      x_ref     : (N, H+2*pad, Wp*Cin)   folded, zero-padded network input
      w_in_ref  : (K, Wp*Cin, W*Chid)    banded input-conv weights (one per kh)
      b_in_ref  : (1, W*Chid)            bias tiled along W (folded layout)
      per residual layer l:
        w_l_ref : (K, Wp*Chid, W*Chid)
        b_l_ref : (1, W*Chid)
      w_out_ref : (K, Wp*Chid, W*Cout)
      b_out_ref : (1, W*Cout)
      o_ref     : (N*H, W*Cout)          output (folded layout)
      h_ref     : (N, Hp, Wp*Chid)       f32 scratch: folded padded hidden act
    """
    x_ref, w_in_ref, b_in_ref = refs[0], refs[1], refs[2]
    layer_refs = refs[3:3 + 2 * num_layers]
    w_out_ref, b_out_ref, o_ref, h_ref = refs[3 + 2 * num_layers:]

    NH = N * H
    WC = W * Chid
    cl = wl * Chid          # lane offset of the valid W window (multiple of 128)
    LH = Wp * Chid          # folded lane width of the hidden scratch

    # Zero ONLY the border strips that the row-band matmuls actually read
    # (top/bottom pad rows + left/right W-pad strips).  The interior is
    # overwritten by the first center store; rows above hl-pad are never read.
    h_ref[:, hl - pad:hl, :] = jnp.zeros((N, pad, LH), jnp.float32)
    h_ref[:, hl + H:hl + H + pad, :] = jnp.zeros((N, pad, LH), jnp.float32)
    h_ref[:, hl:hl + H, 0:cl] = jnp.zeros((N, H, cl), jnp.float32)
    h_ref[:, hl:hl + H, cl + WC:LH] = jnp.zeros((N, H, LH - cl - WC),
                                                jnp.float32)

    def band_conv(src_ref, row0, w_ref, out_cols):
        # SAME-padded KxK conv == sum over kh of one row-band matmul against a
        # banded weight matrix (MXU-friendly; no im2col buffer, no tap stores).
        acc = jnp.zeros((NH, out_cols), jnp.float32)
        for kh in range(K):
            r = row0 - pad + kh
            band = src_ref[:, r:r + H, :]                     # (N, H, lanes)
            acc = acc + jnp.dot(band.reshape(NH, band.shape[-1]), w_ref[kh],
                                preferred_element_type=jnp.float32)
        return acc

    def store_center(act_2d):
        # Lane-dense (offset 128, width W*Chid) and sublane-aligned (hl=8)
        # store of the (N*H, W*Chid) activation into the folded scratch.
        h_ref[:, hl:hl + H, cl:cl + WC] = act_2d.reshape(N, H, WC)

    # ---- input conv + GELU ---------------------------------------------------
    act = _gelu(band_conv(x_ref, pad, w_in_ref, WC) + b_in_ref[...])
    store_center(act)

    # ---- residual conv layers:  h = GELU(conv(h) + b) + h ---------------------
    for l in range(num_layers):
        w_ref, b_ref = layer_refs[2 * l], layer_refs[2 * l + 1]
        acc = band_conv(h_ref, hl, w_ref, WC)
        # Residual: one dense re-load of the center window (kept short-lived to
        # avoid holding a 16-vreg value across the three matmuls).
        res = h_ref[:, hl:hl + H, cl:cl + WC].reshape(NH, WC)
        store_center(_gelu(acc + b_ref[...]) + res)

    # ---- output conv (no activation) ------------------------------------------
    acc = band_conv(h_ref, hl, w_out_ref, W * Cout)
    o_ref[...] = (acc + b_out_ref[...]).astype(o_ref.dtype)


# ----------------------------- wrapper (glue) --------------------------------
def _banded_weight(w_hwio, kh, Wp, wl, W, pad):
    """Banded matrix B_kh with B[wp*Ci+ci, w*Co+co] = W[kh, wp-wl-w+pad, ci, co]."""
    K, _, Ci, Co = w_hwio.shape
    sel = np.zeros((K, Wp, W), np.float32)
    for w in range(W):
        for kw in range(K):
            sel[kw, wl + w + kw - pad, w] = 1.0
    b = jnp.einsum("kpw,kio->piwo", jnp.asarray(sel), w_hwio[kh])
    return b.reshape(Wp * Ci, W * Co)


def res_conv_layers_forward(x_nchw, params):
    """Forward pass of ResConvLayers. Input/output are NCHW like PyTorch."""
    N, Cin, H, W = x_nchw.shape
    w_in, b_in = params["in"]            # (K, K, Cin, Chid), (Chid,)
    K = w_in.shape[0]
    Chid = w_in.shape[3]
    res_params = params["res"]
    w_out, b_out = params["out"]         # (K, K, Chid, Cout), (Cout,)
    Cout = w_out.shape[3]
    num_layers = len(res_params)
    pad = K // 2
    NH = N * H

    # Folded-W layout: valid W window starts at lane offset wl*Chid (multiple
    # of 128 -> lane-dense stores); valid H rows start at sublane offset hl.
    lane = 128
    step = lane // math.gcd(Chid, lane)
    wl = max(1, -(-pad // step)) * step      # smallest multiple of step >= pad
    Wp = wl + W + pad
    hl = max(8, -(-pad // 8) * 8)            # sublane-aligned start of valid H
    Hp = hl + H + pad

    # Folded, zero-padded network input: (N, H+2*pad, Wp*Cin).
    x_nhwc = jnp.transpose(x_nchw, (0, 2, 3, 1))
    xp = jnp.zeros((N, H + 2 * pad, Wp, Cin), x_nhwc.dtype)
    xp = xp.at[:, pad:pad + H, wl:wl + W, :].set(x_nhwc)
    x_folded = xp.reshape(N, H + 2 * pad, Wp * Cin)

    def banded_stack(w):
        return jnp.stack(
            [_banded_weight(w, kh, Wp, wl, W, pad) for kh in range(K)], axis=0)

    def folded_bias(b):
        return jnp.tile(b, W).reshape(1, W * b.shape[0])

    inputs = [x_folded, banded_stack(w_in), folded_bias(b_in)]
    for (w, b) in res_params:
        inputs += [banded_stack(w), folded_bias(b)]
    inputs += [banded_stack(w_out), folded_bias(b_out)]

    kernel = functools.partial(
        _fused_resconv_kernel, num_layers=num_layers,
        N=N, H=H, W=W, Chid=Chid, Cout=Cout, K=K, pad=pad,
        hl=hl, wl=wl, Wp=Wp)

    flops = 2 * NH * K * (Wp * Cin * W * Chid
                          + num_layers * Wp * Chid * W * Chid
                          + Wp * Chid * W * Cout)
    bytes_accessed = 4 * (sum(int(a.size) for a in inputs) + NH * W * Cout)

    out = pl.pallas_call(
        kernel,
        out_shape=jax.ShapeDtypeStruct((NH, W * Cout), jnp.float32),
        in_specs=[pl.BlockSpec(memory_space=pltpu.MemorySpace.VMEM)
                  for _ in inputs],
        out_specs=pl.BlockSpec(memory_space=pltpu.MemorySpace.VMEM),
        scratch_shapes=[
            pltpu.VMEM((N, Hp, Wp * Chid), jnp.float32),   # folded hidden act
        ],
        compiler_params=pltpu.CompilerParams(
            vmem_limit_bytes=32 * 1024 * 1024),
        cost_estimate=pl.CostEstimate(
            flops=flops,
            transcendentals=NH * W * Chid * (1 + num_layers),
            bytes_accessed=bytes_accessed),
    )(*inputs)

    # (N*H, W*Cout) -> NCHW
    return jnp.transpose(out.reshape(N, H, W, Cout), (0, 3, 1, 2))


# ----------------------------- reference (pure JAX) ---------------------------
def _conv_ref(x_nhwc, w_hwio, b):
    y = jax.lax.conv_general_dilated(
        x_nhwc, w_hwio, window_strides=(1, 1), padding="SAME",
        dimension_numbers=("NHWC", "HWIO", "NHWC"),
    )
    return y + b.reshape(1, 1, 1, -1)


def res_conv_layers_ref(x_nchw, params):
    x = jnp.transpose(x_nchw, (0, 2, 3, 1))
    w0, b0 = params["in"]
    h = _gelu(_conv_ref(x, w0, b0))
    for (w, b) in params["res"]:
        h = _gelu(_conv_ref(h, w, b)) + h
    w_out, b_out = params["out"]
    y = _conv_ref(h, w_out, b_out)
    return jnp.transpose(y, (0, 3, 1, 2))


# ----------------------------- parameter init --------------------------------
def init_params(key, channels_in, channels_hidden, channels_out,
                num_layers, kernel_size):
    """Deterministic synthetic init. Weights stored HWIO, biases (Cout,)."""
    def conv_init(k, cin, cout):
        kw, kb = jax.random.split(k)
        w = 0.1 * jax.random.normal(
            kw, (kernel_size, kernel_size, cin, cout), jnp.float32)
        b = 0.1 * jax.random.normal(kb, (cout,), jnp.float32)
        return w, b

    keys = jax.random.split(key, num_layers + 2)
    params = {
        "in": conv_init(keys[0], channels_in, channels_hidden),
        "res": [
            conv_init(keys[1 + i], channels_hidden, channels_hidden)
            for i in range(num_layers)
        ],
        "out": conv_init(keys[-1], channels_hidden, channels_out),
    }
    return params


# ----------------------------- main -------------------------------------------
if __name__ == "__main__":
    N, C_IN, H, W = 2, 4, 16, 16
    C_HID, C_OUT, NUM_LAYERS, KSIZE = 32, 4, 2, 3

    key = jax.random.PRNGKey(0)
    k_x, k_p = jax.random.split(key)
    x = jax.random.normal(k_x, (N, C_IN, H, W), jnp.float32)   # NCHW like torch
    params = init_params(k_p, C_IN, C_HID, C_OUT, NUM_LAYERS, KSIZE)

    out = jax.block_until_ready(res_conv_layers_forward(x, params))
    assert out.shape == (N, C_OUT, H, W), out.shape

    ref = jax.block_until_ready(res_conv_layers_ref(x, params))
    assert jnp.allclose(out, ref, rtol=1e-3, atol=1e-3), (
        float(jnp.max(jnp.abs(out - ref)))
    )

    print("KERNEL_OK")
</pallas_src>

<mosaic_0001>
module attributes {stable_mosaic.version = 11 : i64} {
  func.func @_fused_resconv_kernel(%arg0: memref<2x18x84xf32, #tpu.memory_space<vmem>>, %arg1: memref<3x84x512xf32, #tpu.memory_space<vmem>>, %arg2: memref<1x512xf32, #tpu.memory_space<vmem>>, %arg3: memref<3x672x512xf32, #tpu.memory_space<vmem>>, %arg4: memref<1x512xf32, #tpu.memory_space<vmem>>, %arg5: memref<3x672x512xf32, #tpu.memory_space<vmem>>, %arg6: memref<1x512xf32, #tpu.memory_space<vmem>>, %arg7: memref<3x672x64xf32, #tpu.memory_space<vmem>>, %arg8: memref<1x64xf32, #tpu.memory_space<vmem>>, %arg9: memref<32x64xf32, #tpu.memory_space<vmem>>, %arg10: memref<2x25x672xf32, #tpu.memory_space<vmem>>) attributes {dimension_semantics = [], scalar_prefetch = 0 : i64, scratch_operands = 1 : i64, tpu.core_type = #tpu.core_type<tc>} {
    %cst = arith.constant 0.000000e+00 : f32
    %0 = vector.broadcast %cst : f32 to vector<2x1x672xf32>
    %c0 = arith.constant 0 : index
    %c7 = arith.constant 7 : index
    %c0_0 = arith.constant 0 : index
    %1 = vector.load %arg10[%c0, %c7, %c0_0] : memref<2x25x672xf32, #tpu.memory_space<vmem>>, vector<2x1x672xf32>
    tpu.vector_store %arg10[%c0, %c7, %c0_0], %0 {strides = array<i32>} : memref<2x25x672xf32, #tpu.memory_space<vmem>>, vector<2x1x672xf32>,
    %cst_1 = arith.constant 0.000000e+00 : f32
    %2 = vector.broadcast %cst_1 : f32 to vector<2x1x672xf32>
    %c0_2 = arith.constant 0 : index
    %c24 = arith.constant 24 : index
    %c0_3 = arith.constant 0 : index
    %3 = vector.load %arg10[%c0_2, %c24, %c0_3] : memref<2x25x672xf32, #tpu.memory_space<vmem>>, vector<2x1x672xf32>
    tpu.vector_store %arg10[%c0_2, %c24, %c0_3], %2 {strides = array<i32>} : memref<2x25x672xf32, #tpu.memory_space<vmem>>, vector<2x1x672xf32>,
    %cst_4 = arith.constant 0.000000e+00 : f32
    %4 = vector.broadcast %cst_4 : f32 to vector<2x16x128xf32>
    %c0_5 = arith.constant 0 : index
    %c8 = arith.constant 8 : index
    %c0_6 = arith.constant 0 : index
    %5 = vector.load %arg10[%c0_5, %c8, %c0_6] : memref<2x25x672xf32, #tpu.memory_space<vmem>>, vector<2x16x128xf32>
    tpu.vector_store %arg10[%c0_5, %c8, %c0_6], %4 {strides = array<i32>} : memref<2x25x672xf32, #tpu.memory_space<vmem>>, vector<2x16x128xf32>,
    %cst_7 = arith.constant 0.000000e+00 : f32
    %6 = vector.broadcast %cst_7 : f32 to vector<2x16x32xf32>
    %c0_8 = arith.constant 0 : index
    %c8_9 = arith.constant 8 : index
    %c640 = arith.constant 640 : index
    %7 = vector.load %arg10[%c0_8, %c8_9, %c640] : memref<2x25x672xf32, #tpu.memory_space<vmem>>, vector<2x16x32xf32>
    tpu.vector_store %arg10[%c0_8, %c8_9, %c640], %6 {strides = array<i32>} : memref<2x25x672xf32, #tpu.memory_space<vmem>>, vector<2x16x32xf32>,
    %cst_10 = arith.constant 0.000000e+00 : f32
    %8 = vector.broadcast %cst_10 : f32 to vector<32x512xf32>
    %c0_11 = arith.constant 0 : index
    %c0_12 = arith.constant 0 : index
    %c0_13 = arith.constant 0 : index
    %9 = vector.load %arg0[%c0_11, %c0_12, %c0_13] : memref<2x18x84xf32, #tpu.memory_space<vmem>>, vector<2x16x84xf32>
    %10 = vector.shape_cast %9 : vector<2x16x84xf32> to vector<32x84xf32>
    %c0_14 = arith.constant 0 : index
    %c0_15 = arith.constant 0 : index
    %c0_16 = arith.constant 0 : index
    %11 = vector.load %arg1[%c0_14, %c0_15, %c0_16] : memref<3x84x512xf32, #tpu.memory_space<vmem>>, vector<1x84x512xf32>
    %12 = vector.shape_cast %11 : vector<1x84x512xf32> to vector<84x512xf32>
    %cst_17 = arith.constant dense<0.000000e+00> : vector<32x512xf32>
    %13 = tpu.matmul %10, %12, %cst_17 {dimension_numbers = #tpu.dot_dimension_numbers<[1], [0], [0], [1], [0, 0, 1, 1], [], []>} : vector<32x84xf32>, vector<84x512xf32>, vector<32x512xf32> -> vector<32x512xf32>
    %14 = arith.addf %8, %13 : vector<32x512xf32>
    %c0_18 = arith.constant 0 : index
    %c1 = arith.constant 1 : index
    %c0_19 = arith.constant 0 : index
    %15 = vector.load %arg0[%c0_18, %c1, %c0_19] : memref<2x18x84xf32, #tpu.memory_space<vmem>>, vector<2x16x84xf32>
    %16 = vector.shape_cast %15 : vector<2x16x84xf32> to vector<32x84xf32>
    %c1_20 = arith.constant 1 : index
    %c0_21 = arith.constant 0 : index
    %c0_22 = arith.constant 0 : index
    %17 = vector.load %arg1[%c1_20, %c0_21, %c0_22] : memref<3x84x512xf32, #tpu.memory_space<vmem>>, vector<1x84x512xf32>
    %18 = vector.shape_cast %17 : vector<1x84x512xf32> to vector<84x512xf32>
    %cst_23 = arith.constant dense<0.000000e+00> : vector<32x512xf32>
    %19 = tpu.matmul %16, %18, %cst_23 {dimension_numbers = #tpu.dot_dimension_numbers<[1], [0], [0], [1], [0, 0, 1, 1], [], []>} : vector<32x84xf32>, vector<84x512xf32>, vector<32x512xf32> -> vector<32x512xf32>
    %20 = arith.addf %14, %19 : vector<32x512xf32>
    %c0_24 = arith.constant 0 : index
    %c2 = arith.constant 2 : index
    %c0_25 = arith.constant 0 : index
    %21 = vector.load %arg0[%c0_24, %c2, %c0_25] : memref<2x18x84xf32, #tpu.memory_space<vmem>>, vector<2x16x84xf32>
    %22 = vector.shape_cast %21 : vector<2x16x84xf32> to vector<32x84xf32>
    %c2_26 = arith.constant 2 : index
    %c0_27 = arith.constant 0 : index
    %c0_28 = arith.constant 0 : index
    %23 = vector.load %arg1[%c2_26, %c0_27, %c0_28] : memref<3x84x512xf32, #tpu.memory_space<vmem>>, vector<1x84x512xf32>
    %24 = vector.shape_cast %23 : vector<1x84x512xf32> to vector<84x512xf32>
    %cst_29 = arith.constant dense<0.000000e+00> : vector<32x512xf32>
    %25 = tpu.matmul %22, %24, %cst_29 {dimension_numbers = #tpu.dot_dimension_numbers<[1], [0], [0], [1], [0, 0, 1, 1], [], []>} : vector<32x84xf32>, vector<84x512xf32>, vector<32x512xf32> -> vector<32x512xf32>
    %26 = arith.addf %20, %25 : vector<32x512xf32>
    %c0_30 = arith.constant 0 : index
    %c0_31 = arith.constant 0 : index
    %27 = vector.load %arg2[%c0_30, %c0_31] : memref<1x512xf32, #tpu.memory_space<vmem>>, vector<1x512xf32>
    %28 = vector.broadcast %27 : vector<1x512xf32> to vector<32x512xf32>
    %29 = arith.addf %26, %28 : vector<32x512xf32>
    %30 = arith.mulf %29, %29 : vector<32x512xf32>
    %31 = arith.mulf %29, %30 : vector<32x512xf32>
    %cst_32 = arith.constant 4.471500e-02 : f32
    %32 = vector.broadcast %cst_32 : f32 to vector<32x512xf32>
    %33 = arith.mulf %32, %31 : vector<32x512xf32>
    %34 = arith.addf %29, %33 : vector<32x512xf32>
    %cst_33 = arith.constant 0.797884583 : f32
    %35 = vector.broadcast %cst_33 : f32 to vector<32x512xf32>
    %36 = arith.mulf %35, %34 : vector<32x512xf32>
    %37 = math.tanh %36 : vector<32x512xf32>
    %cst_34 = arith.constant 1.000000e+00 : f32
    %38 = vector.broadcast %cst_34 : f32 to vector<32x512xf32>
    %39 = arith.addf %38, %37 : vector<32x512xf32>
    %cst_35 = arith.constant 5.000000e-01 : f32
    %40 = vector.broadcast %cst_35 : f32 to vector<32x512xf32>
    %41 = arith.mulf %40, %39 : vector<32x512xf32>
    %42 = arith.mulf %29, %41 : vector<32x512xf32>
    %43 = vector.shape_cast %42 : vector<32x512xf32> to vector<2x16x512xf32>
    %c0_36 = arith.constant 0 : index
    %c8_37 = arith.constant 8 : index
    %c128 = arith.constant 128 : index
    %44 = vector.load %arg10[%c0_36, %c8_37, %c128] : memref<2x25x672xf32, #tpu.memory_space<vmem>>, vector<2x16x512xf32>
    tpu.vector_store %arg10[%c0_36, %c8_37, %c128], %43 {strides = array<i32>} : memref<2x25x672xf32, #tpu.memory_space<vmem>>, vector<2x16x512xf32>,
    %cst_38 = arith.constant 0.000000e+00 : f32
    %45 = vector.broadcast %cst_38 : f32 to vector<32x512xf32>
    %c0_39 = arith.constant 0 : index
    %c7_40 = arith.constant 7 : index
    %c0_41 = arith.constant 0 : index
    %46 = vector.load %arg10[%c0_39, %c7_40, %c0_41] : memref<2x25x672xf32, #tpu.memory_space<vmem>>, vector<2x16x672xf32>
    %47 = vector.shape_cast %46 : vector<2x16x672xf32> to vector<32x672xf32>
    %c0_42 = arith.constant 0 : index
    %c0_43 = arith.constant 0 : index
    %c0_44 = arith.constant 0 : index
    %48 = vector.load %arg3[%c0_42, %c0_43, %c0_44] : memref<3x672x512xf32, #tpu.memory_space<vmem>>, vector<1x672x512xf32>
    %49 = vector.shape_cast %48 : vector<1x672x512xf32> to vector<672x512xf32>
    %cst_45 = arith.constant dense<0.000000e+00> : vector<32x512xf32>
    %50 = tpu.matmul %47, %49, %cst_45 {dimension_numbers = #tpu.dot_dimension_numbers<[1], [0], [0], [1], [0, 0, 1, 1], [], []>} : vector<32x672xf32>, vector<672x512xf32>, vector<32x512xf32> -> vector<32x512xf32>
    %51 = arith.addf %45, %50 : vector<32x512xf32>
    %c0_46 = arith.constant 0 : index
    %c8_47 = arith.constant 8 : index
    %c0_48 = arith.constant 0 : index
    %52 = vector.load %arg10[%c0_46, %c8_47, %c0_48] : memref<2x25x672xf32, #tpu.memory_space<vmem>>, vector<2x16x672xf32>
    %53 = vector.shape_cast %52 : vector<2x16x672xf32> to vector<32x672xf32>
    %c1_49 = arith.constant 1 : index
    %c0_50 = arith.constant 0 : index
    %c0_51 = arith.constant 0 : index
    %54 = vector.load %arg3[%c1_49, %c0_50, %c0_51] : memref<3x672x512xf32, #tpu.memory_space<vmem>>, vector<1x672x512xf32>
    %55 = vector.shape_cast %54 : vector<1x672x512xf32> to vector<672x512xf32>
    %cst_52 = arith.constant dense<0.000000e+00> : vector<32x512xf32>
    %56 = tpu.matmul %53, %55, %cst_52 {dimension_numbers = #tpu.dot_dimension_numbers<[1], [0], [0], [1], [0, 0, 1, 1], [], []>} : vector<32x672xf32>, vector<672x512xf32>, vector<32x512xf32> -> vector<32x512xf32>
    %57 = arith.addf %51, %56 : vector<32x512xf32>
    %c0_53 = arith.constant 0 : index
    %c9 = arith.constant 9 : index
    %c0_54 = arith.constant 0 : index
    %58 = vector.load %arg10[%c0_53, %c9, %c0_54] : memref<2x25x672xf32, #tpu.memory_space<vmem>>, vector<2x16x672xf32>
    %59 = vector.shape_cast %58 : vector<2x16x672xf32> to vector<32x672xf32>
    %c2_55 = arith.constant 2 : index
    %c0_56 = arith.constant 0 : index
    %c0_57 = arith.constant 0 : index
    %60 = vector.load %arg3[%c2_55, %c0_56, %c0_57] : memref<3x672x512xf32, #tpu.memory_space<vmem>>, vector<1x672x512xf32>
    %61 = vector.shape_cast %60 : vector<1x672x512xf32> to vector<672x512xf32>
    %cst_58 = arith.constant dense<0.000000e+00> : vector<32x512xf32>
    %62 = tpu.matmul %59, %61, %cst_58 {dimension_numbers = #tpu.dot_dimension_numbers<[1], [0], [0], [1], [0, 0, 1, 1], [], []>} : vector<32x672xf32>, vector<672x512xf32>, vector<32x512xf32> -> vector<32x512xf32>
    %63 = arith.addf %57, %62 : vector<32x512xf32>
    %c0_59 = arith.constant 0 : index
    %c8_60 = arith.constant 8 : index
    %c128_61 = arith.constant 128 : index
    %64 = vector.load %arg10[%c0_59, %c8_60, %c128_61] : memref<2x25x672xf32, #tpu.memory_space<vmem>>, vector<2x16x512xf32>
    %65 = vector.shape_cast %64 : vector<2x16x512xf32> to vector<32x512xf32>
    %c0_62 = arith.constant 0 : index
    %c0_63 = arith.constant 0 : index
    %66 = vector.load %arg4[%c0_62, %c0_63] : memref<1x512xf32, #tpu.memory_space<vmem>>, vector<1x512xf32>
    %67 = vector.broadcast %66 : vector<1x512xf32> to vector<32x512xf32>
    %68 = arith.addf %63, %67 : vector<32x512xf32>
    %69 = arith.mulf %68, %68 : vector<32x512xf32>
    %70 = arith.mulf %68, %69 : vector<32x512xf32>
    %cst_64 = arith.constant 4.471500e-02 : f32
    %71 = vector.broadcast %cst_64 : f32 to vector<32x512xf32>
    %72 = arith.mulf %71, %70 : vector<32x512xf32>
    %73 = arith.addf %68, %72 : vector<32x512xf32>
    %cst_65 = arith.constant 0.797884583 : f32
    %74 = vector.broadcast %cst_65 : f32 to vector<32x512xf32>
    %75 = arith.mulf %74, %73 : vector<32x512xf32>
    %76 = math.tanh %75 : vector<32x512xf32>
    %cst_66 = arith.constant 1.000000e+00 : f32
    %77 = vector.broadcast %cst_66 : f32 to vector<32x512xf32>
    %78 = arith.addf %77, %76 : vector<32x512xf32>
    %cst_67 = arith.constant 5.000000e-01 : f32
    %79 = vector.broadcast %cst_67 : f32 to vector<32x512xf32>
    %80 = arith.mulf %79, %78 : vector<32x512xf32>
    %81 = arith.mulf %68, %80 : vector<32x512xf32>
    %82 = arith.addf %81, %65 : vector<32x512xf32>
    %83 = vector.shape_cast %82 : vector<32x512xf32> to vector<2x16x512xf32>
    %c0_68 = arith.constant 0 : index
    %c8_69 = arith.constant 8 : index
    %c128_70 = arith.constant 128 : index
    %84 = vector.load %arg10[%c0_68, %c8_69, %c128_70] : memref<2x25x672xf32, #tpu.memory_space<vmem>>, vector<2x16x512xf32>
    tpu.vector_store %arg10[%c0_68, %c8_69, %c128_70], %83 {strides = array<i32>} : memref<2x25x672xf32, #tpu.memory_space<vmem>>, vector<2x16x512xf32>,
    %cst_71 = arith.constant 0.000000e+00 : f32
    %85 = vector.broadcast %cst_71 : f32 to vector<32x512xf32>
    %c0_72 = arith.constant 0 : index
    %c7_73 = arith.constant 7 : index
    %c0_74 = arith.constant 0 : index
    %86 = vector.load %arg10[%c0_72, %c7_73, %c0_74] : memref<2x25x672xf32, #tpu.memory_space<vmem>>, vector<2x16x672xf32>
    %87 = vector.shape_cast %86 : vector<2x16x672xf32> to vector<32x672xf32>
    %c0_75 = arith.constant 0 : index
    %c0_76 = arith.constant 0 : index
    %c0_77 = arith.constant 0 : index
    %88 = vector.load %arg5[%c0_75, %c0_76, %c0_77] : memref<3x672x512xf32, #tpu.memory_space<vmem>>, vector<1x672x512xf32>
    %89 = vector.shape_cast %88 : vector<1x672x512xf32> to vector<672x512xf32>
    %cst_78 = arith.constant dense<0.000000e+00> : vector<32x512xf32>
    %90 = tpu.matmul %87, %89, %cst_78 {dimension_numbers = #tpu.dot_dimension_numbers<[1], [0], [0], [1], [0, 0, 1, 1], [], []>} : vector<32x672xf32>, vector<672x512xf32>, vector<32x512xf32> -> vector<32x512xf32>
    %91 = arith.addf %85, %90 : vector<32x512xf32>
    %c0_79 = arith.constant 0 : index
    %c8_80 = arith.constant 8 : index
    %c0_81 = arith.constant 0 : index
    %92 = vector.load %arg10[%c0_79, %c8_80, %c0_81] : memref<2x25x672xf32, #tpu.memory_space<vmem>>, vector<2x16x672xf32>
    %93 = vector.shape_cast %92 : vector<2x16x672xf32> to vector<32x672xf32>
    %c1_82 = arith.constant 1 : index
    %c0_83 = arith.constant 0 : index
    %c0_84 = arith.constant 0 : index
    %94 = vector.load %arg5[%c1_82, %c0_83, %c0_84] : memref<3x672x512xf32, #tpu.memory_space<vmem>>, vector<1x672x512xf32>
    %95 = vector.shape_cast %94 : vector<1x672x512xf32> to vector<672x512xf32>
    %cst_85 = arith.constant dense<0.000000e+00> : vector<32x512xf32>
    %96 = tpu.matmul %93, %95, %cst_85 {dimension_numbers = #tpu.dot_dimension_numbers<[1], [0], [0], [1], [0, 0, 1, 1], [], []>} : vector<32x672xf32>, vector<672x512xf32>, vector<32x512xf32> -> vector<32x512xf32>
    %97 = arith.addf %91, %96 : vector<32x512xf32>
    %c0_86 = arith.constant 0 : index
    %c9_87 = arith.constant 9 : index
    %c0_88 = arith.constant 0 : index
    %98 = vector.load %arg10[%c0_86, %c9_87, %c0_88] : memref<2x25x672xf32, #tpu.memory_space<vmem>>, vector<2x16x672xf32>
    %99 = vector.shape_cast %98 : vector<2x16x672xf32> to vector<32x672xf32>
    %c2_89 = arith.constant 2 : index
    %c0_90 = arith.constant 0 : index
    %c0_91 = arith.constant 0 : index
    %100 = vector.load %arg5[%c2_89, %c0_90, %c0_91] : memref<3x672x512xf32, #tpu.memory_space<vmem>>, vector<1x672x512xf32>
    %101 = vector.shape_cast %100 : vector<1x672x512xf32> to vector<672x512xf32>
    %cst_92 = arith.constant dense<0.000000e+00> : vector<32x512xf32>
    %102 = tpu.matmul %99, %101, %cst_92 {dimension_numbers = #tpu.dot_dimension_numbers<[1], [0], [0], [1], [0, 0, 1, 1], [], []>} : vector<32x672xf32>, vector<672x512xf32>, vector<32x512xf32> -> vector<32x512xf32>
    %103 = arith.addf %97, %102 : vector<32x512xf32>
    %c0_93 = arith.constant 0 : index
    %c8_94 = arith.constant 8 : index
    %c128_95 = arith.constant 128 : index
    %104 = vector.load %arg10[%c0_93, %c8_94, %c128_95] : memref<2x25x672xf32, #tpu.memory_space<vmem>>, vector<2x16x512xf32>
    %105 = vector.shape_cast %104 : vector<2x16x512xf32> to vector<32x512xf32>
    %c0_96 = arith.constant 0 : index
    %c0_97 = arith.constant 0 : index
    %106 = vector.load %arg6[%c0_96, %c0_97] : memref<1x512xf32, #tpu.memory_space<vmem>>, vector<1x512xf32>
    %107 = vector.broadcast %106 : vector<1x512xf32> to vector<32x512xf32>
    %108 = arith.addf %103, %107 : vector<32x512xf32>
    %109 = arith.mulf %108, %108 : vector<32x512xf32>
    %110 = arith.mulf %108, %109 : vector<32x512xf32>
    %cst_98 = arith.constant 4.471500e-02 : f32
    %111 = vector.broadcast %cst_98 : f32 to vector<32x512xf32>
    %112 = arith.mulf %111, %110 : vector<32x512xf32>
    %113 = arith.addf %108, %112 : vector<32x512xf32>
    %cst_99 = arith.constant 0.797884583 : f32
    %114 = vector.broadcast %cst_99 : f32 to vector<32x512xf32>
    %115 = arith.mulf %114, %113 : vector<32x512xf32>
    %116 = math.tanh %115 : vector<32x512xf32>
    %cst_100 = arith.constant 1.000000e+00 : f32
    %117 = vector.broadcast %cst_100 : f32 to vector<32x512xf32>
    %118 = arith.addf %117, %116 : vector<32x512xf32>
    %cst_101 = arith.constant 5.000000e-01 : f32
    %119 = vector.broadcast %cst_101 : f32 to vector<32x512xf32>
    %120 = arith.mulf %119, %118 : vector<32x512xf32>
    %121 = arith.mulf %108, %120 : vector<32x512xf32>
    %122 = arith.addf %121, %105 : vector<32x512xf32>
    %123 = vector.shape_cast %122 : vector<32x512xf32> to vector<2x16x512xf32>
    %c0_102 = arith.constant 0 : index
    %c8_103 = arith.constant 8 : index
    %c128_104 = arith.constant 128 : index
    %124 = vector.load %arg10[%c0_102, %c8_103, %c128_104] : memref<2x25x672xf32, #tpu.memory_space<vmem>>, vector<2x16x512xf32>
    tpu.vector_store %arg10[%c0_102, %c8_103, %c128_104], %123 {strides = array<i32>} : memref<2x25x672xf32, #tpu.memory_space<vmem>>, vector<2x16x512xf32>,
    %cst_105 = arith.constant 0.000000e+00 : f32
    %125 = vector.broadcast %cst_105 : f32 to vector<32x64xf32>
    %c0_106 = arith.constant 0 : index
    %c7_107 = arith.constant 7 : index
    %c0_108 = arith.constant 0 : index
    %126 = vector.load %arg10[%c0_106, %c7_107, %c0_108] : memref<2x25x672xf32, #tpu.memory_space<vmem>>, vector<2x16x672xf32>
    %127 = vector.shape_cast %126 : vector<2x16x672xf32> to vector<32x672xf32>
    %c0_109 = arith.constant 0 : index
    %c0_110 = arith.constant 0 : index
    %c0_111 = arith.constant 0 : index
    %128 = vector.load %arg7[%c0_109, %c0_110, %c0_111] : memref<3x672x64xf32, #tpu.memory_space<vmem>>, vector<1x672x64xf32>
    %129 = vector.shape_cast %128 : vector<1x672x64xf32> to vector<672x64xf32>
    %cst_112 = arith.constant dense<0.000000e+00> : vector<32x64xf32>
    %130 = tpu.matmul %127, %129, %cst_112 {dimension_numbers = #tpu.dot_dimension_numbers<[1], [0], [0], [1], [0, 0, 1, 1], [], []>} : vector<32x672xf32>, vector<672x64xf32>, vector<32x64xf32> -> vector<32x64xf32>
    %131 = arith.addf %125, %130 : vector<32x64xf32>
    %c0_113 = arith.constant 0 : index
    %c8_114 = arith.constant 8 : index
    %c0_115 = arith.constant 0 : index
    %132 = vector.load %arg10[%c0_113, %c8_114, %c0_115] : memref<2x25x672xf32, #tpu.memory_space<vmem>>, vector<2x16x672xf32>
    %133 = vector.shape_cast %132 : vector<2x16x672xf32> to vector<32x672xf32>
    %c1_116 = arith.constant 1 : index
    %c0_117 = arith.constant 0 : index
    %c0_118 = arith.constant 0 : index
    %134 = vector.load %arg7[%c1_116, %c0_117, %c0_118] : memref<3x672x64xf32, #tpu.memory_space<vmem>>, vector<1x672x64xf32>
    %135 = vector.shape_cast %134 : vector<1x672x64xf32> to vector<672x64xf32>
    %cst_119 = arith.constant dense<0.000000e+00> : vector<32x64xf32>
    %136 = tpu.matmul %133, %135, %cst_119 {dimension_numbers = #tpu.dot_dimension_numbers<[1], [0], [0], [1], [0, 0, 1, 1], [], []>} : vector<32x672xf32>, vector<672x64xf32>, vector<32x64xf32> -> vector<32x64xf32>
    %137 = arith.addf %131, %136 : vector<32x64xf32>
    %c0_120 = arith.constant 0 : index
    %c9_121 = arith.constant 9 : index
    %c0_122 = arith.constant 0 : index
    %138 = vector.load %arg10[%c0_120, %c9_121, %c0_122] : memref<2x25x672xf32, #tpu.memory_space<vmem>>, vector<2x16x672xf32>
    %139 = vector.shape_cast %138 : vector<2x16x672xf32> to vector<32x672xf32>
    %c2_123 = arith.constant 2 : index
    %c0_124 = arith.constant 0 : index
    %c0_125 = arith.constant 0 : index
    %140 = vector.load %arg7[%c2_123, %c0_124, %c0_125] : memref<3x672x64xf32, #tpu.memory_space<vmem>>, vector<1x672x64xf32>
    %141 = vector.shape_cast %140 : vector<1x672x64xf32> to vector<672x64xf32>
    %cst_126 = arith.constant dense<0.000000e+00> : vector<32x64xf32>
    %142 = tpu.matmul %139, %141, %cst_126 {dimension_numbers = #tpu.dot_dimension_numbers<[1], [0], [0], [1], [0, 0, 1, 1], [], []>} : vector<32x672xf32>, vector<672x64xf32>, vector<32x64xf32> -> vector<32x64xf32>
    %143 = arith.addf %137, %142 : vector<32x64xf32>
    %c0_127 = arith.constant 0 : index
    %c0_128 = arith.constant 0 : index
    %144 = vector.load %arg8[%c0_127, %c0_128] : memref<1x64xf32, #tpu.memory_space<vmem>>, vector<1x64xf32>
    %145 = vector.broadcast %144 : vector<1x64xf32> to vector<32x64xf32>
    %146 = arith.addf %143, %145 : vector<32x64xf32>
    %c0_129 = arith.constant 0 : index
    %c0_130 = arith.constant 0 : index
    %147 = vector.load %arg9[%c0_129, %c0_130] : memref<32x64xf32, #tpu.memory_space<vmem>>, vector<32x64xf32>
    tpu.vector_store %arg9[%c0_129, %c0_130], %146 {strides = array<i32>} : memref<32x64xf32, #tpu.memory_space<vmem>>, vector<32x64xf32>,
    return
  }
}

</mosaic_0001>

<bundles_post_ra>
// kernel: tpu_custom_call.1
= control target key start
LH: loop header
LB: loop body
LE: loop exit
PB: predicated region body
PF: predicated region fallthrough
CT: control target
= control target key end

     0   :  { %14 = vsyncpa [#allocation4], 0  ;;  %s14686_s0 = inlined_call_operand.vmem [shape: f32[2,18,84], index: 0, kind: input, shape index: {}]   ;;  %s14687_s1 = inlined_call_operand.hbm [shape: f32[3,84,512], index: 1, kind: input, shape index: {}]   ;;  %s14688_s2 = inlined_call_operand.hbm [shape: f32[1,512], index: 2, kind: input, shape index: {}]   ;;  %s14689_s3 = inlined_call_operand.hbm [shape: f32[3,672,512], index: 3, kind: input, shape index: {}]   ;;  %s14690_s4 = inlined_call_operand.hbm [shape: f32[1,512], index: 4, kind: input, shape index: {}]   ;;  %s14691_s5 = inlined_call_operand.hbm [shape: f32[3,672,512], index: 5, kind: input, shape index: {}]   ;;  %s14692_s6 = inlined_call_operand.hbm [shape: f32[1,512], index: 6, kind: input, shape index: {}]   ;;  %s14693_s7 = inlined_call_operand.vmem [shape: f32[3,672,64], index: 7, kind: input, shape index: {}]   ;;  %s14694_s8 = inlined_call_operand.hbm [shape: f32[1,64], index: 8, kind: input, shape index: {}]   ;;  %s14695_s9 = inlined_call_operand.hbm [shape: f32[32,64], index: 9, kind: output, shape index: {}]  }
   0x1   :  { %15 = vsyncpa [#allocation7], 0 }
   0x2   :  { %16 = vsyncpa [#allocation10], 0 }
   0x3   :  { %17 = vsyncpa [#allocation13], 0 }
   0x4   :  { %18 = vsyncpa [#allocation5], 0  ;;  %s12482_s30 = smov [#allocation6]   ;;  %s12483_s11 = smov [#allocation9]  }
   0x5   :  { %s39_s10 = sshll.u32 %s12482_s30, 4  ;;  %s61_s12 = sshll.u32 %s12483_s11, 4  ;;  %s40_s10 = int_to_ptr.vmem [resolvable:$true] %s39_s10  ;;  %s62_s12 = int_to_ptr.vmem [resolvable:$true] %s61_s12 }
   0x6   :  { %s12296_s15 = scalar_lea.hbm %s14688_s2, 64 }
   0x7   :  { %p12297_p0 = scmp.ne.s32.totalorder %s14688_s2, %s12296_s15  ;;  %p12300_p1 = scmp.lt.u32.totalorder %s12296_s15, %s14688_s2 }
   0x9   :  { %p12302_p2 = pnand %p12300_p1, %p12297_p0 }
   0xb   :  { %12305 = shalt.err (!%p12302_p2)
}
   0xc   :  { %s12306_s20 = scalar_lea.vmem %s40_s10, 64  ;;  %p12311_p4 = scmp.lt.s32.totalorder %s40_s10, %s40_s10 }
   0xd   :  { %p12307_p3 = scmp.ne.s32.totalorder %s40_s10, %s12306_s20  ;;  %p12312_p5 = scmp.lt.s32.totalorder %s12306_s20, %s12306_s20 }
   0xf   :  { %p12313_p6 = por %p12312_p5, %p12311_p4 }
  0x11   :  { %p12314_p7 = pnand %p12313_p6, %p12307_p3 }
  0x13   :  { %12317 = shalt.err (!%p12314_p7)
}
  0x14   :  { %42 = dma.hbm_to_vmem [thread:$0]  %s14688_s2, 64, %s40_s10, [#allocation7]  }
  0x15   :  { %s12318_s25 = scalar_lea.hbm %s14690_s4, 64 }
  0x16   :  { %p12319_p8 = scmp.ne.s32.totalorder %s14690_s4, %s12318_s25  ;;  %p12322_p9 = scmp.lt.u32.totalorder %s12318_s25, %s14690_s4 }
  0x18   :  { %p12324_p10 = pnand %p12322_p9, %p12319_p8 }
  0x1a   :  { %12327 = shalt.err (!%p12324_p10)
}
  0x1b   :  { %s12328_s30 = scalar_lea.vmem %s62_s12, 64  ;;  %p12333_p12 = scmp.lt.s32.totalorder %s62_s12, %s62_s12 }
  0x1c   :  { %p12329_p11 = scmp.ne.s32.totalorder %s62_s12, %s12328_s30  ;;  %p12334_p13 = scmp.lt.s32.totalorder %s12328_s30, %s12328_s30 }
  0x1e   :  { %p12335_p0 = por %p12334_p13, %p12333_p12 }
  0x20   :  { %p12336_p1 = pnand %p12335_p0, %p12329_p11 }
  0x22   :  { %12339 = shalt.err (!%p12336_p1)
}
  0x23   :  { %64 = dma.hbm_to_vmem [thread:$0]  %s14690_s4, 64, %s62_s12, [#allocation10]  }
  0x24   :  { %s12484_s11 = smov [#allocation12]   ;;  %s12485_s14 = smov [#allocation3]  }
  0x25   :  { %s83_s13 = sshll.u32 %s12484_s11, 4  ;;  %s26_s15 = sshll.u32 %s12485_s14, 4  ;;  %s84_s13 = int_to_ptr.vmem [resolvable:$true] %s83_s13  ;;  %s12570_s15 = int_to_ptr.vmem [resolvable:$true] %s26_s15 }
  0x26   :  { %s12340_s18 = scalar_lea.hbm %s14692_s6, 64 }
  0x27   :  { %p12341_p2 = scmp.ne.s32.totalorder %s14692_s6, %s12340_s18  ;;  %p12344_p3 = scmp.lt.u32.totalorder %s12340_s18, %s14692_s6 }
  0x29   :  { %p12346_p4 = pnand %p12344_p3, %p12341_p2 }
  0x2b   :  { %12349 = shalt.err (!%p12346_p4)
}
  0x2c   :  { %s12350_s4 = scalar_lea.vmem %s84_s13, 64  ;;  %p12355_p6 = scmp.lt.s32.totalorder %s84_s13, %s84_s13 }
  0x2d   :  { %p12351_p5 = scmp.ne.s32.totalorder %s84_s13, %s12350_s4  ;;  %p12356_p7 = scmp.lt.s32.totalorder %s12350_s4, %s12350_s4 }
  0x2f   :  { %p12357_p8 = por %p12356_p7, %p12355_p6 }
  0x31   :  { %p12358_p9 = pnand %p12357_p8, %p12351_p5 }
  0x33   :  { %12361 = shalt.err (!%p12358_p9)
}
  0x34   :  { %86 = dma.hbm_to_vmem [thread:$0]  %s14692_s6, 64, %s84_s13, [#allocation13]  }
  0x35   :  { %s12362_s26 = scalar_lea.hbm %s14687_s1, 16896 }
  0x36   :  { %p12363_p10 = scmp.ne.s32.totalorder %s14687_s1, %s12362_s26  ;;  %p12366_p11 = scmp.lt.u32.totalorder %s12362_s26, %s14687_s1 }
  0x38   :  { %p12368_p12 = pnand %p12366_p11, %p12363_p10 }
  0x3a   :  { %12371 = shalt.err (!%p12368_p12)
}
  0x3b   :  { %s12372_s2 = scalar_lea.vmem %s12570_s15, 16896  ;;  %p12377_p0 = scmp.lt.s32.totalorder %s12570_s15, %s12570_s15 }
  0x3c   :  { %p12373_p13 = scmp.ne.s32.totalorder %s12570_s15, %s12372_s2  ;;  %p12378_p1 = scmp.lt.s32.totalorder %s12372_s2, %s12372_s2 }
  0x3e   :  { %p12379_p2 = por %p12378_p1, %p12377_p0 }
  0x40   :  { %p12380_p3 = pnand %p12379_p2, %p12373_p13 }
  0x42   :  { %12383 = shalt.err (!%p12380_p3)
}
  0x43   :  { %s12486_s6 = smov 512   ;;  %s12487_s10 = smov 32  }
  0x44   :  { %32 = dma.hbm_to_vmem [thread:$0]  %s14687_s1, 16896, %s12570_s15, [#allocation4], %s12486_s6, %s12486_s6, %s12487_s10  }
  0x45   :  { %s12488_s14 = smov [#allocation8]   ;;  %s12489_s17 = smov [#allocation11]  }
  0x46   :  { %s48_s16 = sshll.u32 %s12488_s14, 4  ;;  %s70_s18 = sshll.u32 %s12489_s17, 4  ;;  %s49_s16 = int_to_ptr.vmem [resolvable:$true] %s48_s16  ;;  %s12604_s18 = int_to_ptr.vmem [resolvable:$true] %s70_s18 }
  0x47   :  { %s12384_s21 = scalar_lea.hbm %s14689_s3, 129024 }
  0x48   :  { %p12385_p4 = scmp.ne.s32.totalorder %s14689_s3, %s12384_s21  ;;  %p12388_p5 = scmp.lt.u32.totalorder %s12384_s21, %s14689_s3 }
  0x4a   :  { %p12390_p6 = pnand %p12388_p5, %p12385_p4 }
  0x4c   :  { %12393 = shalt.err (!%p12390_p6)
}
  0x4d   :  { %s12394_s1 = scalar_lea.vmem %s49_s16, 129024  ;;  %p12399_p8 = scmp.lt.s32.totalorder %s49_s16, %s49_s16 }
  0x4e   :  { %p12395_p7 = scmp.ne.s32.totalorder %s49_s16, %s12394_s1  ;;  %p12400_p9 = scmp.lt.s32.totalorder %s12394_s1, %s12394_s1 }
  0x50   :  { %p12401_p10 = por %p12400_p9, %p12399_p8 }
  0x52   :  { %p12402_p11 = pnand %p12401_p10, %p12395_p7 }
  0x54   :  { %12405 = shalt.err (!%p12402_p11)
}
  0x55   :  { %54 = dma.hbm_to_vmem [thread:$0]  %s14689_s3, 129024, %s49_s16, [#allocation7], %s12486_s6, %s12486_s6, %s12487_s10  }
  0x56   :  { %s12406_s27 = scalar_lea.hbm %s14691_s5, 129024 }
  0x57   :  { %p12407_p12 = scmp.ne.s32.totalorder %s14691_s5, %s12406_s27  ;;  %p12410_p13 = scmp.lt.u32.totalorder %s12406_s27, %s14691_s5 }
  0x59   :  { %p12412_p0 = pnand %p12410_p13, %p12407_p12 }
  0x5b   :  { %12415 = shalt.err (!%p12412_p0)
}
  0x5c   :  { %s12416_s11 = scalar_lea.vmem %s12604_s18, 129024  ;;  %p12421_p2 = scmp.lt.s32.totalorder %s12604_s18, %s12604_s18 }
  0x5d   :  { %p12417_p1 = scmp.ne.s32.totalorder %s12604_s18, %s12416_s11  ;;  %p12422_p3 = scmp.lt.s32.totalorder %s12416_s11, %s12416_s11 }
  0x5f   :  { %p12423_p4 = por %p12422_p3, %p12421_p2 }
  0x61   :  { %p12424_p5 = pnand %p12423_p4, %p12417_p1 }
  0x63   :  { %12427 = shalt.err (!%p12424_p5)
}
  0x64   :  { %76 = dma.hbm_to_vmem [thread:$0]  %s14691_s5, 129024, %s12604_s18, [#allocation10], %s12486_s6, %s12486_s6, %s12487_s10  }
  0x65   :  { %s12490_s14 = smov [#allocation14]   ;;  %s12428_s20 = scalar_lea.hbm %s14694_s8, 16 }
  0x66   :  { %s95_s16 = sshll.u32 %s12490_s14, 4  ;;  %p12429_p6 = scmp.ne.s32.totalorder %s14694_s8, %s12428_s20  ;;  %s96_s16 = int_to_ptr.vmem [resolvable:$true] %s95_s16 }
  0x67   :  { %p12432_p7 = scmp.lt.u32.totalorder %s12428_s20, %s14694_s8 }
  0x69   :  { %p12434_p8 = pnand %p12432_p7, %p12429_p6 }
  0x6b   :  { %12437 = shalt.err (!%p12434_p8)
}
  0x6c   :  { %s12438_s23 = scalar_lea.vmem %s96_s16, 16  ;;  %s12442_s5 = scalar_lea.vmem %s96_s16, 32 }
  0x6d   :  { %p12439_p9 = scmp.ne.s32.totalorder %s96_s16, %s12438_s23  ;;  %p12443_p10 = scmp.lt.s32.totalorder %s96_s16, %s96_s16 }
  0x6e   :  { %p12444_p11 = scmp.lt.s32.totalorder %s12442_s5, %s12438_s23 }
  0x70   :  { %p12445_p12 = por %p12444_p11, %p12443_p10 }
  0x72   :  { %p12446_p13 = pnand %p12445_p12, %p12439_p9 }
  0x74   :  { %12449 = shalt.err (!%p12446_p13)
}
  0x75   :  { %98 = dma.hbm_to_vmem [thread:$0]  %s14694_s8, 16, %s96_s16, [#allocation13]  }
  0x76   :  { %12472 = dma.done.wait [#allocation4], 16896  }
  0x77   :  { %12473 = vsyncadd [#allocation4], 4294950400 }
  0x78   :  { %12474 = dma.done.wait [#allocation7], 129088  }
  0x79   :  { %12475 = vsyncadd [#allocation7], 4294838208 }
  0x7a   :  { %12476 = dma.done.wait [#allocation10], 129088  }
  0x7b   :  { %12477 = vsyncadd [#allocation10], 4294838208 }
  0x7c   :  { %12478 = dma.done.wait [#allocation13], 80  }
  0x7d   :  { %12479 = vsyncadd [#allocation13], 4294967216  ;;  %v12491_v0 = vmov 0.0   ;;  %v199_v1 = vld [vmem:[#allocation3 + $0x168] sm:$0xff]  ;;  %v152_v3 = vld [vmem:[#allocation3 + $0x18] sm:$0xff]  ;;  %vm255_vm0 = vcmask 1043456  }
  0x7e   :  { %332 = vmatprep.mubr.f32.mxu0 %v12491_v0  ;;  %136 = vst [vmem:[#allocation2 + $0x30] sm:$0xff] %v12491_v0  ;;  %137 = vst [vmem:[#allocation2 + $0x60] sm:$0xff] %v12491_v0  ;;  %623 = vmatprep.mubr.f32.mxu1 %v12491_v0  ;;  %v203_v2 = vld [vmem:[#allocation3 + $0x188] sm:$0xff]  ;;  %v156_v5 = vld [vmem:[#allocation3 + $0x38] sm:$0xff]  ;;  %vm242_vm1 = vcmask 687104   ;;  %vm140_vm3 = vcmask 261120  }
  0x7f   :  { %138 = vst [vmem:[#allocation2 + $0xf0] sm:$0xff] %v12491_v0  ;;  %139 = vst [vmem:[#allocation2 + $0x120] sm:$0xff] %v12491_v0  ;;  %v9445_v4 = vpack.c.bf16 %v203_v2, %v199_v1  ;;  %v198_v6 = vld [vmem:[#allocation3 + $0x160] sm:$0xff]  ;;  %v9505_v8 = vpack.c.bf16 %v156_v5, %v152_v3  ;;  %v151_v10 = vld [vmem:[#allocation3 + $0x10] sm:$0xff]  ;;  %vm1185_vm4 = vcmask 1040384   ;;  %vm3109_vm5 = vcmask 1046528  }
  0x80   :  { %v202_v7 = vld [vmem:[#allocation3 + $0x180] sm:$0xff]  ;;  %v155_v11 = vld [vmem:[#allocation3 + $0x30] sm:$0xff]  ;;  %v207_v12 = vld [vmem:[#allocation3 + $0x1a8] sm:$0xff]  ;;  %vm8891_vm6 = vcmask 523264  }
  0x81   :  { %v9447_v9 = vpack.c.bf16 %v202_v7, %v198_v6  ;;  %9446 = vmatprep.subr.bf16.mxu0 %v9445_v4  ;;  %v9507_v13 = vpack.c.bf16 %v155_v11, %v151_v10  ;;  %v211_v14 = vld [vmem:[#allocation3 + $0x1c8] sm:$0xff]  ;;  %v160_v15 = vld [vmem:[#allocation3 + $0x58] sm:$0xff]  ;;  %9506 = vmatprep.subr.bf16.mxu1 %v9505_v8  ;;  %v206_v19 = vld [vmem:[#allocation3 + $0x1a0] sm:$0xff] }
  0x82   :  { %v164_v16 = vld [vmem:[#allocation3 + $0x78] sm:$0xff]  ;;  %v9449_v17 = vpack.c.bf16 %v211_v14, %v207_v12  ;;  %v210_v20 = vld [vmem:[#allocation3 + $0x1c0] sm:$0xff]  ;;  %v159_v21 = vld [vmem:[#allocation3 + $0x50] sm:$0xff] }
  0x83   :  { %9448 = vmatpush1.bf16.msra.mxu0 %v9447_v9  ;;  %v9509_v18 = vpack.c.bf16 %v164_v16, %v160_v15  ;;  %9508 = vmatpush1.bf16.msra.mxu1 %v9507_v13  ;;  %v9451_v22 = vpack.c.bf16 %v210_v20, %v206_v19  ;;  %v163_v23 = vld [vmem:[#allocation3 + $0x70] sm:$0xff]  ;;  %v215_v24 = vld [vmem:[#allocation3 + $0x1e8] sm:$0xff]  ;;  %v168_v28 = vld [vmem:[#allocation3 + $0x98] sm:$0xff] }
  0x84   :  { %v219_v25 = vld [vmem:[#allocation3 + $0x208] sm:$0xff]  ;;  %9450 = vmatprep.subr.bf16.mxu0 %v9449_v17  ;;  %v9511_v26 = vpack.c.bf16 %v163_v23, %v159_v21  ;;  %v172_v29 = vld [vmem:[#allocation3 + $0xb8] sm:$0xff]  ;;  %v214_v30 = vld [vmem:[#allocation3 + $0x1e0] sm:$0xff] }
  0x85   :  { %9510 = vmatprep.subr.bf16.mxu1 %v9509_v18  ;;  %v9453_v27 = vpack.c.bf16 %v219_v25, %v215_v24  ;;  %v9513_v31 = vpack.c.bf16 %v172_v29, %v168_v28  ;;  %v218_v32 = vld [vmem:[#allocation3 + $0x200] sm:$0xff]  ;;  %v167_v33 = vld [vmem:[#allocation3 + $0x90] sm:$0xff]  ;;  %v223_v36 = vld [vmem:[#allocation3 + $0x228] sm:$0xff] }
  0x86   :  { %v171_v34 = vld [vmem:[#allocation3 + $0xb0] sm:$0xff]  ;;  %v9455_v35 = vpack.c.bf16 %v218_v32, %v214_v30  ;;  %v227_v37 = vld [vmem:[#allocation3 + $0x248] sm:$0xff]  ;;  %v176_v38 = vld [vmem:[#allocation3 + $0xd8] sm:$0xff] }
  0x87   :  { %9452 = vmatpush1.bf16.msra.mxu0 %v9451_v22  ;;  %9512 = vmatpush1.bf16.msra.mxu1 %v9511_v26  ;;  %v9515_v39 = vpack.c.bf16 %v171_v34, %v167_v33  ;;  %v9457_v40 = vpack.c.bf16 %v227_v37, %v223_v36  ;;  %v180_v41 = vld [vmem:[#allocation3 + $0xf8] sm:$0xff]  ;;  %v222_v42 = vld [vmem:[#allocation3 + $0x220] sm:$0xff]  ;;  %v175_v45 = vld [vmem:[#allocation3 + $0xd0] sm:$0xff] }
  0x88   :  { %9454 = vmatprep.subr.bf16.mxu0 %v9453_v27  ;;  %v226_v43 = vld [vmem:[#allocation3 + $0x240] sm:$0xff]  ;;  %9514 = vmatprep.subr.bf16.mxu1 %v9513_v31  ;;  %v9517_v44 = vpack.c.bf16 %v180_v41, %v176_v38  ;;  %v179_v46 = vld [vmem:[#allocation3 + $0xf0] sm:$0xff]  ;;  %v231_v47 = vld [vmem:[#allocation3 + $0x268] sm:$0xff] }
  0x89   :  { %v235_v48 = vld [vmem:[#allocation3 + $0x288] sm:$0xff]  ;;  %v184_v49 = vld [vmem:[#allocation3 + $0x118] sm:$0xff]  ;;  %v9459_v51 = vpack.c.bf16 %v226_v43, %v222_v42  ;;  %v9519_v52 = vpack.c.bf16 %v179_v46, %v175_v45  ;;  %v230_v54 = vld [vmem:[#allocation3 + $0x260] sm:$0xff] }
  0x8a   :  { %v188_v50 = vld [vmem:[#allocation3 + $0x138] sm:$0xff]  ;;  %v9461_v53 = vpack.c.bf16 %v235_v48, %v231_v47  ;;  %v234_v55 = vld [vmem:[#allocation3 + $0x280] sm:$0xff]  ;;  %v183_v57 = vld [vmem:[#allocation3 + $0x110] sm:$0xff] }
  0x8b   :  { %9456 = vmatpush1.bf16.msra.mxu0 %v9455_v35  ;;  %9516 = vmatpush1.bf16.msra.mxu1 %v9515_v39  ;;  %v9521_v56 = vpack.c.bf16 %v188_v50, %v184_v49  ;;  %v187_v58 = vld [vmem:[#allocation3 + $0x130] sm:$0xff]  ;;  %v9463_v59 = vpack.c.bf16 %v234_v55, %v230_v54  ;;  %v239_v61 = vld [vmem:[#allocation3 + $0x2a8] sm:$0xf]  ;;  %v192_v62 = vld [vmem:[#allocation3 + $0x158] sm:$0xf] }
  0x8c   :  { %9458 = vmatprep.subr.bf16.mxu0 %v9457_v40  ;;  %9518 = vmatprep.subr.bf16.mxu1 %v9517_v44  ;;  %v9523_v60 = vpack.c.bf16 %v187_v58, %v183_v57  ;;  %v201_v63 = vld [vmem:[#allocation3 + $0x178] sm:$0xff]  ;;  %v238_v2 = vld [vmem:[#allocation3 + $0x2a0] sm:$0xf]  ;;  %v200_v5 = vld [vmem:[#allocation3 + $0x170] sm:$0xff] }
  0x8d   :  { %v205_v1 = vld [vmem:[#allocation3 + $0x198] sm:$0xff]  ;;  %v204_v6 = vld [vmem:[#allocation3 + $0x190] sm:$0xff]  ;;  %v12664_v16 = vld [vmem:[%s14686_s0 + $0x1] sm:$0xff] }
  0x8e   :  { %v656_v3 = vld [vmem:[#allocation3 + $0x2d8] sm:$0xff]  ;;  %v655_v7 = vld [vmem:[#allocation3 + $0x2d0] sm:$0xff]  ;;  %v9465_v8 = vpack.c.bf16 %v205_v1, %v201_v63  ;;  %v9467_v17 = vpack.c.bf16 %v204_v6, %v200_v5  ;;  %v12669_v18 = vld [vmem:[%s14686_s0] sm:$0xff] }
  0x8f   :  { %9460 = vmatpush1.bf16.msra.mxu0 %v9459_v51  ;;  %9520 = vmatpush1.bf16.msra.mxu1 %v9519_v52  ;;  %v660_v4 = vld [vmem:[#allocation3 + $0x2f8] sm:$0xff]  ;;  %v659_v9 = vld [vmem:[#allocation3 + $0x2f0] sm:$0xff]  ;;  %v12685_v37 = vld [vmem:[%s14686_s0 + $0x8] sm:$0xff] }
  0x90   :  { %9462 = vmatprep.subr.bf16.mxu0 %v9461_v53  ;;  %9522 = vmatprep.subr.bf16.mxu1 %v9521_v56  ;;  %v209_v10 = vld [vmem:[#allocation3 + $0x1b8] sm:$0xff]  ;;  %v191_v12 = vld [vmem:[#allocation3 + $0x150] sm:$0xf]  ;;  %v9545_v13 = vpack.c.bf16 %v660_v4, %v656_v3  ;;  %v9547_v19 = vpack.c.bf16 %v659_v9, %v655_v7  ;;  %v12717_v1 = vld [vmem:[%s14686_s0 + $0x20] sm:$0xff] }
  0x91   :  { %v213_v11 = vld [vmem:[#allocation3 + $0x1d8] sm:$0xff]  ;;  %v208_v21 = vld [vmem:[#allocation3 + $0x1b0] sm:$0xff]  ;;  %v150_v9 = vld [vmem:[#allocation3 + $0x8] sm:$0xff] }
  0x92   :  { %v664_v14 = vld [vmem:[#allocation3 + $0x318] sm:$0xff]  ;;  %v9469_v20 = vpack.c.bf16 %v213_v11, %v209_v10  ;;  %v212_v22 = vld [vmem:[#allocation3 + $0x1d0] sm:$0xff]  ;;  %v154_v10 = vld [vmem:[#allocation3 + $0x28] sm:$0xff] }
  0x93   :  { %9464 = vmatpush1.bf16.msra.mxu0 %v9463_v59  ;;  %9524 = vmatpush1.bf16.msra.mxu1 %v9523_v60  ;;  %v668_v15 = vld [vmem:[#allocation3 + $0x338] sm:$0xff]  ;;  %v663_v23 = vld [vmem:[#allocation3 + $0x310] sm:$0xff]  ;;  %v9471_v30 = vpack.c.bf16 %v212_v22, %v208_v21  ;;  %v12712_v59 = vld [vmem:[%s14686_s0 + $0x21] sm:$0xff] }
  0x94   :  { %8916 = vmatprep.subr.msk.mxu0 %vm255_vm0, %v239_v61  ;;  %8934 = vmatprep.subr.msk.mxu1 %vm255_vm0, %v192_v62  ;;  %v9549_v24 = vpack.c.bf16 %v668_v15, %v664_v14  ;;  %v667_v25 = vld [vmem:[#allocation3 + $0x330] sm:$0xff]  ;;  %v217_v26 = vld [vmem:[#allocation3 + $0x1f8] sm:$0xff]  ;;  %v149_v11 = vld [vmem:[#allocation3] sm:$0xff] }
  0x95   :  { %v221_v27 = vld [vmem:[#allocation3 + $0x218] sm:$0xff]  ;;  %v216_v31 = vld [vmem:[#allocation3 + $0x1f0] sm:$0xff]  ;;  %v9551_v33 = vpack.c.bf16 %v667_v25, %v663_v23  ;;  %v158_v14 = vld [vmem:[#allocation3 + $0x48] sm:$0xff] }
  0x96   :  { %v672_v28 = vld [vmem:[#allocation3 + $0x358] sm:$0xff]  ;;  %v12680_v32 = vld [vmem:[%s14686_s0 + $0x9] sm:$0xff]  ;;  %v9473_v34 = vpack.c.bf16 %v221_v27, %v217_v26  ;;  %v157_v23 = vld [vmem:[#allocation3 + $0x40] sm:$0xff] }
  0x97   :  { %8917 = vmatpush1.msk.msra.mxu0 %vm255_vm0, %v238_v2  ;;  %8935 = vmatpush1.msk.msra.mxu1 %vm255_vm0, %v191_v12  ;;  %v676_v29 = vld [vmem:[#allocation3 + $0x378] sm:$0xff]  ;;  %v220_v35 = vld [vmem:[#allocation3 + $0x210] sm:$0xff]  ;;  %v153_v12 = vld [vmem:[#allocation3 + $0x20] sm:$0xff] }
  0x98   :  { %9466 = vmatprep.subr.bf16.mxu0 %v9465_v8  ;;  %9546 = vmatprep.subr.bf16.mxu1 %v9545_v13  ;;  %v671_v36 = vld [vmem:[#allocation3 + $0x350] sm:$0xff]  ;;  %v9553_v38 = vpack.c.bf16 %v676_v29, %v672_v28  ;;  %v225_v40 = vld [vmem:[#allocation3 + $0x238] sm:$0xff]  ;;  %v9475_v44 = vpack.c.bf16 %v220_v35, %v216_v31  ;;  %v162_v15 = vld [vmem:[#allocation3 + $0x68] sm:$0xff]  ;;  %v9487_v21 = vpack.c.bf16 %v153_v12, %v149_v11 }
  0x99   :  { %8918 = vmatmul.mubr.msk.f32.vlgmr.msra.gmra.mrb[0].mxu0 %vm242_vm1, %v12664_v16  ;;  %8936 = vmatmul.mubr.msk.f32.vlgmr.msra.gmra.mrb[0].mxu1 %vm242_vm1, %v12669_v18  ;;  %v675_v39 = vld [vmem:[#allocation3 + $0x370] sm:$0xff]  ;;  %v229_v41 = vld [vmem:[#allocation3 + $0x258] sm:$0xff]  ;;  %v9489_v22 = vpack.c.bf16 %v162_v15, %v158_v14  ;;  %v166_v25 = vld [vmem:[#allocation3 + $0x88] sm:$0xff] }
  0x9a   :  { %9468 = vmatpush1.bf16.msra.mxu0 %v9467_v17  ;;  %9548 = vmatpush1.bf16.msra.mxu1 %v9547_v19  ;;  %v680_v42 = vld [vmem:[#allocation3 + $0x398] sm:$0xff]  ;;  %v224_v45 = vld [vmem:[#allocation3 + $0x230] sm:$0xff]  ;;  %v9555_v47 = vpack.c.bf16 %v675_v39, %v671_v36  ;;  %v9477_v48 = vpack.c.bf16 %v229_v41, %v225_v40  ;;  %v9485_v19 = vpack.c.bf16 %v154_v10, %v150_v9  ;;  %v170_v26 = vld [vmem:[#allocation3 + $0xa8] sm:$0xff] }
  0x9b   :  { %9470 = vmatprep.subr.bf16.mxu0 %v9469_v20  ;;  %9550 = vmatprep.subr.bf16.mxu1 %v9549_v24  ;;  %v684_v43 = vld [vmem:[#allocation3 + $0x3b8] sm:$0xff]  ;;  %v228_v49 = vld [vmem:[#allocation3 + $0x250] sm:$0xff]  ;;  %v12732_v20 = vld [vmem:[%s14686_s0 + $0x2] sm:$0xff]  ;;  %v9493_v29 = vpack.c.bf16 %v170_v26, %v166_v25 }
  0x9c   :  { %338 = vmatprep.mubr.f32.mxu0 %v12491_v0  ;;  %629 = vmatprep.mubr.f32.mxu1 %v12491_v0  ;;  %v12696_v46 = vld [vmem:[%s14686_s0 + $0x19] sm:$0xff]  ;;  %v679_v50 = vld [vmem:[#allocation3 + $0x390] sm:$0xff]  ;;  %v9557_v52 = vpack.c.bf16 %v684_v43, %v680_v42  ;;  %v9479_v58 = vpack.c.bf16 %v228_v49, %v224_v45  ;;  %v174_v31 = vld [vmem:[#allocation3 + $0xc8] sm:$0xff] }
  0x9d   :  { %8919 = vmatmul.mubr.msk.f32.gmra.mrb[2].mxu0 %vm242_vm1, %v12680_v32  ;;  %8937 = vmatmul.mubr.msk.f32.gmra.mrb[2].mxu1 %vm242_vm1, %v12685_v37  ;;  %v12701_v51 = vld [vmem:[%s14686_s0 + $0x18] sm:$0xff]  ;;  %v683_v53 = vld [vmem:[#allocation3 + $0x3b0] sm:$0xff]  ;;  %v161_v24 = vld [vmem:[#allocation3 + $0x60] sm:$0xff] }
  0x9e   :  { %9472 = vmatpush1.bf16.msra.mxu0 %v9471_v30  ;;  %9552 = vmatpush1.bf16.msra.mxu1 %v9551_v33  ;;  %v233_v54 = vld [vmem:[#allocation3 + $0x278] sm:$0xff]  ;;  %v9559_v60 = vpack.c.bf16 %v683_v53, %v679_v50  ;;  %v232_v62 = vld [vmem:[#allocation3 + $0x270] sm:$0xff]  ;;  %v9491_v28 = vpack.c.bf16 %v161_v24, %v157_v23  ;;  %v169_v30 = vld [vmem:[#allocation3 + $0xa0] sm:$0xff] }
  0x9f   :  { %9474 = vmatprep.subr.bf16.mxu0 %v9473_v34  ;;  %9554 = vmatprep.subr.bf16.mxu1 %v9553_v38  ;;  %v237_v55 = vld [vmem:[#allocation3 + $0x298] sm:$0xff]  ;;  %v236_v63 = vld [vmem:[#allocation3 + $0x290] sm:$0xff]  ;;  %v178_v33 = vld [vmem:[#allocation3 + $0xe8] sm:$0xff] }
  0xa0   :  { %344 = vmatprep.mubr.f32.mxu0 %v12491_v0  ;;  %635 = vmatprep.mubr.f32.mxu1 %v12491_v0  ;;  %v688_v56 = vld [vmem:[#allocation3 + $0x3d8] sm:$0xff]  ;;  %v9481_v61 = vpack.c.bf16 %v237_v55, %v233_v54  ;;  %v687_v3 = vld [vmem:[#allocation3 + $0x3d0] sm:$0xff]  ;;  %v9483_v5 = vpack.c.bf16 %v236_v63, %v232_v62  ;;  %v9497_v36 = vpack.c.bf16 %v178_v33, %v174_v31  ;;  %v173_v38 = vld [vmem:[#allocation3 + $0xc0] sm:$0xff] }
  0xa1   :  { %8920 = vmatmul.mubr.msk.f32.gmra.mrb[4].mxu0 %vm242_vm1, %v12696_v46  ;;  %v692_v57 = vld [vmem:[#allocation3 + $0x3f8] sm:$0xff]  ;;  %8938 = vmatmul.mubr.msk.f32.gmra.mrb[4].mxu1 %vm242_vm1, %v12701_v51  ;;  %v691_v4 = vld [vmem:[#allocation3 + $0x3f0] sm:$0xff]  ;;  %v182_v39 = vld [vmem:[#allocation3 + $0x108] sm:$0xff] }
  0xa2   :  { %9476 = vmatpush1.bf16.msra.mxu0 %v9475_v44  ;;  %9556 = vmatpush1.bf16.msra.mxu1 %v9555_v47  ;;  %v9561_v2 = vpack.c.bf16 %v692_v57, %v688_v56  ;;  %v9563_v6 = vpack.c.bf16 %v691_v4, %v687_v3  ;;  %v241_v7 = vld [vmem:[#allocation3 + $0x2b8] sm:$0xf]  ;;  %v240_v13 = vld [vmem:[#allocation3 + $0x2b0] sm:$0xf]  ;;  %v186_v40 = vld [vmem:[#allocation3 + $0x128] sm:$0xff] }
  0xa3   :  { %9478 = vmatprep.subr.bf16.mxu0 %v9477_v48  ;;  %9558 = vmatprep.subr.bf16.mxu1 %v9557_v52  ;;  %v696_v8 = vld [vmem:[#allocation3 + $0x418] sm:$0xf]  ;;  %v695_v17 = vld [vmem:[#allocation3 + $0x410] sm:$0xf]  ;;  %v12767_v41 = vld [vmem:[%s14686_s0 + $0x22] sm:$0xff]  ;;  %v9501_v43 = vpack.c.bf16 %v186_v40, %v182_v39 }
  0xa4   :  { %350 = vmatprep.mubr.f32.mxu0 %v12491_v0  ;;  %641 = vmatprep.mubr.f32.mxu1 %v12491_v0  ;;  %v12744_v27 = vld [vmem:[%s14686_s0 + $0xa] sm:$0xff]  ;;  %v12756_v34 = vld [vmem:[%s14686_s0 + $0x1a] sm:$0xff] }
  0xa5   :  { %8921 = vmatmul.mubr.msk.f32.gmra.mrb[6].mxu0 %vm242_vm1, %v12712_v59  ;;  %8939 = vmatmul.mubr.msk.f32.gmra.mrb[6].mxu1 %vm242_vm1, %v12717_v1  ;;  %v181_v44 = vld [vmem:[#allocation3 + $0x100] sm:$0xff]  ;;  %v190_v47 = vld [vmem:[#allocation3 + $0x148] sm:$0xf]  ;;  %v1628_v31 = vld [vmem:[#allocation8 + $0xae8] sm:$0xff] }
  0xa6   :  { %9480 = vmatpush1.bf16.msra.mxu0 %v9479_v58  ;;  %9560 = vmatpush1.bf16.msra.mxu1 %v9559_v60  ;;  %v185_v45 = vld [vmem:[#allocation3 + $0x120] sm:$0xff]  ;;  %v654_v48 = vld [vmem:[#allocation3 + $0x2c8] sm:$0xff]  ;;  %v1625_v39 = vld [vmem:[#allocation8 + $0xad0] sm:$0xff] }
  0xa7   :  { %9482 = vmatprep.subr.bf16.mxu0 %v9481_v61  ;;  %9562 = vmatprep.subr.bf16.mxu1 %v9561_v2  ;;  %v658_v49 = vld [vmem:[#allocation3 + $0x2e8] sm:$0xff]  ;;  %v653_v50 = vld [vmem:[#allocation3 + $0x2c0] sm:$0xff]  ;;  %v1629_v40 = vld [vmem:[#allocation8 + $0xaf0] sm:$0xff] }
  0xa8   :  { %421 = vmatprep.mubr.f32.mxu0 %v12491_v0  ;;  %874 = vmatprep.mubr.f32.mxu1 %v12491_v0  ;;  %v657_v52 = vld [vmem:[#allocation3 + $0x2e0] sm:$0xff]  ;;  %v662_v53 = vld [vmem:[#allocation3 + $0x308] sm:$0xff]  ;;  %v9525_v56 = vpack.c.bf16 %v658_v49, %v654_v48 }
  0xa9   :  { %v666_v54 = vld [vmem:[#allocation3 + $0x328] sm:$0xff]  ;;  %v189_v55 = vld [vmem:[#allocation3 + $0x140] sm:$0xf]  ;;  %v9527_v57 = vpack.c.bf16 %v657_v52, %v653_v50  ;;  %v1633_v52 = vld [vmem:[#allocation8 + $0xb10] sm:$0xff] }
  0xaa   :  { %9484 = vmatpush1.bf16.msra.mxu0 %v9483_v5  ;;  %9564 = vmatpush1.bf16.msra.mxu1 %v9563_v6  ;;  %v9529_v58 = vpack.c.bf16 %v666_v54, %v662_v53  ;;  %v665_v60 = vld [vmem:[#allocation3 + $0x320] sm:$0xff]  ;;  %v670_v61 = vld [vmem:[#allocation3 + $0x348] sm:$0xff]  ;;  %v1637_v53 = vld [vmem:[#allocation8 + $0xb30] sm:$0xff] }
  0xab   :  { %8922 = vmatprep.subr.msk.mxu0 %vm255_vm0, %v241_v7  ;;  %8946 = vmatprep.subr.msk.mxu1 %vm255_vm0, %v696_v8  ;;  %v674_v62 = vld [vmem:[#allocation3 + $0x368] sm:$0xff]  ;;  %v669_v3 = vld [vmem:[#allocation3 + $0x340] sm:$0xff]  ;;  %v9743_v54 = vpack.c.bf16 %v1637_v53, %v1633_v52 }
  0xac   :  { %v9533_v2 = vpack.c.bf16 %v674_v62, %v670_v61  ;;  %v673_v4 = vld [vmem:[#allocation3 + $0x360] sm:$0xff]  ;;  %v678_v5 = vld [vmem:[#allocation3 + $0x388] sm:$0xff] }
  0xad   :  { %v682_v6 = vld [vmem:[#allocation3 + $0x3a8] sm:$0xff]  ;;  %v9535_v7 = vpack.c.bf16 %v673_v4, %v669_v3  ;;  %v681_v9 = vld [vmem:[#allocation3 + $0x3a0] sm:$0xff]  ;;  %v1645_v3 = vld [vmem:[#allocation8 + $0xb70] sm:$0xff] }
  0xae   :  { %8923 = vmatpush1.msk.msra.mxu0 %vm255_vm0, %v240_v13  ;;  %8947 = vmatpush1.msk.msra.mxu1 %vm255_vm0, %v695_v17  ;;  %v9537_v8 = vpack.c.bf16 %v682_v6, %v678_v5  ;;  %v686_v10 = vld [vmem:[#allocation3 + $0x3c8] sm:$0xff]  ;;  %v689_v14 = vld [vmem:[#allocation3 + $0x3e0] sm:$0xff] }
  0xaf   :  { %8924 = vmatmul.mubr.msk.f32.vlgmr.msra.gmra.mrb[8].mxu0 %vm242_vm1, %v12664_v16  ;;  %9486 = vmatprep.subr.bf16.mxu0 %v9485_v19  ;;  %v165_v16 = vld [vmem:[#allocation3 + $0x80] sm:$0xff]  ;;  %v690_v11 = vld [vmem:[#allocation3 + $0x3e8] sm:$0xff] }
  0xb0   :  { %8948 = vmatmul.mubr.msk.f32.vlgmr.msra.gmra.mrb[0].mxu1 %vm242_vm1, %v12732_v20  ;;  %9488 = vmatpush1.bf16.msra.mxu0 %v9487_v21  ;;  %v9495_v35 = vpack.c.bf16 %v169_v30, %v165_v16  ;;  %v9541_v13 = vpack.c.bf16 %v690_v11, %v686_v10  ;;  %v694_v17 = vld [vmem:[#allocation3 + $0x408] sm:$0xf]  ;;  %v1616_v19 = vld [vmem:[#allocation8 + $0xa88] sm:$0xff]  ;;  %v1618_v21 = vld [vmem:[#allocation8 + $0xa98] sm:$0xff] }
  0xb1   :  { %427 = vmatprep.mubr.f32.mxu0 %v12491_v0  ;;  %880 = vmatprep.mubr.f32.mxu1 %v12491_v0  ;;  %v1622_v23 = vld [vmem:[#allocation8 + $0xab8] sm:$0xff]  ;;  %v1615_v24 = vld [vmem:[#allocation8 + $0xa80] sm:$0xff]  ;;  %v1624_v30 = vld [vmem:[#allocation8 + $0xac8] sm:$0xff] }
  0xb2   :  { %9490 = vmatprep.subr.bf16.mxu0 %v9489_v22  ;;  %v1619_v25 = vld [vmem:[#allocation8 + $0xaa0] sm:$0xff]  ;;  %v9733_v26 = vpack.c.bf16 %v1622_v23, %v1618_v21  ;;  %v1626_v33 = vld [vmem:[#allocation8 + $0xad8] sm:$0xff]  ;;  %v1648_v5 = vld [vmem:[#allocation8 + $0xb88] sm:$0xff] }
  0xb3   :  { %8925 = vmatmul.mubr.msk.f32.gmra.mrb[10].mxu0 %vm242_vm1, %v12680_v32  ;;  %v177_v32 = vld [vmem:[#allocation3 + $0xe0] sm:$0xff]  ;;  %v1652_v6 = vld [vmem:[#allocation8 + $0xba8] sm:$0xff] }
  0xb4   :  { %8949 = vmatmul.mubr.msk.f32.gmra.mrb[2].mxu1 %vm242_vm1, %v12744_v27  ;;  %433 = vmatprep.mubr.f32.mxu0 %v12491_v0  ;;  %v9499_v42 = vpack.c.bf16 %v177_v32, %v173_v38  ;;  %v1635_v48 = vld [vmem:[#allocation8 + $0xb20] sm:$0xff]  ;;  %v1680_v52 = vld [vmem:[#allocation8 + $0xc88] sm:$0xff] }
  0xb5   :  { %9492 = vmatpush1.bf16.msra.mxu0 %v9491_v28  ;;  %886 = vmatprep.mubr.f32.mxu1 %v12491_v0  ;;  %v1617_v28 = vld [vmem:[#allocation8 + $0xa90] sm:$0xff]  ;;  %v1643_v61 = vld [vmem:[#allocation8 + $0xb60] sm:$0xff]  ;;  %v1684_v53 = vld [vmem:[#allocation8 + $0xca8] sm:$0xff] }
  0xb6   :  { %9494 = vmatprep.subr.bf16.mxu0 %v9493_v29  ;;  %v1621_v29 = vld [vmem:[#allocation8 + $0xab0] sm:$0xff]  ;;  %9734 = vmatprep.subr.bf16.mxu1 %v9733_v26  ;;  %v1651_v10 = vld [vmem:[#allocation8 + $0xba0] sm:$0xff] }
  0xb7   :  { %8926 = vmatmul.mubr.msk.f32.gmra.mrb[12].mxu0 %vm242_vm1, %v12696_v46  ;;  %v9503_v46 = vpack.c.bf16 %v185_v45, %v181_v44  ;;  %v9735_v16 = vpack.c.bf16 %v1621_v29, %v1617_v28  ;;  %v1634_v44 = vld [vmem:[#allocation8 + $0xb18] sm:$0xff]  ;;  %v1655_v21 = vld [vmem:[#allocation8 + $0xbc0] sm:$0xff]  ;;  %v1661_v26 = vld [vmem:[#allocation8 + $0xbf0] sm:$0xff] }
  0xb8   :  { %8950 = vmatmul.mubr.msk.f32.gmra.mrb[4].mxu1 %vm242_vm1, %v12756_v34  ;;  %439 = vmatprep.mubr.f32.mxu0 %v12491_v0  ;;  %v1664_v28 = vld [vmem:[#allocation8 + $0xc08] sm:$0xff] }
  0xb9   :  { %9496 = vmatpush1.bf16.msra.mxu0 %v9495_v35  ;;  %892 = vmatprep.mubr.f32.mxu1 %v12491_v0  ;;  %v1623_v35 = vld [vmem:[#allocation8 + $0xac0] sm:$0xff]  ;;  %v1668_v29 = vld [vmem:[#allocation8 + $0xc28] sm:$0xff] }
  0xba   :  { %9498 = vmatprep.subr.bf16.mxu0 %v9497_v36  ;;  %9736 = vmatpush1.bf16.msra.mxu1 %v9735_v16  ;;  %v1627_v36 = vld [vmem:[#allocation8 + $0xae0] sm:$0xff]  ;;  %v1666_v16 = vld [vmem:[#allocation8 + $0xc18] sm:$0xff] }
  0xbb   :  { %8927 = vmatmul.mubr.msk.f32.gmra.mrb[14].mxu0 %vm242_vm1, %v12712_v59  ;;  %v661_v59 = vld [vmem:[#allocation3 + $0x300] sm:$0xff]  ;;  %v9571_v32 = vpack.c.bf16 %v1627_v36, %v1623_v35  ;;  %v1665_v36 = vld [vmem:[#allocation8 + $0xc10] sm:$0xff] }
  0xbc   :  { %8951 = vmatmul.mubr.msk.f32.gmra.mrb[6].mxu1 %vm242_vm1, %v12767_v41  ;;  %534 = vmatprep.mubr.f32.mxu0 %v12491_v0  ;;  %v9531_v63 = vpack.c.bf16 %v665_v60, %v661_v59  ;;  %v1646_v59 = vld [vmem:[#allocation8 + $0xb78] sm:$0xff]  ;;  %v1639_v60 = vld [vmem:[#allocation8 + $0xb40] sm:$0xff] }
  0xbd   :  { %9500 = vmatpush1.bf16.msra.mxu0 %v9499_v42  ;;  %v1632_v42 = vld [vmem:[#allocation8 + $0xb08] sm:$0xff] }
  0xbe   :  { %9502 = vmatprep.subr.bf16.mxu0 %v9501_v43  ;;  %v1636_v43 = vld [vmem:[#allocation8 + $0xb28] sm:$0xff] }
  0xbf   :  { %v9573_v45 = vpack.c.bf16 %v1636_v43, %v1632_v42  ;;  %v1678_v43 = vld [vmem:[#allocation8 + $0xc78] sm:$0xff] }
  0xc1   :  { %9504 = vmatpush1.bf16.msra.mxu0 %v9503_v46  ;;  %v1638_v46 = vld [vmem:[#allocation8 + $0xb38] sm:$0xff] }
  0xc2   :  { %8928 = vmatprep.subr.msk.mxu0 %vm255_vm0, %v190_v47  ;;  %v1631_v47 = vld [vmem:[#allocation8 + $0xb00] sm:$0xff]  ;;  %v9741_v49 = vpack.c.bf16 %v1638_v46, %v1634_v44 }
  0xc3   :  { %v9575_v50 = vpack.c.bf16 %v1635_v48, %v1631_v47  ;;  %v1671_v44 = vld [vmem:[#allocation8 + $0xc40] sm:$0xff]  ;;  %v1673_v48 = vld [vmem:[#allocation8 + $0xc50] sm:$0xff] }
  0xc5   :  { %8929 = vmatpush1.msk.msra.mxu0 %vm255_vm0, %v189_v55  ;;  %v1640_v55 = vld [vmem:[#allocation8 + $0xb48] sm:$0xff] }
  0xc6   :  { %9526 = vmatprep.subr.bf16.mxu0 %v9525_v56  ;;  %8930 = vmatmul.mubr.msk.f32.vlgmr.msra.gmra.mrb[0].mxu0 %vm242_vm1, %v12669_v18  ;;  %v677_v18 = vld [vmem:[#allocation3 + $0x380] sm:$0xff]  ;;  %v1644_v56 = vld [vmem:[#allocation8 + $0xb68] sm:$0xff] }
  0xc7   :  { %9528 = vmatpush1.bf16.msra.mxu0 %v9527_v57  ;;  %540 = vmatprep.mubr.f32.mxu0 %v12491_v0  ;;  %v9539_v12 = vpack.c.bf16 %v681_v9, %v677_v18  ;;  %v1642_v57 = vld [vmem:[#allocation8 + $0xb58] sm:$0xff]  ;;  %v1647_v9 = vld [vmem:[#allocation8 + $0xb80] sm:$0xff] }
  0xc8   :  { %9530 = vmatprep.subr.bf16.mxu0 %v9529_v58  ;;  %v9577_v58 = vpack.c.bf16 %v1644_v56, %v1640_v55  ;;  %v9745_v62 = vpack.c.bf16 %v1646_v59, %v1642_v57  ;;  %v1654_v18 = vld [vmem:[#allocation8 + $0xbb8] sm:$0xff]  ;;  %v9597_v55 = vpack.c.bf16 %v1684_v53, %v1680_v52  ;;  %v1679_v57 = vld [vmem:[#allocation8 + $0xc80] sm:$0xff] }
  0xc9   :  { %v1686_v56 = vld [vmem:[#allocation8 + $0xcb8] sm:$0xff] }
  0xca   :  { %8931 = vmatmul.mubr.msk.f32.gmra.mrb[2].mxu0 %vm242_vm1, %v12685_v37  ;;  %v685_v37 = vld [vmem:[#allocation3 + $0x3c0] sm:$0xff] }
  0xcb   :  { %9532 = vmatpush1.bf16.msra.mxu0 %v9531_v63  ;;  %546 = vmatprep.mubr.f32.mxu0 %v12491_v0  ;;  %v9543_v15 = vpack.c.bf16 %v689_v14, %v685_v37  ;;  %v9579_v63 = vpack.c.bf16 %v1643_v61, %v1639_v60  ;;  %v1653_v37 = vld [vmem:[#allocation8 + $0xbb0] sm:$0xff]  ;;  %v1726_v53 = vld [vmem:[#allocation8 + $0xdf8] sm:$0xff] }
  0xcc   :  { %9534 = vmatprep.subr.bf16.mxu0 %v9533_v2  ;;  %v1641_v2 = vld [vmem:[#allocation8 + $0xb50] sm:$0xff] }
  0xcd   :  { %v9747_v4 = vpack.c.bf16 %v1645_v3, %v1641_v2  ;;  %v1681_v61 = vld [vmem:[#allocation8 + $0xc90] sm:$0xff]  ;;  %v1688_v2 = vld [vmem:[#allocation8 + $0xcc8] sm:$0xff] }
  0xce   :  { %8932 = vmatmul.mubr.msk.f32.gmra.mrb[4].mxu0 %vm242_vm1, %v12701_v51  ;;  %v693_v51 = vld [vmem:[#allocation3 + $0x400] sm:$0xf]  ;;  %v1692_v3 = vld [vmem:[#allocation8 + $0xce8] sm:$0xff] }
  0xcf   :  { %9536 = vmatpush1.bf16.msra.mxu0 %v9535_v7  ;;  %552 = vmatprep.mubr.f32.mxu0 %v12491_v0  ;;  %v1650_v7 = vld [vmem:[#allocation8 + $0xb98] sm:$0xff] }
  0xd0   :  { %9538 = vmatprep.subr.bf16.mxu0 %v9537_v8  ;;  %v9581_v8 = vpack.c.bf16 %v1652_v6, %v1648_v5  ;;  %v9749_v11 = vpack.c.bf16 %v1654_v18, %v1650_v7  ;;  %v9601_v5 = vpack.c.bf16 %v1692_v3, %v1688_v2  ;;  %v1694_v6 = vld [vmem:[#allocation8 + $0xcf8] sm:$0xff]  ;;  %v1687_v7 = vld [vmem:[#allocation8 + $0xcc0] sm:$0xff] }
  0xd1   :  { %v1734_v3 = vld [vmem:[#allocation8 + $0xe38] sm:$0xff] }
  0xd2   :  { %8933 = vmatmul.mubr.msk.f32.gmra.mrb[6].mxu0 %vm242_vm1, %v12717_v1  ;;  %v120_v1 = vlaneseq }
  0xd3   :  { %9540 = vmatpush1.bf16.msra.mxu0 %v9539_v12  ;;  %785 = vmatprep.mubr.f32.mxu0 %v12491_v0  ;;  %v9583_v12 = vpack.c.bf16 %v1651_v10, %v1647_v9  ;;  %v1689_v10 = vld [vmem:[#allocation8 + $0xcd0] sm:$0xff] }
  0xd4   :  { %9542 = vmatprep.subr.bf16.mxu0 %v9541_v13  ;;  %vm122_vm2 = vcmp.lt.s32.totalorder %v120_v1, 672  ;;  %v1649_v13 = vld [vmem:[#allocation8 + $0xb90] sm:$0xff] }
  0xd5   :  { %125 = vst.msk [vmem:[#allocation2 + $0x7] ss:$8 sm:$0xf] %vm122_vm2, %v12491_v0  ;;  %126 = vst.msk [vmem:[#allocation2 + $0x7] ss:$8 sm:$0x30] %vm122_vm2, %v12491_v0  ;;  %v9751_v14 = vpack.c.bf16 %v1653_v37, %v1649_v13 }
  0xd6   :  { %128 = vst.msk [vmem:[#allocation2 + $0xc7] ss:$8 sm:$0xf] %vm122_vm2, %v12491_v0  ;;  %129 = vst.msk [vmem:[#allocation2 + $0xc7] ss:$8 sm:$0x30] %vm122_vm2, %v12491_v0 }
  0xd7   :  { %9544 = vmatpush1.bf16.msra.mxu0 %v9543_v15  ;;  %131 = vst.msk [vmem:[#allocation2 + $0x90] ss:$8 sm:$0xf] %vm122_vm2, %v12491_v0  ;;  %132 = vst.msk [vmem:[#allocation2 + $0x90] ss:$8 sm:$0x30] %vm122_vm2, %v12491_v0 }
  0xd8   :  { %8940 = vmatprep.subr.msk.mxu0 %vm255_vm0, %v694_v17  ;;  %134 = vst.msk [vmem:[#allocation2 + $0x150] ss:$8 sm:$0xf] %vm122_vm2, %v12491_v0  ;;  %135 = vst.msk [vmem:[#allocation2 + $0x150] ss:$8 sm:$0x30] %vm122_vm2, %v12491_v0 }
  0xd9   :  { %v1656_v15 = vld [vmem:[#allocation8 + $0xbc8] sm:$0xff] }
  0xda   :  { %v1660_v17 = vld [vmem:[#allocation8 + $0xbe8] sm:$0xff] }
  0xdb   :  { %8941 = vmatpush1.msk.msra.mxu0 %vm255_vm0, %v693_v51  ;;  %v1658_v51 = vld [vmem:[#allocation8 + $0xbd8] sm:$0xff]  ;;  %v1696_v13 = vld [vmem:[#allocation8 + $0xd08] sm:$0xff] }
  0xdc   :  { %8942 = vmatmul.mubr.msk.f32.vlgmr.msra.gmra.mrb[0].mxu0 %vm242_vm1, %v12732_v20  ;;  %v1620_v20 = vld [vmem:[#allocation8 + $0xaa8] sm:$0xff] }
  0xdd   :  { %791 = vmatprep.mubr.f32.mxu0 %v12491_v0  ;;  %v9565_v22 = vpack.c.bf16 %v1620_v20, %v1616_v19  ;;  %v9585_v19 = vpack.c.bf16 %v1660_v17, %v1656_v15  ;;  %v1662_v20 = vld [vmem:[#allocation8 + $0xbf8] sm:$0xff]  ;;  %v1700_v37 = vld [vmem:[#allocation8 + $0xd28] sm:$0xff] }
  0xde   :  { %v9753_v23 = vpack.c.bf16 %v1662_v20, %v1658_v51  ;;  %v9605_v15 = vpack.c.bf16 %v1700_v37, %v1696_v13  ;;  %v1702_v17 = vld [vmem:[#allocation8 + $0xd38] sm:$0xff]  ;;  %v1695_v51 = vld [vmem:[#allocation8 + $0xd00] sm:$0xff] }
  0xdf   :  { %9566 = vmatprep.subr.bf16.mxu0 %v9565_v22  ;;  %v1659_v22 = vld [vmem:[#allocation8 + $0xbe0] sm:$0xff]  ;;  %v1742_v37 = vld [vmem:[#allocation8 + $0xe78] sm:$0xff] }
  0xe0   :  { %8943 = vmatmul.mubr.msk.f32.gmra.mrb[2].mxu0 %vm242_vm1, %v12744_v27  ;;  %v9567_v27 = vpack.c.bf16 %v1619_v25, %v1615_v24  ;;  %v9587_v24 = vpack.c.bf16 %v1659_v22, %v1655_v21  ;;  %v1657_v25 = vld [vmem:[#allocation8 + $0xbd0] sm:$0xff] }
  0xe1   :  { %797 = vmatprep.mubr.f32.mxu0 %v12491_v0  ;;  %v1697_v22 = vld [vmem:[#allocation8 + $0xd10] sm:$0xff] }
  0xe2   :  { %9568 = vmatpush1.bf16.msra.mxu0 %v9567_v27  ;;  %v9755_v27 = vpack.c.bf16 %v1661_v26, %v1657_v25  ;;  %v1704_v25 = vld [vmem:[#allocation8 + $0xd48] sm:$0xff] }
  0xe3   :  { %v1708_v26 = vld [vmem:[#allocation8 + $0xd68] sm:$0xff] }
  0xe4   :  { %8944 = vmatmul.mubr.msk.f32.gmra.mrb[4].mxu0 %vm242_vm1, %v12756_v34  ;;  %v1630_v34 = vld [vmem:[#allocation8 + $0xaf8] sm:$0xff] }
  0xe5   :  { %803 = vmatprep.mubr.f32.mxu0 %v12491_v0  ;;  %v9569_v0 = vpack.c.bf16 %v1628_v31, %v1624_v30  ;;  %v9737_v38 = vpack.c.bf16 %v1630_v34, %v1626_v33  ;;  %v9589_v30 = vpack.c.bf16 %v1668_v29, %v1664_v28  ;;  %v1670_v31 = vld [vmem:[#allocation8 + $0xc38] sm:$0xff]  ;;  %v1663_v33 = vld [vmem:[#allocation8 + $0xc00] sm:$0xff]  ;;  %v9609_v28 = vpack.c.bf16 %v1708_v26, %v1704_v25 }
  0xe6   :  { %v9757_v34 = vpack.c.bf16 %v1670_v31, %v1666_v16  ;;  %v1710_v29 = vld [vmem:[#allocation8 + $0xd78] sm:$0xff]  ;;  %v1703_v16 = vld [vmem:[#allocation8 + $0xd40] sm:$0xff] }
  0xe7   :  { %9570 = vmatprep.subr.bf16.mxu0 %v9569_v0  ;;  %9738 = vmatprep.subr.bf16.mxu1 %v9737_v38  ;;  %v1667_v0 = vld [vmem:[#allocation8 + $0xc20] sm:$0xff]  ;;  %v1669_v38 = vld [vmem:[#allocation8 + $0xc30] sm:$0xff]  ;;  %v1750_v26 = vld [vmem:[#allocation8 + $0xeb8] sm:$0xff] }
  0xe8   :  { %8945 = vmatmul.mubr.msk.f32.gmra.mrb[6].mxu0 %vm242_vm1, %v12767_v41  ;;  %v9739_v41 = vpack.c.bf16 %v1629_v40, %v1625_v39  ;;  %v9591_v35 = vpack.c.bf16 %v1667_v0, %v1663_v33  ;;  %v1672_v39 = vld [vmem:[#allocation8 + $0xc48] sm:$0xff]  ;;  %v1705_v0 = vld [vmem:[#allocation8 + $0xd50] sm:$0xff] }
  0xe9   :  { %9572 = vmatpush1.bf16.msra.mxu0 %v9571_v32  ;;  %v9759_v32 = vpack.c.bf16 %v1669_v38, %v1665_v36  ;;  %v1676_v40 = vld [vmem:[#allocation8 + $0xc68] sm:$0xff] }
  0xea   :  { %9740 = vmatpush1.bf16.msra.mxu1 %v9739_v41  ;;  %9574 = vmatprep.subr.bf16.mxu0 %v9573_v45  ;;  %v1674_v41 = vld [vmem:[#allocation8 + $0xc58] sm:$0xff]  ;;  %v9593_v42 = vpack.c.bf16 %v1676_v40, %v1672_v39  ;;  %v1675_v45 = vld [vmem:[#allocation8 + $0xc60] sm:$0xff]  ;;  %v1712_v36 = vld [vmem:[#allocation8 + $0xd88] sm:$0xff] }
  0xeb   :  { %9742 = vmatprep.subr.bf16.mxu1 %v9741_v49  ;;  %v9761_v46 = vpack.c.bf16 %v1678_v43, %v1674_v41  ;;  %v9595_v47 = vpack.c.bf16 %v1675_v45, %v1671_v44  ;;  %v1677_v49 = vld [vmem:[#allocation8 + $0xc70] sm:$0xff]  ;;  %v1716_v38 = vld [vmem:[#allocation8 + $0xda8] sm:$0xff]  ;;  %v1718_v40 = vld [vmem:[#allocation8 + $0xdb8] sm:$0xff] }
  0xec   :  { %v9613_v39 = vpack.c.bf16 %v1716_v38, %v1712_v36  ;;  %v1711_v41 = vld [vmem:[#allocation8 + $0xd80] sm:$0xff]  ;;  %v1713_v45 = vld [vmem:[#allocation8 + $0xd90] sm:$0xff] }
  0xed   :  { %9576 = vmatpush1.bf16.msra.mxu0 %v9575_v50  ;;  %v9763_v50 = vpack.c.bf16 %v1677_v49, %v1673_v48  ;;  %v1720_v48 = vld [vmem:[#allocation8 + $0xdc8] sm:$0xff] }
  0xee   :  { %9744 = vmatpush1.bf16.msra.mxu1 %v9743_v54  ;;  %9578 = vmatprep.subr.bf16.mxu0 %v9577_v58  ;;  %v1682_v54 = vld [vmem:[#allocation8 + $0xc98] sm:$0xff]  ;;  %v1683_v58 = vld [vmem:[#allocation8 + $0xca0] sm:$0xff]  ;;  %v1724_v49 = vld [vmem:[#allocation8 + $0xde8] sm:$0xff] }
  0xef   :  { %9746 = vmatprep.subr.bf16.mxu1 %v9745_v62  ;;  %v9765_v59 = vpack.c.bf16 %v1686_v56, %v1682_v54  ;;  %v9599_v60 = vpack.c.bf16 %v1683_v58, %v1679_v57  ;;  %v1685_v62 = vld [vmem:[#allocation8 + $0xcb0] sm:$0xff]  ;;  %v9617_v52 = vpack.c.bf16 %v1724_v49, %v1720_v48  ;;  %v1719_v54 = vld [vmem:[#allocation8 + $0xdc0] sm:$0xff] }
  0xf0   :  { %v1721_v58 = vld [vmem:[#allocation8 + $0xdd0] sm:$0xff] }
  0xf1   :  { %9580 = vmatpush1.bf16.msra.mxu0 %v9579_v63  ;;  %v9767_v63 = vpack.c.bf16 %v1685_v62, %v1681_v61  ;;  %v1728_v61 = vld [vmem:[#allocation8 + $0xe08] sm:$0xff] }
  0xf2   :  { %9748 = vmatpush1.bf16.msra.mxu1 %v9747_v4  ;;  %9582 = vmatprep.subr.bf16.mxu0 %v9581_v8  ;;  %v1690_v4 = vld [vmem:[#allocation8 + $0xcd8] sm:$0xff]  ;;  %v1691_v8 = vld [vmem:[#allocation8 + $0xce0] sm:$0xff]  ;;  %v1732_v62 = vld [vmem:[#allocation8 + $0xe28] sm:$0xff] }
  0xf3   :  { %9750 = vmatprep.subr.bf16.mxu1 %v9749_v11  ;;  %v9769_v18 = vpack.c.bf16 %v1694_v6, %v1690_v4  ;;  %v9603_v9 = vpack.c.bf16 %v1691_v8, %v1687_v7  ;;  %v1693_v11 = vld [vmem:[#allocation8 + $0xcf0] sm:$0xff]  ;;  %v9621_v2 = vpack.c.bf16 %v1732_v62, %v1728_v61  ;;  %v1727_v4 = vld [vmem:[#allocation8 + $0xe00] sm:$0xff] }
  0xf4   :  { %v1729_v8 = vld [vmem:[#allocation8 + $0xe10] sm:$0xff] }
  0xf5   :  { %9584 = vmatpush1.bf16.msra.mxu0 %v9583_v12  ;;  %v9771_v12 = vpack.c.bf16 %v1693_v11, %v1689_v10  ;;  %v1736_v10 = vld [vmem:[#allocation8 + $0xe48] sm:$0xff] }
  0xf6   :  { %9752 = vmatpush1.bf16.msra.mxu1 %v9751_v14  ;;  %9586 = vmatprep.subr.bf16.mxu0 %v9585_v19  ;;  %v1698_v14 = vld [vmem:[#allocation8 + $0xd18] sm:$0xff]  ;;  %v1699_v19 = vld [vmem:[#allocation8 + $0xd20] sm:$0xff]  ;;  %v1740_v11 = vld [vmem:[#allocation8 + $0xe68] sm:$0xff] }
  0xf7   :  { %9754 = vmatprep.subr.bf16.mxu1 %v9753_v23  ;;  %v9773_v20 = vpack.c.bf16 %v1702_v17, %v1698_v14  ;;  %v9607_v21 = vpack.c.bf16 %v1699_v19, %v1695_v51  ;;  %v1701_v23 = vld [vmem:[#allocation8 + $0xd30] sm:$0xff]  ;;  %v9625_v13 = vpack.c.bf16 %v1740_v11, %v1736_v10  ;;  %v1735_v14 = vld [vmem:[#allocation8 + $0xe40] sm:$0xff] }
  0xf8   :  { %v1737_v19 = vld [vmem:[#allocation8 + $0xe50] sm:$0xff] }
  0xf9   :  { %9588 = vmatpush1.bf16.msra.mxu0 %v9587_v24  ;;  %v9775_v24 = vpack.c.bf16 %v1701_v23, %v1697_v22  ;;  %v1744_v22 = vld [vmem:[#allocation8 + $0xe88] sm:$0xff] }
  0xfa   :  { %9756 = vmatpush1.bf16.msra.mxu1 %v9755_v27  ;;  %9590 = vmatprep.subr.bf16.mxu0 %v9589_v30  ;;  %v1706_v27 = vld [vmem:[#allocation8 + $0xd58] sm:$0xff]  ;;  %v1707_v30 = vld [vmem:[#allocation8 + $0xd60] sm:$0xff]  ;;  %v1748_v23 = vld [vmem:[#allocation8 + $0xea8] sm:$0xff] }
  0xfb   :  { %9758 = vmatprep.subr.bf16.mxu1 %v9757_v34  ;;  %v9777_v31 = vpack.c.bf16 %v1710_v29, %v1706_v27  ;;  %v9611_v33 = vpack.c.bf16 %v1707_v30, %v1703_v16  ;;  %v1709_v34 = vld [vmem:[#allocation8 + $0xd70] sm:$0xff]  ;;  %v9629_v25 = vpack.c.bf16 %v1748_v23, %v1744_v22  ;;  %v12816_v16 = vld [vmem:[#allocation6] sm:$0xf] }
  0xfd   :  { %9592 = vmatpush1.bf16.msra.mxu0 %v9591_v35  ;;  %v9779_v35 = vpack.c.bf16 %v1709_v34, %v1705_v0 }
  0xfe   :  { %9760 = vmatpush1.bf16.msra.mxu1 %v9759_v32  ;;  %9594 = vmatprep.subr.bf16.mxu0 %v9593_v42  ;;  %v1714_v32 = vld [vmem:[#allocation8 + $0xd98] sm:$0xff]  ;;  %v1715_v42 = vld [vmem:[#allocation8 + $0xda0] sm:$0xff] }
  0xff   :  { %9762 = vmatprep.subr.bf16.mxu1 %v9761_v46  ;;  %v9781_v43 = vpack.c.bf16 %v1718_v40, %v1714_v32  ;;  %v9615_v44 = vpack.c.bf16 %v1715_v42, %v1711_v41  ;;  %v1717_v46 = vld [vmem:[#allocation8 + $0xdb0] sm:$0xff] }
 0x101   :  { %9596 = vmatpush1.bf16.msra.mxu0 %v9595_v47  ;;  %v9783_v47 = vpack.c.bf16 %v1717_v46, %v1713_v45 }
 0x102   :  { %9764 = vmatpush1.bf16.msra.mxu1 %v9763_v50  ;;  %9598 = vmatprep.subr.bf16.mxu0 %v9597_v55  ;;  %v1722_v50 = vld [vmem:[#allocation8 + $0xdd8] sm:$0xff]  ;;  %v1723_v55 = vld [vmem:[#allocation8 + $0xde0] sm:$0xff] }
 0x103   :  { %9766 = vmatprep.subr.bf16.mxu1 %v9765_v59  ;;  %v9785_v56 = vpack.c.bf16 %v1726_v53, %v1722_v50  ;;  %v9619_v57 = vpack.c.bf16 %v1723_v55, %v1719_v54  ;;  %v1725_v59 = vld [vmem:[#allocation8 + $0xdf0] sm:$0xff] }
 0x105   :  { %9600 = vmatpush1.bf16.msra.mxu0 %v9599_v60  ;;  %v9787_v60 = vpack.c.bf16 %v1725_v59, %v1721_v58 }
 0x106   :  { %9768 = vmatpush1.bf16.msra.mxu1 %v9767_v63  ;;  %9602 = vmatprep.subr.bf16.mxu0 %v9601_v5  ;;  %v1730_v63 = vld [vmem:[#allocation8 + $0xe18] sm:$0xff]  ;;  %v1731_v5 = vld [vmem:[#allocation8 + $0xe20] sm:$0xff] }
 0x107   :  { %9770 = vmatprep.subr.bf16.mxu1 %v9769_v18  ;;  %v9789_v6 = vpack.c.bf16 %v1734_v3, %v1730_v63  ;;  %v9623_v7 = vpack.c.bf16 %v1731_v5, %v1727_v4  ;;  %v1733_v18 = vld [vmem:[#allocation8 + $0xe30] sm:$0xff] }
 0x109   :  { %9604 = vmatpush1.bf16.msra.mxu0 %v9603_v9  ;;  %v9791_v9 = vpack.c.bf16 %v1733_v18, %v1729_v8 }
 0x10a   :  { %9772 = vmatpush1.bf16.msra.mxu1 %v9771_v12  ;;  %9606 = vmatprep.subr.bf16.mxu0 %v9605_v15  ;;  %v1738_v12 = vld [vmem:[#allocation8 + $0xe58] sm:$0xff]  ;;  %v1739_v15 = vld [vmem:[#allocation8 + $0xe60] sm:$0xff] }
 0x10b   :  { %9774 = vmatprep.subr.bf16.mxu1 %v9773_v20  ;;  %v9793_v17 = vpack.c.bf16 %v1742_v37, %v1738_v12  ;;  %v9627_v51 = vpack.c.bf16 %v1739_v15, %v1735_v14  ;;  %v1741_v20 = vld [vmem:[#allocation8 + $0xe70] sm:$0xff] }
 0x10d   :  { %9608 = vmatpush1.bf16.msra.mxu0 %v9607_v21  ;;  %v9795_v21 = vpack.c.bf16 %v1741_v20, %v1737_v19 }
 0x10e   :  { %9776 = vmatpush1.bf16.msra.mxu1 %v9775_v24  ;;  %9610 = vmatprep.subr.bf16.mxu0 %v9609_v28  ;;  %v1746_v24 = vld [vmem:[#allocation8 + $0xe98] sm:$0xff]  ;;  %v12811_v28 = vshrl.u32 %v120_v1, 7 }
 0x10f   :  { %9778 = vmatprep.subr.bf16.mxu1 %v9777_v31  ;;  %v9797_v27 = vpack.c.bf16 %v1750_v26, %v1746_v24 }
 0x110   :  { %v12814_v29 = vsub.s32 2, %v12811_v28  ;;  %v12819_v30 = vsub.s32 3, %v12811_v28 }
 0x111   :  { %9612 = vmatpush1.bf16.msra.mxu0 %v9611_v33 }
 0x112   :  { %9780 = vmatpush1.bf16.msra.mxu1 %v9779_v35  ;;  %9614 = vmatprep.subr.bf16.mxu0 %v9613_v39  ;;  %v928_v33 = vrot.slane %v12816_v16, %v12814_v29  ;;  %v932_v35 = vrot.slane %v12816_v16, %v12819_v30 }
 0x113   :  { %9782 = vmatprep.subr.bf16.mxu1 %v9781_v43 }
 0x115   :  { %9616 = vmatpush1.bf16.msra.mxu0 %v9615_v44 }
 0x116   :  { %9784 = vmatpush1.bf16.msra.mxu1 %v9783_v47  ;;  %9618 = vmatprep.subr.bf16.mxu0 %v9617_v52 }
 0x117   :  { %9786 = vmatprep.subr.bf16.mxu1 %v9785_v56 }
 0x119   :  { %9620 = vmatpush1.bf16.msra.mxu0 %v9619_v57 }
 0x11a   :  { %9788 = vmatpush1.bf16.msra.mxu1 %v9787_v60  ;;  %9622 = vmatprep.subr.bf16.mxu0 %v9621_v2 }
 0x11b   :  { %9790 = vmatprep.subr.bf16.mxu1 %v9789_v6 }
 0x11d   :  { %9624 = vmatpush1.bf16.msra.mxu0 %v9623_v7 }
 0x11e   :  { %9792 = vmatpush1.bf16.msra.mxu1 %v9791_v9  ;;  %9626 = vmatprep.subr.bf16.mxu0 %v9625_v13 }
 0x11f   :  { %9794 = vmatprep.subr.bf16.mxu1 %v9793_v17 }
 0x121   :  { %9628 = vmatpush1.bf16.msra.mxu0 %v9627_v51 }
 0x122   :  { %9796 = vmatpush1.bf16.msra.mxu1 %v9795_v21  ;;  %9630 = vmatprep.subr.bf16.mxu0 %v9629_v25 }
 0x123   :  { %9798 = vmatprep.subr.bf16.mxu1 %v9797_v27 }
 0x182   :  { %v423_v31 = vpop.f32.mrb[8].mxu0 }
 0x183   :  { %v876_v0 = vpop.f32.mrb[0].mxu1  ;;  %v425_v34 = vpop.f32.mrb[9].mxu0 }
 0x184   :  { %v11863_v36 = vadd.f32 %v876_v0, %v423_v31  ;;  %v878_v1 = vpop.f32.mrb[1].mxu1 }
 0x185   :  { %v11864_v38 = vadd.f32 %v878_v1, %v425_v34 }
 0x186   :  { %v12825_v32 = vadd.f32 %v11863_v36, %v928_v33  ;;  %v429_v39 = vpop.f32.mrb[10].mxu0 }
 0x187   :  { %v12827_v40 = vadd.f32 %v11864_v38, %v932_v35  ;;  %v882_v41 = vpop.f32.mrb[2].mxu1  ;;  %v431_v42 = vpop.f32.mrb[11].mxu0 }
 0x188   :  { %v955_v43 = vmul.f32 %v12825_v32, %v12825_v32  ;;  %v11865_v44 = vadd.f32 %v882_v41, %v429_v39  ;;  %v884_v45 = vpop.f32.mrb[3].mxu1 }
 0x189   :  { %v956_v46 = vmul.f32 %v12827_v40, %v12827_v40  ;;  %v11866_v47 = vadd.f32 %v884_v45, %v431_v42 }
 0x18a   :  { %v971_v48 = vmul.f32 %v955_v43, %v12825_v32  ;;  %v12834_v49 = vadd.f32 %v11865_v44, %v928_v33  ;;  %v435_v50 = vpop.f32.mrb[12].mxu0 }
 0x18b   :  { %v972_v52 = vmul.f32 %v956_v46, %v12827_v40  ;;  %v12837_v53 = vadd.f32 %v11866_v47, %v932_v35  ;;  %v888_v54 = vpop.f32.mrb[4].mxu1  ;;  %v437_v55 = vpop.f32.mrb[13].mxu0 }
 0x18c   :  { %v987_v56 = vmul.f32 0.044715, %v971_v48  ;;  %v959_v57 = vmul.f32 %v12834_v49, %v12834_v49  ;;  %v11867_v58 = vadd.f32 %v888_v54, %v435_v50  ;;  %v890_v59 = vpop.f32.mrb[5].mxu1 }
 0x18d   :  { %v988_v60 = vmul.f32 0.044715, %v972_v52  ;;  %v960_v61 = vmul.f32 %v12837_v53, %v12837_v53  ;;  %v11868_v62 = vadd.f32 %v890_v59, %v437_v55 }
 0x18e   :  { %v1003_v63 = vadd.f32 %v987_v56, %v12825_v32  ;;  %v975_v2 = vmul.f32 %v959_v57, %v12834_v49  ;;  %v12845_v3 = vadd.f32 %v11867_v58, %v928_v33  ;;  %v441_v4 = vpop.f32.mrb[14].mxu0 }
 0x18f   :  { %v1004_v5 = vadd.f32 %v988_v60, %v12827_v40  ;;  %v976_v6 = vmul.f32 %v960_v61, %v12837_v53  ;;  %v12849_v7 = vadd.f32 %v11868_v62, %v932_v35  ;;  %v894_v8 = vpop.f32.mrb[6].mxu1  ;;  %v443_v18 = vpop.f32.mrb[15].mxu0 }
 0x190   :  { %v1019_v9 = vmul.f32 0.7978846, %v1003_v63  ;;  %v991_v10 = vmul.f32 0.044715, %v975_v2  ;;  %v963_v11 = vmul.f32 %v12845_v3, %v12845_v3  ;;  %v11869_v12 = vadd.f32 %v894_v8, %v441_v4  ;;  %v896_v13 = vpop.f32.mrb[7].mxu1 }
 0x191   :  { %v1020_v37 = vmul.f32 0.7978846, %v1004_v5  ;;  %v992_v14 = vmul.f32 0.044715, %v976_v6  ;;  %v964_v15 = vmul.f32 %v12849_v7, %v12849_v7  ;;  %v11870_v17 = vadd.f32 %v896_v13, %v443_v18 }
 0x192   :  { %12165 = vtanh.f32 %v1019_v9  ;;  %v1007_v51 = vadd.f32 %v991_v10, %v12834_v49  ;;  %v979_v19 = vmul.f32 %v963_v11, %v12845_v3  ;;  %v12857_v20 = vadd.f32 %v11869_v12, %v928_v33 }
 0x193   :  { %12167 = vtanh.f32 %v1020_v37  ;;  %v1008_v21 = vadd.f32 %v992_v14, %v12837_v53  ;;  %v980_v22 = vmul.f32 %v964_v15, %v12849_v7  ;;  %v12861_v23 = vadd.f32 %v11870_v17, %v932_v35 }
 0x194   :  { %v1023_v24 = vmul.f32 0.7978846, %v1007_v51  ;;  %v995_v25 = vmul.f32 0.044715, %v979_v19  ;;  %v967_v26 = vmul.f32 %v12857_v20, %v12857_v20  ;;  %v12882_v13 = vsub.s32 1, %v12811_v28 }
 0x195   :  { %v1024_v27 = vmul.f32 0.7978846, %v1008_v21  ;;  %v996_v31 = vmul.f32 0.044715, %v980_v22  ;;  %v968_v0 = vmul.f32 %v12861_v23, %v12861_v23 }
 0x196   :  { %12169 = vtanh.f32 %v1023_v24  ;;  %v1011_v33 = vadd.f32 %v995_v25, %v12845_v3  ;;  %v983_v34 = vmul.f32 %v967_v26, %v12857_v20  ;;  %v924_v51 = vrot.slane %v12816_v16, %v12882_v13 }
 0x197   :  { %12171 = vtanh.f32 %v1024_v27  ;;  %v1012_v36 = vadd.f32 %v996_v31, %v12849_v7  ;;  %v984_v35 = vmul.f32 %v968_v0, %v12861_v23 }
 0x198   :  { %v1027_v1 = vmul.f32 0.7978846, %v1011_v33  ;;  %v999_v38 = vmul.f32 0.044715, %v983_v34 }
 0x199   :  { %v1028_v39 = vmul.f32 0.7978846, %v1012_v36  ;;  %v1000_v41 = vmul.f32 0.044715, %v984_v35 }
 0x19a   :  { %12173 = vtanh.f32 %v1027_v1  ;;  %v1015_v42 = vadd.f32 %v999_v38, %v12857_v20 }
 0x19b   :  { %12175 = vtanh.f32 %v1028_v39  ;;  %v1016_v43 = vadd.f32 %v1000_v41, %v12861_v23 }
 0x19c   :  { %v12166_v44 = vpop.eup %12165  ;;  %v1031_v45 = vmul.f32 0.7978846, %v1015_v42 }
 0x19d   :  { %v12168_v46 = vpop.eup %12167  ;;  %v1051_v47 = vadd.f32 1.0, %v12166_v44  ;;  %v1032_v48 = vmul.f32 0.7978846, %v1016_v43 }
 0x19e   :  { %v1052_v50 = vadd.f32 1.0, %v12168_v46  ;;  %12177 = vtanh.f32 %v1031_v45 }
 0x19f   :  { %v1067_v52 = vmul.f32 0.5, %v1051_v47  ;;  %12179 = vtanh.f32 %v1032_v48 }
 0x1a0   :  { %v12170_v54 = vpop.eup %12169  ;;  %v1068_v55 = vmul.f32 0.5, %v1052_v50 }
 0x1a1   :  { %v12172_v56 = vpop.eup %12171  ;;  %v1083_v57 = vmul.f32 %v1067_v52, %v12825_v32  ;;  %v1055_v58 = vadd.f32 1.0, %v12170_v54 }
 0x1a2   :  { %v1084_v59 = vmul.f32 %v1068_v55, %v12827_v40  ;;  %v1056_v60 = vadd.f32 1.0, %v12172_v56  ;;  %v12878_v40 = vsub.s32 0, %v12811_v28  ;;  %v12891_v28 = vld [vmem:[#allocation2 + $0x30] sm:$0xff] }
 0x1a3   :  { %1099 = vst [vmem:[#allocation2 + $0x48] sm:$0xff] %v1083_v57  ;;  %v1071_v61 = vmul.f32 0.5, %v1055_v58  ;;  %141 = vst.msk [vmem:[#allocation2 + $0x58] sm:$0xff] %vm140_vm3, %v12891_v28 }
 0x1a4   :  { %v12174_v62 = vpop.eup %12173  ;;  %1100 = vst [vmem:[#allocation2 + $0x50] sm:$0xff] %v1084_v59  ;;  %v1072_v63 = vmul.f32 0.5, %v1056_v60  ;;  %v920_v15 = vrot.slane %v12816_v16, %v12878_v40  ;;  %142 = vst.msk [vmem:[#allocation2 + $0x88] sm:$0xff] %vm140_vm3, %v12891_v28 }
 0x1a5   :  { %v12176_v2 = vpop.eup %12175  ;;  %v1087_v4 = vmul.f32 %v1071_v61, %v12834_v49  ;;  %v1059_v5 = vadd.f32 1.0, %v12174_v62  ;;  %143 = vst.msk [vmem:[#allocation2 + $0x118] sm:$0xff] %vm140_vm3, %v12891_v28  ;;  %144 = vst.msk [vmem:[#allocation2 + $0x148] sm:$0xff] %vm140_vm3, %v12891_v28 }
 0x1a6   :  { %v1088_v6 = vmul.f32 %v1072_v63, %v12837_v53  ;;  %v1060_v8 = vadd.f32 1.0, %v12176_v2 }
 0x1a7   :  { %1103 = vst [vmem:[#allocation2 + $0x78] sm:$0xff] %v1087_v4  ;;  %v1075_v18 = vmul.f32 0.5, %v1059_v5 }
 0x1a8   :  { %v12178_v9 = vpop.eup %12177  ;;  %1104 = vst [vmem:[#allocation2 + $0x80] sm:$0xff] %v1088_v6  ;;  %v1076_v32 = vmul.f32 0.5, %v1060_v8 }
 0x1a9   :  { %v12180_v10 = vpop.eup %12179  ;;  %v1091_v11 = vmul.f32 %v1075_v18, %v12845_v3  ;;  %v1063_v12 = vadd.f32 1.0, %v12178_v9 }
 0x1aa   :  { %v1092_v49 = vmul.f32 %v1076_v32, %v12849_v7  ;;  %v1064_v37 = vadd.f32 1.0, %v12180_v10 }
 0x1ab   :  { %1107 = vst [vmem:[#allocation2 + $0x108] sm:$0xff] %v1091_v11  ;;  %v1079_v53 = vmul.f32 0.5, %v1063_v12 }
 0x1ac   :  { %1108 = vst [vmem:[#allocation2 + $0x110] sm:$0xff] %v1092_v49  ;;  %v1080_v14 = vmul.f32 0.5, %v1064_v37 }
 0x1ad   :  { %v1095_v17 = vmul.f32 %v1079_v53, %v12857_v20 }
 0x1ae   :  { %v1096_v3 = vmul.f32 %v1080_v14, %v12861_v23 }
 0x1af   :  { %1111 = vst [vmem:[#allocation2 + $0x138] sm:$0xff] %v1095_v17  ;;  %v787_v7 = vpop.f32.mrb[0].mxu0 }
 0x1b0   :  { %1112 = vst [vmem:[#allocation2 + $0x140] sm:$0xff] %v1096_v3  ;;  %v12901_v16 = vadd.f32 %v920_v15, %v787_v7  ;;  %v789_v19 = vpop.f32.mrb[1].mxu0  ;;  %v1743_v7 = vld [vmem:[#allocation8 + $0xe80] sm:$0xff] }
 0x1b1   :  { %v12903_v20 = vadd.f32 %v924_v51, %v789_v19  ;;  %v1747_v19 = vld [vmem:[#allocation8 + $0xea0] sm:$0xff] }
 0x1b2   :  { %v953_v21 = vmul.f32 %v12901_v16, %v12901_v16 }
 0x1b3   :  { %v954_v22 = vmul.f32 %v12903_v20, %v12903_v20  ;;  %v793_v23 = vpop.f32.mrb[2].mxu0 }
 0x1b4   :  { %v969_v24 = vmul.f32 %v953_v21, %v12901_v16  ;;  %v12910_v25 = vadd.f32 %v920_v15, %v793_v23  ;;  %v795_v26 = vpop.f32.mrb[3].mxu0  ;;  %v1749_v23 = vld [vmem:[#allocation8 + $0xeb0] sm:$0xff] }
 0x1b5   :  { %v970_v27 = vmul.f32 %v954_v22, %v12903_v20  ;;  %v12913_v31 = vadd.f32 %v924_v51, %v795_v26  ;;  %v1745_v22 = vld [vmem:[#allocation8 + $0xe90] sm:$0xff] }
 0x1b6   :  { %v985_v0 = vmul.f32 0.044715, %v969_v24  ;;  %v957_v33 = vmul.f32 %v12910_v25, %v12910_v25  ;;  %v1752_v24 = vld [vmem:[#allocation8 + $0xec8] sm:$0xff] }
 0x1b7   :  { %v986_v34 = vmul.f32 0.044715, %v970_v27  ;;  %v958_v36 = vmul.f32 %v12913_v31, %v12913_v31  ;;  %v799_v35 = vpop.f32.mrb[4].mxu0  ;;  %v1756_v27 = vld [vmem:[#allocation8 + $0xee8] sm:$0xff] }
 0x1b8   :  { %v1001_v1 = vadd.f32 %v985_v0, %v12901_v16  ;;  %v973_v38 = vmul.f32 %v957_v33, %v12910_v25  ;;  %v12921_v39 = vadd.f32 %v920_v15, %v799_v35  ;;  %v801_v41 = vpop.f32.mrb[5].mxu0  ;;  %v1754_v0 = vld [vmem:[#allocation8 + $0xed8] sm:$0xff] }
 0x1b9   :  { %v1002_v42 = vadd.f32 %v986_v34, %v12903_v20  ;;  %v974_v43 = vmul.f32 %v958_v36, %v12913_v31  ;;  %v12925_v44 = vadd.f32 %v924_v51, %v801_v41  ;;  %v1758_v33 = vld [vmem:[#allocation8 + $0xef8] sm:$0xff]  ;;  %v9631_v41 = vpack.c.bf16 %v1747_v19, %v1743_v7 }
 0x1ba   :  { %v1017_v45 = vmul.f32 0.7978846, %v1001_v1  ;;  %v989_v46 = vmul.f32 0.044715, %v973_v38  ;;  %v961_v47 = vmul.f32 %v12921_v39, %v12921_v39 }
 0x1bb   :  { %v1018_v48 = vmul.f32 0.7978846, %v1002_v42  ;;  %v990_v50 = vmul.f32 0.044715, %v974_v43  ;;  %v962_v52 = vmul.f32 %v12925_v44, %v12925_v44  ;;  %v805_v54 = vpop.f32.mrb[6].mxu0  ;;  %v9799_v42 = vpack.c.bf16 %v1749_v23, %v1745_v22  ;;  %v1751_v43 = vld [vmem:[#allocation8 + $0xec0] sm:$0xff] }
 0x1bc   :  { %12181 = vtanh.f32 %v1017_v45  ;;  %v1005_v55 = vadd.f32 %v989_v46, %v12910_v25  ;;  %v977_v56 = vmul.f32 %v961_v47, %v12921_v39  ;;  %v12933_v57 = vadd.f32 %v920_v15, %v805_v54  ;;  %v807_v58 = vpop.f32.mrb[7].mxu0  ;;  %v1755_v45 = vld [vmem:[#allocation8 + $0xee0] sm:$0xff]  ;;  %v1757_v54 = vld [vmem:[#allocation8 + $0xef0] sm:$0xff] }
 0x1bd   :  { %12183 = vtanh.f32 %v1018_v48  ;;  %v1006_v59 = vadd.f32 %v990_v50, %v12913_v31  ;;  %v978_v60 = vmul.f32 %v962_v52, %v12925_v44  ;;  %v12937_v61 = vadd.f32 %v924_v51, %v807_v58  ;;  %v1753_v52 = vld [vmem:[#allocation8 + $0xed0] sm:$0xff]  ;;  %v1764_v58 = vld [vmem:[#allocation8 + $0xf28] sm:$0xff] }
 0x1be   :  { %v1021_v62 = vmul.f32 0.7978846, %v1005_v55  ;;  %v993_v63 = vmul.f32 0.044715, %v977_v56  ;;  %v965_v2 = vmul.f32 %v12933_v57, %v12933_v57  ;;  %v9633_v48 = vpack.c.bf16 %v1756_v27, %v1752_v24  ;;  %v1760_v55 = vld [vmem:[#allocation8 + $0xf08] sm:$0xff]  ;;  %v1771_v27 = vld [vmem:[#allocation8 + $0xf60] sm:$0xff] }
 0x1bf   :  { %v1022_v4 = vmul.f32 0.7978846, %v1006_v59  ;;  %v994_v5 = vmul.f32 0.044715, %v978_v60  ;;  %v966_v6 = vmul.f32 %v12937_v61, %v12937_v61  ;;  %v9801_v50 = vpack.c.bf16 %v1758_v33, %v1754_v0  ;;  %v1766_v59 = vld [vmem:[#allocation8 + $0xf38] sm:$0xff]  ;;  %v1769_v0 = vld [vmem:[#allocation8 + $0xf50] sm:$0xff] }
 0x1c0   :  { %12185 = vtanh.f32 %v1021_v62  ;;  %v1009_v8 = vadd.f32 %v993_v63, %v12921_v39  ;;  %v981_v18 = vmul.f32 %v965_v2, %v12933_v57  ;;  %v1773_v33 = vld [vmem:[#allocation8 + $0xf70] sm:$0xff] }
 0x1c1   :  { %12187 = vtanh.f32 %v1022_v4  ;;  %v1010_v9 = vadd.f32 %v994_v5, %v12925_v44  ;;  %v982_v32 = vmul.f32 %v966_v6, %v12937_v61  ;;  %v9635_v4 = vpack.c.bf16 %v1755_v45, %v1751_v43  ;;  %v1759_v6 = vld [vmem:[#allocation8 + $0xf00] sm:$0xff] }
 0x1c2   :  { %v1025_v10 = vmul.f32 0.7978846, %v1009_v8  ;;  %v997_v11 = vmul.f32 0.044715, %v981_v18  ;;  %v9803_v5 = vpack.c.bf16 %v1757_v54, %v1753_v52  ;;  %v1763_v8 = vld [vmem:[#allocation8 + $0xf20] sm:$0xff]  ;;  %v1784_v52 = vld [vmem:[#allocation8 + $0xfc8] sm:$0xff] }
 0x1c3   :  { %v1026_v12 = vmul.f32 0.7978846, %v1010_v9  ;;  %v998_v49 = vmul.f32 0.044715, %v982_v32  ;;  %v9637_v32 = vpack.c.bf16 %v1764_v58, %v1760_v55  ;;  %v9639_v7 = vpack.c.bf16 %v1763_v8, %v1759_v6  ;;  %v1775_v43 = vld [vmem:[#allocation8 + $0xf80] sm:$0xff]  ;;  %v1790_v58 = vld [vmem:[#allocation8 + $0xff8] sm:$0xff] }
 0x1c4   :  { %12189 = vtanh.f32 %v1025_v10  ;;  %v1013_v37 = vadd.f32 %v997_v11, %v12933_v57  ;;  %v1761_v11 = vld [vmem:[#allocation8 + $0xf10] sm:$0xff]  ;;  %v1779_v45 = vld [vmem:[#allocation8 + $0xfa0] sm:$0xff]  ;;  %v1796_v6 = vld [vmem:[#allocation8 + $0x1028] sm:$0xff] }
 0x1c5   :  { %12191 = vtanh.f32 %v1026_v12  ;;  %v1014_v53 = vadd.f32 %v998_v49, %v12937_v61  ;;  %v1765_v12 = vld [vmem:[#allocation8 + $0xf30] sm:$0xff]  ;;  %v1768_v49 = vld [vmem:[#allocation8 + $0xf48] sm:$0xff]  ;;  %v1794_v8 = vld [vmem:[#allocation8 + $0x1018] sm:$0xff] }
 0x1c6   :  { %v12182_v14 = vpop.eup %12181  ;;  %v1029_v15 = vmul.f32 0.7978846, %v1013_v37  ;;  %v1772_v37 = vld [vmem:[#allocation8 + $0xf68] sm:$0xff]  ;;  %v9807_v19 = vpack.c.bf16 %v1765_v12, %v1761_v11  ;;  %v1795_v11 = vld [vmem:[#allocation8 + $0x1020] sm:$0xff] }
 0x1c7   :  { %v12184_v17 = vpop.eup %12183  ;;  %v1049_v51 = vadd.f32 1.0, %v12182_v14  ;;  %v1030_v3 = vmul.f32 0.7978846, %v1014_v53  ;;  %v1770_v53 = vld [vmem:[#allocation8 + $0xf58] sm:$0xff]  ;;  %v9641_v24 = vpack.c.bf16 %v1772_v37, %v1768_v49  ;;  %v1797_v37 = vld [vmem:[#allocation8 + $0x1030] sm:$0xff] }
 0x1c8   :  { %v1050_v21 = vadd.f32 1.0, %v12184_v17  ;;  %12193 = vtanh.f32 %v1029_v15  ;;  %v1774_v14 = vld [vmem:[#allocation8 + $0xf78] sm:$0xff] }
 0x1c9   :  { %v1065_v26 = vmul.f32 0.5, %v1049_v51  ;;  %12195 = vtanh.f32 %v1030_v3 }
 0x1ca   :  { %v12186_v34 = vpop.eup %12185  ;;  %v1066_v36 = vmul.f32 0.5, %v1050_v21  ;;  %v1767_v21 = vld [vmem:[#allocation8 + $0xf40] sm:$0xff] }
 0x1cb   :  { %v12188_v35 = vpop.eup %12187  ;;  %v1081_v1 = vmul.f32 %v1065_v26, %v12901_v16  ;;  %v1053_v38 = vadd.f32 1.0, %v12186_v34  ;;  %v1762_v16 = vld [vmem:[#allocation8 + $0xf18] sm:$0xff]  ;;  %v9809_v26 = vpack.c.bf16 %v1774_v14, %v1770_v53  ;;  %v1800_v53 = vld [vmem:[#allocation8 + $0x1048] sm:$0xff] }
 0x1cc   :  { %v12951_v46 = vmul.f32 %v1066_v36, %v12903_v20  ;;  %v1054_v47 = vadd.f32 1.0, %v12188_v35  ;;  %v9805_v10 = vpack.c.bf16 %v1766_v59, %v1762_v16  ;;  %v1778_v35 = vld [vmem:[#allocation8 + $0xf98] sm:$0xff]  ;;  %v9647_v16 = vpack.c.bf16 %v1779_v45, %v1775_v43  ;;  %v1804_v14 = vld [vmem:[#allocation8 + $0x1068] sm:$0xff] }
 0x1cd   :  { %1097 = vst [vmem:[#allocation2 + $0x38] sm:$0xff] %v1081_v1  ;;  %v1069_v56 = vmul.f32 0.5, %v1053_v38  ;;  %2025 = vmatprep.mubr.f32.mxu0 %v1081_v1  ;;  %2292 = vmatprep.mubr.f32.mxu1 %v1081_v1  ;;  %v1782_v1 = vld [vmem:[#allocation8 + $0xfb8] sm:$0xff]  ;;  %v1820_v43 = vld [vmem:[#allocation8 + $0x10e8] sm:$0xff] }
 0x1ce   :  { %v12190_v60 = vpop.eup %12189  ;;  %1098 = vst [vmem:[#allocation2 + $0x40] sm:$0xff] %v12951_v46  ;;  %v1070_v62 = vmul.f32 0.5, %v1054_v47  ;;  %2026 = vmatmul.mubr.f32.vlgmr.msra.gmra.mrb[16].mxu0 %v12891_v28  ;;  %2293 = vmatmul.mubr.f32.vlgmr.msra.gmra.mrb[8].mxu1 %v12891_v28  ;;  %v9813_v55 = vpack.c.bf16 %v1782_v1, %v1778_v35  ;;  %v1818_v45 = vld [vmem:[#allocation8 + $0x10d8] sm:$0xff] }
 0x1cf   :  { %v12192_v20 = vpop.eup %12191  ;;  %v1085_v63 = vmul.f32 %v1069_v56, %v12910_v25  ;;  %v1057_v2 = vadd.f32 1.0, %v12190_v60  ;;  %9632 = vmatpush1.bf16.msra.mxu0 %v9631_v41  ;;  %9800 = vmatpush1.bf16.msra.mxu1 %v9799_v42  ;;  %v9643_v41 = vpack.c.bf16 %v1771_v27, %v1767_v21  ;;  %v9811_v42 = vpack.c.bf16 %v1773_v33, %v1769_v0  ;;  %v1786_v56 = vld [vmem:[#allocation8 + $0xfd8] sm:$0xff]  ;;  %v1783_v60 = vld [vmem:[#allocation8 + $0xfc0] sm:$0xff]  ;;  %v1812_v27 = vld [vmem:[#allocation8 + $0x10a8] sm:$0xff] }
 0x1d0   :  { %v12958_v18 = vmul.f32 %v1070_v62, %v12913_v31  ;;  %v1058_v9 = vadd.f32 1.0, %v12192_v20  ;;  %9634 = vmatprep.subr.bf16.mxu0 %v9633_v48  ;;  %9802 = vmatprep.subr.bf16.mxu1 %v9801_v50  ;;  %v1777_v48 = vld [vmem:[#allocation8 + $0xf90] sm:$0xff]  ;;  %v1787_v62 = vld [vmem:[#allocation8 + $0xfe0] sm:$0xff]  ;;  %v1810_v0 = vld [vmem:[#allocation8 + $0x1098] sm:$0xff] }
 0x1d1   :  { %1101 = vst [vmem:[#allocation2 + $0x68] sm:$0xff] %v1085_v63  ;;  %v1073_v25 = vmul.f32 0.5, %v1057_v2  ;;  %2031 = vmatprep.mubr.f32.mxu0 %v1085_v63  ;;  %2298 = vmatprep.mubr.f32.mxu1 %v1085_v63  ;;  %v1781_v50 = vld [vmem:[#allocation8 + $0xfb0] sm:$0xff]  ;;  %v9817_v63 = vpack.c.bf16 %v1790_v58, %v1786_v56  ;;  %v1814_v33 = vld [vmem:[#allocation8 + $0x10b8] sm:$0xff] }
 0x1d2   :  { %v12194_v15 = vpop.eup %12193  ;;  %1102 = vst [vmem:[#allocation2 + $0x70] sm:$0xff] %v12958_v18  ;;  %v1074_v31 = vmul.f32 0.5, %v1058_v9  ;;  %2032 = vmatmul.mubr.f32.gmra.mrb[18].mxu0 %v12891_v28  ;;  %2299 = vmatmul.mubr.f32.gmra.mrb[10].mxu1 %v12891_v28  ;;  %v9815_v59 = vpack.c.bf16 %v1781_v50, %v1777_v48  ;;  %v1785_v2 = vld [vmem:[#allocation8 + $0xfd0] sm:$0xff]  ;;  %v1798_v9 = vld [vmem:[#allocation8 + $0x1038] sm:$0xff]  ;;  %v9829_v1 = vpack.c.bf16 %v1814_v33, %v1810_v0 }
 0x1d3   :  { %v12196_v17 = vpop.eup %12195  ;;  %v1089_v51 = vmul.f32 %v1073_v25, %v12921_v39  ;;  %v1061_v3 = vadd.f32 1.0, %v12194_v15  ;;  %9636 = vmatpush1.bf16.msra.mxu0 %v9635_v4  ;;  %9804 = vmatpush1.bf16.msra.mxu1 %v9803_v5  ;;  %v1776_v39 = vld [vmem:[#allocation8 + $0xf88] sm:$0xff]  ;;  %v1789_v4 = vld [vmem:[#allocation8 + $0xff0] sm:$0xff]  ;;  %v9821_v49 = vpack.c.bf16 %v1798_v9, %v1794_v8  ;;  %v1802_v15 = vld [vmem:[#allocation8 + $0x1058] sm:$0xff] }
 0x1d4   :  { %v12965_v22 = vmul.f32 %v1074_v31, %v12925_v44  ;;  %v1062_v23 = vadd.f32 1.0, %v12196_v17  ;;  %9638 = vmatprep.subr.bf16.mxu0 %v9637_v32  ;;  %9806 = vmatprep.subr.bf16.mxu1 %v9805_v10  ;;  %v1780_v44 = vld [vmem:[#allocation8 + $0xfa8] sm:$0xff]  ;;  %v9819_v32 = vpack.c.bf16 %v1789_v4, %v1785_v2  ;;  %v1791_v10 = vld [vmem:[#allocation8 + $0x1000] sm:$0xff]  ;;  %v1793_v25 = vld [vmem:[#allocation8 + $0x1010] sm:$0xff] }
 0x1d5   :  { %1105 = vst [vmem:[#allocation2 + $0xf8] sm:$0xff] %v1089_v51  ;;  %v1077_v34 = vmul.f32 0.5, %v1061_v3  ;;  %2037 = vmatprep.mubr.f32.mxu0 %v1089_v51  ;;  %2304 = vmatprep.mubr.f32.mxu1 %v1089_v51  ;;  %v9645_v54 = vpack.c.bf16 %v1780_v44, %v1776_v39  ;;  %v1792_v5 = vld [vmem:[#allocation8 + $0x1008] sm:$0xff]  ;;  %v1806_v31 = vld [vmem:[#allocation8 + $0x1078] sm:$0xff]  ;;  %v9655_v17 = vpack.c.bf16 %v1795_v11, %v1791_v10  ;;  %v1799_v3 = vld [vmem:[#allocation8 + $0x1040] sm:$0xff] }
 0x1d6   :  { %1106 = vst [vmem:[#allocation2 + $0x100] sm:$0xff] %v12965_v22  ;;  %v1078_v36 = vmul.f32 0.5, %v1062_v23  ;;  %2038 = vmatmul.mubr.f32.gmra.mrb[20].mxu0 %v12891_v28  ;;  %2305 = vmatmul.mubr.f32.gmra.mrb[12].mxu1 %v12891_v28  ;;  %v9653_v12 = vpack.c.bf16 %v1796_v6, %v1792_v5  ;;  %v9823_v51 = vpack.c.bf16 %v1797_v37, %v1793_v25  ;;  %v1801_v23 = vld [vmem:[#allocation8 + $0x1050] sm:$0xff]  ;;  %v1811_v44 = vld [vmem:[#allocation8 + $0x10a0] sm:$0xff]  ;;  %v1822_v48 = vld [vmem:[#allocation8 + $0x10f8] sm:$0xff] }
 0x1d7   :  { %v1093_v38 = vmul.f32 %v1077_v34, %v12933_v57  ;;  %9640 = vmatpush1.bf16.msra.mxu0 %v9639_v7  ;;  %9808 = vmatpush1.bf16.msra.mxu1 %v9807_v19  ;;  %v1788_v57 = vld [vmem:[#allocation8 + $0xfe8] sm:$0xff]  ;;  %v1803_v7 = vld [vmem:[#allocation8 + $0x1060] sm:$0xff]  ;;  %v9657_v19 = vpack.c.bf16 %v1804_v14, %v1800_v53  ;;  %v9825_v21 = vpack.c.bf16 %v1806_v31, %v1802_v15  ;;  %v1817_v58 = vld [vmem:[#allocation8 + $0x10d0] sm:$0xff] }
 0x1d8   :  { %v12972_v47 = vmul.f32 %v1078_v36, %v12937_v61  ;;  %9642 = vmatprep.subr.bf16.mxu0 %v9641_v24  ;;  %9810 = vmatprep.subr.bf16.mxu1 %v9809_v26  ;;  %v1122_v61 = vld [vmem:[#allocation2 + $0x48] sm:$0xff]  ;;  %v9649_v20 = vpack.c.bf16 %v1788_v57, %v1784_v52  ;;  %v1805_v24 = vld [vmem:[#allocation8 + $0x1070] sm:$0xff]  ;;  %v9659_v34 = vpack.c.bf16 %v1803_v7, %v1799_v3  ;;  %v1834_v10 = vld [vmem:[#allocation8 + $0x1158] sm:$0xff] }
 0x1d9   :  { %1109 = vst [vmem:[#allocation2 + $0x128] sm:$0xff] %v1093_v38  ;;  %2043 = vmatprep.mubr.f32.mxu0 %v1093_v38  ;;  %2310 = vmatprep.mubr.f32.mxu1 %v1093_v38  ;;  %v1808_v26 = vld [vmem:[#allocation8 + $0x1088] sm:$0xff]  ;;  %v9827_v39 = vpack.c.bf16 %v1805_v24, %v1801_v23  ;;  %v1807_v36 = vld [vmem:[#allocation8 + $0x1080] sm:$0xff]  ;;  %v1809_v38 = vld [vmem:[#allocation8 + $0x1090] sm:$0xff]  ;;  %v9833_v56 = vpack.c.bf16 %v1822_v48, %v1818_v45 }
 0x1da   :  { %1110 = vst [vmem:[#allocation2 + $0x130] sm:$0xff] %v12972_v47  ;;  %2044 = vmatmul.mubr.f32.gmra.mrb[22].mxu0 %v12891_v28  ;;  %2311 = vmatmul.mubr.f32.gmra.mrb[14].mxu1 %v12891_v28  ;;  %v9651_v28 = vpack.c.bf16 %v1787_v62, %v1783_v60  ;;  %v9661_v35 = vpack.c.bf16 %v1812_v27, %v1808_v26  ;;  %v1826_v60 = vld [vmem:[#allocation8 + $0x1118] sm:$0xff]  ;;  %v1823_v2 = vld [vmem:[#allocation8 + $0x1100] sm:$0xff]  ;;  %v1825_v8 = vld [vmem:[#allocation8 + $0x1110] sm:$0xff] }
 0x1db   :  { %9644 = vmatpush1.bf16.msra.mxu0 %v9643_v41  ;;  %9812 = vmatpush1.bf16.msra.mxu1 %v9811_v42  ;;  %v1813_v41 = vld [vmem:[#allocation8 + $0x10b0] sm:$0xff]  ;;  %v1816_v42 = vld [vmem:[#allocation8 + $0x10c8] sm:$0xff]  ;;  %v9663_v50 = vpack.c.bf16 %v1811_v44, %v1807_v36  ;;  %v1830_v62 = vld [vmem:[#allocation8 + $0x1138] sm:$0xff] }
 0x1dc   :  { %2114 = vmatprep.mubr.f32.mxu0 %v1122_v61  ;;  %2381 = vmatprep.mubr.f32.mxu1 %v1122_v61  ;;  %v9831_v52 = vpack.c.bf16 %v1813_v41, %v1809_v38  ;;  %v9665_v57 = vpack.c.bf16 %v1820_v43, %v1816_v42  ;;  %v1821_v61 = vld [vmem:[#allocation8 + $0x10f0] sm:$0xff]  ;;  %v1827_v4 = vld [vmem:[#allocation8 + $0x1120] sm:$0xff]  ;;  %v9837_v6 = vpack.c.bf16 %v1830_v62, %v1826_v60  ;;  %v1838_v11 = vld [vmem:[#allocation8 + $0x1178] sm:$0xff] }
 0x1dd   :  { %9646 = vmatprep.subr.bf16.mxu0 %v9645_v54  ;;  %9814 = vmatprep.subr.bf16.mxu1 %v9813_v55  ;;  %v1815_v54 = vld [vmem:[#allocation8 + $0x10c0] sm:$0xff]  ;;  %v1829_v9 = vld [vmem:[#allocation8 + $0x1130] sm:$0xff]  ;;  %v9841_v14 = vpack.c.bf16 %v1838_v11, %v1834_v10  ;;  %v1842_v3 = vld [vmem:[#allocation8 + $0x1198] sm:$0xff] }
 0x1de   :  { %v1819_v55 = vld [vmem:[#allocation8 + $0x10e0] sm:$0xff]  ;;  %v1833_v15 = vld [vmem:[#allocation8 + $0x1150] sm:$0xff]  ;;  %v1846_v7 = vld [vmem:[#allocation8 + $0x11b8] sm:$0xff] }
 0x1df   :  { %9648 = vmatpush1.bf16.msra.mxu0 %v9647_v16  ;;  %9816 = vmatpush1.bf16.msra.mxu1 %v9815_v59  ;;  %v1824_v16 = vld [vmem:[#allocation8 + $0x1108] sm:$0xff]  ;;  %v1831_v25 = vld [vmem:[#allocation8 + $0x1140] sm:$0xff]  ;;  %v1837_v31 = vld [vmem:[#allocation8 + $0x1170] sm:$0xff]  ;;  %v9845_v27 = vpack.c.bf16 %v1846_v7, %v1842_v3 }
 0x1e0   :  { %9650 = vmatprep.subr.bf16.mxu0 %v9649_v20  ;;  %9818 = vmatprep.subr.bf16.mxu1 %v9817_v63  ;;  %v1828_v59 = vld [vmem:[#allocation8 + $0x1128] sm:$0xff]  ;;  %v9667_v20 = vpack.c.bf16 %v1819_v55, %v1815_v54  ;;  %v9835_v63 = vpack.c.bf16 %v1821_v61, %v1817_v58  ;;  %v1835_v37 = vld [vmem:[#allocation8 + $0x1160] sm:$0xff]  ;;  %v1841_v0 = vld [vmem:[#allocation8 + $0x1190] sm:$0xff] }
 0x1e1   :  { %v9669_v5 = vpack.c.bf16 %v1828_v59, %v1824_v16  ;;  %v1839_v23 = vld [vmem:[#allocation8 + $0x1180] sm:$0xff]  ;;  %v1845_v33 = vld [vmem:[#allocation8 + $0x11b0] sm:$0xff]  ;;  %v1850_v36 = vld [vmem:[#allocation8 + $0x11d8] sm:$0xff] }
 0x1e2   :  { %v1843_v24 = vld [vmem:[#allocation8 + $0x11a0] sm:$0xff]  ;;  %v1854_v44 = vld [vmem:[#allocation8 + $0x11f8] sm:$0xff]  ;;  %v1849_v45 = vld [vmem:[#allocation8 + $0x11d0] sm:$0xff] }
 0x1e3   :  { %9652 = vmatpush1.bf16.msra.mxu0 %v9651_v28  ;;  %9820 = vmatpush1.bf16.msra.mxu1 %v9819_v32  ;;  %v1832_v28 = vld [vmem:[#allocation8 + $0x1148] sm:$0xff]  ;;  %v1847_v38 = vld [vmem:[#allocation8 + $0x11c0] sm:$0xff]  ;;  %v9849_v43 = vpack.c.bf16 %v1854_v44, %v1850_v36  ;;  %v1853_v48 = vld [vmem:[#allocation8 + $0x11f0] sm:$0xff] }
 0x1e4   :  { %9654 = vmatprep.subr.bf16.mxu0 %v9653_v12  ;;  %9822 = vmatprep.subr.bf16.mxu1 %v9821_v49  ;;  %v1836_v32 = vld [vmem:[#allocation8 + $0x1168] sm:$0xff]  ;;  %v9671_v12 = vpack.c.bf16 %v1827_v4, %v1823_v2  ;;  %v9839_v49 = vpack.c.bf16 %v1829_v9, %v1825_v8  ;;  %v1851_v41 = vld [vmem:[#allocation8 + $0x11e0] sm:$0xff]  ;;  %v1858_v54 = vld [vmem:[#allocation8 + $0x1218] sm:$0xff] }
 0x1e5   :  { %v9673_v53 = vpack.c.bf16 %v1836_v32, %v1832_v28  ;;  %v1862_v55 = vld [vmem:[#allocation8 + $0x1238] sm:$0xff]  ;;  %v1855_v58 = vld [vmem:[#allocation8 + $0x1200] sm:$0xff]  ;;  %v1857_v60 = vld [vmem:[#allocation8 + $0x1210] sm:$0xff] }
 0x1e6   :  { %v1859_v61 = vld [vmem:[#allocation8 + $0x1220] sm:$0xff]  ;;  %v9853_v59 = vpack.c.bf16 %v1862_v55, %v1858_v54  ;;  %v1861_v62 = vld [vmem:[#allocation8 + $0x1230] sm:$0xff]  ;;  %v1866_v2 = vld [vmem:[#allocation8 + $0x1258] sm:$0xff] }
 0x1e7   :  { %9656 = vmatpush1.bf16.msra.mxu0 %v9655_v17  ;;  %9824 = vmatpush1.bf16.msra.mxu1 %v9823_v51  ;;  %v1840_v17 = vld [vmem:[#allocation8 + $0x1188] sm:$0xff]  ;;  %v1870_v4 = vld [vmem:[#allocation8 + $0x1278] sm:$0xff]  ;;  %v1863_v8 = vld [vmem:[#allocation8 + $0x1240] sm:$0xff] }
 0x1e8   :  { %9658 = vmatprep.subr.bf16.mxu0 %v9657_v19  ;;  %9826 = vmatprep.subr.bf16.mxu1 %v9825_v21  ;;  %v1844_v51 = vld [vmem:[#allocation8 + $0x11a8] sm:$0xff]  ;;  %v9675_v19 = vpack.c.bf16 %v1835_v37, %v1831_v25  ;;  %v9843_v21 = vpack.c.bf16 %v1837_v31, %v1833_v15  ;;  %v1867_v9 = vld [vmem:[#allocation8 + $0x1260] sm:$0xff]  ;;  %v9857_v32 = vpack.c.bf16 %v1870_v4, %v1866_v2  ;;  %v1865_v10 = vld [vmem:[#allocation8 + $0x1250] sm:$0xff] }
 0x1e9   :  { %v9677_v26 = vpack.c.bf16 %v1844_v51, %v1840_v17  ;;  %v1869_v11 = vld [vmem:[#allocation8 + $0x1270] sm:$0xff]  ;;  %v1874_v25 = vld [vmem:[#allocation8 + $0x1298] sm:$0xff]  ;;  %v1871_v17 = vld [vmem:[#allocation8 + $0x1280] sm:$0xff] }
 0x1ea   :  { %v1878_v37 = vld [vmem:[#allocation8 + $0x12b8] sm:$0xff]  ;;  %v1875_v51 = vld [vmem:[#allocation8 + $0x12a0] sm:$0xff]  ;;  %v1873_v3 = vld [vmem:[#allocation8 + $0x1290] sm:$0xff] }
 0x1eb   :  { %9660 = vmatpush1.bf16.msra.mxu0 %v9659_v34  ;;  %9828 = vmatpush1.bf16.msra.mxu1 %v9827_v39  ;;  %v1848_v34 = vld [vmem:[#allocation8 + $0x11c8] sm:$0xff]  ;;  %v9861_v31 = vpack.c.bf16 %v1878_v37, %v1874_v25  ;;  %v1877_v7 = vld [vmem:[#allocation8 + $0x12b0] sm:$0xff] }
 0x1ec   :  { %9662 = vmatprep.subr.bf16.mxu0 %v9661_v35  ;;  %9830 = vmatprep.subr.bf16.mxu1 %v9829_v1  ;;  %v1852_v39 = vld [vmem:[#allocation8 + $0x11e8] sm:$0xff]  ;;  %v9679_v35 = vpack.c.bf16 %v1843_v24, %v1839_v23  ;;  %v9847_v1 = vpack.c.bf16 %v1845_v33, %v1841_v0  ;;  %v1882_v23 = vld [vmem:[#allocation8 + $0x12d8] sm:$0xff]  ;;  %v1879_v0 = vld [vmem:[#allocation8 + $0x12c0] sm:$0xff] }
 0x1ed   :  { %v9681_v42 = vpack.c.bf16 %v1852_v39, %v1848_v34  ;;  %v1886_v24 = vld [vmem:[#allocation8 + $0x12f8] sm:$0xff]  ;;  %v1883_v33 = vld [vmem:[#allocation8 + $0x12e0] sm:$0xff]  ;;  %v1881_v34 = vld [vmem:[#allocation8 + $0x12d0] sm:$0xff] }
 0x1ee   :  { %v9865_v36 = vpack.c.bf16 %v1886_v24, %v1882_v23  ;;  %v1885_v44 = vld [vmem:[#allocation8 + $0x12f0] sm:$0xff] }
 0x1ef   :  { %9664 = vmatpush1.bf16.msra.mxu0 %v9663_v50  ;;  %9832 = vmatpush1.bf16.msra.mxu1 %v9831_v52  ;;  %v1856_v50 = vld [vmem:[#allocation8 + $0x1208] sm:$0xff]  ;;  %v1905_v25 = vld [vmem:[#allocation8 + $0x1390] sm:$0xff] }
 0x1f0   :  { %9666 = vmatprep.subr.bf16.mxu0 %v9665_v57  ;;  %9834 = vmatprep.subr.bf16.mxu1 %v9833_v56  ;;  %v1860_v52 = vld [vmem:[#allocation8 + $0x1228] sm:$0xff]  ;;  %v9683_v57 = vpack.c.bf16 %v1851_v41, %v1847_v38  ;;  %v9851_v56 = vpack.c.bf16 %v1853_v48, %v1849_v45  ;;  %v1605_v38 = vld [vmem:[#allocation2 + $0x78] sm:$0xff]  ;;  %v9867_v45 = vpack.c.bf16 %v1885_v44, %v1881_v34  ;;  %v1887_v48 = vld [vmem:[#allocation8 + $0x1300] sm:$0xff] }
 0x1f1   :  { %v9685_v16 = vpack.c.bf16 %v1860_v52, %v1856_v50  ;;  %v1890_v41 = vld [vmem:[#allocation8 + $0x1318] sm:$0xff]  ;;  %v1891_v50 = vld [vmem:[#allocation8 + $0x1320] sm:$0xff]  ;;  %v1889_v52 = vld [vmem:[#allocation8 + $0x1310] sm:$0xff] }
 0x1f2   :  { %v1124_v37 = vld [vmem:[#allocation2 + $0x58] sm:$0xff]  ;;  %v1919_v44 = vld [vmem:[#allocation8 + $0x1400] sm:$0xff] }
 0x1f3   :  { %9668 = vmatpush1.bf16.msra.mxu0 %v9667_v20  ;;  %9836 = vmatpush1.bf16.msra.mxu1 %v9835_v63  ;;  %v1864_v20 = vld [vmem:[#allocation8 + $0x1248] sm:$0xff]  ;;  %v1913_v23 = vld [vmem:[#allocation8 + $0x13d0] sm:$0xff] }
 0x1f4   :  { %9670 = vmatprep.subr.bf16.mxu0 %v9669_v5  ;;  %9838 = vmatprep.subr.bf16.mxu1 %v9837_v6  ;;  %v1868_v63 = vld [vmem:[#allocation8 + $0x1268] sm:$0xff]  ;;  %v9687_v5 = vpack.c.bf16 %v1859_v61, %v1855_v58  ;;  %v9855_v6 = vpack.c.bf16 %v1861_v62, %v1857_v60  ;;  %v1898_v61 = vld [vmem:[#allocation8 + $0x1358] sm:$0xff]  ;;  %v1895_v62 = vld [vmem:[#allocation8 + $0x1340] sm:$0xff] }
 0x1f5   :  { %v9689_v28 = vpack.c.bf16 %v1868_v63, %v1864_v20  ;;  %v1900_v58 = vld [vmem:[#allocation8 + $0x1368] sm:$0xff]  ;;  %v1899_v20 = vld [vmem:[#allocation8 + $0x1360] sm:$0xff]  ;;  %v1897_v63 = vld [vmem:[#allocation8 + $0x1350] sm:$0xff] }
 0x1f7   :  { %9672 = vmatpush1.bf16.msra.mxu0 %v9671_v12  ;;  %9840 = vmatpush1.bf16.msra.mxu1 %v9839_v49  ;;  %v1872_v12 = vld [vmem:[#allocation8 + $0x1288] sm:$0xff] }
 0x1f8   :  { %9674 = vmatprep.subr.bf16.mxu0 %v9673_v53  ;;  %9842 = vmatprep.subr.bf16.mxu1 %v9841_v14  ;;  %v1876_v49 = vld [vmem:[#allocation8 + $0x12a8] sm:$0xff]  ;;  %v9691_v53 = vpack.c.bf16 %v1867_v9, %v1863_v8  ;;  %v9859_v14 = vpack.c.bf16 %v1869_v11, %v1865_v10  ;;  %v1906_v9 = vld [vmem:[#allocation8 + $0x1398] sm:$0xff]  ;;  %v1903_v10 = vld [vmem:[#allocation8 + $0x1380] sm:$0xff] }
 0x1f9   :  { %v9693_v15 = vpack.c.bf16 %v1876_v49, %v1872_v12  ;;  %v1908_v8 = vld [vmem:[#allocation8 + $0x13a8] sm:$0xff]  ;;  %v1907_v49 = vld [vmem:[#allocation8 + $0x13a0] sm:$0xff] }
 0x1fb   :  { %9676 = vmatpush1.bf16.msra.mxu0 %v9675_v19  ;;  %9844 = vmatpush1.bf16.msra.mxu1 %v9843_v21  ;;  %v1880_v19 = vld [vmem:[#allocation8 + $0x12c8] sm:$0xff] }
 0x1fc   :  { %9678 = vmatprep.subr.bf16.mxu0 %v9677_v26  ;;  %9846 = vmatprep.subr.bf16.mxu1 %v9845_v27  ;;  %v1884_v21 = vld [vmem:[#allocation8 + $0x12e8] sm:$0xff]  ;;  %v9695_v26 = vpack.c.bf16 %v1875_v51, %v1871_v17  ;;  %v9863_v27 = vpack.c.bf16 %v1877_v7, %v1873_v3  ;;  %v1918_v17 = vld [vmem:[#allocation8 + $0x13f8] sm:$0xff]  ;;  %v9711_v51 = vpack.c.bf16 %v1907_v49, %v1903_v10  ;;  %v1943_v49 = vld [vmem:[#allocation8 + $0x14c0] sm:$0xff] }
 0x1fd   :  { %v9697_v39 = vpack.c.bf16 %v1884_v21, %v1880_v19  ;;  %v1911_v19 = vld [vmem:[#allocation8 + $0x13c0] sm:$0xff] }
 0x1fe   :  { %v1915_v21 = vld [vmem:[#allocation8 + $0x13e0] sm:$0xff] }
 0x1ff   :  { %9680 = vmatpush1.bf16.msra.mxu0 %v9679_v35  ;;  %9848 = vmatpush1.bf16.msra.mxu1 %v9847_v1  ;;  %v1888_v35 = vld [vmem:[#allocation8 + $0x1308] sm:$0xff]  ;;  %v9715_v34 = vpack.c.bf16 %v1915_v21, %v1911_v19  ;;  %v1266_v19 = vld [vmem:[#allocation8] sm:$0xff] }
 0x200   :  { %9682 = vmatprep.subr.bf16.mxu0 %v9681_v42  ;;  %9850 = vmatprep.subr.bf16.mxu1 %v9849_v43  ;;  %v1892_v1 = vld [vmem:[#allocation8 + $0x1328] sm:$0xff]  ;;  %v1894_v42 = vld [vmem:[#allocation8 + $0x1338] sm:$0xff]  ;;  %v9699_v43 = vpack.c.bf16 %v1883_v33, %v1879_v0  ;;  %v1270_v21 = vld [vmem:[#allocation8 + $0x20] sm:$0xff] }
 0x201   :  { %v9701_v54 = vpack.c.bf16 %v1892_v1, %v1888_v35  ;;  %v9869_v55 = vpack.c.bf16 %v1894_v42, %v1890_v41  ;;  %v1924_v0 = vld [vmem:[#allocation8 + $0x1428] sm:$0xff]  ;;  %v1926_v33 = vld [vmem:[#allocation8 + $0x1438] sm:$0xff]  ;;  %v1923_v35 = vld [vmem:[#allocation8 + $0x1420] sm:$0xff] }
 0x202   :  { %v1921_v1 = vld [vmem:[#allocation8 + $0x1410] sm:$0xff]  ;;  %v1928_v42 = vld [vmem:[#allocation8 + $0x1448] sm:$0xff] }
 0x203   :  { %9684 = vmatpush1.bf16.msra.mxu0 %v9683_v57  ;;  %9852 = vmatpush1.bf16.msra.mxu1 %v9851_v56  ;;  %v1893_v57 = vld [vmem:[#allocation8 + $0x1330] sm:$0xff]  ;;  %v1896_v56 = vld [vmem:[#allocation8 + $0x1348] sm:$0xff] }
 0x204   :  { %9686 = vmatprep.subr.bf16.mxu0 %v9685_v16  ;;  %9854 = vmatprep.subr.bf16.mxu1 %v9853_v59  ;;  %v1902_v16 = vld [vmem:[#allocation8 + $0x1378] sm:$0xff]  ;;  %v9703_v59 = vpack.c.bf16 %v1891_v50, %v1887_v48  ;;  %v9871_v60 = vpack.c.bf16 %v1893_v57, %v1889_v52  ;;  %v9705_v2 = vpack.c.bf16 %v1900_v58, %v1896_v56  ;;  %v1925_v41 = vld [vmem:[#allocation8 + $0x1430] sm:$0xff]  ;;  %v1931_v57 = vld [vmem:[#allocation8 + $0x1460] sm:$0xff] }
 0x205   :  { %v9873_v4 = vpack.c.bf16 %v1902_v16, %v1898_v61  ;;  %v1934_v48 = vld [vmem:[#allocation8 + $0x1478] sm:$0xff]  ;;  %v9719_v50 = vpack.c.bf16 %v1923_v35, %v1919_v44  ;;  %v9887_v52 = vpack.c.bf16 %v1925_v41, %v1921_v1  ;;  %v1929_v56 = vld [vmem:[#allocation8 + $0x1450] sm:$0xff]  ;;  %v1936_v61 = vld [vmem:[#allocation8 + $0x1488] sm:$0xff] }
 0x206   :  { %v1940_v16 = vld [vmem:[#allocation8 + $0x14a8] sm:$0xff]  ;;  %v1274_v44 = vld [vmem:[#allocation8 + $0x40] sm:$0xff]  ;;  %v1276_v41 = vld [vmem:[#allocation8 + $0x50] sm:$0xff] }
 0x207   :  { %9688 = vmatpush1.bf16.msra.mxu0 %v9687_v5  ;;  %9856 = vmatpush1.bf16.msra.mxu1 %v9855_v6  ;;  %v1901_v5 = vld [vmem:[#allocation8 + $0x1370] sm:$0xff]  ;;  %v1904_v6 = vld [vmem:[#allocation8 + $0x1388] sm:$0xff]  ;;  %v1278_v35 = vld [vmem:[#allocation8 + $0x60] sm:$0xff] }
 0x208   :  { %9690 = vmatprep.subr.bf16.mxu0 %v9689_v28  ;;  %9858 = vmatprep.subr.bf16.mxu1 %v9857_v32  ;;  %v1910_v28 = vld [vmem:[#allocation8 + $0x13b8] sm:$0xff]  ;;  %v9707_v32 = vpack.c.bf16 %v1899_v20, %v1895_v62  ;;  %v9875_v11 = vpack.c.bf16 %v1901_v5, %v1897_v63  ;;  %v9709_v12 = vpack.c.bf16 %v1908_v8, %v1904_v6  ;;  %v1937_v5 = vld [vmem:[#allocation8 + $0x1490] sm:$0xff]  ;;  %v1607_v1 = vld [vmem:[#allocation2 + $0x88] sm:$0xff] }
 0x209   :  { %v9725_v63 = vpack.c.bf16 %v1940_v16, %v1936_v61  ;;  %v1941_v8 = vld [vmem:[#allocation8 + $0x14b0] sm:$0xff] }
 0x20a   :  { %v1284_v16 = vld [vmem:[#allocation8 + $0x90] sm:$0xff] }
 0x20b   :  { %9692 = vmatpush1.bf16.msra.mxu0 %v9691_v53  ;;  %9860 = vmatpush1.bf16.msra.mxu1 %v9859_v14  ;;  %v9877_v53 = vpack.c.bf16 %v1910_v28, %v1906_v9  ;;  %v1909_v14 = vld [vmem:[#allocation8 + $0x13b0] sm:$0xff]  ;;  %v1948_v9 = vld [vmem:[#allocation8 + $0x14e8] sm:$0xff]  ;;  %v1946_v28 = vld [vmem:[#allocation8 + $0x14d8] sm:$0xff] }
 0x20c   :  { %9694 = vmatprep.subr.bf16.mxu0 %v9693_v15  ;;  %9862 = vmatprep.subr.bf16.mxu1 %v9861_v31  ;;  %v1912_v15 = vld [vmem:[#allocation8 + $0x13c8] sm:$0xff]  ;;  %v1914_v31 = vld [vmem:[#allocation8 + $0x13d8] sm:$0xff]  ;;  %v9879_v3 = vpack.c.bf16 %v1909_v14, %v1905_v25  ;;  %v1947_v25 = vld [vmem:[#allocation8 + $0x14e0] sm:$0xff] }
 0x20d   :  { %v9881_v24 = vpack.c.bf16 %v1918_v17, %v1914_v31  ;;  %v1949_v14 = vld [vmem:[#allocation8 + $0x14f0] sm:$0xff]  ;;  %v1269_v31 = vld [vmem:[#allocation8 + $0x18] sm:$0xff] }
 0x20e   :  { %2115 = vmatmul.mubr.f32.vlgmr.msra.gmra.mrb[16].mxu0 %v12951_v46  ;;  %2382 = vmatmul.mubr.f32.vlgmr.msra.gmra.mrb[8].mxu1 %v12951_v46  ;;  %v1140_v46 = vld [vmem:[#allocation2 + $0x108] sm:$0xff]  ;;  %v1273_v17 = vld [vmem:[#allocation8 + $0x38] sm:$0xff] }
 0x20f   :  { %2120 = vmatprep.mubr.f32.mxu0 %v1605_v38  ;;  %9696 = vmatpush1.bf16.msra.mxu0 %v9695_v26  ;;  %v1917_v26 = vld [vmem:[#allocation8 + $0x13f0] sm:$0xff] }
 0x210   :  { %2387 = vmatprep.mubr.f32.mxu1 %v1605_v38  ;;  %9864 = vmatpush1.bf16.msra.mxu1 %v9863_v27  ;;  %v1920_v27 = vld [vmem:[#allocation8 + $0x1408] sm:$0xff] }
 0x211   :  { %9698 = vmatprep.subr.bf16.mxu0 %v9697_v39  ;;  %9866 = vmatprep.subr.bf16.mxu1 %v9865_v36  ;;  %v9883_v39 = vpack.c.bf16 %v1917_v26, %v1913_v23  ;;  %v9717_v36 = vpack.c.bf16 %v1924_v0, %v1920_v27  ;;  %v10069_v23 = vpack.c.bf16 %v1273_v17, %v1269_v31  ;;  %v1272_v26 = vld [vmem:[#allocation8 + $0x30] sm:$0xff]  ;;  %v1275_v27 = vld [vmem:[#allocation8 + $0x48] sm:$0xff]  ;;  %v1301_v31 = vld [vmem:[#allocation8 + $0x118] sm:$0xff] }
 0x212   :  { %2121 = vmatmul.mubr.f32.gmra.mrb[18].mxu0 %v12958_v18  ;;  %2388 = vmatmul.mubr.f32.gmra.mrb[10].mxu1 %v12958_v18  ;;  %v1611_v18 = vld [vmem:[#allocation2 + $0x138] sm:$0xff]  ;;  %v1279_v0 = vld [vmem:[#allocation8 + $0x68] sm:$0xff] }
 0x213   :  { %2126 = vmatprep.mubr.f32.mxu0 %v1140_v46  ;;  %9700 = vmatpush1.bf16.msra.mxu0 %v9699_v43  ;;  %v1932_v43 = vld [vmem:[#allocation8 + $0x1468] sm:$0xff]  ;;  %v1305_v17 = vld [vmem:[#allocation8 + $0x138] sm:$0xff] }
 0x214   :  { %2393 = vmatprep.mubr.f32.mxu1 %v1140_v46  ;;  %9868 = vmatpush1.bf16.msra.mxu1 %v9867_v45  ;;  %v1930_v45 = vld [vmem:[#allocation8 + $0x1458] sm:$0xff]  ;;  %v1933_v46 = vld [vmem:[#allocation8 + $0x1470] sm:$0xff] }
 0x215   :  { %9702 = vmatprep.subr.bf16.mxu0 %v9701_v54  ;;  %9870 = vmatprep.subr.bf16.mxu1 %v9869_v55  ;;  %v9721_v54 = vpack.c.bf16 %v1932_v43, %v1928_v42  ;;  %v1927_v55 = vld [vmem:[#allocation8 + $0x1440] sm:$0xff]  ;;  %v9889_v58 = vpack.c.bf16 %v1934_v48, %v1930_v45  ;;  %v9891_v20 = vpack.c.bf16 %v1933_v46, %v1929_v56  ;;  %v1280_v42 = vld [vmem:[#allocation8 + $0x70] sm:$0xff]  ;;  %v1283_v45 = vld [vmem:[#allocation8 + $0x88] sm:$0xff] }
 0x216   :  { %2127 = vmatmul.mubr.f32.gmra.mrb[20].mxu0 %v12965_v22  ;;  %2394 = vmatmul.mubr.f32.gmra.mrb[12].mxu1 %v12965_v22  ;;  %v1916_v22 = vld [vmem:[#allocation8 + $0x13e8] sm:$0xff]  ;;  %v9723_v62 = vpack.c.bf16 %v1931_v57, %v1927_v55  ;;  %v1606_v55 = vld [vmem:[#allocation2 + $0x80] sm:$0xff]  ;;  %v10075_v57 = vpack.c.bf16 %v1280_v42, %v1276_v41  ;;  %v1142_v46 = vld [vmem:[#allocation2 + $0x118] sm:$0xff] }
 0x217   :  { %2132 = vmatprep.mubr.f32.mxu0 %v1611_v18  ;;  %9704 = vmatpush1.bf16.msra.mxu0 %v9703_v59  ;;  %v9713_v7 = vpack.c.bf16 %v1916_v22, %v1912_v15  ;;  %v1938_v59 = vld [vmem:[#allocation8 + $0x1498] sm:$0xff]  ;;  %v1267_v15 = vld [vmem:[#allocation8 + $0x8] sm:$0xff]  ;;  %v1282_v56 = vld [vmem:[#allocation8 + $0x80] sm:$0xff] }
 0x218   :  { %2399 = vmatprep.mubr.f32.mxu1 %v1611_v18  ;;  %9872 = vmatpush1.bf16.msra.mxu1 %v9871_v60  ;;  %v1942_v60 = vld [vmem:[#allocation8 + $0x14b8] sm:$0xff]  ;;  %v1944_v18 = vld [vmem:[#allocation8 + $0x14c8] sm:$0xff]  ;;  %v1312_v41 = vld [vmem:[#allocation8 + $0x170] sm:$0xff] }
 0x219   :  { %9706 = vmatprep.subr.bf16.mxu0 %v9705_v2  ;;  %9874 = vmatprep.subr.bf16.mxu1 %v9873_v4  ;;  %v1935_v2 = vld [vmem:[#allocation8 + $0x1480] sm:$0xff]  ;;  %v9893_v6 = vpack.c.bf16 %v1942_v60, %v1938_v59  ;;  %v1271_v22 = vld [vmem:[#allocation8 + $0x28] sm:$0xff]  ;;  %v1288_v59 = vld [vmem:[#allocation8 + $0xb0] sm:$0xff] }
 0x21a   :  { %2133 = vmatmul.mubr.f32.gmra.mrb[22].mxu0 %v12972_v47  ;;  %2400 = vmatmul.mubr.f32.gmra.mrb[14].mxu1 %v12972_v47  ;;  %v1922_v47 = vld [vmem:[#allocation8 + $0x1418] sm:$0xff]  ;;  %v1939_v4 = vld [vmem:[#allocation8 + $0x14a0] sm:$0xff]  ;;  %v1287_v48 = vld [vmem:[#allocation8 + $0xa8] sm:$0xff] }
 0x21b   :  { %9708 = vmatpush1.bf16.msra.mxu0 %v9707_v32  ;;  %8952 = vmatprep.mubr.msk.f32.mxu0 %vm140_vm3, %v1124_v37  ;;  %v9885_v38 = vpack.c.bf16 %v1926_v33, %v1922_v47  ;;  %v1950_v32 = vld [vmem:[#allocation8 + $0x14f8] sm:$0xff]  ;;  %v9727_v10 = vpack.c.bf16 %v1939_v4, %v1935_v2  ;;  %v9903_v47 = vpack.c.bf16 %v1270_v21, %v1266_v19  ;;  %v1300_v19 = vld [vmem:[#allocation8 + $0x110] sm:$0xff]  ;;  %v1315_v42 = vld [vmem:[#allocation8 + $0x188] sm:$0xff] }
 0x21c   :  { %9876 = vmatpush1.bf16.msra.mxu1 %v9875_v11  ;;  %9710 = vmatprep.subr.bf16.mxu0 %v9709_v12  ;;  %v9895_v11 = vpack.c.bf16 %v1941_v8, %v1937_v5  ;;  %v9729_v12 = vpack.c.bf16 %v1948_v9, %v1944_v18  ;;  %v1277_v33 = vld [vmem:[#allocation8 + $0x58] sm:$0xff]  ;;  %v9909_v61 = vpack.c.bf16 %v1287_v48, %v1283_v45  ;;  %v1114_v5 = vld [vmem:[#allocation2 + $0x8] sm:$0x80]  ;;  %v1290_v18 = vld [vmem:[#allocation8 + $0xc0] sm:$0xff] }
 0x21d   :  { %9878 = vmatprep.subr.bf16.mxu1 %v9877_v53  ;;  %8956 = vmatprep.mubr.msk.f32.mxu1 %vm140_vm3, %v1124_v37  ;;  %v1945_v37 = vld [vmem:[#allocation8 + $0x14d0] sm:$0xff]  ;;  %v9897_v53 = vpack.c.bf16 %v1950_v32, %v1946_v28  ;;  %v1293_v2 = vld [vmem:[#allocation8 + $0xd8] sm:$0xff]  ;;  %v10079_v8 = vpack.c.bf16 %v1288_v59, %v1284_v16  ;;  %v1294_v9 = vld [vmem:[#allocation8 + $0xe0] sm:$0xff] }
 0x21e   :  { %v1297_v4 = vld [vmem:[#allocation8 + $0xf8] sm:$0xff]  ;;  %v1613_v28 = vld [vmem:[#allocation2 + $0x148] sm:$0xff] }
 0x21f   :  { %9712 = vmatpush1.bf16.msra.mxu0 %v9711_v51  ;;  %v9731_v51 = vpack.c.bf16 %v1947_v25, %v1943_v49  ;;  %v1299_v49 = vld [vmem:[#allocation8 + $0x108] sm:$0xff]  ;;  %v1317_v45 = vld [vmem:[#allocation8 + $0x198] sm:$0xff] }
 0x220   :  { %9880 = vmatpush1.bf16.msra.mxu1 %v9879_v3  ;;  %9714 = vmatprep.subr.bf16.mxu0 %v9713_v7  ;;  %v9899_v3 = vpack.c.bf16 %v1949_v14, %v1945_v37  ;;  %v9901_v7 = vpack.c.bf16 %v1271_v22, %v1267_v15  ;;  %v1303_v25 = vld [vmem:[#allocation8 + $0x128] sm:$0xff]  ;;  %v1612_v37 = vld [vmem:[#allocation2 + $0x140] sm:$0xff]  ;;  %v1189_v14 = vrot.slane %v1114_v5, 7  ;;  %v12991_v15 = vld [vmem:[#allocation2 + $0x38] sm:$0xff] }
 0x221   :  { %9882 = vmatprep.subr.bf16.mxu1 %v9881_v24  ;;  %v1268_v24 = vld [vmem:[#allocation8 + $0x10] sm:$0xff]  ;;  %v1190_v22 = vrot.slane %v12991_v15, 7  ;;  %v9917_v21 = vpack.c.bf16 %v1303_v25, %v1299_v49  ;;  %v1321_v48 = vld [vmem:[#allocation8 + $0x1b8] sm:$0xff]  ;;  %v1327_v16 = vld [vmem:[#allocation8 + $0x1e8] sm:$0xff] }
 0x222   :  { %v1325_v59 = vld [vmem:[#allocation8 + $0x1d8] sm:$0xff]  ;;  %v1324_v5 = vld [vmem:[#allocation8 + $0x1d0] sm:$0xff]  ;;  %v1330_v49 = vld [vmem:[#allocation8 + $0x200] sm:$0xff] }
 0x223   :  { %9716 = vmatpush1.bf16.msra.mxu0 %v9715_v34  ;;  %v1281_v34 = vld [vmem:[#allocation8 + $0x78] sm:$0xff]  ;;  %v1334_v25 = vld [vmem:[#allocation8 + $0x220] sm:$0xff] }
 0x224   :  { %9884 = vmatpush1.bf16.msra.mxu1 %v9883_v39  ;;  %9718 = vmatprep.subr.bf16.mxu0 %v9717_v36  ;;  %v1123_v39 = vld [vmem:[#allocation2 + $0x50] sm:$0xff]  ;;  %v10071_v36 = vpack.c.bf16 %v1272_v26, %v1268_v24  ;;  %v10073_v43 = vpack.c.bf16 %v1281_v34, %v1277_v33  ;;  %v1191_v33 = vsel %vm1185_vm4, %v1189_v14, %v1190_v22 }
 0x225   :  { %9886 = vmatprep.subr.bf16.mxu1 %v9885_v38  ;;  %v9905_v38 = vpack.c.bf16 %v1279_v0, %v1275_v27  ;;  %v1307_v24 = vld [vmem:[#allocation8 + $0x148] sm:$0xff]  ;;  %v10085_v27 = vpack.c.bf16 %v1305_v17, %v1301_v31  ;;  %v1309_v0 = vld [vmem:[#allocation8 + $0x158] sm:$0xff]  ;;  %v1336_v14 = vld [vmem:[#allocation8 + $0x230] sm:$0xff] }
 0x226   :  { %v1311_v26 = vld [vmem:[#allocation8 + $0x168] sm:$0xff] }
 0x227   :  { %9720 = vmatpush1.bf16.msra.mxu0 %v9719_v50  ;;  %v9907_v50 = vpack.c.bf16 %v1278_v35, %v1274_v44  ;;  %v1306_v44 = vld [vmem:[#allocation8 + $0x140] sm:$0xff]  ;;  %v1339_v31 = vld [vmem:[#allocation8 + $0x248] sm:$0xff] }
 0x228   :  { %9888 = vmatpush1.bf16.msra.mxu1 %v9887_v52  ;;  %9722 = vmatprep.subr.bf16.mxu0 %v9721_v54  ;;  %v1285_v52 = vld [vmem:[#allocation8 + $0x98] sm:$0xff]  ;;  %v1310_v35 = vld [vmem:[#allocation8 + $0x160] sm:$0xff]  ;;  %v1343_v17 = vld [vmem:[#allocation8 + $0x268] sm:$0xff] }
 0x229   :  { %9890 = vmatprep.subr.bf16.mxu1 %v9889_v58  ;;  %v1289_v54 = vld [vmem:[#allocation8 + $0xb8] sm:$0xff]  ;;  %v1286_v58 = vld [vmem:[#allocation8 + $0xa0] sm:$0xff] }
 0x22a   :  { %v10077_v60 = vpack.c.bf16 %v1289_v54, %v1285_v52 }
 0x22b   :  { %9724 = vmatpush1.bf16.msra.mxu0 %v9723_v62  ;;  %v1291_v62 = vld [vmem:[#allocation8 + $0xc8] sm:$0xff] }
 0x22c   :  { %9892 = vmatpush1.bf16.msra.mxu1 %v9891_v20  ;;  %9726 = vmatprep.subr.bf16.mxu0 %v9725_v63  ;;  %v1295_v20 = vld [vmem:[#allocation8 + $0xe8] sm:$0xff]  ;;  %v9911_v63 = vpack.c.bf16 %v1286_v58, %v1282_v56  ;;  %v1316_v56 = vld [vmem:[#allocation8 + $0x190] sm:$0xff]  ;;  %v10093_v58 = vpack.c.bf16 %v1321_v48, %v1317_v45 }
 0x22d   :  { %9894 = vmatprep.subr.bf16.mxu1 %v9893_v6  ;;  %v1141_v6 = vld [vmem:[#allocation2 + $0x110] sm:$0xff]  ;;  %v9913_v32 = vpack.c.bf16 %v1295_v20, %v1291_v62 }
 0x22e   :  { %v1355_v45 = vld [vmem:[#allocation8 + $0x2c8] sm:$0xff] }
 0x22f   :  { %9728 = vmatpush1.bf16.msra.mxu0 %v9727_v10  ;;  %v1292_v10 = vld [vmem:[#allocation8 + $0xd0] sm:$0xff]  ;;  %v1359_v48 = vld [vmem:[#allocation8 + $0x2e8] sm:$0xff] }
 0x230   :  { %9896 = vmatpush1.bf16.msra.mxu1 %v9895_v11  ;;  %9730 = vmatprep.subr.bf16.mxu0 %v9729_v12  ;;  %v1296_v11 = vld [vmem:[#allocation8 + $0xf0] sm:$0xff]  ;;  %v10081_v12 = vpack.c.bf16 %v1297_v4, %v1293_v2  ;;  %v1322_v2 = vld [vmem:[#allocation8 + $0x1c0] sm:$0xff] }
 0x231   :  { %9898 = vmatprep.subr.bf16.mxu1 %v9897_v53  ;;  %v9915_v53 = vpack.c.bf16 %v1294_v9, %v1290_v18  ;;  %v1326_v4 = vld [vmem:[#allocation8 + $0x1e0] sm:$0xff]  ;;  %v1331_v18 = vld [vmem:[#allocation8 + $0x208] sm:$0xff] }
 0x232   :  { %v1335_v9 = vld [vmem:[#allocation8 + $0x228] sm:$0xff] }
 0x233   :  { %9732 = vmatpush1.bf16.msra.mxu0 %v9731_v51  ;;  %v10083_v51 = vpack.c.bf16 %v1296_v11, %v1292_v10  ;;  %v9931_v10 = vpack.c.bf16 %v1326_v4, %v1322_v2 }
 0x234   :  { %9900 = vmatpush1.bf16.msra.mxu1 %v9899_v3  ;;  %9902 = vmatprep.subr.bf16.mxu0 %v9901_v7  ;;  %v1298_v3 = vld [vmem:[#allocation8 + $0x100] sm:$0xff] }
 0x235   :  { %10070 = vmatprep.subr.bf16.mxu1 %v10069_v23  ;;  %v1302_v7 = vld [vmem:[#allocation8 + $0x120] sm:$0xff]  ;;  %v1304_v23 = vld [vmem:[#allocation8 + $0x130] sm:$0xff] }
 0x236   :  { %2204 = vmatmul.mubr.f32.vlgmr.msra.gmra.mrb[16].mxu0 %v1123_v39  ;;  %v9919_v34 = vpack.c.bf16 %v1302_v7, %v1298_v3  ;;  %v1345_v3 = vld [vmem:[#allocation8 + $0x278] sm:$0xff]  ;;  %v9935_v7 = vpack.c.bf16 %v1334_v25, %v1330_v49 }
 0x237   :  { %2471 = vmatmul.mubr.f32.vlgmr.msra.gmra.mrb[8].mxu1 %v1123_v39  ;;  %9904 = vmatpush1.bf16.msra.mxu0 %v9903_v47  ;;  %v1313_v47 = vld [vmem:[#allocation8 + $0x178] sm:$0xff]  ;;  %v10087_v39 = vpack.c.bf16 %v1304_v23, %v1300_v19  ;;  %v1338_v23 = vld [vmem:[#allocation8 + $0x240] sm:$0xff] }
 0x238   :  { %10072 = vmatpush1.bf16.msra.mxu1 %v10071_v36  ;;  %8953 = vmatprep.mubr.msk.f32.mxu0 %vm140_vm3, %v1607_v1  ;;  %v9921_v36 = vpack.c.bf16 %v1311_v26, %v1307_v24  ;;  %v1342_v24 = vld [vmem:[#allocation8 + $0x260] sm:$0xff]  ;;  %v1340_v26 = vld [vmem:[#allocation8 + $0x250] sm:$0xff] }
 0x239   :  { %8957 = vmatprep.mubr.msk.f32.mxu1 %vm140_vm3, %v1607_v1  ;;  %9906 = vmatprep.subr.bf16.mxu0 %v9905_v38  ;;  %v1308_v1 = vld [vmem:[#allocation8 + $0x150] sm:$0xff]  ;;  %v10089_v38 = vpack.c.bf16 %v1313_v47, %v1309_v0  ;;  %v1347_v47 = vld [vmem:[#allocation8 + $0x288] sm:$0xff] }
 0x23a   :  { %2210 = vmatmul.mubr.f32.gmra.mrb[18].mxu0 %v1606_v55  ;;  %10074 = vmatprep.subr.bf16.mxu1 %v10073_v43  ;;  %v1319_v43 = vld [vmem:[#allocation8 + $0x1a8] sm:$0xff]  ;;  %v10091_v52 = vpack.c.bf16 %v1312_v41, %v1308_v1  ;;  %v1344_v0 = vld [vmem:[#allocation8 + $0x270] sm:$0xff]  ;;  %v1346_v1 = vld [vmem:[#allocation8 + $0x280] sm:$0xff] }
 0x23b   :  { %2477 = vmatmul.mubr.f32.gmra.mrb[10].mxu1 %v1606_v55  ;;  %9908 = vmatpush1.bf16.msra.mxu0 %v9907_v50  ;;  %v9923_v50 = vpack.c.bf16 %v1310_v35, %v1306_v44  ;;  %v9925_v54 = vpack.c.bf16 %v1319_v43, %v1315_v42  ;;  %v1314_v55 = vld [vmem:[#allocation8 + $0x180] sm:$0xff]  ;;  %v10107_v44 = vpack.c.bf16 %v1344_v0, %v1340_v26  ;;  %v1348_v41 = vld [vmem:[#allocation8 + $0x290] sm:$0xff] }
 0x23c   :  { %10076 = vmatpush1.bf16.msra.mxu1 %v10075_v57  ;;  %8954 = vmatprep.mubr.msk.f32.mxu0 %vm140_vm3, %v1142_v46  ;;  %v1318_v57 = vld [vmem:[#allocation8 + $0x1a0] sm:$0xff]  ;;  %v1352_v43 = vld [vmem:[#allocation8 + $0x2b0] sm:$0xff] }
 0x23d   :  { %8958 = vmatprep.mubr.msk.f32.mxu1 %vm140_vm3, %v1142_v46  ;;  %9910 = vmatprep.subr.bf16.mxu0 %v9909_v61  ;;  %v1320_v46 = vld [vmem:[#allocation8 + $0x1b0] sm:$0xff]  ;;  %v1323_v61 = vld [vmem:[#allocation8 + $0x1c8] sm:$0xff]  ;;  %v9927_v62 = vpack.c.bf16 %v1318_v57, %v1314_v55  ;;  %v10111_v55 = vpack.c.bf16 %v1352_v43, %v1348_v41  ;;  %v9945_v57 = vpack.c.bf16 %v1359_v48, %v1355_v45  ;;  %v1378_v26 = vld [vmem:[#allocation8 + $0x380] sm:$0xff] }
 0x23e   :  { %2216 = vmatmul.mubr.f32.gmra.mrb[20].mxu0 %v1141_v6  ;;  %10078 = vmatprep.subr.bf16.mxu1 %v10077_v60  ;;  %v1329_v60 = vld [vmem:[#allocation8 + $0x1f8] sm:$0xff]  ;;  %v10095_v20 = vpack.c.bf16 %v1320_v46, %v1316_v56  ;;  %v1354_v56 = vld [vmem:[#allocation8 + $0x2c0] sm:$0xff]  ;;  %v1356_v46 = vld [vmem:[#allocation8 + $0x2d0] sm:$0xff] }
 0x23f   :  { %2483 = vmatmul.mubr.f32.gmra.mrb[12].mxu1 %v1141_v6  ;;  %9912 = vmatpush1.bf16.msra.mxu0 %v9911_v63  ;;  %v9929_v63 = vpack.c.bf16 %v1327_v16, %v1323_v61  ;;  %v10097_v6 = vpack.c.bf16 %v1329_v60, %v1325_v59  ;;  %v1360_v16 = vld [vmem:[#allocation8 + $0x2f0] sm:$0xff]  ;;  %v1363_v59 = vld [vmem:[#allocation8 + $0x308] sm:$0xff]  ;;  %v1113_v45 = vld [vmem:[#allocation2] sm:$0x80] }
 0x240   :  { %10080 = vmatpush1.bf16.msra.mxu1 %v10079_v8  ;;  %8955 = vmatprep.mubr.msk.f32.mxu0 %vm140_vm3, %v1613_v28  ;;  %v1328_v8 = vld [vmem:[#allocation8 + $0x1f0] sm:$0xff]  ;;  %v1367_v60 = vld [vmem:[#allocation8 + $0x328] sm:$0xff]  ;;  %v10115_v2 = vpack.c.bf16 %v1360_v16, %v1356_v46 }
 0x241   :  { %8959 = vmatprep.mubr.msk.f32.mxu1 %vm140_vm3, %v1613_v28  ;;  %9914 = vmatprep.subr.bf16.mxu0 %v9913_v32  ;;  %v1333_v28 = vld [vmem:[#allocation8 + $0x218] sm:$0xff]  ;;  %v10099_v11 = vpack.c.bf16 %v1328_v8, %v1324_v5  ;;  %v9949_v4 = vpack.c.bf16 %v1367_v60, %v1363_v59  ;;  %v1362_v5 = vld [vmem:[#allocation8 + $0x300] sm:$0xff]  ;;  %v1364_v8 = vld [vmem:[#allocation8 + $0x310] sm:$0xff] }
 0x242   :  { %2222 = vmatmul.mubr.f32.gmra.mrb[22].mxu0 %v1612_v37  ;;  %10082 = vmatprep.subr.bf16.mxu1 %v10081_v12  ;;  %v1337_v32 = vld [vmem:[#allocation8 + $0x238] sm:$0xff]  ;;  %v9933_v12 = vpack.c.bf16 %v1335_v9, %v1331_v18  ;;  %v1368_v9 = vld [vmem:[#allocation8 + $0x330] sm:$0xff]  ;;  %v1126_v16 = vld [vmem:[#allocation2 + $0x68] sm:$0x7f] }
 0x243   :  { %2489 = vmatmul.mubr.f32.gmra.mrb[14].mxu1 %v1612_v37  ;;  %9916 = vmatpush1.bf16.msra.mxu0 %v9915_v53  ;;  %v1332_v37 = vld [vmem:[#allocation8 + $0x210] sm:$0xff]  ;;  %v10101_v53 = vpack.c.bf16 %v1337_v32, %v1333_v28  ;;  %v1371_v28 = vld [vmem:[#allocation8 + $0x348] sm:$0xff]  ;;  %v10119_v49 = vpack.c.bf16 %v1368_v9, %v1364_v8 }
 0x244   :  { %2567 = vmatprep.mubr.f32.mxu0 %v1191_v33  ;;  %10084 = vmatpush1.bf16.msra.mxu1 %v10083_v51  ;;  %v1341_v51 = vld [vmem:[#allocation8 + $0x258] sm:$0xff]  ;;  %v10103_v19 = vpack.c.bf16 %v1336_v14, %v1332_v37  ;;  %v1375_v32 = vld [vmem:[#allocation8 + $0x368] sm:$0xff]  ;;  %v1370_v37 = vld [vmem:[#allocation8 + $0x340] sm:$0xff] }
 0x245   :  { %2834 = vmatprep.mubr.f32.mxu1 %v1191_v33  ;;  %9918 = vmatprep.subr.bf16.mxu0 %v9917_v21  ;;  %v9937_v21 = vpack.c.bf16 %v1343_v17, %v1339_v31  ;;  %v1351_v33 = vld [vmem:[#allocation8 + $0x2a8] sm:$0xff]  ;;  %v9953_v25 = vpack.c.bf16 %v1375_v32, %v1371_v28  ;;  %v1372_v14 = vld [vmem:[#allocation8 + $0x350] sm:$0xff]  ;;  %v1405_v32 = vld [vmem:[#allocation8 + $0x458] sm:$0xff] }
 0x246   :  { %10086 = vmatprep.subr.bf16.mxu1 %v10085_v27  ;;  %v10105_v27 = vpack.c.bf16 %v1345_v3, %v1341_v51  ;;  %v9941_v35 = vpack.c.bf16 %v1351_v33, %v1347_v47  ;;  %v1376_v17 = vld [vmem:[#allocation8 + $0x370] sm:$0xff]  ;;  %v1379_v51 = vld [vmem:[#allocation8 + $0x388] sm:$0xff] }
 0x247   :  { %9920 = vmatpush1.bf16.msra.mxu0 %v9919_v34  ;;  %v1349_v34 = vld [vmem:[#allocation8 + $0x298] sm:$0xff]  ;;  %v1383_v3 = vld [vmem:[#allocation8 + $0x3a8] sm:$0xff]  ;;  %v1380_v0 = vld [vmem:[#allocation8 + $0x390] sm:$0xff] }
 0x248   :  { %10088 = vmatpush1.bf16.msra.mxu1 %v10087_v39  ;;  %9922 = vmatprep.subr.bf16.mxu0 %v9921_v36  ;;  %v1353_v39 = vld [vmem:[#allocation8 + $0x2b8] sm:$0xff]  ;;  %v9939_v36 = vpack.c.bf16 %v1342_v24, %v1338_v23  ;;  %v10123_v23 = vpack.c.bf16 %v1376_v17, %v1372_v14  ;;  %v9957_v24 = vpack.c.bf16 %v1383_v3, %v1379_v51  ;;  %v1384_v33 = vld [vmem:[#allocation8 + $0x3b0] sm:$0xff]  ;;  %v1403_v8 = vld [vmem:[#allocation8 + $0x448] sm:$0xff] }
 0x249   :  { %10090 = vmatprep.subr.bf16.mxu1 %v10089_v38  ;;  %v1350_v38 = vld [vmem:[#allocation8 + $0x2a0] sm:$0xff]  ;;  %v10109_v42 = vpack.c.bf16 %v1353_v39, %v1349_v34  ;;  %v1387_v34 = vld [vmem:[#allocation8 + $0x3c8] sm:$0xff]  ;;  %v1388_v43 = vld [vmem:[#allocation8 + $0x3d0] sm:$0xff] }
 0x24a   :  { %v1391_v39 = vld [vmem:[#allocation8 + $0x3e8] sm:$0xff]  ;;  %v1406_v14 = vld [vmem:[#allocation8 + $0x460] sm:$0xff] }
 0x24b   :  { %9924 = vmatpush1.bf16.msra.mxu0 %v9923_v50  ;;  %v1357_v50 = vld [vmem:[#allocation8 + $0x2d8] sm:$0xff]  ;;  %v9961_v41 = vpack.c.bf16 %v1391_v39, %v1387_v34 }
 0x24c   :  { %10092 = vmatpush1.bf16.msra.mxu1 %v10091_v52  ;;  %9926 = vmatprep.subr.bf16.mxu0 %v9925_v54  ;;  %v1361_v52 = vld [vmem:[#allocation8 + $0x2f8] sm:$0xff]  ;;  %v9943_v54 = vpack.c.bf16 %v1350_v38, %v1346_v1  ;;  %v1386_v1 = vld [vmem:[#allocation8 + $0x3c0] sm:$0xff]  ;;  %v10127_v38 = vpack.c.bf16 %v1384_v33, %v1380_v0 }
 0x24d   :  { %10094 = vmatprep.subr.bf16.mxu1 %v10093_v58  ;;  %v1358_v58 = vld [vmem:[#allocation8 + $0x2e0] sm:$0xff]  ;;  %v10113_v61 = vpack.c.bf16 %v1361_v52, %v1357_v50  ;;  %v1392_v50 = vld [vmem:[#allocation8 + $0x3f0] sm:$0xff]  ;;  %v1395_v52 = vld [vmem:[#allocation8 + $0x408] sm:$0xff] }
 0x24e   :  { %v10131_v59 = vpack.c.bf16 %v1392_v50, %v1388_v43  ;;  %v1413_v0 = vld [vmem:[#allocation8 + $0x498] sm:$0xff]  ;;  %v1144_v33 = vld [vmem:[#allocation2 + $0x128] sm:$0x7f] }
 0x24f   :  { %9928 = vmatpush1.bf16.msra.mxu0 %v9927_v62  ;;  %v1365_v62 = vld [vmem:[#allocation8 + $0x318] sm:$0xff]  ;;  %v1419_v43 = vld [vmem:[#allocation8 + $0x4c8] sm:$0xff] }
 0x250   :  { %10096 = vmatpush1.bf16.msra.mxu1 %v10095_v20  ;;  %9930 = vmatprep.subr.bf16.mxu0 %v9929_v63  ;;  %v1369_v20 = vld [vmem:[#allocation8 + $0x338] sm:$0xff]  ;;  %v9947_v63 = vpack.c.bf16 %v1358_v58, %v1354_v56  ;;  %v12263_v56 = vld [vmem:[#allocation2 + $0x30] sm:$0xff] }
 0x251   :  { %10098 = vmatprep.subr.bf16.mxu1 %v10097_v6  ;;  %v1366_v6 = vld [vmem:[#allocation8 + $0x320] sm:$0xff]  ;;  %v10117_v18 = vpack.c.bf16 %v1369_v20, %v1365_v62  ;;  %v12999_v58 = vrot.slane %v12263_v56, 7 }
 0x252   :  { %v1125_v62 = vld [vmem:[#allocation2 + $0x60] sm:$0x7f] }
 0x253   :  { %9932 = vmatpush1.bf16.msra.mxu0 %v9931_v10  ;;  %v1373_v10 = vld [vmem:[#allocation8 + $0x358] sm:$0xff]  ;;  %v1204_v28 = vrot.slane %v1125_v62, 7 }
 0x254   :  { %10100 = vmatpush1.bf16.msra.mxu1 %v10099_v11  ;;  %9934 = vmatprep.subr.bf16.mxu0 %v9933_v12  ;;  %v1377_v11 = vld [vmem:[#allocation8 + $0x378] sm:$0xff]  ;;  %v9951_v12 = vpack.c.bf16 %v1366_v6, %v1362_v5  ;;  %v1206_v5 = vrot.slane %v1126_v16, 7  ;;  %v1400_v6 = vld [vmem:[#allocation8 + $0x430] sm:$0xff]  ;;  %v1422_v16 = vld [vmem:[#allocation8 + $0x4e0] sm:$0xff] }
 0x255   :  { %10102 = vmatprep.subr.bf16.mxu1 %v10101_v53  ;;  %v1374_v53 = vld [vmem:[#allocation8 + $0x360] sm:$0xff]  ;;  %v10121_v31 = vpack.c.bf16 %v1377_v11, %v1373_v10  ;;  %v1409_v10 = vld [vmem:[#allocation8 + $0x478] sm:$0xff]  ;;  %v1132_v11 = vld [vmem:[#allocation2 + $0xc8] sm:$0x80] }
 0x256   :  { %v1207_v17 = vsel %vm1185_vm4, %v1190_v22, %v1206_v5  ;;  %v10137_v51 = vpack.c.bf16 %v1409_v10, %v1405_v32  ;;  %v1219_v3 = vrot.slane %v1132_v11, 7  ;;  %v1143_v22 = vld [vmem:[#allocation2 + $0x120] sm:$0x7f]  ;;  %v1427_v5 = vld [vmem:[#allocation8 + $0x508] sm:$0xff] }
 0x257   :  { %9936 = vmatpush1.bf16.msra.mxu0 %v9935_v7  ;;  %v1381_v7 = vld [vmem:[#allocation8 + $0x398] sm:$0xff]  ;;  %v1234_v50 = vrot.slane %v1143_v22, 7  ;;  %v1426_v11 = vld [vmem:[#allocation8 + $0x500] sm:$0xff] }
 0x258   :  { %10104 = vmatpush1.bf16.msra.mxu1 %v10103_v19  ;;  %9938 = vmatprep.subr.bf16.mxu0 %v9937_v21  ;;  %v1385_v19 = vld [vmem:[#allocation8 + $0x3b8] sm:$0xff]  ;;  %v9955_v21 = vpack.c.bf16 %v1374_v53, %v1370_v37  ;;  %v1402_v53 = vld [vmem:[#allocation8 + $0x440] sm:$0xff] }
 0x259   :  { %10106 = vmatprep.subr.bf16.mxu1 %v10105_v27  ;;  %v1382_v27 = vld [vmem:[#allocation8 + $0x3a0] sm:$0xff]  ;;  %v10125_v47 = vpack.c.bf16 %v1385_v19, %v1381_v7  ;;  %v12264_v7 = vld [vmem:[#allocation2 + $0xf8] sm:$0xff]  ;;  %v9971_v15 = vpack.c.bf16 %v1406_v14, %v1402_v53  ;;  %v1435_v53 = vld [vmem:[#allocation8 + $0x548] sm:$0xff] }
 0x25a   :  { %v1220_v19 = vrot.slane %v12264_v7, 7  ;;  %v1439_v14 = vld [vmem:[#allocation8 + $0x568] sm:$0xff] }
 0x25b   :  { %9940 = vmatpush1.bf16.msra.mxu0 %v9939_v36  ;;  %v1389_v36 = vld [vmem:[#allocation8 + $0x3d8] sm:$0xff]  ;;  %v9985_v7 = vpack.c.bf16 %v1439_v14, %v1435_v53  ;;  %v1472_v14 = vld [vmem:[#allocation8 + $0x670] sm:$0xff] }
 0x25c   :  { %10108 = vmatpush1.bf16.msra.mxu1 %v10107_v44  ;;  %9942 = vmatprep.subr.bf16.mxu0 %v9941_v35  ;;  %v1393_v44 = vld [vmem:[#allocation8 + $0x3f8] sm:$0xff]  ;;  %v9959_v35 = vpack.c.bf16 %v1382_v27, %v1378_v26  ;;  %v1205_v26 = vsel %vm1185_vm4, %v12999_v58, %v1204_v28 }
 0x25d   :  { %10110 = vmatprep.subr.bf16.mxu1 %v10109_v42  ;;  %v1390_v42 = vld [vmem:[#allocation8 + $0x3e0] sm:$0xff]  ;;  %v10129_v48 = vpack.c.bf16 %v1393_v44, %v1389_v36 }
 0x25e   :  { %v9963_v46 = vpack.c.bf16 %v1390_v42, %v1386_v1  ;;  %v1410_v36 = vld [vmem:[#allocation8 + $0x480] sm:$0xff]  ;;  %v1221_v1 = vsel %vm1185_vm4, %v1219_v3, %v1220_v19  ;;  %v1416_v42 = vld [vmem:[#allocation8 + $0x4b0] sm:$0xff] }
 0x25f   :  { %9944 = vmatpush1.bf16.msra.mxu0 %v9943_v54  ;;  %v1399_v54 = vld [vmem:[#allocation8 + $0x428] sm:$0xff]  ;;  %v1414_v44 = vld [vmem:[#allocation8 + $0x4a0] sm:$0xff] }
 0x260   :  { %10112 = vmatpush1.bf16.msra.mxu1 %v10111_v55  ;;  %9946 = vmatprep.subr.bf16.mxu0 %v9945_v57  ;;  %v1397_v55 = vld [vmem:[#allocation8 + $0x418] sm:$0xff]  ;;  %v9965_v60 = vpack.c.bf16 %v1399_v54, %v1395_v52 }
 0x261   :  { %10114 = vmatprep.subr.bf16.mxu1 %v10113_v61  ;;  %v1401_v57 = vld [vmem:[#allocation8 + $0x438] sm:$0xff]  ;;  %v1186_v61 = vrot.slane %v1113_v45, 7  ;;  %v1423_v45 = vld [vmem:[#allocation8 + $0x4e8] sm:$0xff] }
 0x262   :  { %v10133_v20 = vpack.c.bf16 %v1401_v57, %v1397_v55  ;;  %v1421_v52 = vld [vmem:[#allocation8 + $0x4d8] sm:$0xff]  ;;  %v9975_v57 = vpack.c.bf16 %v1414_v44, %v1410_v36  ;;  %v1446_v36 = vld [vmem:[#allocation8 + $0x5a0] sm:$0xff]  ;;  %v1444_v44 = vld [vmem:[#allocation8 + $0x590] sm:$0xff] }
 0x263   :  { %9948 = vmatpush1.bf16.msra.mxu0 %v9947_v63  ;;  %v1394_v63 = vld [vmem:[#allocation8 + $0x400] sm:$0xff]  ;;  %v1188_v9 = vsel %vm1185_vm4, %v1186_v61, %v12999_v58  ;;  %v1425_v54 = vld [vmem:[#allocation8 + $0x4f8] sm:$0xff] }
 0x264   :  { %10116 = vmatpush1.bf16.msra.mxu1 %v10115_v2  ;;  %9950 = vmatprep.subr.bf16.mxu0 %v9949_v4  ;;  %v1398_v2 = vld [vmem:[#allocation8 + $0x420] sm:$0xff]  ;;  %v1396_v4 = vld [vmem:[#allocation8 + $0x410] sm:$0xff]  ;;  %v1116_v55 = vld [vmem:[#allocation2 + $0x18] sm:$0x80]  ;;  %v10145_v62 = vpack.c.bf16 %v1425_v54, %v1421_v52 }
 0x265   :  { %10118 = vmatprep.subr.bf16.mxu1 %v10117_v18  ;;  %v1407_v18 = vld [vmem:[#allocation8 + $0x468] sm:$0xff]  ;;  %v1418_v61 = vld [vmem:[#allocation8 + $0x4c0] sm:$0xff] }
 0x266   :  { %v9969_v37 = vpack.c.bf16 %v1407_v18, %v1403_v8  ;;  %v1235_v8 = vsel %vm1185_vm4, %v12999_v58, %v1234_v50  ;;  %v1429_v18 = vld [vmem:[#allocation8 + $0x518] sm:$0xff]  ;;  %v9979_v28 = vpack.c.bf16 %v1422_v16, %v1418_v61  ;;  %v1450_v52 = vld [vmem:[#allocation8 + $0x5c0] sm:$0xff]  ;;  %v1463_v61 = vld [vmem:[#allocation8 + $0x628] sm:$0xff] }
 0x267   :  { %9952 = vmatpush1.bf16.msra.mxu0 %v9951_v12  ;;  %v9967_v12 = vpack.c.bf16 %v1398_v2, %v1394_v63  ;;  %v13012_v63 = vld [vmem:[#allocation2 + $0x48] sm:$0xff]  ;;  %v1461_v16 = vld [vmem:[#allocation8 + $0x618] sm:$0xff] }
 0x268   :  { %10120 = vmatpush1.bf16.msra.mxu1 %v10119_v49  ;;  %9954 = vmatprep.subr.bf16.mxu0 %v9953_v25  ;;  %v1131_v49 = vld [vmem:[#allocation2 + $0xc0] sm:$0x80]  ;;  %v10135_v25 = vpack.c.bf16 %v1400_v6, %v1396_v4  ;;  %v1196_v2 = vrot.slane %v13012_v63, 7  ;;  %v1424_v4 = vld [vmem:[#allocation8 + $0x4f0] sm:$0xff]  ;;  %v1431_v6 = vld [vmem:[#allocation8 + $0x528] sm:$0xff] }
 0x269   :  { %10122 = vmatprep.subr.bf16.mxu1 %v10121_v31  ;;  %v1404_v31 = vld [vmem:[#allocation8 + $0x450] sm:$0xff]  ;;  %v1216_v27 = vrot.slane %v1131_v49, 7  ;;  %v9981_v10 = vpack.c.bf16 %v1431_v6, %v1427_v5  ;;  %v1454_v54 = vld [vmem:[#allocation8 + $0x5e0] sm:$0xff] }
 0x26a   :  { %v1428_v49 = vld [vmem:[#allocation8 + $0x510] sm:$0xff]  ;;  %v1462_v5 = vld [vmem:[#allocation8 + $0x620] sm:$0xff] }
 0x26b   :  { %9956 = vmatpush1.bf16.msra.mxu0 %v9955_v21  ;;  %v1408_v21 = vld [vmem:[#allocation8 + $0x470] sm:$0xff] }
 0x26c   :  { %10124 = vmatpush1.bf16.msra.mxu1 %v10123_v23  ;;  %9958 = vmatprep.subr.bf16.mxu0 %v9957_v24  ;;  %v1411_v23 = vld [vmem:[#allocation8 + $0x488] sm:$0xff]  ;;  %v10139_v34 = vpack.c.bf16 %v1408_v21, %v1404_v31  ;;  %v1437_v31 = vld [vmem:[#allocation8 + $0x558] sm:$0xff]  ;;  %v1438_v21 = vld [vmem:[#allocation8 + $0x560] sm:$0xff] }
 0x26d   :  { %10126 = vmatprep.subr.bf16.mxu1 %v10125_v47  ;;  %v1415_v24 = vld [vmem:[#allocation8 + $0x4a8] sm:$0xff]  ;;  %v1417_v47 = vld [vmem:[#allocation8 + $0x4b8] sm:$0xff]  ;;  %v1460_v6 = vld [vmem:[#allocation8 + $0x610] sm:$0xff] }
 0x26e   :  { %v9973_v39 = vpack.c.bf16 %v1415_v24, %v1411_v23  ;;  %v1436_v23 = vld [vmem:[#allocation8 + $0x550] sm:$0xff] }
 0x26f   :  { %9960 = vmatpush1.bf16.msra.mxu0 %v9959_v35  ;;  %v1412_v35 = vld [vmem:[#allocation8 + $0x490] sm:$0xff] }
 0x270   :  { %10128 = vmatpush1.bf16.msra.mxu1 %v10127_v38  ;;  %9962 = vmatprep.subr.bf16.mxu0 %v9961_v41  ;;  %v10141_v38 = vpack.c.bf16 %v1417_v47, %v1413_v0  ;;  %v1236_v41 = vrot.slane %v1144_v33, 7  ;;  %v10143_v56 = vpack.c.bf16 %v1416_v42, %v1412_v35  ;;  %v1447_v0 = vld [vmem:[#allocation8 + $0x5a8] sm:$0xff]  ;;  %v1445_v47 = vld [vmem:[#allocation8 + $0x598] sm:$0xff] }
 0x271   :  { %10130 = vmatprep.subr.bf16.mxu1 %v10129_v48  ;;  %v1218_v48 = vsel %vm1185_vm4, %v1216_v27, %v12999_v58  ;;  %v1432_v58 = vld [vmem:[#allocation8 + $0x530] sm:$0xff]  ;;  %v1443_v27 = vld [vmem:[#allocation8 + $0x588] sm:$0xff]  ;;  %v1449_v33 = vld [vmem:[#allocation8 + $0x5b8] sm:$0xff] }
 0x272   :  { %v10151_v3 = vpack.c.bf16 %v1432_v58, %v1428_v49  ;;  %v10157_v35 = vpack.c.bf16 %v1449_v33, %v1445_v47  ;;  %v1453_v42 = vld [vmem:[#allocation8 + $0x5d8] sm:$0xff]  ;;  %v1468_v58 = vld [vmem:[#allocation8 + $0x650] sm:$0xff]  ;;  %v1483_v47 = vld [vmem:[#allocation8 + $0x6c8] sm:$0xff] }
 0x273   :  { %9964 = vmatpush1.bf16.msra.mxu0 %v9963_v46  ;;  %v9977_v46 = vpack.c.bf16 %v1423_v45, %v1419_v43  ;;  %v1457_v43 = vld [vmem:[#allocation8 + $0x5f8] sm:$0xff]  ;;  %v1487_v33 = vld [vmem:[#allocation8 + $0x6e8] sm:$0xff] }
 0x274   :  { %10132 = vmatpush1.bf16.msra.mxu1 %v10131_v59  ;;  %9966 = vmatprep.subr.bf16.mxu0 %v9965_v60  ;;  %v1420_v59 = vld [vmem:[#allocation8 + $0x4d0] sm:$0xff]  ;;  %v1237_v60 = vsel %vm1185_vm4, %v1220_v19, %v1236_v41  ;;  %v1434_v19 = vld [vmem:[#allocation8 + $0x540] sm:$0xff]  ;;  %v1455_v41 = vld [vmem:[#allocation8 + $0x5e8] sm:$0xff] }
 0x275   :  { %10134 = vmatprep.subr.bf16.mxu1 %v10133_v20  ;;  %v1195_v20 = vrot.slane %v1116_v55, 7  ;;  %v10147_v32 = vpack.c.bf16 %v1424_v4, %v1420_v59  ;;  %v1452_v55 = vld [vmem:[#allocation8 + $0x5d0] sm:$0xff]  ;;  %v1465_v59 = vld [vmem:[#allocation8 + $0x638] sm:$0xff]  ;;  %v1458_v4 = vld [vmem:[#allocation8 + $0x600] sm:$0xff] }
 0x276   :  { %2568 = vmatmul.mubr.f32.vlgmr.msra.gmra.mrb[16].mxu0 %v1188_v9  ;;  %v1145_v63 = vld [vmem:[#allocation2 + $0x130] sm:$0x7f] }
 0x277   :  { %2835 = vmatmul.mubr.f32.vlgmr.msra.gmra.mrb[8].mxu1 %v1188_v9  ;;  %2573 = vmatprep.mubr.f32.mxu0 %v1207_v17  ;;  %v1433_v9 = vld [vmem:[#allocation8 + $0x538] sm:$0xff] }
 0x278   :  { %9968 = vmatpush1.bf16.msra.mxu0 %v9967_v12  ;;  %2840 = vmatprep.mubr.f32.mxu1 %v1207_v17  ;;  %v1430_v12 = vld [vmem:[#allocation8 + $0x520] sm:$0xff]  ;;  %v1441_v17 = vld [vmem:[#allocation8 + $0x578] sm:$0xff] }
 0x279   :  { %10136 = vmatpush1.bf16.msra.mxu1 %v10135_v25  ;;  %9970 = vmatprep.subr.bf16.mxu0 %v9969_v37  ;;  %v1197_v25 = vsel %vm1185_vm4, %v1195_v20, %v1196_v2  ;;  %v10149_v37 = vpack.c.bf16 %v1433_v9, %v1429_v18  ;;  %v10153_v24 = vpack.c.bf16 %v1441_v17, %v1437_v31  ;;  %v1464_v18 = vld [vmem:[#allocation8 + $0x630] sm:$0xff]  ;;  %v1467_v9 = vld [vmem:[#allocation8 + $0x648] sm:$0xff] }
 0x27a   :  { %2574 = vmatmul.mubr.f32.gmra.mrb[18].mxu0 %v1205_v26  ;;  %10138 = vmatprep.subr.bf16.mxu1 %v10137_v51  ;;  %v9983_v51 = vpack.c.bf16 %v1430_v12, %v1426_v11  ;;  %v9999_v11 = vpack.c.bf16 %v1462_v5, %v1458_v4  ;;  %v10167_v12 = vpack.c.bf16 %v1464_v18, %v1460_v6  ;;  %v1475_v31 = vld [vmem:[#allocation8 + $0x688] sm:$0xff]  ;;  %v1498_v6 = vld [vmem:[#allocation8 + $0x740] sm:$0xff]  ;;  %v1500_v18 = vld [vmem:[#allocation8 + $0x750] sm:$0xff] }
 0x27b   :  { %2841 = vmatmul.mubr.f32.gmra.mrb[10].mxu1 %v1205_v26  ;;  %2579 = vmatprep.mubr.f32.mxu0 %v1221_v1  ;;  %v1440_v26 = vld [vmem:[#allocation8 + $0x570] sm:$0xff]  ;;  %v1479_v17 = vld [vmem:[#allocation8 + $0x6a8] sm:$0xff] }
 0x27c   :  { %9972 = vmatpush1.bf16.msra.mxu0 %v9971_v15  ;;  %2846 = vmatprep.mubr.f32.mxu1 %v1221_v1  ;;  %v9987_v15 = vpack.c.bf16 %v1438_v21, %v1434_v19  ;;  %v10155_v22 = vpack.c.bf16 %v1440_v26, %v1436_v23  ;;  %v1448_v1 = vld [vmem:[#allocation8 + $0x5b0] sm:$0xff]  ;;  %v10171_v19 = vpack.c.bf16 %v1472_v14, %v1468_v58  ;;  %v1474_v23 = vld [vmem:[#allocation8 + $0x680] sm:$0xff] }
 0x27d   :  { %10140 = vmatpush1.bf16.msra.mxu1 %v10139_v34  ;;  %9974 = vmatprep.subr.bf16.mxu0 %v9973_v39  ;;  %v9989_v34 = vpack.c.bf16 %v1447_v0, %v1443_v27  ;;  %v1442_v39 = vld [vmem:[#allocation8 + $0x580] sm:$0xff]  ;;  %v10005_v21 = vpack.c.bf16 %v1479_v17, %v1475_v31  ;;  %v1476_v26 = vld [vmem:[#allocation8 + $0x690] sm:$0xff] }
 0x27e   :  { %2580 = vmatmul.mubr.f32.gmra.mrb[20].mxu0 %v1218_v48  ;;  %10142 = vmatprep.subr.bf16.mxu1 %v10141_v38  ;;  %v1451_v38 = vld [vmem:[#allocation8 + $0x5c8] sm:$0xff]  ;;  %v9991_v45 = vpack.c.bf16 %v1446_v36, %v1442_v39  ;;  %v1480_v0 = vld [vmem:[#allocation8 + $0x6b0] sm:$0xff]  ;;  %v10009_v36 = vpack.c.bf16 %v1487_v33, %v1483_v47  ;;  %v1506_v58 = vld [vmem:[#allocation8 + $0x780] sm:$0xff] }
 0x27f   :  { %2847 = vmatmul.mubr.f32.gmra.mrb[12].mxu1 %v1218_v48  ;;  %2585 = vmatprep.mubr.f32.mxu0 %v1237_v60  ;;  %v10159_v48 = vpack.c.bf16 %v1448_v1, %v1444_v44  ;;  %v9993_v50 = vpack.c.bf16 %v1455_v41, %v1451_v38  ;;  %v10175_v39 = vpack.c.bf16 %v1480_v0, %v1476_v26  ;;  %v1482_v44 = vld [vmem:[#allocation8 + $0x6c0] sm:$0xff]  ;;  %v1484_v1 = vld [vmem:[#allocation8 + $0x6d0] sm:$0xff] }
 0x280   :  { %9976 = vmatpush1.bf16.msra.mxu0 %v9975_v57  ;;  %2852 = vmatprep.mubr.f32.mxu1 %v1237_v60  ;;  %v10161_v57 = vpack.c.bf16 %v1457_v43, %v1453_v42  ;;  %v9995_v60 = vpack.c.bf16 %v1454_v54, %v1450_v52  ;;  %v1488_v41 = vld [vmem:[#allocation8 + $0x6f0] sm:$0xff]  ;;  %v1491_v42 = vld [vmem:[#allocation8 + $0x708] sm:$0xff]  ;;  %v1514_v26 = vld [vmem:[#allocation8 + $0x7c0] sm:$0xff] }
 0x281   :  { %10144 = vmatpush1.bf16.msra.mxu1 %v10143_v56  ;;  %9978 = vmatprep.subr.bf16.mxu0 %v9977_v46  ;;  %v1456_v56 = vld [vmem:[#allocation8 + $0x5f0] sm:$0xff]  ;;  %v1459_v46 = vld [vmem:[#allocation8 + $0x608] sm:$0xff]  ;;  %v10179_v52 = vpack.c.bf16 %v1488_v41, %v1484_v1 }
 0x282   :  { %2586 = vmatmul.mubr.f32.gmra.mrb[22].mxu0 %v1235_v8  ;;  %10146 = vmatprep.subr.bf16.mxu1 %v10145_v62  ;;  %v10163_v62 = vpack.c.bf16 %v1456_v56, %v1452_v55  ;;  %v9997_v20 = vpack.c.bf16 %v1463_v61, %v1459_v46  ;;  %v1495_v43 = vld [vmem:[#allocation8 + $0x728] sm:$0xff]  ;;  %v1490_v55 = vld [vmem:[#allocation8 + $0x700] sm:$0xff]  ;;  %v1492_v56 = vld [vmem:[#allocation8 + $0x710] sm:$0xff] }
 0x283   :  { %2853 = vmatmul.mubr.f32.gmra.mrb[14].mxu1 %v1235_v8  ;;  %2656 = vmatprep.mubr.f32.mxu0 %v1197_v25  ;;  %v10165_v8 = vpack.c.bf16 %v1465_v59, %v1461_v16  ;;  %v10013_v54 = vpack.c.bf16 %v1495_v43, %v1491_v42  ;;  %v1496_v61 = vld [vmem:[#allocation8 + $0x730] sm:$0xff]  ;;  %v1499_v16 = vld [vmem:[#allocation8 + $0x748] sm:$0xff]  ;;  %v12266_v42 = vld [vmem:[#allocation2 + $0x40] sm:$0xff] }
 0x284   :  { %9980 = vmatpush1.bf16.msra.mxu0 %v9979_v28  ;;  %2923 = vmatprep.mubr.f32.mxu1 %v1197_v25  ;;  %v1471_v28 = vld [vmem:[#allocation8 + $0x668] sm:$0xff]  ;;  %v1466_v25 = vld [vmem:[#allocation8 + $0x640] sm:$0xff]  ;;  %v10183_v4 = vpack.c.bf16 %v1496_v61, %v1492_v56  ;;  %v1508_v14 = vld [vmem:[#allocation8 + $0x790] sm:$0xff]  ;;  %v1193_v43 = vrot.slane %v12266_v42, 7  ;;  %v1238_v42 = vrot.slane %v1145_v63, 7 }
 0x285   :  { %10148 = vmatpush1.bf16.msra.mxu1 %v10147_v32  ;;  %9982 = vmatprep.subr.bf16.mxu0 %v9981_v10  ;;  %v1469_v32 = vld [vmem:[#allocation8 + $0x658] sm:$0xff]  ;;  %v10001_v49 = vpack.c.bf16 %v1471_v28, %v1467_v9  ;;  %v1503_v59 = vld [vmem:[#allocation8 + $0x768] sm:$0xff]  ;;  %v1504_v28 = vld [vmem:[#allocation8 + $0x770] sm:$0xff] }
 0x286   :  { %10150 = vmatprep.subr.bf16.mxu1 %v10149_v37  ;;  %v1473_v10 = vld [vmem:[#allocation8 + $0x678] sm:$0xff]  ;;  %v1470_v37 = vld [vmem:[#allocation8 + $0x660] sm:$0xff]  ;;  %v10017_v5 = vpack.c.bf16 %v1503_v59, %v1499_v16  ;;  %v1512_v17 = vld [vmem:[#allocation8 + $0x7b0] sm:$0xff] }
 0x287   :  { %v10169_v53 = vpack.c.bf16 %v1473_v10, %v1469_v32  ;;  %v1507_v32 = vld [vmem:[#allocation8 + $0x788] sm:$0xff]  ;;  %v1516_v0 = vld [vmem:[#allocation8 + $0x7d0] sm:$0xff]  ;;  %v1533_v61 = vld [vmem:[#allocation8 + $0x858] sm:$0xff] }
 0x288   :  { %9984 = vmatpush1.bf16.msra.mxu0 %v9983_v51  ;;  %v1477_v51 = vld [vmem:[#allocation8 + $0x698] sm:$0xff]  ;;  %v1511_v10 = vld [vmem:[#allocation8 + $0x7a8] sm:$0xff]  ;;  %v1520_v33 = vld [vmem:[#allocation8 + $0x7f0] sm:$0xff] }
 0x289   :  { %10152 = vmatpush1.bf16.msra.mxu1 %v10151_v3  ;;  %9986 = vmatprep.subr.bf16.mxu0 %v9985_v7  ;;  %v1481_v3 = vld [vmem:[#allocation8 + $0x6b8] sm:$0xff]  ;;  %v10003_v7 = vpack.c.bf16 %v1470_v37, %v1466_v25  ;;  %v10187_v25 = vpack.c.bf16 %v1504_v28, %v1500_v18  ;;  %v10021_v37 = vpack.c.bf16 %v1511_v10, %v1507_v32  ;;  %v1127_v41 = vld [vmem:[#allocation2 + $0x70] sm:$0x7f]  ;;  %v1534_v18 = vld [vmem:[#allocation8 + $0x860] sm:$0xff] }
 0x28a   :  { %10154 = vmatprep.subr.bf16.mxu1 %v10153_v24  ;;  %v1478_v24 = vld [vmem:[#allocation8 + $0x6a0] sm:$0xff]  ;;  %v10173_v27 = vpack.c.bf16 %v1481_v3, %v1477_v51  ;;  %v1515_v51 = vld [vmem:[#allocation8 + $0x7c8] sm:$0xff]  ;;  %v10195_v1 = vpack.c.bf16 %v1520_v33, %v1516_v0  ;;  %v1537_v16 = vld [vmem:[#allocation8 + $0x878] sm:$0xff] }
 0x28b   :  { %v1519_v3 = vld [vmem:[#allocation8 + $0x7e8] sm:$0xff]  ;;  %v1134_v59 = vld [vmem:[#allocation2 + $0xd8] sm:$0x80]  ;;  %v10201_v32 = vpack.c.bf16 %v1537_v16, %v1533_v61  ;;  %v1544_v33 = vld [vmem:[#allocation8 + $0x8b0] sm:$0xff] }
 0x28c   :  { %9988 = vmatpush1.bf16.msra.mxu0 %v9987_v15  ;;  %v1485_v15 = vld [vmem:[#allocation8 + $0x6d8] sm:$0xff]  ;;  %v1531_v56 = vld [vmem:[#allocation8 + $0x848] sm:$0xff]  ;;  %v1225_v10 = vrot.slane %v1134_v59, 7 }
 0x28d   :  { %10156 = vmatpush1.bf16.msra.mxu1 %v10155_v22  ;;  %9990 = vmatprep.subr.bf16.mxu0 %v9989_v34  ;;  %v1489_v22 = vld [vmem:[#allocation8 + $0x6f8] sm:$0xff]  ;;  %v10007_v34 = vpack.c.bf16 %v1478_v24, %v1474_v23  ;;  %v10191_v23 = vpack.c.bf16 %v1512_v17, %v1508_v14  ;;  %v10025_v24 = vpack.c.bf16 %v1519_v3, %v1515_v51  ;;  %v1538_v51 = vld [vmem:[#allocation8 + $0x880] sm:$0xff] }
 0x28e   :  { %10158 = vmatprep.subr.bf16.mxu1 %v10157_v35  ;;  %v1486_v35 = vld [vmem:[#allocation8 + $0x6e0] sm:$0xff]  ;;  %v10177_v38 = vpack.c.bf16 %v1489_v22, %v1485_v15  ;;  %v1523_v15 = vld [vmem:[#allocation8 + $0x808] sm:$0xff]  ;;  %v1146_v14 = vld [vmem:[#allocation2 + $0x138] sm:$0x7f] }
 0x28f   :  { %v1527_v22 = vld [vmem:[#allocation8 + $0x828] sm:$0xff]  ;;  %v1561_v61 = vld [vmem:[#allocation8 + $0x938] sm:$0xff] }
 0x290   :  { %9992 = vmatpush1.bf16.msra.mxu0 %v9991_v45  ;;  %v1493_v45 = vld [vmem:[#allocation8 + $0x718] sm:$0xff] }
 0x291   :  { %10160 = vmatpush1.bf16.msra.mxu1 %v10159_v48  ;;  %9994 = vmatprep.subr.bf16.mxu0 %v9993_v50  ;;  %v1497_v48 = vld [vmem:[#allocation8 + $0x738] sm:$0xff]  ;;  %v10011_v50 = vpack.c.bf16 %v1486_v35, %v1482_v44 }
 0x292   :  { %10162 = vmatprep.subr.bf16.mxu1 %v10161_v57  ;;  %v1494_v57 = vld [vmem:[#allocation8 + $0x720] sm:$0xff]  ;;  %v10181_v46 = vpack.c.bf16 %v1497_v48, %v1493_v45  ;;  %v1128_v35 = vld [vmem:[#allocation2 + $0x78] sm:$0x7f] }
 0x293   :  { %v1577_v63 = vld [vmem:[#allocation8 + $0x9b8] sm:$0xff] }
 0x294   :  { %9996 = vmatpush1.bf16.msra.mxu0 %v9995_v60  ;;  %v1501_v60 = vld [vmem:[#allocation8 + $0x758] sm:$0xff] }
 0x295   :  { %10164 = vmatpush1.bf16.msra.mxu1 %v10163_v62  ;;  %9998 = vmatprep.subr.bf16.mxu0 %v9997_v20  ;;  %v1505_v62 = vld [vmem:[#allocation8 + $0x778] sm:$0xff]  ;;  %v10015_v20 = vpack.c.bf16 %v1494_v57, %v1490_v55  ;;  %v1210_v55 = vrot.slane %v1128_v35, 7  ;;  %v1528_v57 = vld [vmem:[#allocation8 + $0x830] sm:$0xff] }
 0x296   :  { %10166 = vmatprep.subr.bf16.mxu1 %v10165_v8  ;;  %v1502_v8 = vld [vmem:[#allocation8 + $0x760] sm:$0xff]  ;;  %v10185_v9 = vpack.c.bf16 %v1505_v62, %v1501_v60  ;;  %v1133_v62 = vld [vmem:[#allocation2 + $0xd0] sm:$0x80] }
 0x297   :  { %v1211_v28 = vsel %vm1185_vm4, %v1196_v2, %v1210_v55  ;;  %v1222_v17 = vrot.slane %v1133_v62, 7  ;;  %v1552_v55 = vld [vmem:[#allocation8 + $0x8f0] sm:$0xff] }
 0x298   :  { %10000 = vmatpush1.bf16.msra.mxu0 %v9999_v11  ;;  %v1509_v11 = vld [vmem:[#allocation8 + $0x798] sm:$0xff] }
 0x299   :  { %10168 = vmatpush1.bf16.msra.mxu1 %v10167_v12  ;;  %10002 = vmatprep.subr.bf16.mxu0 %v10001_v49  ;;  %v1513_v12 = vld [vmem:[#allocation8 + $0x7b8] sm:$0xff]  ;;  %v10019_v49 = vpack.c.bf16 %v1502_v8, %v1498_v6  ;;  %v1530_v8 = vld [vmem:[#allocation8 + $0x840] sm:$0xff] }
 0x29a   :  { %10170 = vmatprep.subr.bf16.mxu1 %v10169_v53  ;;  %v1510_v53 = vld [vmem:[#allocation8 + $0x7a0] sm:$0xff]  ;;  %v10189_v31 = vpack.c.bf16 %v1513_v12, %v1509_v11 }
 0x29b   :  { %v12267_v11 = vld [vmem:[#allocation2 + $0x108] sm:$0xff] }
 0x29c   :  { %10004 = vmatpush1.bf16.msra.mxu0 %v10003_v7  ;;  %v1517_v7 = vld [vmem:[#allocation8 + $0x7d8] sm:$0xff]  ;;  %v1226_v12 = vrot.slane %v12267_v11, 7 }
 0x29d   :  { %10172 = vmatpush1.bf16.msra.mxu1 %v10171_v19  ;;  %10006 = vmatprep.subr.bf16.mxu0 %v10005_v21  ;;  %v1521_v19 = vld [vmem:[#allocation8 + $0x7f8] sm:$0xff]  ;;  %v10023_v21 = vpack.c.bf16 %v1510_v53, %v1506_v58 }
 0x29e   :  { %10174 = vmatprep.subr.bf16.mxu1 %v10173_v27  ;;  %v1518_v27 = vld [vmem:[#allocation8 + $0x7e0] sm:$0xff]  ;;  %v10193_v47 = vpack.c.bf16 %v1521_v19, %v1517_v7  ;;  %v1541_v58 = vld [vmem:[#allocation8 + $0x898] sm:$0xff] }
 0x29f   :  { %v10027_v44 = vpack.c.bf16 %v1518_v27, %v1514_v26  ;;  %v1545_v53 = vld [vmem:[#allocation8 + $0x8b8] sm:$0xff]  ;;  %v1118_v26 = vld [vmem:[#allocation2 + $0x28] sm:$0x80]  ;;  %v1227_v27 = vsel %vm1185_vm4, %v1225_v10, %v1226_v12 }
 0x2a0   :  { %10008 = vmatpush1.bf16.msra.mxu0 %v10007_v34  ;;  %v1115_v34 = vld [vmem:[#allocation2 + $0x10] sm:$0x80]  ;;  %v12268_v7 = vld [vmem:[#allocation2 + $0x100] sm:$0xff]  ;;  %v10205_v0 = vpack.c.bf16 %v1545_v53, %v1541_v58 }
 0x2a1   :  { %10176 = vmatpush1.bf16.msra.mxu1 %v10175_v39  ;;  %10010 = vmatprep.subr.bf16.mxu0 %v10009_v36  ;;  %v1525_v39 = vld [vmem:[#allocation8 + $0x818] sm:$0xff]  ;;  %v1192_v45 = vrot.slane %v1115_v34, 7  ;;  %v1223_v19 = vrot.slane %v12268_v7, 7  ;;  %v1564_v58 = vld [vmem:[#allocation8 + $0x950] sm:$0xff] }
 0x2a2   :  { %10178 = vmatprep.subr.bf16.mxu1 %v10177_v38  ;;  %v1529_v36 = vld [vmem:[#allocation8 + $0x838] sm:$0xff]  ;;  %v10029_v38 = vpack.c.bf16 %v1527_v22, %v1523_v15  ;;  %v1547_v15 = vld [vmem:[#allocation8 + $0x8c8] sm:$0xff] }
 0x2a3   :  { %v10197_v48 = vpack.c.bf16 %v1529_v36, %v1525_v39  ;;  %v1551_v22 = vld [vmem:[#allocation8 + $0x8e8] sm:$0xff]  ;;  %v1549_v34 = vld [vmem:[#allocation8 + $0x8d8] sm:$0xff] }
 0x2a4   :  { %10012 = vmatpush1.bf16.msra.mxu0 %v10011_v50  ;;  %v1522_v50 = vld [vmem:[#allocation8 + $0x800] sm:$0xff]  ;;  %v1553_v39 = vld [vmem:[#allocation8 + $0x8f8] sm:$0xff] }
 0x2a5   :  { %10180 = vmatpush1.bf16.msra.mxu1 %v10179_v52  ;;  %10014 = vmatprep.subr.bf16.mxu0 %v10013_v54  ;;  %v1526_v52 = vld [vmem:[#allocation8 + $0x820] sm:$0xff]  ;;  %v1524_v54 = vld [vmem:[#allocation8 + $0x810] sm:$0xff]  ;;  %v1569_v10 = vld [vmem:[#allocation8 + $0x978] sm:$0xff] }
 0x2a6   :  { %10182 = vmatprep.subr.bf16.mxu1 %v10181_v46  ;;  %v1535_v46 = vld [vmem:[#allocation8 + $0x868] sm:$0xff]  ;;  %v10031_v60 = vpack.c.bf16 %v1526_v52, %v1522_v50  ;;  %v13026_v36 = vld [vmem:[#allocation2 + $0x58] sm:$0xff] }
 0x2a7   :  { %v10033_v6 = vpack.c.bf16 %v1535_v46, %v1531_v56  ;;  %v1548_v50 = vld [vmem:[#allocation8 + $0x8d0] sm:$0xff]  ;;  %v1559_v56 = vld [vmem:[#allocation8 + $0x928] sm:$0xff]  ;;  %v1557_v46 = vld [vmem:[#allocation8 + $0x918] sm:$0xff] }
 0x2a8   :  { %10016 = vmatpush1.bf16.msra.mxu0 %v10015_v20  ;;  %v1194_v20 = vsel %vm1185_vm4, %v1192_v45, %v1193_v43  ;;  %v1546_v45 = vld [vmem:[#allocation8 + $0x8c0] sm:$0xff]  ;;  %v10211_v62 = vpack.c.bf16 %v1552_v55, %v1548_v50 }
 0x2a9   :  { %10184 = vmatpush1.bf16.msra.mxu1 %v10183_v4  ;;  %10018 = vmatprep.subr.bf16.mxu0 %v10017_v5  ;;  %v10199_v4 = vpack.c.bf16 %v1528_v57, %v1524_v54  ;;  %v1208_v5 = vrot.slane %v1127_v41, 7  ;;  %v10209_v54 = vpack.c.bf16 %v1553_v39, %v1549_v34  ;;  %v1555_v57 = vld [vmem:[#allocation8 + $0x908] sm:$0xff]  ;;  %v1578_v39 = vld [vmem:[#allocation8 + $0x9c0] sm:$0xff] }
 0x2aa   :  { %10186 = vmatprep.subr.bf16.mxu1 %v10185_v9  ;;  %v1532_v9 = vld [vmem:[#allocation8 + $0x850] sm:$0xff]  ;;  %v1586_v55 = vld [vmem:[#allocation8 + $0xa00] sm:$0xff] }
 0x2ab   :  { %v1209_v2 = vsel %vm1185_vm4, %v1193_v43, %v1208_v5  ;;  %v10041_v43 = vpack.c.bf16 %v1551_v22, %v1547_v15  ;;  %v1558_v5 = vld [vmem:[#allocation8 + $0x920] sm:$0xff] }
 0x2ac   :  { %10020 = vmatpush1.bf16.msra.mxu0 %v10019_v49  ;;  %v1536_v49 = vld [vmem:[#allocation8 + $0x870] sm:$0xff] }
 0x2ad   :  { %10188 = vmatpush1.bf16.msra.mxu1 %v10187_v25  ;;  %10022 = vmatprep.subr.bf16.mxu0 %v10021_v37  ;;  %v1539_v25 = vld [vmem:[#allocation8 + $0x888] sm:$0xff]  ;;  %v10203_v3 = vpack.c.bf16 %v1536_v49, %v1532_v9 }
 0x2ae   :  { %10190 = vmatprep.subr.bf16.mxu1 %v10189_v31  ;;  %v1543_v37 = vld [vmem:[#allocation8 + $0x8a8] sm:$0xff]  ;;  %v10035_v31 = vpack.c.bf16 %v1534_v18, %v1530_v8  ;;  %v10213_v8 = vpack.c.bf16 %v1561_v61, %v1557_v46  ;;  %v1560_v18 = vld [vmem:[#allocation8 + $0x930] sm:$0xff] }
 0x2af   :  { %v1563_v9 = vld [vmem:[#allocation8 + $0x948] sm:$0xff]  ;;  %v1592_v61 = vld [vmem:[#allocation8 + $0xa30] sm:$0xff] }
 0x2b0   :  { %10024 = vmatpush1.bf16.msra.mxu0 %v10023_v21  ;;  %v10037_v21 = vpack.c.bf16 %v1543_v37, %v1539_v25  ;;  %v1562_v25 = vld [vmem:[#allocation8 + $0x940] sm:$0xff] }
 0x2b1   :  { %10192 = vmatpush1.bf16.msra.mxu1 %v10191_v23  ;;  %10026 = vmatprep.subr.bf16.mxu0 %v10025_v24  ;;  %v1542_v23 = vld [vmem:[#allocation8 + $0x8a0] sm:$0xff]  ;;  %v1540_v24 = vld [vmem:[#allocation8 + $0x890] sm:$0xff] }
 0x2b2   :  { %10194 = vmatprep.subr.bf16.mxu1 %v10193_v47  ;;  %v1240_v47 = vrot.slane %v1146_v14, 7  ;;  %v10039_v35 = vpack.c.bf16 %v1542_v23, %v1538_v51  ;;  %v10207_v41 = vpack.c.bf16 %v1544_v33, %v1540_v24  ;;  %v1566_v37 = vld [vmem:[#allocation8 + $0x960] sm:$0xff]  ;;  %v1568_v14 = vld [vmem:[#allocation8 + $0x970] sm:$0xff]  ;;  %v1573_v51 = vld [vmem:[#allocation8 + $0x998] sm:$0xff] }
 0x2b3   :  { %v1572_v23 = vld [vmem:[#allocation8 + $0x990] sm:$0xff]  ;;  %v10221_v24 = vpack.c.bf16 %v1577_v63, %v1573_v51  ;;  %v1585_v33 = vld [vmem:[#allocation8 + $0x9f8] sm:$0xff]  ;;  %v3191_v51 = vld [vmem:[#allocation8 + $0x1500] sm:$0xff] }
 0x2b4   :  { %10028 = vmatpush1.bf16.msra.mxu0 %v10027_v44  ;;  %v1202_v44 = vrot.slane %v13026_v36, 7  ;;  %v1241_v52 = vsel %vm1185_vm4, %v1226_v12, %v1240_v47  ;;  %v1581_v47 = vld [vmem:[#allocation8 + $0x9d8] sm:$0xff]  ;;  %v3195_v63 = vld [vmem:[#allocation8 + $0x1520] sm:$0xff] }
 0x2b5   :  { %10196 = vmatpush1.bf16.msra.mxu1 %v10195_v1  ;;  %10030 = vmatprep.subr.bf16.mxu0 %v10029_v38  ;;  %v1201_v1 = vrot.slane %v1118_v26, 7  ;;  %v1224_v38 = vsel %vm1185_vm4, %v1222_v17, %v1223_v19  ;;  %v1575_v17 = vld [vmem:[#allocation8 + $0x9a8] sm:$0xff]  ;;  %v1576_v26 = vld [vmem:[#allocation8 + $0x9b0] sm:$0xff] }
 0x2b6   :  { %10198 = vmatprep.subr.bf16.mxu1 %v10197_v48  ;;  %v1550_v48 = vld [vmem:[#allocation8 + $0x8e0] sm:$0xff]  ;;  %v10223_v22 = vpack.c.bf16 %v1576_v26, %v1572_v23  ;;  %v3200_v23 = vld [vmem:[#allocation8 + $0x1548] sm:$0xff] }
 0x2b7   :  { %2657 = vmatmul.mubr.f32.vlgmr.msra.gmra.mrb[16].mxu0 %v1194_v20  ;;  %v10043_v16 = vpack.c.bf16 %v1550_v48, %v1546_v45  ;;  %v1203_v59 = vsel %vm1185_vm4, %v1201_v1, %v1202_v44  ;;  %v1580_v1 = vld [vmem:[#allocation8 + $0x9d0] sm:$0xff]  ;;  %v1589_v45 = vld [vmem:[#allocation8 + $0xa18] sm:$0xff]  ;;  %v1136_v26 = vld [vmem:[#allocation2 + $0xe8] sm:$0x80] }
 0x2b8   :  { %2924 = vmatmul.mubr.f32.vlgmr.msra.gmra.mrb[8].mxu1 %v1194_v20  ;;  %2662 = vmatprep.mubr.f32.mxu0 %v1211_v28  ;;  %v10045_v20 = vpack.c.bf16 %v1559_v56, %v1555_v57  ;;  %v1593_v48 = vld [vmem:[#allocation8 + $0xa38] sm:$0xff]  ;;  %v1590_v57 = vld [vmem:[#allocation8 + $0xa20] sm:$0xff]  ;;  %v1588_v56 = vld [vmem:[#allocation8 + $0xa10] sm:$0xff] }
 0x2b9   :  { %10032 = vmatpush1.bf16.msra.mxu0 %v10031_v60  ;;  %2929 = vmatprep.mubr.f32.mxu1 %v1211_v28  ;;  %v1239_v60 = vsel %vm1185_vm4, %v1223_v19, %v1238_v42  ;;  %v1567_v28 = vld [vmem:[#allocation8 + $0x968] sm:$0xff]  ;;  %v1570_v19 = vld [vmem:[#allocation8 + $0x980] sm:$0xff]  ;;  %v10229_v46 = vpack.c.bf16 %v1593_v48, %v1589_v45  ;;  %v1231_v45 = vrot.slane %v1136_v26, 7  ;;  %v3230_v26 = vld [vmem:[#allocation8 + $0x1638] sm:$0xff] }
 0x2ba   :  { %10200 = vmatpush1.bf16.msra.mxu1 %v10199_v4  ;;  %10034 = vmatprep.subr.bf16.mxu0 %v10033_v6  ;;  %v1554_v4 = vld [vmem:[#allocation8 + $0x900] sm:$0xff]  ;;  %v1556_v6 = vld [vmem:[#allocation8 + $0x910] sm:$0xff]  ;;  %v10049_v49 = vpack.c.bf16 %v1567_v28, %v1563_v9  ;;  %v1587_v42 = vld [vmem:[#allocation8 + $0xa08] sm:$0xff] }
 0x2bb   :  { %2663 = vmatmul.mubr.f32.gmra.mrb[18].mxu0 %v1209_v2  ;;  %10202 = vmatprep.subr.bf16.mxu1 %v10201_v32  ;;  %v1565_v32 = vld [vmem:[#allocation8 + $0x958] sm:$0xff]  ;;  %v10047_v11 = vpack.c.bf16 %v1558_v5, %v1554_v4  ;;  %v10215_v12 = vpack.c.bf16 %v1560_v18, %v1556_v6  ;;  %v1117_v4 = vld [vmem:[#allocation2 + $0x20] sm:$0x80]  ;;  %v10231_v5 = vpack.c.bf16 %v1592_v61, %v1588_v56  ;;  %v1596_v9 = vld [vmem:[#allocation8 + $0xa50] sm:$0xff] }
 0x2bc   :  { %2930 = vmatmul.mubr.f32.gmra.mrb[10].mxu1 %v1209_v2  ;;  %2668 = vmatprep.mubr.f32.mxu0 %v1227_v27  ;;  %v10217_v53 = vpack.c.bf16 %v1569_v10, %v1565_v32  ;;  %v10051_v2 = vpack.c.bf16 %v1566_v37, %v1562_v25  ;;  %v1598_v18 = vld [vmem:[#allocation8 + $0xa60] sm:$0xff]  ;;  %v1600_v32 = vld [vmem:[#allocation8 + $0xa70] sm:$0xff]  ;;  %v3192_v10 = vld [vmem:[#allocation8 + $0x1508] sm:$0xff] }
 0x2bd   :  { %10036 = vmatpush1.bf16.msra.mxu0 %v10035_v31  ;;  %2935 = vmatprep.mubr.f32.mxu1 %v1227_v27  ;;  %v1571_v31 = vld [vmem:[#allocation8 + $0x988] sm:$0xff]  ;;  %v1135_v48 = vld [vmem:[#allocation2 + $0xe0] sm:$0x80]  ;;  %v3210_v56 = vld [vmem:[#allocation8 + $0x1598] sm:$0xff] }
 0x2be   :  { %10204 = vmatpush1.bf16.msra.mxu1 %v10203_v3  ;;  %10038 = vmatprep.subr.bf16.mxu0 %v10037_v21  ;;  %v10219_v3 = vpack.c.bf16 %v1568_v14, %v1564_v58  ;;  %v10053_v7 = vpack.c.bf16 %v1575_v17, %v1571_v31  ;;  %v1574_v21 = vld [vmem:[#allocation8 + $0x9a0] sm:$0xff]  ;;  %v1579_v27 = vld [vmem:[#allocation8 + $0x9c8] sm:$0xff]  ;;  %v10235_v14 = vpack.c.bf16 %v1600_v32, %v1596_v9  ;;  %v1198_v31 = vrot.slane %v1117_v4, 7 }
 0x2bf   :  { %2669 = vmatmul.mubr.f32.gmra.mrb[20].mxu0 %v1224_v38  ;;  %10206 = vmatprep.subr.bf16.mxu1 %v10205_v0  ;;  %v1583_v0 = vld [vmem:[#allocation8 + $0x9e8] sm:$0xff]  ;;  %v10055_v15 = vpack.c.bf16 %v1574_v21, %v1570_v19  ;;  %v1129_v21 = vld [vmem:[#allocation2 + $0x80] sm:$0x7f]  ;;  %v1228_v61 = vrot.slane %v1135_v48, 7 }
 0x2c0   :  { %2936 = vmatmul.mubr.f32.gmra.mrb[12].mxu1 %v1224_v38  ;;  %2674 = vmatprep.mubr.f32.mxu0 %v1241_v52  ;;  %v10057_v34 = vpack.c.bf16 %v1583_v0, %v1579_v27  ;;  %v10225_v38 = vpack.c.bf16 %v1585_v33, %v1581_v47  ;;  %v1130_v25 = vld [vmem:[#allocation2 + $0x88] sm:$0x7f]  ;;  %v12270_v58 = vld [vmem:[#allocation2 + $0x50] sm:$0xff]  ;;  %v10239_v27 = vpack.c.bf16 %v3195_v63, %v3191_v51  ;;  %v3202_v0 = vld [vmem:[#allocation8 + $0x1558] sm:$0xff] }
 0x2c1   :  { %10040 = vmatpush1.bf16.msra.mxu0 %v10039_v35  ;;  %2941 = vmatprep.mubr.f32.mxu1 %v1241_v52  ;;  %v1582_v35 = vld [vmem:[#allocation8 + $0x9e0] sm:$0xff]  ;;  %v1214_v19 = vrot.slane %v1130_v25, 7  ;;  %v3206_v47 = vld [vmem:[#allocation8 + $0x1578] sm:$0xff]  ;;  %v3220_v32 = vld [vmem:[#allocation8 + $0x15e8] sm:$0xff] }
 0x2c2   :  { %10208 = vmatpush1.bf16.msra.mxu1 %v10207_v41  ;;  %10042 = vmatprep.subr.bf16.mxu0 %v10041_v43  ;;  %v1584_v41 = vld [vmem:[#allocation8 + $0x9f0] sm:$0xff]  ;;  %v1591_v43 = vld [vmem:[#allocation8 + $0xa28] sm:$0xff]  ;;  %v10059_v50 = vpack.c.bf16 %v1582_v35, %v1578_v39  ;;  %v3203_v39 = vld [vmem:[#allocation8 + $0x1560] sm:$0xff] }
 0x2c3   :  { %2675 = vmatmul.mubr.f32.gmra.mrb[22].mxu0 %v1239_v60  ;;  %10210 = vmatprep.subr.bf16.mxu1 %v10209_v54  ;;  %v10227_v52 = vpack.c.bf16 %v1584_v41, %v1580_v1  ;;  %v10061_v54 = vpack.c.bf16 %v1591_v43, %v1587_v42  ;;  %v12271_v35 = vld [vmem:[#allocation2 + $0x118] sm:$0xff]  ;;  %v1147_v9 = vld [vmem:[#allocation2 + $0x140] sm:$0x7f] }
 0x2c4   :  { %2942 = vmatmul.mubr.f32.gmra.mrb[14].mxu1 %v1239_v60  ;;  %8960 = vmatprep.mubr.msk.f32.mxu0 %vm140_vm3, %v1203_v59  ;;  %v1597_v60 = vld [vmem:[#allocation8 + $0xa58] sm:$0xff]  ;;  %v1232_v1 = vrot.slane %v12271_v35, 7  ;;  %v3201_v42 = vld [vmem:[#allocation8 + $0x1550] sm:$0xff]  ;;  %v3215_v25 = vld [vmem:[#allocation8 + $0x15c0] sm:$0xff] }
 0x2c5   :  { %10044 = vmatpush1.bf16.msra.mxu0 %v10043_v16  ;;  %8964 = vmatprep.mubr.msk.f32.mxu1 %vm140_vm3, %v1203_v59  ;;  %v1595_v16 = vld [vmem:[#allocation8 + $0xa48] sm:$0xff]  ;;  %v3205_v43 = vld [vmem:[#allocation8 + $0x1570] sm:$0xff] }
 0x2c6   :  { %10212 = vmatpush1.bf16.msra.mxu1 %v10211_v62  ;;  %10046 = vmatprep.subr.bf16.mxu0 %v10045_v20  ;;  %v1599_v59 = vld [vmem:[#allocation8 + $0xa68] sm:$0xff]  ;;  %v1601_v62 = vld [vmem:[#allocation8 + $0xa78] sm:$0xff]  ;;  %v10063_v20 = vpack.c.bf16 %v1590_v57, %v1586_v55  ;;  %v3217_v51 = vld [vmem:[#allocation8 + $0x15d0] sm:$0xff] }
 0x2c7   :  { %10214 = vmatprep.subr.bf16.mxu1 %v10213_v8  ;;  %v10065_v6 = vpack.c.bf16 %v1599_v59, %v1595_v16  ;;  %v1594_v8 = vld [vmem:[#allocation8 + $0xa40] sm:$0xff]  ;;  %v10233_v28 = vpack.c.bf16 %v1601_v62, %v1597_v60  ;;  %v1233_v60 = vsel %vm1185_vm4, %v1231_v45, %v1232_v1  ;;  %v12272_v62 = vld [vmem:[#allocation2 + $0x110] sm:$0xff] }
 0x2c8   :  { %v10067_v37 = vpack.c.bf16 %v1598_v18, %v1594_v8  ;;  %v1148_v55 = vld [vmem:[#allocation2 + $0x148] sm:$0x7f]  ;;  %v3221_v63 = vld [vmem:[#allocation8 + $0x15f0] sm:$0xff] }
 0x2c9   :  { %10048 = vmatpush1.bf16.msra.mxu0 %v10047_v11  ;;  %v3196_v11 = vld [vmem:[#allocation8 + $0x1528] sm:$0xff]  ;;  %v3207_v16 = vld [vmem:[#allocation8 + $0x1580] sm:$0xff]  ;;  %v1244_v8 = vrot.slane %v1148_v55, 7  ;;  %v3233_v55 = vld [vmem:[#allocation8 + $0x1650] sm:$0xff] }
 0x2ca   :  { %10216 = vmatpush1.bf16.msra.mxu1 %v10215_v12  ;;  %10050 = vmatprep.subr.bf16.mxu0 %v10049_v49  ;;  %v3194_v12 = vld [vmem:[#allocation8 + $0x1518] sm:$0xff]  ;;  %v10237_v17 = vpack.c.bf16 %v3196_v11, %v3192_v10  ;;  %v3211_v59 = vld [vmem:[#allocation8 + $0x15a0] sm:$0xff]  ;;  %v3232_v35 = vld [vmem:[#allocation8 + $0x1648] sm:$0xff] }
 0x2cb   :  { %10218 = vmatprep.subr.bf16.mxu1 %v10217_v53  ;;  %v3198_v49 = vld [vmem:[#allocation8 + $0x1538] sm:$0xff]  ;;  %v1199_v53 = vrot.slane %v12270_v58, 7  ;;  %v10247_v10 = vpack.c.bf16 %v3211_v59, %v3207_v16  ;;  %v13046_v58 = vld [vmem:[#allocation2 + $0x68] sm:$0xff] }
 0x2cc   :  { %v3218_v11 = vld [vmem:[#allocation8 + $0x15d8] sm:$0xff] }
 0x2cd   :  { %10052 = vmatpush1.bf16.msra.mxu0 %v10051_v2  ;;  %v10405_v2 = vpack.c.bf16 %v3198_v49, %v3194_v12  ;;  %v1200_v33 = vsel %vm1185_vm4, %v1198_v31, %v1199_v53  ;;  %v3222_v12 = vld [vmem:[#allocation8 + $0x15f8] sm:$0xff]  ;;  %v1242_v31 = vrot.slane %v1147_v9, 7 }
 0x2ce   :  { %10220 = vmatpush1.bf16.msra.mxu1 %v10219_v3  ;;  %10054 = vmatprep.subr.bf16.mxu0 %v10053_v7  ;;  %v3193_v3 = vld [vmem:[#allocation8 + $0x1510] sm:$0xff]  ;;  %v3250_v9 = vld [vmem:[#allocation8 + $0x16d8] sm:$0xff] }
 0x2cf   :  { %10222 = vmatprep.subr.bf16.mxu1 %v10221_v24  ;;  %v3197_v7 = vld [vmem:[#allocation8 + $0x1530] sm:$0xff]  ;;  %v3204_v24 = vld [vmem:[#allocation8 + $0x1568] sm:$0xff] }
 0x2d0   :  { %v10241_v41 = vpack.c.bf16 %v3204_v24, %v3200_v23  ;;  %v3114_v23 = vrot.slane %v13046_v58, 1  ;;  %v3226_v24 = vld [vmem:[#allocation8 + $0x1618] sm:$0xff] }
 0x2d1   :  { %10056 = vmatpush1.bf16.msra.mxu0 %v10055_v15  ;;  %v10407_v15 = vpack.c.bf16 %v3197_v7, %v3193_v3  ;;  %v3038_v3 = vld [vmem:[#allocation2 + $0x38] sm:$0xfe]  ;;  %v3224_v7 = vld [vmem:[#allocation8 + $0x1608] sm:$0xff] }
 0x2d2   :  { %10224 = vmatpush1.bf16.msra.mxu1 %v10223_v22  ;;  %10058 = vmatprep.subr.bf16.mxu0 %v10057_v34  ;;  %v1212_v22 = vrot.slane %v1129_v21, 7  ;;  %v3199_v34 = vld [vmem:[#allocation8 + $0x1540] sm:$0xff] }
 0x2d3   :  { %10226 = vmatprep.subr.bf16.mxu1 %v10225_v38  ;;  %v1215_v38 = vsel %vm1185_vm4, %v1202_v44, %v1214_v19  ;;  %v10243_v57 = vpack.c.bf16 %v3203_v39, %v3199_v34  ;;  %v10411_v44 = vpack.c.bf16 %v3205_v43, %v3201_v42  ;;  %v3228_v19 = vld [vmem:[#allocation8 + $0x1628] sm:$0xff]  ;;  %v3229_v39 = vld [vmem:[#allocation8 + $0x1630] sm:$0xff]  ;;  %v3238_v42 = vld [vmem:[#allocation8 + $0x1678] sm:$0xff] }
 0x2d4   :  { %v1213_v36 = vsel %vm1185_vm4, %v1199_v53, %v1212_v22  ;;  %v3113_v22 = vrot.slane %v3038_v3, 1  ;;  %v10253_v34 = vpack.c.bf16 %v3228_v19, %v3224_v7  ;;  %v3255_v7 = vld [vmem:[#allocation8 + $0x1700] sm:$0xff] }
 0x2d5   :  { %10060 = vmatpush1.bf16.msra.mxu0 %v10059_v50  ;;  %v10409_v50 = vpack.c.bf16 %v3206_v47, %v3202_v0  ;;  %v3223_v0 = vld [vmem:[#allocation8 + $0x1600] sm:$0xff] }
 0x2d6   :  { %10228 = vmatpush1.bf16.msra.mxu1 %v10227_v52  ;;  %10062 = vmatprep.subr.bf16.mxu0 %v10061_v54  ;;  %v3208_v52 = vld [vmem:[#allocation8 + $0x1588] sm:$0xff]  ;;  %v3227_v47 = vld [vmem:[#allocation8 + $0x1620] sm:$0xff]  ;;  %v3115_v43 = vsel %vm3109_vm5, %v3113_v22, %v3114_v23 }
 0x2d7   :  { %10230 = vmatprep.subr.bf16.mxu1 %v10229_v46  ;;  %v3212_v54 = vld [vmem:[#allocation8 + $0x15a8] sm:$0xff]  ;;  %v3214_v46 = vld [vmem:[#allocation8 + $0x15b8] sm:$0xff]  ;;  %v10255_v45 = vpack.c.bf16 %v3227_v47, %v3223_v0  ;;  %v3259_v19 = vld [vmem:[#allocation8 + $0x1720] sm:$0xff] }
 0x2d8   :  { %v10245_v4 = vpack.c.bf16 %v3212_v54, %v3208_v52  ;;  %v10413_v18 = vpack.c.bf16 %v3214_v46, %v3210_v56  ;;  %v3231_v52 = vld [vmem:[#allocation8 + $0x1640] sm:$0xff]  ;;  %v3237_v56 = vld [vmem:[#allocation8 + $0x1670] sm:$0xff]  ;;  %v3240_v46 = vld [vmem:[#allocation8 + $0x1688] sm:$0xff] }
 0x2d9   :  { %10064 = vmatpush1.bf16.msra.mxu0 %v10063_v20  ;;  %v1229_v20 = vrot.slane %v12272_v62, 7  ;;  %v3235_v54 = vld [vmem:[#allocation8 + $0x1660] sm:$0xff]  ;;  %v10427_v59 = vpack.c.bf16 %v3237_v56, %v3233_v55  ;;  %v3268_v0 = vld [vmem:[#allocation8 + $0x1768] sm:$0xff]  ;;  %v3266_v47 = vld [vmem:[#allocation8 + $0x1758] sm:$0xff] }
 0x2da   :  { %10232 = vmatpush1.bf16.msra.mxu1 %v10231_v5  ;;  %10066 = vmatprep.subr.bf16.mxu0 %v10065_v6  ;;  %v3209_v5 = vld [vmem:[#allocation8 + $0x1590] sm:$0xff]  ;;  %v10259_v16 = vpack.c.bf16 %v3235_v54, %v3231_v52  ;;  %v3239_v62 = vld [vmem:[#allocation8 + $0x1680] sm:$0xff] }
 0x2db   :  { %10234 = vmatprep.subr.bf16.mxu1 %v10233_v28  ;;  %v3213_v6 = vld [vmem:[#allocation8 + $0x15b0] sm:$0xff]  ;;  %v3216_v28 = vld [vmem:[#allocation8 + $0x15c8] sm:$0xff]  ;;  %v1230_v53 = vsel %vm1185_vm4, %v1228_v61, %v1229_v20  ;;  %v3246_v61 = vld [vmem:[#allocation8 + $0x16b8] sm:$0xff] }
 0x2dc   :  { %v10415_v49 = vpack.c.bf16 %v3213_v6, %v3209_v5  ;;  %v3245_v6 = vld [vmem:[#allocation8 + $0x16b0] sm:$0xff]  ;;  %v3271_v55 = vld [vmem:[#allocation8 + $0x1780] sm:$0xff] }
 0x2dd   :  { %10068 = vmatpush1.bf16.msra.mxu0 %v10067_v37  ;;  %v3219_v37 = vld [vmem:[#allocation8 + $0x15e0] sm:$0xff]  ;;  %v3273_v56 = vld [vmem:[#allocation8 + $0x1790] sm:$0xff] }
 0x2de   :  { %10236 = vmatpush1.bf16.msra.mxu1 %v10235_v14  ;;  %10238 = vmatprep.subr.bf16.mxu0 %v10237_v17  ;;  %v1245_v14 = vsel %vm1185_vm4, %v1232_v1, %v1244_v8  ;;  %v10249_v17 = vpack.c.bf16 %v3220_v32, %v3216_v28  ;;  %v10251_v21 = vpack.c.bf16 %v3219_v37, %v3215_v25  ;;  %v3236_v1 = vld [vmem:[#allocation8 + $0x1668] sm:$0xff]  ;;  %v3254_v28 = vld [vmem:[#allocation8 + $0x16f8] sm:$0xff]  ;;  %v3249_v25 = vld [vmem:[#allocation8 + $0x16d0] sm:$0xff] }
 0x2df   :  { %10406 = vmatprep.subr.bf16.mxu1 %v10405_v2  ;;  %v10417_v2 = vpack.c.bf16 %v3222_v12, %v3218_v11  ;;  %v3248_v8 = vld [vmem:[#allocation8 + $0x16c8] sm:$0xff]  ;;  %v3247_v12 = vld [vmem:[#allocation8 + $0x16c0] sm:$0xff]  ;;  %v10433_v37 = vpack.c.bf16 %v3254_v28, %v3250_v9 }
 0x2e0   :  { %2746 = vmatmul.mubr.f32.vlgmr.msra.gmra.mrb[16].mxu0 %v1200_v33  ;;  %v3288_v9 = vld [vmem:[#allocation8 + $0x1808] sm:$0xff] }
 0x2e1   :  { %3013 = vmatmul.mubr.f32.vlgmr.msra.gmra.mrb[8].mxu1 %v1200_v33  ;;  %10240 = vmatpush1.bf16.msra.mxu0 %v10239_v27  ;;  %v10419_v27 = vpack.c.bf16 %v3221_v63, %v3217_v51  ;;  %v3225_v33 = vld [vmem:[#allocation8 + $0x1610] sm:$0xff]  ;;  %v3262_v51 = vld [vmem:[#allocation8 + $0x1738] sm:$0xff]  ;;  %v3292_v28 = vld [vmem:[#allocation8 + $0x1828] sm:$0xff] }
 0x2e2   :  { %10408 = vmatpush1.bf16.msra.mxu1 %v10407_v15  ;;  %8961 = vmatprep.mubr.msk.f32.mxu0 %vm140_vm3, %v1215_v38  ;;  %v1243_v15 = vsel %vm1185_vm4, %v1229_v20, %v1242_v31  ;;  %v10423_v48 = vpack.c.bf16 %v3229_v39, %v3225_v33  ;;  %v3243_v20 = vld [vmem:[#allocation8 + $0x16a0] sm:$0xff]  ;;  %v3260_v31 = vld [vmem:[#allocation8 + $0x1728] sm:$0xff]  ;;  %v3270_v33 = vld [vmem:[#allocation8 + $0x1778] sm:$0xff] }
 0x2e3   :  { %8965 = vmatprep.mubr.msk.f32.mxu1 %vm140_vm3, %v1215_v38  ;;  %10242 = vmatprep.subr.bf16.mxu0 %v10241_v41  ;;  %v10421_v38 = vpack.c.bf16 %v3230_v26, %v3226_v24  ;;  %v3234_v41 = vld [vmem:[#allocation8 + $0x1658] sm:$0xff]  ;;  %v10263_v32 = vpack.c.bf16 %v3243_v20, %v3239_v62  ;;  %v3261_v26 = vld [vmem:[#allocation8 + $0x1730] sm:$0xff]  ;;  %v3263_v39 = vld [vmem:[#allocation8 + $0x1740] sm:$0xff] }
 0x2e4   :  { %2752 = vmatmul.mubr.f32.gmra.mrb[18].mxu0 %v1213_v36  ;;  %10410 = vmatprep.subr.bf16.mxu1 %v10409_v50  ;;  %v10257_v50 = vpack.c.bf16 %v3236_v1, %v3232_v35  ;;  %v3267_v35 = vld [vmem:[#allocation8 + $0x1760] sm:$0xff]  ;;  %v3265_v1 = vld [vmem:[#allocation8 + $0x1750] sm:$0xff] }
 0x2e5   :  { %3019 = vmatmul.mubr.f32.gmra.mrb[10].mxu1 %v1213_v36  ;;  %10244 = vmatpush1.bf16.msra.mxu0 %v10243_v57  ;;  %v10425_v57 = vpack.c.bf16 %v3238_v42, %v3234_v41  ;;  %v3244_v36 = vld [vmem:[#allocation8 + $0x16a8] sm:$0xff]  ;;  %v3269_v41 = vld [vmem:[#allocation8 + $0x1770] sm:$0xff] }
 0x2e6   :  { %10412 = vmatpush1.bf16.msra.mxu1 %v10411_v44  ;;  %8962 = vmatprep.mubr.msk.f32.mxu0 %vm140_vm3, %v1233_v60  ;;  %v3242_v44 = vld [vmem:[#allocation8 + $0x1698] sm:$0xff]  ;;  %v3272_v42 = vld [vmem:[#allocation8 + $0x1788] sm:$0xff]  ;;  %v10443_v52 = vpack.c.bf16 %v3269_v41, %v3265_v1  ;;  %v3303_v1 = vld [vmem:[#allocation8 + $0x1880] sm:$0xff] }
 0x2e7   :  { %8966 = vmatprep.mubr.msk.f32.mxu1 %vm140_vm3, %v1233_v60  ;;  %10246 = vmatprep.subr.bf16.mxu0 %v10245_v4  ;;  %v10261_v60 = vpack.c.bf16 %v3244_v36, %v3240_v46  ;;  %v3241_v4 = vld [vmem:[#allocation8 + $0x1690] sm:$0xff]  ;;  %v10429_v5 = vpack.c.bf16 %v3246_v61, %v3242_v44  ;;  %v3280_v44 = vld [vmem:[#allocation8 + $0x17c8] sm:$0xff] }
 0x2e8   :  { %2758 = vmatmul.mubr.f32.gmra.mrb[20].mxu0 %v1230_v53  ;;  %10414 = vmatprep.subr.bf16.mxu1 %v10413_v18  ;;  %v3252_v18 = vld [vmem:[#allocation8 + $0x16e8] sm:$0xff]  ;;  %v3277_v36 = vld [vmem:[#allocation8 + $0x17b0] sm:$0xff] }
 0x2e9   :  { %3025 = vmatmul.mubr.f32.gmra.mrb[12].mxu1 %v1230_v53  ;;  %10248 = vmatpush1.bf16.msra.mxu0 %v10247_v10  ;;  %v10431_v10 = vpack.c.bf16 %v3245_v6, %v3241_v4  ;;  %v10265_v11 = vpack.c.bf16 %v3252_v18, %v3248_v8  ;;  %v3253_v53 = vld [vmem:[#allocation8 + $0x16f0] sm:$0xff]  ;;  %v3284_v61 = vld [vmem:[#allocation8 + $0x17e8] sm:$0xff]  ;;  %v10447_v62 = vpack.c.bf16 %v3277_v36, %v3273_v56  ;;  %v3279_v4 = vld [vmem:[#allocation8 + $0x17c0] sm:$0xff] }
 0x2ea   :  { %10416 = vmatpush1.bf16.msra.mxu1 %v10415_v49  ;;  %8963 = vmatprep.mubr.msk.f32.mxu0 %vm140_vm3, %v1245_v14  ;;  %v3251_v49 = vld [vmem:[#allocation8 + $0x16e0] sm:$0xff]  ;;  %v10281_v20 = vpack.c.bf16 %v3284_v61, %v3280_v44  ;;  %v3281_v6 = vld [vmem:[#allocation8 + $0x17d0] sm:$0xff] }
 0x2eb   :  { %8967 = vmatprep.mubr.msk.f32.mxu1 %vm140_vm3, %v1245_v14  ;;  %10250 = vmatprep.subr.bf16.mxu0 %v10249_v17  ;;  %v3256_v14 = vld [vmem:[#allocation8 + $0x1708] sm:$0xff]  ;;  %v3258_v17 = vld [vmem:[#allocation8 + $0x1718] sm:$0xff]  ;;  %v10267_v63 = vpack.c.bf16 %v3251_v49, %v3247_v12  ;;  %v3285_v18 = vld [vmem:[#allocation8 + $0x17f0] sm:$0xff]  ;;  %v10285_v49 = vpack.c.bf16 %v3292_v28, %v3288_v9 }
 0x2ec   :  { %2764 = vmatmul.mubr.f32.gmra.mrb[22].mxu0 %v1243_v15  ;;  %10418 = vmatprep.subr.bf16.mxu1 %v10417_v2  ;;  %v10435_v2 = vpack.c.bf16 %v3253_v53, %v3249_v25  ;;  %v10269_v3 = vpack.c.bf16 %v3260_v31, %v3256_v14  ;;  %v10437_v24 = vpack.c.bf16 %v3262_v51, %v3258_v17  ;;  %v3287_v25 = vld [vmem:[#allocation8 + $0x1800] sm:$0xff]  ;;  %v3289_v53 = vld [vmem:[#allocation8 + $0x1810] sm:$0xff]  ;;  %v3296_v17 = vld [vmem:[#allocation8 + $0x1848] sm:$0xff] }
 0x2ed   :  { %3031 = vmatmul.mubr.f32.gmra.mrb[14].mxu1 %v1243_v15  ;;  %10252 = vmatpush1.bf16.msra.mxu0 %v10251_v21  ;;  %v3257_v21 = vld [vmem:[#allocation8 + $0x1710] sm:$0xff]  ;;  %v10271_v15 = vpack.c.bf16 %v3259_v19, %v3255_v7  ;;  %v10451_v12 = vpack.c.bf16 %v3285_v18, %v3281_v6  ;;  %v3300_v51 = vld [vmem:[#allocation8 + $0x1868] sm:$0xff] }
 0x2ee   :  { %3599 = vmatprep.mubr.f32.mxu0 %v3115_v43  ;;  %10420 = vmatpush1.bf16.msra.mxu1 %v10419_v27  ;;  %v3264_v27 = vld [vmem:[#allocation8 + $0x1748] sm:$0xff]  ;;  %v10439_v22 = vpack.c.bf16 %v3261_v26, %v3257_v21  ;;  %v3293_v31 = vld [vmem:[#allocation8 + $0x1830] sm:$0xff]  ;;  %v10289_v19 = vpack.c.bf16 %v3300_v51, %v3296_v17  ;;  %v3295_v21 = vld [vmem:[#allocation8 + $0x1840] sm:$0xff] }
 0x2ef   :  { %3866 = vmatprep.mubr.f32.mxu1 %v3115_v43  ;;  %10254 = vmatprep.subr.bf16.mxu0 %v10253_v34  ;;  %v10273_v34 = vpack.c.bf16 %v3268_v0, %v3264_v27  ;;  %v3276_v43 = vld [vmem:[#allocation8 + $0x17a8] sm:$0xff]  ;;  %v10455_v7 = vpack.c.bf16 %v3293_v31, %v3289_v53  ;;  %v3297_v26 = vld [vmem:[#allocation8 + $0x1850] sm:$0xff]  ;;  %v3330_v51 = vld [vmem:[#allocation8 + $0x1958] sm:$0xff] }
 0x2f0   :  { %10422 = vmatprep.subr.bf16.mxu1 %v10421_v38  ;;  %v10441_v38 = vpack.c.bf16 %v3270_v33, %v3266_v47  ;;  %v10277_v54 = vpack.c.bf16 %v3276_v43, %v3272_v42  ;;  %v3301_v0 = vld [vmem:[#allocation8 + $0x1870] sm:$0xff]  ;;  %v3304_v47 = vld [vmem:[#allocation8 + $0x1888] sm:$0xff] }
 0x2f1   :  { %10256 = vmatpush1.bf16.msra.mxu0 %v10255_v45  ;;  %v3274_v45 = vld [vmem:[#allocation8 + $0x1798] sm:$0xff]  ;;  %v3308_v33 = vld [vmem:[#allocation8 + $0x18a8] sm:$0xff]  ;;  %v3305_v41 = vld [vmem:[#allocation8 + $0x1890] sm:$0xff] }
 0x2f2   :  { %10424 = vmatpush1.bf16.msra.mxu1 %v10423_v48  ;;  %10258 = vmatprep.subr.bf16.mxu0 %v10257_v50  ;;  %v3278_v48 = vld [vmem:[#allocation8 + $0x17b8] sm:$0xff]  ;;  %v10275_v50 = vpack.c.bf16 %v3267_v35, %v3263_v39  ;;  %v10459_v39 = vpack.c.bf16 %v3301_v0, %v3297_v26  ;;  %v10293_v35 = vpack.c.bf16 %v3308_v33, %v3304_v47  ;;  %v3309_v43 = vld [vmem:[#allocation8 + $0x18b0] sm:$0xff]  ;;  %v3328_v53 = vld [vmem:[#allocation8 + $0x1948] sm:$0xff] }
 0x2f3   :  { %10426 = vmatprep.subr.bf16.mxu1 %v10425_v57  ;;  %v3275_v57 = vld [vmem:[#allocation8 + $0x17a0] sm:$0xff]  ;;  %v10445_v46 = vpack.c.bf16 %v3278_v48, %v3274_v45  ;;  %v3312_v45 = vld [vmem:[#allocation8 + $0x18c8] sm:$0xff]  ;;  %v3313_v36 = vld [vmem:[#allocation8 + $0x18d0] sm:$0xff] }
 0x2f4   :  { %v3316_v48 = vld [vmem:[#allocation8 + $0x18e8] sm:$0xff]  ;;  %v3050_v18 = vld [vmem:[#allocation2 + $0x98] sm:$0x1]  ;;  %v3327_v26 = vld [vmem:[#allocation8 + $0x1940] sm:$0xff] }
 0x2f5   :  { %10260 = vmatpush1.bf16.msra.mxu0 %v10259_v16  ;;  %v3282_v16 = vld [vmem:[#allocation8 + $0x17d8] sm:$0xff]  ;;  %v10297_v56 = vpack.c.bf16 %v3316_v48, %v3312_v45  ;;  %v3037_v44 = vld [vmem:[#allocation2 + $0x30] sm:$0xfe] }
 0x2f6   :  { %10428 = vmatpush1.bf16.msra.mxu1 %v10427_v59  ;;  %10262 = vmatprep.subr.bf16.mxu0 %v10261_v60  ;;  %v3286_v59 = vld [vmem:[#allocation8 + $0x17f8] sm:$0xff]  ;;  %v10279_v60 = vpack.c.bf16 %v3275_v57, %v3271_v55  ;;  %v3311_v55 = vld [vmem:[#allocation8 + $0x18c0] sm:$0xff]  ;;  %v10463_v57 = vpack.c.bf16 %v3309_v43, %v3305_v41  ;;  %v12273_v6 = vld [vmem:[#allocation2 + $0x30] sm:$0xff] }
 0x2f7   :  { %10430 = vmatprep.subr.bf16.mxu1 %v10429_v5  ;;  %v3283_v5 = vld [vmem:[#allocation8 + $0x17e0] sm:$0xff]  ;;  %v10449_v8 = vpack.c.bf16 %v3286_v59, %v3282_v16  ;;  %v3317_v16 = vld [vmem:[#allocation8 + $0x18f0] sm:$0xff]  ;;  %v3320_v59 = vld [vmem:[#allocation8 + $0x1908] sm:$0xff] }
 0x2f8   :  { %v10467_v9 = vpack.c.bf16 %v3317_v16, %v3313_v36  ;;  %v3329_v0 = vld [vmem:[#allocation8 + $0x1950] sm:$0xff]  ;;  %v3342_v41 = vld [vmem:[#allocation8 + $0x19b8] sm:$0xff]  ;;  %v3344_v36 = vld [vmem:[#allocation8 + $0x19c8] sm:$0xff] }
 0x2f9   :  { %10264 = vmatpush1.bf16.msra.mxu0 %v10263_v32  ;;  %v3290_v32 = vld [vmem:[#allocation8 + $0x1818] sm:$0xff] }
 0x2fa   :  { %10432 = vmatpush1.bf16.msra.mxu1 %v10431_v10  ;;  %10266 = vmatprep.subr.bf16.mxu0 %v10265_v11  ;;  %v3294_v10 = vld [vmem:[#allocation8 + $0x1838] sm:$0xff]  ;;  %v10283_v11 = vpack.c.bf16 %v3283_v5, %v3279_v4  ;;  %v3110_v5 = vrot.slane %v3037_v44, 1  ;;  %v3348_v44 = vld [vmem:[#allocation8 + $0x19e8] sm:$0xff] }
 0x2fb   :  { %10434 = vmatprep.subr.bf16.mxu1 %v10433_v37  ;;  %v3291_v37 = vld [vmem:[#allocation8 + $0x1820] sm:$0xff]  ;;  %v10453_v14 = vpack.c.bf16 %v3294_v10, %v3290_v32  ;;  %v3049_v32 = vld [vmem:[#allocation2 + $0x90] sm:$0x1] }
 0x2fc   :  { %v3128_v17 = vrot.slane %v3049_v32, 1 }
 0x2fd   :  { %10268 = vmatpush1.bf16.msra.mxu0 %v10267_v63  ;;  %v3298_v63 = vld [vmem:[#allocation8 + $0x1858] sm:$0xff] }
 0x2fe   :  { %10436 = vmatpush1.bf16.msra.mxu1 %v10435_v2  ;;  %10270 = vmatprep.subr.bf16.mxu0 %v10269_v3  ;;  %v3302_v2 = vld [vmem:[#allocation8 + $0x1878] sm:$0xff]  ;;  %v10287_v3 = vpack.c.bf16 %v3291_v37, %v3287_v25  ;;  %v3130_v25 = vrot.slane %v3050_v18, 1  ;;  %v3325_v37 = vld [vmem:[#allocation8 + $0x1930] sm:$0xff]  ;;  %v3343_v18 = vld [vmem:[#allocation8 + $0x19c0] sm:$0xff] }
 0x2ff   :  { %10438 = vmatprep.subr.bf16.mxu1 %v10437_v24  ;;  %v3299_v24 = vld [vmem:[#allocation8 + $0x1860] sm:$0xff]  ;;  %v10457_v27 = vpack.c.bf16 %v3302_v2, %v3298_v63  ;;  %v3334_v63 = vld [vmem:[#allocation8 + $0x1978] sm:$0xff] }
 0x300   :  { %v13062_v2 = vld [vmem:[#allocation2 + $0x128] sm:$0xff]  ;;  %v3131_v47 = vsel %vm3109_vm5, %v3114_v23, %v3130_v25  ;;  %v10473_v33 = vpack.c.bf16 %v3334_v63, %v3330_v51  ;;  %v3067_v23 = vld [vmem:[#allocation2 + $0x150] sm:$0x1] }
 0x301   :  { %10272 = vmatpush1.bf16.msra.mxu0 %v10271_v15  ;;  %v3306_v15 = vld [vmem:[#allocation8 + $0x1898] sm:$0xff]  ;;  %v3158_v16 = vrot.slane %v3067_v23, 1  ;;  %v3356_v25 = vld [vmem:[#allocation8 + $0x1a28] sm:$0xff] }
 0x302   :  { %10440 = vmatpush1.bf16.msra.mxu1 %v10439_v22  ;;  %10274 = vmatprep.subr.bf16.mxu0 %v10273_v34  ;;  %v3310_v22 = vld [vmem:[#allocation8 + $0x18b8] sm:$0xff]  ;;  %v10291_v34 = vpack.c.bf16 %v3299_v24, %v3295_v21 }
 0x303   :  { %10442 = vmatprep.subr.bf16.mxu1 %v10441_v38  ;;  %v3307_v38 = vld [vmem:[#allocation8 + $0x18a0] sm:$0xff]  ;;  %v10461_v42 = vpack.c.bf16 %v3310_v22, %v3306_v15  ;;  %v3144_v15 = vrot.slane %v13062_v2, 1  ;;  %v3333_v22 = vld [vmem:[#allocation8 + $0x1970] sm:$0xff] }
 0x304   :  { %v10475_v45 = vpack.c.bf16 %v3333_v22, %v3329_v0  ;;  %v3351_v2 = vld [vmem:[#allocation8 + $0x1a00] sm:$0xff]  ;;  %v3366_v0 = vld [vmem:[#allocation8 + $0x1a78] sm:$0xff] }
 0x305   :  { %10276 = vmatpush1.bf16.msra.mxu0 %v10275_v50  ;;  %v3314_v50 = vld [vmem:[#allocation8 + $0x18d8] sm:$0xff]  ;;  %v3359_v22 = vld [vmem:[#allocation8 + $0x1a40] sm:$0xff] }
 0x306   :  { %10444 = vmatpush1.bf16.msra.mxu1 %v10443_v52  ;;  %10278 = vmatprep.subr.bf16.mxu0 %v10277_v54  ;;  %v3318_v52 = vld [vmem:[#allocation8 + $0x18f8] sm:$0xff]  ;;  %v10295_v54 = vpack.c.bf16 %v3307_v38, %v3303_v1 }
 0x307   :  { %10446 = vmatprep.subr.bf16.mxu1 %v10445_v46  ;;  %v3315_v46 = vld [vmem:[#allocation8 + $0x18e0] sm:$0xff]  ;;  %v10465_v61 = vpack.c.bf16 %v3318_v52, %v3314_v50  ;;  %v3338_v38 = vld [vmem:[#allocation8 + $0x1998] sm:$0xff] }
 0x308   :  { %v10299_v4 = vpack.c.bf16 %v3315_v46, %v3311_v55  ;;  %v3335_v50 = vld [vmem:[#allocation8 + $0x1980] sm:$0xff]  ;;  %v3341_v46 = vld [vmem:[#allocation8 + $0x19b0] sm:$0xff] }
 0x309   :  { %10280 = vmatpush1.bf16.msra.mxu0 %v10279_v60  ;;  %v3324_v60 = vld [vmem:[#allocation8 + $0x1928] sm:$0xff]  ;;  %v3339_v52 = vld [vmem:[#allocation8 + $0x19a0] sm:$0xff] }
 0x30a   :  { %10448 = vmatpush1.bf16.msra.mxu1 %v10447_v62  ;;  %10282 = vmatprep.subr.bf16.mxu0 %v10281_v20  ;;  %v3322_v62 = vld [vmem:[#allocation8 + $0x1918] sm:$0xff]  ;;  %v10301_v28 = vpack.c.bf16 %v3324_v60, %v3320_v59 }
 0x30b   :  { %10450 = vmatprep.subr.bf16.mxu1 %v10449_v8  ;;  %v3326_v20 = vld [vmem:[#allocation8 + $0x1938] sm:$0xff]  ;;  %v13058_v8 = vrot.slane %v12273_v6, 1  ;;  %v10313_v6 = vpack.c.bf16 %v3348_v44, %v3344_v36 }
 0x30c   :  { %v10469_v10 = vpack.c.bf16 %v3326_v20, %v3322_v62  ;;  %v3346_v59 = vld [vmem:[#allocation8 + $0x19d8] sm:$0xff]  ;;  %v10311_v20 = vpack.c.bf16 %v3339_v52, %v3335_v50  ;;  %v3371_v50 = vld [vmem:[#allocation8 + $0x1aa0] sm:$0xff]  ;;  %v3369_v52 = vld [vmem:[#allocation8 + $0x1a90] sm:$0xff] }
 0x30d   :  { %10284 = vmatpush1.bf16.msra.mxu0 %v10283_v11  ;;  %v3319_v11 = vld [vmem:[#allocation8 + $0x1900] sm:$0xff]  ;;  %v3112_v31 = vsel %vm3109_vm5, %v3110_v5, %v13058_v8  ;;  %v3350_v60 = vld [vmem:[#allocation8 + $0x19f8] sm:$0xff] }
 0x30e   :  { %10452 = vmatpush1.bf16.msra.mxu1 %v10451_v12  ;;  %10286 = vmatprep.subr.bf16.mxu0 %v10285_v49  ;;  %v3323_v12 = vld [vmem:[#allocation8 + $0x1920] sm:$0xff]  ;;  %v3321_v49 = vld [vmem:[#allocation8 + $0x1910] sm:$0xff]  ;;  %v3382_v36 = vld [vmem:[#allocation8 + $0x1af8] sm:$0xff] }
 0x30f   :  { %10454 = vmatprep.subr.bf16.mxu1 %v10453_v14  ;;  %v3332_v14 = vld [vmem:[#allocation8 + $0x1968] sm:$0xff]  ;;  %v10471_v21 = vpack.c.bf16 %v3325_v37, %v3321_v49  ;;  %v13073_v62 = vld [vmem:[#allocation2 + $0x78] sm:$0xff]  ;;  %v3159_v37 = vsel %vm3109_vm5, %v13058_v8, %v3158_v16 }
 0x310   :  { %v10305_v24 = vpack.c.bf16 %v3332_v14, %v3328_v53  ;;  %v3352_v49 = vld [vmem:[#allocation8 + $0x1a08] sm:$0xff]  ;;  %v3354_v53 = vld [vmem:[#allocation8 + $0x1a18] sm:$0xff] }
 0x311   :  { %10288 = vmatpush1.bf16.msra.mxu0 %v10287_v3  ;;  %v10303_v3 = vpack.c.bf16 %v3323_v12, %v3319_v11  ;;  %v3120_v11 = vrot.slane %v13073_v62, 1  ;;  %v3349_v12 = vld [vmem:[#allocation8 + $0x19f0] sm:$0xff]  ;;  %v3358_v14 = vld [vmem:[#allocation8 + $0x1a38] sm:$0xff]  ;;  %v10317_v63 = vpack.c.bf16 %v3356_v25, %v3352_v49  ;;  %v3383_v49 = vld [vmem:[#allocation8 + $0x1b00] sm:$0xff] }
 0x312   :  { %10456 = vmatpush1.bf16.msra.mxu1 %v10455_v7  ;;  %10290 = vmatprep.subr.bf16.mxu0 %v10289_v19  ;;  %v3056_v7 = vld [vmem:[#allocation2 + $0xf8] sm:$0xfe]  ;;  %v3055_v19 = vld [vmem:[#allocation2 + $0xf0] sm:$0xfe]  ;;  %v3387_v25 = vld [vmem:[#allocation8 + $0x1b20] sm:$0xff] }
 0x313   :  { %10458 = vmatprep.subr.bf16.mxu1 %v10457_v27  ;;  %v3331_v27 = vld [vmem:[#allocation8 + $0x1960] sm:$0xff]  ;;  %v3140_v1 = vrot.slane %v3055_v19, 1  ;;  %v3143_v58 = vrot.slane %v3056_v7, 1  ;;  %v3353_v7 = vld [vmem:[#allocation8 + $0x1a10] sm:$0xff] }
 0x314   :  { %v10307_v43 = vpack.c.bf16 %v3331_v27, %v3327_v26  ;;  %v3364_v26 = vld [vmem:[#allocation8 + $0x1a68] sm:$0xff]  ;;  %v3362_v27 = vld [vmem:[#allocation8 + $0x1a58] sm:$0xff]  ;;  %v3467_v62 = vld [vmem:[#allocation8 + $0x1da0] sm:$0xff] }
 0x315   :  { %10292 = vmatpush1.bf16.msra.mxu0 %v10291_v34  ;;  %v3336_v34 = vld [vmem:[#allocation8 + $0x1988] sm:$0xff]  ;;  %v3145_v55 = vsel %vm3109_vm5, %v3143_v58, %v3144_v15  ;;  %v3374_v58 = vld [vmem:[#allocation8 + $0x1ab8] sm:$0xff] }
 0x316   :  { %10460 = vmatpush1.bf16.msra.mxu1 %v10459_v39  ;;  %10294 = vmatprep.subr.bf16.mxu0 %v10293_v35  ;;  %v3340_v39 = vld [vmem:[#allocation8 + $0x19a8] sm:$0xff]  ;;  %v3129_v35 = vsel %vm3109_vm5, %v13058_v8, %v3128_v17 }
 0x317   :  { %10462 = vmatprep.subr.bf16.mxu1 %v10461_v42  ;;  %v3068_v42 = vld [vmem:[#allocation2 + $0x158] sm:$0x1]  ;;  %v10309_v48 = vpack.c.bf16 %v3340_v39, %v3336_v34  ;;  %v3363_v34 = vld [vmem:[#allocation8 + $0x1a60] sm:$0xff] }
 0x318   :  { %v3361_v39 = vld [vmem:[#allocation8 + $0x1a50] sm:$0xff] }
 0x319   :  { %10296 = vmatpush1.bf16.msra.mxu0 %v10295_v54  ;;  %v3337_v54 = vld [vmem:[#allocation8 + $0x1990] sm:$0xff] }
 0x31a   :  { %10464 = vmatpush1.bf16.msra.mxu1 %v10463_v57  ;;  %10298 = vmatprep.subr.bf16.mxu0 %v10297_v56  ;;  %v10477_v57 = vpack.c.bf16 %v3342_v41, %v3338_v38  ;;  %v3160_v56 = vrot.slane %v3068_v42, 1  ;;  %v10479_v5 = vpack.c.bf16 %v3341_v46, %v3337_v54  ;;  %v3368_v38 = vld [vmem:[#allocation8 + $0x1a88] sm:$0xff]  ;;  %v3370_v42 = vld [vmem:[#allocation8 + $0x1a98] sm:$0xff] }
 0x31b   :  { %10466 = vmatprep.subr.bf16.mxu1 %v10465_v61  ;;  %v3142_v61 = vsel %vm3109_vm5, %v3140_v1, %v13058_v8  ;;  %v10485_v8 = vpack.c.bf16 %v3358_v14, %v3354_v53  ;;  %v3365_v1 = vld [vmem:[#allocation8 + $0x1a70] sm:$0xff]  ;;  %v3372_v41 = vld [vmem:[#allocation8 + $0x1aa8] sm:$0xff]  ;;  %v10493_v54 = vpack.c.bf16 %v3374_v58, %v3370_v42  ;;  %v3378_v46 = vld [vmem:[#allocation8 + $0x1ad8] sm:$0xff] }
 0x31c   :  { %v3161_v32 = vsel %vm3109_vm5, %v3144_v15, %v3160_v56  ;;  %v10491_v23 = vpack.c.bf16 %v3365_v1, %v3361_v39  ;;  %v3380_v56 = vld [vmem:[#allocation8 + $0x1ae8] sm:$0xff]  ;;  %v3389_v14 = vld [vmem:[#allocation8 + $0x1b30] sm:$0xff]  ;;  %v3399_v39 = vld [vmem:[#allocation8 + $0x1b80] sm:$0xff] }
 0x31d   :  { %10300 = vmatpush1.bf16.msra.mxu0 %v10299_v4  ;;  %v3040_v4 = vld [vmem:[#allocation2 + $0x48] sm:$0xfe]  ;;  %v3401_v1 = vld [vmem:[#allocation8 + $0x1b90] sm:$0xff] }
 0x31e   :  { %10468 = vmatpush1.bf16.msra.mxu1 %v10467_v9  ;;  %10302 = vmatprep.subr.bf16.mxu0 %v10301_v28  ;;  %v3347_v9 = vld [vmem:[#allocation8 + $0x19e0] sm:$0xff]  ;;  %v3345_v28 = vld [vmem:[#allocation8 + $0x19d0] sm:$0xff]  ;;  %v3119_v17 = vrot.slane %v3040_v4, 1  ;;  %v10497_v4 = vpack.c.bf16 %v3382_v36, %v3378_v46  ;;  %v3408_v42 = vld [vmem:[#allocation8 + $0x1bc8] sm:$0xff] }
 0x31f   :  { %10470 = vmatprep.subr.bf16.mxu1 %v10469_v10  ;;  %v10481_v10 = vpack.c.bf16 %v3350_v60, %v3346_v59  ;;  %v10483_v51 = vpack.c.bf16 %v3349_v12, %v3345_v28  ;;  %v3375_v59 = vld [vmem:[#allocation8 + $0x1ac0] sm:$0xff]  ;;  %v3390_v28 = vld [vmem:[#allocation8 + $0x1b38] sm:$0xff]  ;;  %v3412_v58 = vld [vmem:[#allocation8 + $0x1be8] sm:$0xff] }
 0x320   :  { %3600 = vmatmul.mubr.f32.vlgmr.msra.gmra.mrb[16].mxu0 %v3112_v31  ;;  %v3121_v19 = vsel %vm3109_vm5, %v3119_v17, %v3120_v11  ;;  %v3379_v60 = vld [vmem:[#allocation8 + $0x1ae0] sm:$0xff]  ;;  %v3396_v17 = vld [vmem:[#allocation8 + $0x1b68] sm:$0xff] }
 0x321   :  { %3867 = vmatmul.mubr.f32.vlgmr.msra.gmra.mrb[8].mxu1 %v3112_v31  ;;  %3605 = vmatprep.mubr.f32.mxu0 %v3131_v47  ;;  %v10315_v31 = vpack.c.bf16 %v3347_v9, %v3343_v18  ;;  %v3388_v18 = vld [vmem:[#allocation8 + $0x1b28] sm:$0xff]  ;;  %v3386_v9 = vld [vmem:[#allocation8 + $0x1b18] sm:$0xff] }
 0x322   :  { %10304 = vmatpush1.bf16.msra.mxu0 %v10303_v3  ;;  %3872 = vmatprep.mubr.f32.mxu1 %v3131_v47  ;;  %v3355_v3 = vld [vmem:[#allocation8 + $0x1a20] sm:$0xff]  ;;  %v10501_v53 = vpack.c.bf16 %v3390_v28, %v3386_v9  ;;  %v3416_v46 = vld [vmem:[#allocation8 + $0x1c08] sm:$0xff] }
 0x323   :  { %10472 = vmatpush1.bf16.msra.mxu1 %v10471_v21  ;;  %10306 = vmatprep.subr.bf16.mxu0 %v10305_v24  ;;  %v3357_v21 = vld [vmem:[#allocation8 + $0x1a30] sm:$0xff]  ;;  %v3360_v24 = vld [vmem:[#allocation8 + $0x1a48] sm:$0xff]  ;;  %v10319_v47 = vpack.c.bf16 %v3355_v3, %v3351_v2  ;;  %v10335_v2 = vpack.c.bf16 %v3387_v25, %v3383_v49 }
 0x324   :  { %3606 = vmatmul.mubr.f32.gmra.mrb[18].mxu0 %v3129_v35  ;;  %10474 = vmatprep.subr.bf16.mxu1 %v10473_v33  ;;  %v10487_v33 = vpack.c.bf16 %v3357_v21, %v3353_v7  ;;  %v10321_v15 = vpack.c.bf16 %v3364_v26, %v3360_v24  ;;  %v3393_v21 = vld [vmem:[#allocation8 + $0x1b50] sm:$0xff]  ;;  %v3420_v36 = vld [vmem:[#allocation8 + $0x1c28] sm:$0xff] }
 0x325   :  { %3873 = vmatmul.mubr.f32.gmra.mrb[10].mxu1 %v3129_v35  ;;  %3611 = vmatprep.mubr.f32.mxu0 %v3145_v55  ;;  %v10489_v35 = vpack.c.bf16 %v3366_v0, %v3362_v27  ;;  %v3397_v26 = vld [vmem:[#allocation8 + $0x1b70] sm:$0xff]  ;;  %v3400_v27 = vld [vmem:[#allocation8 + $0x1b88] sm:$0xff] }
 0x326   :  { %10308 = vmatpush1.bf16.msra.mxu0 %v10307_v43  ;;  %3878 = vmatprep.mubr.f32.mxu1 %v3145_v55  ;;  %v10323_v43 = vpack.c.bf16 %v3363_v34, %v3359_v22  ;;  %v3373_v55 = vld [vmem:[#allocation8 + $0x1ab0] sm:$0xff]  ;;  %v3404_v0 = vld [vmem:[#allocation8 + $0x1ba8] sm:$0xff]  ;;  %v10507_v22 = vpack.c.bf16 %v3397_v26, %v3393_v21  ;;  %v3431_v21 = vld [vmem:[#allocation8 + $0x1c80] sm:$0xff] }
 0x327   :  { %10476 = vmatpush1.bf16.msra.mxu1 %v10475_v45  ;;  %10310 = vmatprep.subr.bf16.mxu0 %v10309_v48  ;;  %v10325_v45 = vpack.c.bf16 %v3372_v41, %v3368_v38  ;;  %v3367_v48 = vld [vmem:[#allocation8 + $0x1a80] sm:$0xff]  ;;  %v10341_v34 = vpack.c.bf16 %v3404_v0, %v3400_v27  ;;  %v3405_v41 = vld [vmem:[#allocation8 + $0x1bb0] sm:$0xff]  ;;  %v3424_v9 = vld [vmem:[#allocation8 + $0x1c48] sm:$0xff] }
 0x328   :  { %3612 = vmatmul.mubr.f32.gmra.mrb[20].mxu0 %v3142_v61  ;;  %10478 = vmatprep.subr.bf16.mxu1 %v10477_v57  ;;  %v3376_v57 = vld [vmem:[#allocation8 + $0x1ac8] sm:$0xff]  ;;  %v10327_v44 = vpack.c.bf16 %v3371_v50, %v3367_v48  ;;  %v10511_v48 = vpack.c.bf16 %v3405_v41, %v3401_v1  ;;  %v10345_v50 = vpack.c.bf16 %v3412_v58, %v3408_v42  ;;  %v3433_v26 = vld [vmem:[#allocation8 + $0x1c90] sm:$0xff]  ;;  %v3439_v1 = vld [vmem:[#allocation8 + $0x1cc0] sm:$0xff] }
 0x329   :  { %3879 = vmatmul.mubr.f32.gmra.mrb[12].mxu1 %v3142_v61  ;;  %3617 = vmatprep.mubr.f32.mxu0 %v3161_v32  ;;  %v10495_v61 = vpack.c.bf16 %v3373_v55, %v3369_v52  ;;  %v10329_v16 = vpack.c.bf16 %v3380_v56, %v3376_v57  ;;  %v3407_v52 = vld [vmem:[#allocation8 + $0x1bc0] sm:$0xff]  ;;  %v3409_v55 = vld [vmem:[#allocation8 + $0x1bd0] sm:$0xff]  ;;  %v3428_v28 = vld [vmem:[#allocation8 + $0x1c68] sm:$0xff] }
 0x32a   :  { %10312 = vmatpush1.bf16.msra.mxu0 %v10311_v20  ;;  %3884 = vmatprep.mubr.f32.mxu1 %v3161_v32  ;;  %v3377_v20 = vld [vmem:[#allocation8 + $0x1ad0] sm:$0xff]  ;;  %v10331_v32 = vpack.c.bf16 %v3379_v60, %v3375_v59  ;;  %v10349_v60 = vpack.c.bf16 %v3420_v36, %v3416_v46  ;;  %v10353_v25 = vpack.c.bf16 %v3428_v28, %v3424_v9  ;;  %v3051_v46 = vld [vmem:[#allocation2 + $0xa0] sm:$0x1] }
 0x32b   :  { %10480 = vmatpush1.bf16.msra.mxu1 %v10479_v5  ;;  %10314 = vmatprep.subr.bf16.mxu0 %v10313_v6  ;;  %v3381_v5 = vld [vmem:[#allocation8 + $0x1af0] sm:$0xff]  ;;  %v3384_v6 = vld [vmem:[#allocation8 + $0x1b08] sm:$0xff]  ;;  %v3462_v9 = vld [vmem:[#allocation8 + $0x1d78] sm:$0xff] }
 0x32c   :  { %3618 = vmatmul.mubr.f32.gmra.mrb[22].mxu0 %v3159_v37  ;;  %10482 = vmatprep.subr.bf16.mxu1 %v10481_v10  ;;  %v10499_v10 = vpack.c.bf16 %v3381_v5, %v3377_v20  ;;  %v10333_v12 = vpack.c.bf16 %v3388_v18, %v3384_v6  ;;  %v3413_v56 = vld [vmem:[#allocation8 + $0x1bf0] sm:$0xff]  ;;  %v3415_v20 = vld [vmem:[#allocation8 + $0x1c00] sm:$0xff] }
 0x32d   :  { %3885 = vmatmul.mubr.f32.gmra.mrb[14].mxu1 %v3159_v37  ;;  %3688 = vmatprep.mubr.f32.mxu0 %v3121_v19  ;;  %v3385_v37 = vld [vmem:[#allocation8 + $0x1b10] sm:$0xff]  ;;  %v10515_v59 = vpack.c.bf16 %v3413_v56, %v3409_v55 }
 0x32e   :  { %10316 = vmatpush1.bf16.msra.mxu0 %v10315_v31  ;;  %3955 = vmatprep.mubr.f32.mxu1 %v3121_v19  ;;  %v3392_v31 = vld [vmem:[#allocation8 + $0x1b48] sm:$0xff]  ;;  %v10503_v3 = vpack.c.bf16 %v3389_v14, %v3385_v37  ;;  %v3391_v19 = vld [vmem:[#allocation8 + $0x1b40] sm:$0xff]  ;;  %v3417_v5 = vld [vmem:[#allocation8 + $0x1c10] sm:$0xff] }
 0x32f   :  { %10484 = vmatpush1.bf16.msra.mxu1 %v10483_v51  ;;  %10318 = vmatprep.subr.bf16.mxu0 %v10317_v63  ;;  %v3394_v51 = vld [vmem:[#allocation8 + $0x1b58] sm:$0xff]  ;;  %v10337_v7 = vpack.c.bf16 %v3396_v17, %v3392_v31  ;;  %v3421_v18 = vld [vmem:[#allocation8 + $0x1c30] sm:$0xff]  ;;  %v3423_v37 = vld [vmem:[#allocation8 + $0x1c40] sm:$0xff] }
 0x330   :  { %10486 = vmatprep.subr.bf16.mxu1 %v10485_v8  ;;  %v3398_v63 = vld [vmem:[#allocation8 + $0x1b78] sm:$0xff]  ;;  %v3395_v8 = vld [vmem:[#allocation8 + $0x1b60] sm:$0xff]  ;;  %v10519_v49 = vpack.c.bf16 %v3421_v18, %v3417_v5  ;;  %v3425_v14 = vld [vmem:[#allocation8 + $0x1c50] sm:$0xff] }
 0x331   :  { %v10505_v24 = vpack.c.bf16 %v3398_v63, %v3394_v51  ;;  %v3429_v17 = vld [vmem:[#allocation8 + $0x1c70] sm:$0xff]  ;;  %v3432_v51 = vld [vmem:[#allocation8 + $0x1c88] sm:$0xff]  ;;  %v3458_v18 = vld [vmem:[#allocation8 + $0x1d58] sm:$0xff] }
 0x332   :  { %10320 = vmatpush1.bf16.msra.mxu0 %v10319_v47  ;;  %v3402_v47 = vld [vmem:[#allocation8 + $0x1b98] sm:$0xff]  ;;  %v3436_v63 = vld [vmem:[#allocation8 + $0x1ca8] sm:$0xff]  ;;  %v3437_v0 = vld [vmem:[#allocation8 + $0x1cb0] sm:$0xff] }
 0x333   :  { %10488 = vmatpush1.bf16.msra.mxu1 %v10487_v33  ;;  %10322 = vmatprep.subr.bf16.mxu0 %v10321_v15  ;;  %v3406_v33 = vld [vmem:[#allocation8 + $0x1bb8] sm:$0xff]  ;;  %v10339_v15 = vpack.c.bf16 %v3395_v8, %v3391_v19  ;;  %v10523_v19 = vpack.c.bf16 %v3429_v17, %v3425_v14  ;;  %v10357_v8 = vpack.c.bf16 %v3436_v63, %v3432_v51  ;;  %v3441_v41 = vld [vmem:[#allocation8 + $0x1cd0] sm:$0xff]  ;;  %v3460_v5 = vld [vmem:[#allocation8 + $0x1d68] sm:$0xff] }
 0x334   :  { %10490 = vmatprep.subr.bf16.mxu1 %v10489_v35  ;;  %v3403_v35 = vld [vmem:[#allocation8 + $0x1ba0] sm:$0xff]  ;;  %v10509_v38 = vpack.c.bf16 %v3406_v33, %v3402_v47  ;;  %v3440_v47 = vld [vmem:[#allocation8 + $0x1cc8] sm:$0xff]  ;;  %v3445_v58 = vld [vmem:[#allocation8 + $0x1cf0] sm:$0xff]  ;;  %v10537_v63 = vpack.c.bf16 %v3462_v9, %v3458_v18 }
 0x335   :  { %v3444_v33 = vld [vmem:[#allocation8 + $0x1ce8] sm:$0xff]  ;;  %v10531_v55 = vpack.c.bf16 %v3445_v58, %v3441_v41  ;;  %v13085_v28 = vld [vmem:[#allocation2 + $0x138] sm:$0xff]  ;;  %v3455_v14 = vld [vmem:[#allocation8 + $0x1d40] sm:$0xff] }
 0x336   :  { %10324 = vmatpush1.bf16.msra.mxu0 %v10323_v43  ;;  %v3410_v43 = vld [vmem:[#allocation8 + $0x1bd8] sm:$0xff]  ;;  %v3457_v17 = vld [vmem:[#allocation8 + $0x1d50] sm:$0xff] }
 0x337   :  { %10492 = vmatpush1.bf16.msra.mxu1 %v10491_v23  ;;  %10326 = vmatprep.subr.bf16.mxu0 %v10325_v45  ;;  %v3414_v23 = vld [vmem:[#allocation8 + $0x1bf8] sm:$0xff]  ;;  %v10343_v45 = vpack.c.bf16 %v3403_v35, %v3399_v39  ;;  %v10527_v39 = vpack.c.bf16 %v3437_v0, %v3433_v26  ;;  %v10361_v35 = vpack.c.bf16 %v3444_v33, %v3440_v47  ;;  %v3463_v47 = vld [vmem:[#allocation8 + $0x1d80] sm:$0xff]  ;;  %v3469_v58 = vld [vmem:[#allocation8 + $0x1db0] sm:$0xff] }
 0x338   :  { %10494 = vmatprep.subr.bf16.mxu1 %v10493_v54  ;;  %v3411_v54 = vld [vmem:[#allocation8 + $0x1be0] sm:$0xff]  ;;  %v10513_v57 = vpack.c.bf16 %v3414_v23, %v3410_v43  ;;  %v3448_v43 = vld [vmem:[#allocation8 + $0x1d08] sm:$0xff]  ;;  %v3069_v33 = vld [vmem:[#allocation2 + $0x160] sm:$0x1] }
 0x339   :  { %v3452_v23 = vld [vmem:[#allocation8 + $0x1d28] sm:$0xff]  ;;  %v3057_v0 = vld [vmem:[#allocation2 + $0x100] sm:$0xfe] }
 0x33a   :  { %10328 = vmatpush1.bf16.msra.mxu0 %v10327_v44  ;;  %v3418_v44 = vld [vmem:[#allocation8 + $0x1c18] sm:$0xff]  ;;  %v10365_v56 = vpack.c.bf16 %v3452_v23, %v3448_v43  ;;  %v3472_v43 = vld [vmem:[#allocation8 + $0x1dc8] sm:$0xff] }
 0x33b   :  { %10496 = vmatpush1.bf16.msra.mxu1 %v10495_v61  ;;  %10330 = vmatprep.subr.bf16.mxu0 %v10329_v16  ;;  %v3422_v61 = vld [vmem:[#allocation8 + $0x1c38] sm:$0xff]  ;;  %v10347_v16 = vpack.c.bf16 %v3411_v54, %v3407_v52  ;;  %v3052_v54 = vld [vmem:[#allocation2 + $0xa8] sm:$0x1]  ;;  %v3476_v23 = vld [vmem:[#allocation8 + $0x1de8] sm:$0xff] }
 0x33c   :  { %10498 = vmatprep.subr.bf16.mxu1 %v10497_v4  ;;  %v3419_v4 = vld [vmem:[#allocation8 + $0x1c20] sm:$0xff]  ;;  %v10517_v6 = vpack.c.bf16 %v3422_v61, %v3418_v44  ;;  %v3486_v18 = vld [vmem:[#allocation8 + $0x1e38] sm:$0xff] }
 0x33d   :  { %v3447_v61 = vld [vmem:[#allocation8 + $0x1d00] sm:$0xff] }
 0x33e   :  { %10332 = vmatpush1.bf16.msra.mxu0 %v10331_v32  ;;  %v3426_v32 = vld [vmem:[#allocation8 + $0x1c58] sm:$0xff] }
 0x33f   :  { %10500 = vmatpush1.bf16.msra.mxu1 %v10499_v10  ;;  %10334 = vmatprep.subr.bf16.mxu0 %v10333_v12  ;;  %v3430_v10 = vld [vmem:[#allocation8 + $0x1c78] sm:$0xff]  ;;  %v10351_v12 = vpack.c.bf16 %v3419_v4, %v3415_v20  ;;  %v3453_v20 = vld [vmem:[#allocation8 + $0x1d30] sm:$0xff]  ;;  %v3456_v4 = vld [vmem:[#allocation8 + $0x1d48] sm:$0xff] }
 0x340   :  { %10502 = vmatprep.subr.bf16.mxu1 %v10501_v53  ;;  %v3427_v53 = vld [vmem:[#allocation8 + $0x1c60] sm:$0xff]  ;;  %v10521_v31 = vpack.c.bf16 %v3430_v10, %v3426_v32 }
 0x341   :  { %v3058_v10 = vld [vmem:[#allocation2 + $0x108] sm:$0xfe] }
 0x342   :  { %10336 = vmatpush1.bf16.msra.mxu0 %v10335_v2  ;;  %v3434_v2 = vld [vmem:[#allocation8 + $0x1c98] sm:$0xff]  ;;  %v3149_v26 = vrot.slane %v3058_v10, 1 }
 0x343   :  { %10504 = vmatpush1.bf16.msra.mxu1 %v10503_v3  ;;  %10338 = vmatprep.subr.bf16.mxu0 %v10337_v7  ;;  %v3438_v3 = vld [vmem:[#allocation8 + $0x1cb8] sm:$0xff]  ;;  %v10355_v7 = vpack.c.bf16 %v3427_v53, %v3423_v37  ;;  %v3132_v37 = vrot.slane %v3051_v46, 1  ;;  %v10369_v53 = vpack.c.bf16 %v3460_v5, %v3456_v4  ;;  %v3162_v46 = vrot.slane %v3069_v33, 1  ;;  %v3480_v4 = vld [vmem:[#allocation8 + $0x1e08] sm:$0xff] }
 0x344   :  { %10506 = vmatprep.subr.bf16.mxu1 %v10505_v24  ;;  %v3435_v24 = vld [vmem:[#allocation8 + $0x1ca0] sm:$0xff]  ;;  %v10525_v27 = vpack.c.bf16 %v3438_v3, %v3434_v2  ;;  %v3150_v2 = vrot.slane %v13085_v28, 1  ;;  %v3461_v3 = vld [vmem:[#allocation8 + $0x1d70] sm:$0xff]  ;;  %v3484_v5 = vld [vmem:[#allocation8 + $0x1e28] sm:$0xff] }
 0x346   :  { %10340 = vmatpush1.bf16.msra.mxu0 %v10339_v15  ;;  %v3442_v15 = vld [vmem:[#allocation8 + $0x1cd8] sm:$0xff] }
 0x347   :  { %10508 = vmatpush1.bf16.msra.mxu1 %v10507_v22  ;;  %10342 = vmatprep.subr.bf16.mxu0 %v10341_v34  ;;  %v3446_v22 = vld [vmem:[#allocation8 + $0x1cf8] sm:$0xff]  ;;  %v10359_v34 = vpack.c.bf16 %v3435_v24, %v3431_v21  ;;  %v3070_v24 = vld [vmem:[#allocation2 + $0x168] sm:$0x1] }
 0x348   :  { %10510 = vmatprep.subr.bf16.mxu1 %v10509_v38  ;;  %v3443_v38 = vld [vmem:[#allocation8 + $0x1ce0] sm:$0xff]  ;;  %v10529_v42 = vpack.c.bf16 %v3446_v22, %v3442_v15  ;;  %v3470_v21 = vld [vmem:[#allocation8 + $0x1db8] sm:$0xff]  ;;  %v10539_v15 = vpack.c.bf16 %v3461_v3, %v3457_v17  ;;  %v3492_v17 = vld [vmem:[#allocation8 + $0x1e68] sm:$0xff] }
 0x349   :  { %v10363_v52 = vpack.c.bf16 %v3443_v38, %v3439_v1  ;;  %v13096_v1 = vld [vmem:[#allocation2 + $0x88] sm:$0xff]  ;;  %v3151_v38 = vsel %vm3109_vm5, %v3149_v26, %v3150_v2  ;;  %v3493_v26 = vld [vmem:[#allocation8 + $0x1e70] sm:$0xff] }
 0x34a   :  { %10344 = vmatpush1.bf16.msra.mxu0 %v10343_v45  ;;  %v13082_v45 = vld [vmem:[#allocation2 + $0x70] sm:$0xff] }
 0x34b   :  { %10512 = vmatpush1.bf16.msra.mxu1 %v10511_v48  ;;  %10346 = vmatprep.subr.bf16.mxu0 %v10345_v50  ;;  %v3450_v48 = vld [vmem:[#allocation8 + $0x1d18] sm:$0xff]  ;;  %v3117_v36 = vrot.slane %v13082_v45, 1  ;;  %v3146_v45 = vrot.slane %v3057_v0, 1  ;;  %v3500_v0 = vld [vmem:[#allocation8 + $0x1ea8] sm:$0xff] }
 0x34c   :  { %10514 = vmatprep.subr.bf16.mxu1 %v10513_v57  ;;  %v3454_v50 = vld [vmem:[#allocation8 + $0x1d38] sm:$0xff] }
 0x34d   :  { %v3039_v57 = vld [vmem:[#allocation2 + $0x40] sm:$0xfe]  ;;  %v10533_v44 = vpack.c.bf16 %v3454_v50, %v3450_v48 }
 0x34e   :  { %10348 = vmatpush1.bf16.msra.mxu0 %v10347_v16  ;;  %v3451_v16 = vld [vmem:[#allocation8 + $0x1d20] sm:$0xff]  ;;  %v3474_v48 = vld [vmem:[#allocation8 + $0x1dd8] sm:$0xff] }
 0x34f   :  { %10516 = vmatpush1.bf16.msra.mxu1 %v10515_v59  ;;  %10350 = vmatprep.subr.bf16.mxu0 %v10349_v60  ;;  %v3449_v59 = vld [vmem:[#allocation8 + $0x1d10] sm:$0xff]  ;;  %v3134_v60 = vrot.slane %v3052_v54, 1  ;;  %v10367_v32 = vpack.c.bf16 %v3451_v16, %v3447_v61  ;;  %v3478_v50 = vld [vmem:[#allocation8 + $0x1df8] sm:$0xff]  ;;  %v3475_v61 = vld [vmem:[#allocation8 + $0x1de0] sm:$0xff] }
 0x350   :  { %10518 = vmatprep.subr.bf16.mxu1 %v10517_v6  ;;  %v3116_v6 = vrot.slane %v3039_v57, 1  ;;  %v3473_v16 = vld [vmem:[#allocation8 + $0x1dd0] sm:$0xff] }
 0x351   :  { %v3135_v51 = vsel %vm3109_vm5, %v3120_v11, %v3134_v60  ;;  %v3133_v11 = vsel %vm3109_vm5, %v3117_v36, %v3132_v37  ;;  %v10545_v60 = vpack.c.bf16 %v3478_v50, %v3474_v48  ;;  %v3481_v37 = vld [vmem:[#allocation8 + $0x1e10] sm:$0xff]  ;;  %v3503_v50 = vld [vmem:[#allocation8 + $0x1ec0] sm:$0xff] }
 0x352   :  { %10352 = vmatpush1.bf16.msra.mxu0 %v10351_v12  ;;  %v13087_v12 = vld [vmem:[#allocation2 + $0x130] sm:$0xff] }
 0x353   :  { %10520 = vmatpush1.bf16.msra.mxu1 %v10519_v49  ;;  %10354 = vmatprep.subr.bf16.mxu0 %v10353_v25  ;;  %v3118_v49 = vsel %vm3109_vm5, %v3116_v6, %v3117_v36  ;;  %v10535_v25 = vpack.c.bf16 %v3453_v20, %v3449_v59  ;;  %v3147_v22 = vrot.slane %v13087_v12, 1  ;;  %v10377_v36 = vpack.c.bf16 %v3476_v23, %v3472_v43  ;;  %v3477_v20 = vld [vmem:[#allocation8 + $0x1df0] sm:$0xff]  ;;  %v3482_v6 = vld [vmem:[#allocation8 + $0x1e18] sm:$0xff] }
 0x354   :  { %10522 = vmatprep.subr.bf16.mxu1 %v10521_v31  ;;  %v3459_v31 = vld [vmem:[#allocation8 + $0x1d60] sm:$0xff]  ;;  %v10547_v10 = vpack.c.bf16 %v3477_v20, %v3473_v16  ;;  %v10381_v12 = vpack.c.bf16 %v3484_v5, %v3480_v4  ;;  %v3510_v43 = vld [vmem:[#allocation8 + $0x1ef8] sm:$0xff]  ;;  %v3513_v5 = vld [vmem:[#allocation8 + $0x1f10] sm:$0xff] }
 0x355   :  { %v3148_v57 = vsel %vm3109_vm5, %v3146_v45, %v3147_v22  ;;  %v3511_v20 = vld [vmem:[#allocation8 + $0x1f00] sm:$0xff] }
 0x356   :  { %10356 = vmatpush1.bf16.msra.mxu0 %v10355_v7  ;;  %v3464_v7 = vld [vmem:[#allocation8 + $0x1d88] sm:$0xff]  ;;  %v3515_v4 = vld [vmem:[#allocation8 + $0x1f20] sm:$0xff] }
 0x357   :  { %10524 = vmatpush1.bf16.msra.mxu1 %v10523_v19  ;;  %10358 = vmatprep.subr.bf16.mxu0 %v10357_v8  ;;  %v3468_v19 = vld [vmem:[#allocation8 + $0x1da8] sm:$0xff]  ;;  %v3466_v8 = vld [vmem:[#allocation8 + $0x1d98] sm:$0xff] }
 0x358   :  { %10526 = vmatprep.subr.bf16.mxu1 %v10525_v27  ;;  %v10371_v27 = vpack.c.bf16 %v3459_v31, %v3455_v14  ;;  %v10541_v41 = vpack.c.bf16 %v3470_v21, %v3466_v8  ;;  %v3485_v14 = vld [vmem:[#allocation8 + $0x1e30] sm:$0xff]  ;;  %v3488_v31 = vld [vmem:[#allocation8 + $0x1e48] sm:$0xff]  ;;  %v3491_v8 = vld [vmem:[#allocation8 + $0x1e60] sm:$0xff] }
 0x359   :  { %v10551_v3 = vpack.c.bf16 %v3485_v14, %v3481_v37  ;;  %v3489_v21 = vld [vmem:[#allocation8 + $0x1e50] sm:$0xff] }
 0x35a   :  { %10360 = vmatpush1.bf16.msra.mxu0 %v10359_v34  ;;  %v10373_v34 = vpack.c.bf16 %v3468_v19, %v3464_v7  ;;  %v10385_v7 = vpack.c.bf16 %v3492_v17, %v3488_v31  ;;  %v3487_v19 = vld [vmem:[#allocation8 + $0x1e40] sm:$0xff]  ;;  %v3521_v14 = vld [vmem:[#allocation8 + $0x1f50] sm:$0xff] }
 0x35b   :  { %10528 = vmatpush1.bf16.msra.mxu1 %v10527_v39  ;;  %10362 = vmatprep.subr.bf16.mxu0 %v10361_v35  ;;  %v3465_v39 = vld [vmem:[#allocation8 + $0x1d90] sm:$0xff]  ;;  %v10387_v33 = vpack.c.bf16 %v3491_v8, %v3487_v19  ;;  %v4823_v19 = vld [vmem:[#allocation11 + $0xab8] sm:$0xff] }
 0x35c   :  { %10530 = vmatprep.subr.bf16.mxu1 %v10529_v42  ;;  %v3042_v35 = vld [vmem:[#allocation2 + $0x58] sm:$0xfe]  ;;  %v3164_v42 = vrot.slane %v3070_v24, 1 }
 0x35d   :  { %v3125_v54 = vrot.slane %v3042_v35, 1  ;;  %v3525_v31 = vld [vmem:[#allocation8 + $0x1f70] sm:$0xff] }
 0x35e   :  { %10364 = vmatpush1.bf16.msra.mxu0 %v10363_v52  ;;  %v10375_v52 = vpack.c.bf16 %v3467_v62, %v3463_v47  ;;  %v3165_v59 = vsel %vm3109_vm5, %v3150_v2, %v3164_v42  ;;  %v3498_v47 = vld [vmem:[#allocation8 + $0x1e98] sm:$0xff]  ;;  %v3508_v42 = vld [vmem:[#allocation8 + $0x1ee8] sm:$0xff] }
 0x35f   :  { %10532 = vmatpush1.bf16.msra.mxu1 %v10531_v55  ;;  %10366 = vmatprep.subr.bf16.mxu0 %v10365_v56  ;;  %v3126_v55 = vrot.slane %v13096_v1, 1  ;;  %v10543_v56 = vpack.c.bf16 %v3469_v58, %v3465_v39  ;;  %v3502_v62 = vld [vmem:[#allocation8 + $0x1eb8] sm:$0xff]  ;;  %v3497_v39 = vld [vmem:[#allocation8 + $0x1e90] sm:$0xff] }
 0x360   :  { %10534 = vmatprep.subr.bf16.mxu1 %v10533_v44  ;;  %v3471_v44 = vld [vmem:[#allocation8 + $0x1dc0] sm:$0xff]  ;;  %v10557_v35 = vpack.c.bf16 %v3502_v62, %v3498_v47  ;;  %v3506_v58 = vld [vmem:[#allocation8 + $0x1ed8] sm:$0xff] }
 0x361   :  { %3689 = vmatmul.mubr.f32.vlgmr.msra.gmra.mrb[16].mxu0 %v3118_v49  ;;  %v10379_v9 = vpack.c.bf16 %v3475_v61, %v3471_v44  ;;  %v3127_v28 = vsel %vm3109_vm5, %v3125_v54, %v3126_v55  ;;  %v3505_v54 = vld [vmem:[#allocation8 + $0x1ed0] sm:$0xff]  ;;  %v3514_v44 = vld [vmem:[#allocation8 + $0x1f18] sm:$0xff]  ;;  %v13108_v47 = vld [vmem:[#allocation2 + $0x148] sm:$0xff] }
 0x362   :  { %3956 = vmatmul.mubr.f32.vlgmr.msra.gmra.mrb[8].mxu1 %v3118_v49  ;;  %3694 = vmatprep.mubr.f32.mxu0 %v3135_v51  ;;  %v3479_v49 = vld [vmem:[#allocation8 + $0x1e00] sm:$0xff]  ;;  %v3518_v61 = vld [vmem:[#allocation8 + $0x1f38] sm:$0xff] }
 0x363   :  { %10368 = vmatpush1.bf16.msra.mxu0 %v10367_v32  ;;  %3961 = vmatprep.mubr.f32.mxu1 %v3135_v51  ;;  %v3163_v32 = vsel %vm3109_vm5, %v3147_v22, %v3162_v46  ;;  %v3490_v51 = vld [vmem:[#allocation8 + $0x1e58] sm:$0xff]  ;;  %v3495_v22 = vld [vmem:[#allocation8 + $0x1e80] sm:$0xff]  ;;  %v3512_v46 = vld [vmem:[#allocation8 + $0x1f08] sm:$0xff] }
 0x364   :  { %10536 = vmatpush1.bf16.msra.mxu1 %v10535_v25  ;;  %10370 = vmatprep.subr.bf16.mxu0 %v10369_v53  ;;  %v3483_v25 = vld [vmem:[#allocation8 + $0x1e20] sm:$0xff]  ;;  %v10549_v53 = vpack.c.bf16 %v3486_v18, %v3482_v6  ;;  %v10565_v6 = vpack.c.bf16 %v3518_v61, %v3514_v44  ;;  %v3517_v18 = vld [vmem:[#allocation8 + $0x1f30] sm:$0xff] }
 0x365   :  { %3695 = vmatmul.mubr.f32.gmra.mrb[18].mxu0 %v3133_v11  ;;  %10538 = vmatprep.subr.bf16.mxu1 %v10537_v63  ;;  %v3494_v63 = vld [vmem:[#allocation8 + $0x1e78] sm:$0xff]  ;;  %v10383_v2 = vpack.c.bf16 %v3483_v25, %v3479_v49  ;;  %v3519_v49 = vld [vmem:[#allocation8 + $0x1f40] sm:$0xff]  ;;  %v10567_v25 = vpack.c.bf16 %v3517_v18, %v3513_v5  ;;  %v3059_v5 = vld [vmem:[#allocation2 + $0x110] sm:$0xfe] }
 0x366   :  { %3962 = vmatmul.mubr.f32.gmra.mrb[10].mxu1 %v3133_v11  ;;  %3700 = vmatprep.mubr.f32.mxu0 %v3151_v38  ;;  %v10553_v24 = vpack.c.bf16 %v3494_v63, %v3490_v51  ;;  %v10555_v11 = vpack.c.bf16 %v3493_v26, %v3489_v21  ;;  %v3054_v51 = vld [vmem:[#allocation2 + $0xb8] sm:$0x1]  ;;  %v4817_v63 = vld [vmem:[#allocation11 + $0xa88] sm:$0xff]  ;;  %v10571_v21 = vpack.c.bf16 %v3525_v31, %v3521_v14  ;;  %v4828_v44 = vld [vmem:[#allocation11 + $0xae0] sm:$0xff] }
 0x367   :  { %10372 = vmatpush1.bf16.msra.mxu0 %v10371_v27  ;;  %3967 = vmatprep.mubr.f32.mxu1 %v3151_v38  ;;  %v3496_v27 = vld [vmem:[#allocation8 + $0x1e88] sm:$0xff]  ;;  %v3501_v38 = vld [vmem:[#allocation8 + $0x1eb0] sm:$0xff]  ;;  %v3138_v26 = vrot.slane %v3054_v51, 1  ;;  %v3152_v51 = vrot.slane %v3059_v5, 1  ;;  %v4871_v5 = vld [vmem:[#allocation11 + $0xc38] sm:$0xff] }
 0x368   :  { %10540 = vmatpush1.bf16.msra.mxu1 %v10539_v15  ;;  %10374 = vmatprep.subr.bf16.mxu0 %v10373_v34  ;;  %v10389_v15 = vpack.c.bf16 %v3500_v0, %v3496_v27  ;;  %v3499_v34 = vld [vmem:[#allocation8 + $0x1ea0] sm:$0xff]  ;;  %v10559_v45 = vpack.c.bf16 %v3501_v38, %v3497_v39  ;;  %v3053_v27 = vld [vmem:[#allocation2 + $0xb0] sm:$0x1]  ;;  %v3060_v0 = vld [vmem:[#allocation2 + $0x118] sm:$0xfe] }
 0x369   :  { %3701 = vmatmul.mubr.f32.gmra.mrb[20].mxu0 %v3148_v57  ;;  %10542 = vmatprep.subr.bf16.mxu1 %v10541_v41  ;;  %v3504_v41 = vld [vmem:[#allocation8 + $0x1ec8] sm:$0xff]  ;;  %v10391_v23 = vpack.c.bf16 %v3499_v34, %v3495_v22  ;;  %v4818_v34 = vld [vmem:[#allocation11 + $0xa90] sm:$0xff] }
 0x36a   :  { %3968 = vmatmul.mubr.f32.gmra.mrb[12].mxu1 %v3148_v57  ;;  %3706 = vmatprep.mubr.f32.mxu0 %v3165_v59  ;;  %v10393_v48 = vpack.c.bf16 %v3508_v42, %v3504_v41  ;;  %v10561_v57 = vpack.c.bf16 %v3510_v43, %v3506_v58  ;;  %v4820_v22 = vld [vmem:[#allocation11 + $0xaa0] sm:$0xff]  ;;  %v4822_v39 = vld [vmem:[#allocation11 + $0xab0] sm:$0xff]  ;;  %v4829_v38 = vld [vmem:[#allocation11 + $0xae8] sm:$0xff]  ;;  %v3139_v43 = vsel %vm3109_vm5, %v3126_v55, %v3138_v26 }
 0x36b   :  { %10376 = vmatpush1.bf16.msra.mxu0 %v10375_v52  ;;  %3973 = vmatprep.mubr.f32.mxu1 %v3165_v59  ;;  %v3507_v52 = vld [vmem:[#allocation8 + $0x1ee0] sm:$0xff]  ;;  %v4826_v61 = vld [vmem:[#allocation11 + $0xad0] sm:$0xff]  ;;  %v3071_v18 = vld [vmem:[#allocation2 + $0x170] sm:$0x1] }
 0x36c   :  { %10544 = vmatpush1.bf16.msra.mxu1 %v10543_v56  ;;  %10378 = vmatprep.subr.bf16.mxu0 %v10377_v36  ;;  %v3509_v56 = vld [vmem:[#allocation8 + $0x1ef0] sm:$0xff]  ;;  %v3516_v36 = vld [vmem:[#allocation8 + $0x1f28] sm:$0xff]  ;;  %v10395_v16 = vpack.c.bf16 %v3507_v52, %v3503_v50  ;;  %v4827_v42 = vld [vmem:[#allocation11 + $0xad8] sm:$0xff] }
 0x36d   :  { %3707 = vmatmul.mubr.f32.gmra.mrb[22].mxu0 %v3163_v32  ;;  %10546 = vmatprep.subr.bf16.mxu1 %v10545_v60  ;;  %v10563_v59 = vpack.c.bf16 %v3509_v56, %v3505_v54  ;;  %v10397_v60 = vpack.c.bf16 %v3516_v36, %v3512_v46  ;;  %v4831_v58 = vld [vmem:[#allocation11 + $0xaf8] sm:$0xff]  ;;  %v3072_v50 = vld [vmem:[#allocation2 + $0x178] sm:$0x1]  ;;  %v10743_v56 = vpack.c.bf16 %v4822_v39, %v4818_v34  ;;  %v4824_v36 = vld [vmem:[#allocation11 + $0xac0] sm:$0xff] }
 0x36e   :  { %3974 = vmatmul.mubr.f32.gmra.mrb[14].mxu1 %v3163_v32  ;;  %8968 = vmatprep.mubr.msk.f32.mxu0 %vm140_vm3, %v3127_v28  ;;  %v3522_v32 = vld [vmem:[#allocation8 + $0x1f58] sm:$0xff]  ;;  %v10745_v1 = vpack.c.bf16 %v4831_v58, %v4827_v42  ;;  %v4841_v31 = vld [vmem:[#allocation11 + $0xb48] sm:$0xff]  ;;  %v4840_v26 = vld [vmem:[#allocation11 + $0xb40] sm:$0xff] }
 0x36f   :  { %10380 = vmatpush1.bf16.msra.mxu0 %v10379_v9  ;;  %8972 = vmatprep.mubr.msk.f32.mxu1 %vm140_vm3, %v3127_v28  ;;  %v3520_v9 = vld [vmem:[#allocation8 + $0x1f48] sm:$0xff]  ;;  %v4830_v55 = vld [vmem:[#allocation11 + $0xaf0] sm:$0xff] }
 0x370   :  { %10548 = vmatpush1.bf16.msra.mxu1 %v10547_v10  ;;  %10382 = vmatprep.subr.bf16.mxu0 %v10381_v12  ;;  %v3524_v28 = vld [vmem:[#allocation8 + $0x1f68] sm:$0xff]  ;;  %v3526_v10 = vld [vmem:[#allocation8 + $0x1f78] sm:$0xff]  ;;  %v10399_v12 = vpack.c.bf16 %v3515_v4, %v3511_v20 }
 0x371   :  { %10550 = vmatprep.subr.bf16.mxu1 %v10549_v53  ;;  %v10401_v37 = vpack.c.bf16 %v3524_v28, %v3520_v9  ;;  %v3523_v53 = vld [vmem:[#allocation8 + $0x1f60] sm:$0xff]  ;;  %v10569_v17 = vpack.c.bf16 %v3526_v10, %v3522_v32  ;;  %v10579_v9 = vpack.c.bf16 %v4828_v44, %v4824_v36  ;;  %v10747_v10 = vpack.c.bf16 %v4830_v55, %v4826_v61  ;;  %v4838_v14 = vld [vmem:[#allocation11 + $0xb30] sm:$0xff] }
 0x372   :  { %v10403_v8 = vpack.c.bf16 %v3523_v53, %v3519_v49  ;;  %v4839_v20 = vld [vmem:[#allocation11 + $0xb38] sm:$0xff]  ;;  %v4832_v49 = vld [vmem:[#allocation11 + $0xb00] sm:$0xff]  ;;  %v4850_v58 = vld [vmem:[#allocation11 + $0xb90] sm:$0xff] }
 0x373   :  { %10384 = vmatpush1.bf16.msra.mxu0 %v10383_v2  ;;  %v4821_v2 = vld [vmem:[#allocation11 + $0xaa8] sm:$0xff]  ;;  %v4852_v42 = vld [vmem:[#allocation11 + $0xba0] sm:$0xff]  ;;  %v4858_v61 = vld [vmem:[#allocation11 + $0xbd0] sm:$0xff] }
 0x374   :  { %10552 = vmatpush1.bf16.msra.mxu1 %v10551_v3  ;;  %10386 = vmatprep.subr.bf16.mxu0 %v10385_v7  ;;  %v3047_v3 = vld [vmem:[#allocation2 + $0x80] sm:$0xff]  ;;  %v10573_v62 = vpack.c.bf16 %v4821_v2, %v4817_v63  ;;  %v4860_v36 = vld [vmem:[#allocation11 + $0xbe0] sm:$0xff] }
 0x375   :  { %10554 = vmatprep.subr.bf16.mxu1 %v10553_v24  ;;  %v4819_v7 = vld [vmem:[#allocation11 + $0xa98] sm:$0xff]  ;;  %v3041_v24 = vld [vmem:[#allocation2 + $0x50] sm:$0xfe] }
 0x376   :  { %v3122_v41 = vrot.slane %v3041_v24, 1  ;;  %v4843_v63 = vld [vmem:[#allocation11 + $0xb58] sm:$0xff] }
 0x377   :  { %10388 = vmatpush1.bf16.msra.mxu0 %v10387_v33  ;;  %v3123_v33 = vrot.slane %v3047_v3, 1  ;;  %v4847_v2 = vld [vmem:[#allocation11 + $0xb78] sm:$0xff] }
 0x378   :  { %10556 = vmatpush1.bf16.msra.mxu1 %v10555_v11  ;;  %10390 = vmatprep.subr.bf16.mxu0 %v10389_v15  ;;  %v10741_v11 = vpack.c.bf16 %v4823_v19, %v4819_v7  ;;  %v4816_v15 = vld [vmem:[#allocation11 + $0xa80] sm:$0xff] }
 0x379   :  { %10558 = vmatprep.subr.bf16.mxu1 %v10557_v35  ;;  %v4825_v35 = vld [vmem:[#allocation11 + $0xac8] sm:$0xff]  ;;  %v10575_v52 = vpack.c.bf16 %v4820_v22, %v4816_v15  ;;  %v3124_v54 = vsel %vm3109_vm5, %v3122_v41, %v3123_v33  ;;  %v4851_v15 = vld [vmem:[#allocation11 + $0xb98] sm:$0xff]  ;;  %v4848_v41 = vld [vmem:[#allocation11 + $0xb80] sm:$0xff] }
 0x37a   :  { %v10577_v46 = vpack.c.bf16 %v4829_v38, %v4825_v35  ;;  %v4855_v22 = vld [vmem:[#allocation11 + $0xbb8] sm:$0xff] }
 0x37b   :  { %10392 = vmatpush1.bf16.msra.mxu0 %v10391_v23  ;;  %v3155_v23 = vrot.slane %v3060_v0, 1  ;;  %v4842_v0 = vld [vmem:[#allocation11 + $0xb50] sm:$0xff] }
 0x37c   :  { %10560 = vmatpush1.bf16.msra.mxu1 %v10559_v45  ;;  %10394 = vmatprep.subr.bf16.mxu0 %v10393_v48  ;;  %v3156_v45 = vrot.slane %v13108_v47, 1  ;;  %v13114_v48 = vld [vmem:[#allocation2 + $0x140] sm:$0xff]  ;;  %v10753_v47 = vpack.c.bf16 %v4847_v2, %v4843_v63  ;;  %v4874_v2 = vld [vmem:[#allocation11 + $0xc50] sm:$0xff] }
 0x37d   :  { %10562 = vmatprep.subr.bf16.mxu1 %v10561_v57  ;;  %v3136_v57 = vrot.slane %v3053_v27, 1  ;;  %v3153_v32 = vrot.slane %v13114_v48, 1  ;;  %v4844_v27 = vld [vmem:[#allocation11 + $0xb60] sm:$0xff]  ;;  %v4861_v48 = vld [vmem:[#allocation11 + $0xbe8] sm:$0xff] }
 0x37e   :  { %v3157_v4 = vsel %vm3109_vm5, %v3155_v23, %v3156_v45  ;;  %v10587_v34 = vpack.c.bf16 %v4844_v27, %v4840_v26  ;;  %v4854_v23 = vld [vmem:[#allocation11 + $0xbb0] sm:$0xff]  ;;  %v4887_v26 = vld [vmem:[#allocation11 + $0xcb8] sm:$0xff]  ;;  %v4880_v27 = vld [vmem:[#allocation11 + $0xc80] sm:$0xff] }
 0x37f   :  { %10396 = vmatpush1.bf16.msra.mxu0 %v10395_v16  ;;  %v4833_v16 = vld [vmem:[#allocation11 + $0xb08] sm:$0xff]  ;;  %v3137_v28 = vsel %vm3109_vm5, %v3123_v33, %v3136_v57  ;;  %v3154_v19 = vsel %vm3109_vm5, %v3152_v51, %v3153_v32  ;;  %v10759_v57 = vpack.c.bf16 %v4854_v23, %v4850_v58  ;;  %v4890_v23 = vld [vmem:[#allocation11 + $0xcd0] sm:$0xff] }
 0x380   :  { %10564 = vmatpush1.bf16.msra.mxu1 %v10563_v59  ;;  %10398 = vmatprep.subr.bf16.mxu0 %v10397_v60  ;;  %v4837_v59 = vld [vmem:[#allocation11 + $0xb28] sm:$0xff]  ;;  %v4835_v60 = vld [vmem:[#allocation11 + $0xb18] sm:$0xff] }
 0x381   :  { %10566 = vmatprep.subr.bf16.mxu1 %v10565_v6  ;;  %v3168_v6 = vrot.slane %v3072_v50, 1  ;;  %v10749_v53 = vpack.c.bf16 %v4839_v20, %v4835_v60  ;;  %v4849_v33 = vld [vmem:[#allocation11 + $0xb88] sm:$0xff]  ;;  %v4859_v50 = vld [vmem:[#allocation11 + $0xbd8] sm:$0xff] }
 0x382   :  { %v4869_v60 = vld [vmem:[#allocation11 + $0xc28] sm:$0xff]  ;;  %v4867_v20 = vld [vmem:[#allocation11 + $0xc18] sm:$0xff] }
 0x383   :  { %10400 = vmatpush1.bf16.msra.mxu0 %v10399_v12  ;;  %v10581_v12 = vpack.c.bf16 %v4837_v59, %v4833_v16  ;;  %v3169_v3 = vsel %vm3109_vm5, %v3156_v45, %v3168_v6  ;;  %v4857_v45 = vld [vmem:[#allocation11 + $0xbc8] sm:$0xff]  ;;  %v4864_v6 = vld [vmem:[#allocation11 + $0xc00] sm:$0xff] }
 0x384   :  { %10568 = vmatpush1.bf16.msra.mxu1 %v10567_v25  ;;  %10402 = vmatprep.subr.bf16.mxu0 %v10401_v37  ;;  %v4836_v25 = vld [vmem:[#allocation11 + $0xb20] sm:$0xff]  ;;  %v4834_v37 = vld [vmem:[#allocation11 + $0xb10] sm:$0xff]  ;;  %v4865_v59 = vld [vmem:[#allocation11 + $0xc08] sm:$0xff] }
 0x385   :  { %10570 = vmatprep.subr.bf16.mxu1 %v10569_v17  ;;  %v4845_v17 = vld [vmem:[#allocation11 + $0xb68] sm:$0xff]  ;;  %v10583_v7 = vpack.c.bf16 %v4836_v25, %v4832_v49 }
 0x386   :  { %v10585_v24 = vpack.c.bf16 %v4845_v17, %v4841_v31  ;;  %v4873_v49 = vld [vmem:[#allocation11 + $0xc48] sm:$0xff]  ;;  %v4872_v31 = vld [vmem:[#allocation11 + $0xc40] sm:$0xff] }
 0x387   :  { %10404 = vmatpush1.bf16.msra.mxu0 %v10403_v8  ;;  %v3166_v8 = vrot.slane %v3071_v18, 1  ;;  %v4868_v18 = vld [vmem:[#allocation11 + $0xc20] sm:$0xff]  ;;  %v4877_v25 = vld [vmem:[#allocation11 + $0xc68] sm:$0xff] }
 0x388   :  { %10572 = vmatpush1.bf16.msra.mxu1 %v10571_v21  ;;  %10574 = vmatprep.subr.bf16.mxu0 %v10573_v62  ;;  %v10751_v21 = vpack.c.bf16 %v4838_v14, %v4834_v37  ;;  %v4846_v62 = vld [vmem:[#allocation11 + $0xb70] sm:$0xff]  ;;  %v4875_v37 = vld [vmem:[#allocation11 + $0xc58] sm:$0xff]  ;;  %v4876_v17 = vld [vmem:[#allocation11 + $0xc60] sm:$0xff] }
 0x389   :  { %10742 = vmatprep.subr.bf16.mxu1 %v10741_v11  ;;  %v4853_v11 = vld [vmem:[#allocation11 + $0xba8] sm:$0xff]  ;;  %v3167_v39 = vsel %vm3109_vm5, %v3153_v32, %v3166_v8  ;;  %v10755_v35 = vpack.c.bf16 %v4846_v62, %v4842_v0  ;;  %v4866_v32 = vld [vmem:[#allocation11 + $0xc10] sm:$0xff]  ;;  %v4879_v14 = vld [vmem:[#allocation11 + $0xc78] sm:$0xff]  ;;  %v10603_v63 = vpack.c.bf16 %v4876_v17, %v4872_v31 }
 0x38a   :  { %3778 = vmatmul.mubr.f32.vlgmr.msra.gmra.mrb[16].mxu0 %v3124_v54  ;;  %v10589_v38 = vpack.c.bf16 %v4853_v11, %v4849_v33  ;;  %v10769_v51 = vpack.c.bf16 %v4879_v14, %v4875_v37  ;;  %v4885_v8 = vld [vmem:[#allocation11 + $0xca8] sm:$0xff]  ;;  %v4884_v0 = vld [vmem:[#allocation11 + $0xca0] sm:$0xff]  ;;  %v4882_v33 = vld [vmem:[#allocation11 + $0xc90] sm:$0xff] }
 0x38b   :  { %4045 = vmatmul.mubr.f32.vlgmr.msra.gmra.mrb[8].mxu1 %v3124_v54  ;;  %8969 = vmatprep.mubr.msk.f32.mxu0 %vm140_vm3, %v3139_v43  ;;  %v10591_v54 = vpack.c.bf16 %v4852_v42, %v4848_v41  ;;  %v10607_v62 = vpack.c.bf16 %v4884_v0, %v4880_v27  ;;  %v4886_v11 = vld [vmem:[#allocation11 + $0xcb0] sm:$0xff]  ;;  %v4888_v41 = vld [vmem:[#allocation11 + $0xcc0] sm:$0xff]  ;;  %v4915_v37 = vld [vmem:[#allocation11 + $0xd98] sm:$0xff] }
 0x38c   :  { %8973 = vmatprep.mubr.msk.f32.mxu1 %vm140_vm3, %v3139_v43  ;;  %10576 = vmatpush1.bf16.msra.mxu0 %v10575_v52  ;;  %v10757_v43 = vpack.c.bf16 %v4855_v22, %v4851_v15  ;;  %v4863_v52 = vld [vmem:[#allocation11 + $0xbf8] sm:$0xff]  ;;  %v10775_v15 = vpack.c.bf16 %v4886_v11, %v4882_v33  ;;  %v4889_v22 = vld [vmem:[#allocation11 + $0xcc8] sm:$0xff]  ;;  %v4892_v42 = vld [vmem:[#allocation11 + $0xce0] sm:$0xff] }
 0x38d   :  { %10744 = vmatpush1.bf16.msra.mxu1 %v10743_v56  ;;  %10578 = vmatprep.subr.bf16.mxu0 %v10577_v46  ;;  %v10593_v56 = vpack.c.bf16 %v4861_v48, %v4857_v45  ;;  %v4856_v46 = vld [vmem:[#allocation11 + $0xbc0] sm:$0xff]  ;;  %v10761_v44 = vpack.c.bf16 %v4863_v52, %v4859_v50  ;;  %v4894_v45 = vld [vmem:[#allocation11 + $0xcf0] sm:$0xff]  ;;  %v4897_v50 = vld [vmem:[#allocation11 + $0xd08] sm:$0xff] }
 0x38e   :  { %3784 = vmatmul.mubr.f32.gmra.mrb[18].mxu0 %v3137_v28  ;;  %10746 = vmatprep.subr.bf16.mxu1 %v10745_v1  ;;  %v4862_v1 = vld [vmem:[#allocation11 + $0xbf0] sm:$0xff]  ;;  %v10595_v55 = vpack.c.bf16 %v4860_v36, %v4856_v46  ;;  %v10779_v48 = vpack.c.bf16 %v4894_v45, %v4890_v23  ;;  %v4901_v52 = vld [vmem:[#allocation11 + $0xd28] sm:$0xff]  ;;  %v4896_v46 = vld [vmem:[#allocation11 + $0xd00] sm:$0xff] }
 0x38f   :  { %4051 = vmatmul.mubr.f32.gmra.mrb[10].mxu1 %v3137_v28  ;;  %8970 = vmatprep.mubr.msk.f32.mxu0 %vm140_vm3, %v3157_v4  ;;  %v10763_v16 = vpack.c.bf16 %v4862_v1, %v4858_v61  ;;  %v10599_v28 = vpack.c.bf16 %v4868_v18, %v4864_v6  ;;  %v4900_v36 = vld [vmem:[#allocation11 + $0xd20] sm:$0xff]  ;;  %v4898_v1 = vld [vmem:[#allocation11 + $0xd10] sm:$0xff]  ;;  %v4919_v14 = vld [vmem:[#allocation11 + $0xdb8] sm:$0xff] }
 0x390   :  { %8974 = vmatprep.mubr.msk.f32.mxu1 %vm140_vm3, %v3157_v4  ;;  %10580 = vmatpush1.bf16.msra.mxu0 %v10579_v9  ;;  %v10597_v4 = vpack.c.bf16 %v4869_v60, %v4865_v59  ;;  %v10765_v9 = vpack.c.bf16 %v4871_v5, %v4867_v20  ;;  %v10615_v61 = vpack.c.bf16 %v4900_v36, %v4896_v46  ;;  %v4905_v59 = vld [vmem:[#allocation11 + $0xd48] sm:$0xff]  ;;  %v4907_v20 = vld [vmem:[#allocation11 + $0xd58] sm:$0xff]  ;;  %v4904_v6 = vld [vmem:[#allocation11 + $0xd40] sm:$0xff] }
 0x391   :  { %10748 = vmatpush1.bf16.msra.mxu1 %v10747_v10  ;;  %10582 = vmatprep.subr.bf16.mxu0 %v10581_v12  ;;  %v4870_v10 = vld [vmem:[#allocation11 + $0xc30] sm:$0xff]  ;;  %v4909_v60 = vld [vmem:[#allocation11 + $0xd68] sm:$0xff]  ;;  %v4911_v5 = vld [vmem:[#allocation11 + $0xd78] sm:$0xff] }
 0x392   :  { %3790 = vmatmul.mubr.f32.gmra.mrb[20].mxu0 %v3154_v19  ;;  %10750 = vmatprep.subr.bf16.mxu1 %v10749_v53  ;;  %v10767_v12 = vpack.c.bf16 %v4870_v10, %v4866_v32  ;;  %v10601_v53 = vpack.c.bf16 %v4877_v25, %v4873_v49  ;;  %v4908_v18 = vld [vmem:[#allocation11 + $0xd60] sm:$0xff]  ;;  %v4906_v32 = vld [vmem:[#allocation11 + $0xd50] sm:$0xff]  ;;  %v4913_v49 = vld [vmem:[#allocation11 + $0xd88] sm:$0xff] }
 0x393   :  { %4057 = vmatmul.mubr.f32.gmra.mrb[12].mxu1 %v3154_v19  ;;  %8971 = vmatprep.mubr.msk.f32.mxu0 %vm140_vm3, %v3169_v3  ;;  %v4881_v19 = vld [vmem:[#allocation11 + $0xc88] sm:$0xff]  ;;  %v4910_v10 = vld [vmem:[#allocation11 + $0xd70] sm:$0xff]  ;;  %v4912_v31 = vld [vmem:[#allocation11 + $0xd80] sm:$0xff] }
 0x394   :  { %8975 = vmatprep.mubr.msk.f32.mxu1 %vm140_vm3, %v3169_v3  ;;  %10584 = vmatpush1.bf16.msra.mxu0 %v10583_v7  ;;  %v4878_v3 = vld [vmem:[#allocation11 + $0xc70] sm:$0xff]  ;;  %v4917_v25 = vld [vmem:[#allocation11 + $0xda8] sm:$0xff]  ;;  %v4916_v17 = vld [vmem:[#allocation11 + $0xda0] sm:$0xff] }
 0x395   :  { %10752 = vmatpush1.bf16.msra.mxu1 %v10751_v21  ;;  %10586 = vmatprep.subr.bf16.mxu0 %v10585_v24  ;;  %v10771_v7 = vpack.c.bf16 %v4878_v3, %v4874_v2  ;;  %v4883_v21 = vld [vmem:[#allocation11 + $0xc98] sm:$0xff]  ;;  %v10605_v24 = vpack.c.bf16 %v4885_v8, %v4881_v19  ;;  %v4914_v2 = vld [vmem:[#allocation11 + $0xd90] sm:$0xff]  ;;  %v4921_v19 = vld [vmem:[#allocation11 + $0xdc8] sm:$0xff] }
 0x396   :  { %3796 = vmatmul.mubr.f32.gmra.mrb[22].mxu0 %v3167_v39  ;;  %10754 = vmatprep.subr.bf16.mxu1 %v10753_v47  ;;  %v10773_v47 = vpack.c.bf16 %v4887_v26, %v4883_v21  ;;  %v4918_v3 = vld [vmem:[#allocation11 + $0xdb0] sm:$0xff]  ;;  %v4925_v8 = vld [vmem:[#allocation11 + $0xde8] sm:$0xff]  ;;  %v4923_v21 = vld [vmem:[#allocation11 + $0xdd8] sm:$0xff] }
 0x397   :  { %4063 = vmatmul.mubr.f32.gmra.mrb[14].mxu1 %v3167_v39  ;;  %v4891_v39 = vld [vmem:[#allocation11 + $0xcd8] sm:$0xff]  ;;  %v4920_v27 = vld [vmem:[#allocation11 + $0xdc0] sm:$0xff]  ;;  %v4922_v33 = vld [vmem:[#allocation11 + $0xdd0] sm:$0xff] }
 0x398   :  { %10588 = vmatpush1.bf16.msra.mxu0 %v10587_v34  ;;  %v4893_v34 = vld [vmem:[#allocation11 + $0xce8] sm:$0xff]  ;;  %v4927_v26 = vld [vmem:[#allocation11 + $0xdf8] sm:$0xff]  ;;  %v4924_v0 = vld [vmem:[#allocation11 + $0xde0] sm:$0xff] }
 0x399   :  { %10756 = vmatpush1.bf16.msra.mxu1 %v10755_v35  ;;  %10590 = vmatprep.subr.bf16.mxu0 %v10589_v38  ;;  %v10609_v35 = vpack.c.bf16 %v4893_v34, %v4889_v22  ;;  %v4895_v38 = vld [vmem:[#allocation11 + $0xcf8] sm:$0xff]  ;;  %v4926_v11 = vld [vmem:[#allocation11 + $0xdf0] sm:$0xff]  ;;  %v4929_v22 = vld [vmem:[#allocation11 + $0xe08] sm:$0xff] }
 0x39a   :  { %10758 = vmatprep.subr.bf16.mxu1 %v10757_v43  ;;  %v10777_v58 = vpack.c.bf16 %v4895_v38, %v4891_v39  ;;  %v10611_v43 = vpack.c.bf16 %v4892_v42, %v4888_v41  ;;  %v4933_v34 = vld [vmem:[#allocation11 + $0xe28] sm:$0xff]  ;;  %v4931_v39 = vld [vmem:[#allocation11 + $0xe18] sm:$0xff]  ;;  %v4928_v41 = vld [vmem:[#allocation11 + $0xe00] sm:$0xff] }
 0x39b   :  { %v4935_v38 = vld [vmem:[#allocation11 + $0xe38] sm:$0xff]  ;;  %v4932_v42 = vld [vmem:[#allocation11 + $0xe20] sm:$0xff]  ;;  %v4930_v23 = vld [vmem:[#allocation11 + $0xe10] sm:$0xff] }
 0x39c   :  { %10592 = vmatpush1.bf16.msra.mxu0 %v10591_v54  ;;  %v4899_v54 = vld [vmem:[#allocation11 + $0xd18] sm:$0xff]  ;;  %v4934_v45 = vld [vmem:[#allocation11 + $0xe30] sm:$0xff]  ;;  %v4936_v46 = vld [vmem:[#allocation11 + $0xe40] sm:$0xff] }
 0x39d   :  { %10760 = vmatpush1.bf16.msra.mxu1 %v10759_v57  ;;  %10594 = vmatprep.subr.bf16.mxu0 %v10593_v56  ;;  %v10613_v57 = vpack.c.bf16 %v4901_v52, %v4897_v50  ;;  %v4903_v56 = vld [vmem:[#allocation11 + $0xd38] sm:$0xff]  ;;  %v4937_v50 = vld [vmem:[#allocation11 + $0xe48] sm:$0xff]  ;;  %v4940_v36 = vld [vmem:[#allocation11 + $0xe60] sm:$0xff] }
 0x39e   :  { %10762 = vmatprep.subr.bf16.mxu1 %v10761_v44  ;;  %v10781_v44 = vpack.c.bf16 %v4903_v56, %v4899_v54  ;;  %v4941_v52 = vld [vmem:[#allocation11 + $0xe68] sm:$0xff]  ;;  %v4939_v54 = vld [vmem:[#allocation11 + $0xe58] sm:$0xff] }
 0x39f   :  { %v4943_v56 = vld [vmem:[#allocation11 + $0xe78] sm:$0xff] }
 0x3a0   :  { %10596 = vmatpush1.bf16.msra.mxu0 %v10595_v55  ;;  %v4902_v55 = vld [vmem:[#allocation11 + $0xd30] sm:$0xff] }
 0x3a1   :  { %10764 = vmatpush1.bf16.msra.mxu1 %v10763_v16  ;;  %10598 = vmatprep.subr.bf16.mxu0 %v10597_v4  ;;  %v10783_v16 = vpack.c.bf16 %v4902_v55, %v4898_v1  ;;  %v10617_v4 = vpack.c.bf16 %v4909_v60, %v4905_v59  ;;  %v4938_v1 = vld [vmem:[#allocation11 + $0xe50] sm:$0xff]  ;;  %v4945_v59 = vld [vmem:[#allocation11 + $0xe88] sm:$0xff] }
 0x3a2   :  { %10766 = vmatprep.subr.bf16.mxu1 %v10765_v9  ;;  %v10785_v9 = vpack.c.bf16 %v4911_v5, %v4907_v20  ;;  %v4942_v55 = vld [vmem:[#allocation11 + $0xe70] sm:$0xff]  ;;  %v4949_v60 = vld [vmem:[#allocation11 + $0xea8] sm:$0xff]  ;;  %v4947_v20 = vld [vmem:[#allocation11 + $0xe98] sm:$0xff] }
 0x3a3   :  { %v4951_v5 = vld [vmem:[#allocation11 + $0xeb8] sm:$0xff] }
 0x3a4   :  { %10600 = vmatpush1.bf16.msra.mxu0 %v10599_v28  ;;  %v10619_v28 = vpack.c.bf16 %v4908_v18, %v4904_v6  ;;  %v10805_v6 = vpack.c.bf16 %v4951_v5, %v4947_v20  ;;  %v4101_v18 = vld [vmem:[#allocation9] sm:$0xf] }
 0x3a5   :  { %10768 = vmatpush1.bf16.msra.mxu1 %v10767_v12  ;;  %10602 = vmatprep.subr.bf16.mxu0 %v10601_v53  ;;  %v10787_v12 = vpack.c.bf16 %v4910_v10, %v4906_v32  ;;  %v10621_v53 = vpack.c.bf16 %v4917_v25, %v4913_v49  ;;  %v13134_v32 = vld [vmem:[#allocation11 + $0xea0] sm:$0xff]  ;;  %v13137_v10 = vrot.slane %v4101_v18, %v12814_v29  ;;  %v13142_v49 = vld [vmem:[#allocation11 + $0xe90] sm:$0xff] }
 0x3a6   :  { %10770 = vmatprep.subr.bf16.mxu1 %v10769_v51  ;;  %v10789_v51 = vpack.c.bf16 %v4919_v14, %v4915_v37  ;;  %v13144_v25 = vld [vmem:[#allocation11 + $0xeb0] sm:$0xff]  ;;  %v13146_v37 = vld [vmem:[#allocation11 + $0xec8] sm:$0xff] }
 0x3a7   :  { %v13151_v14 = vld [vmem:[#allocation11 + $0xee8] sm:$0xff] }
 0x3a8   :  { %10604 = vmatpush1.bf16.msra.mxu0 %v10603_v63  ;;  %v10623_v63 = vpack.c.bf16 %v4916_v17, %v4912_v31  ;;  %v13153_v31 = vld [vmem:[#allocation11 + $0xed8] sm:$0xff] }
 0x3a9   :  { %10772 = vmatpush1.bf16.msra.mxu1 %v10771_v7  ;;  %10606 = vmatprep.subr.bf16.mxu0 %v10605_v24  ;;  %v10791_v7 = vpack.c.bf16 %v4918_v3, %v4914_v2  ;;  %v10625_v24 = vpack.c.bf16 %v4925_v8, %v4921_v19  ;;  %v13155_v17 = vld [vmem:[#allocation11 + $0xef8] sm:$0xff]  ;;  %v13159_v2 = vld [vmem:[#allocation11 + $0xee0] sm:$0xff]  ;;  %v13161_v3 = vld [vmem:[#allocation11 + $0xed0] sm:$0xff] }
 0x3aa   :  { %10774 = vmatprep.subr.bf16.mxu1 %v10773_v47  ;;  %v10793_v47 = vpack.c.bf16 %v4927_v26, %v4923_v21  ;;  %v13170_v26 = vld [vmem:[#allocation11 + $0xf08] sm:$0xff] }
 0x3ac   :  { %10608 = vmatpush1.bf16.msra.mxu0 %v10607_v62  ;;  %v10627_v62 = vpack.c.bf16 %v4924_v0, %v4920_v27  ;;  %v13172_v27 = vld [vmem:[#allocation11 + $0xf28] sm:$0xff] }
 0x3ad   :  { %10776 = vmatpush1.bf16.msra.mxu1 %v10775_v15  ;;  %10610 = vmatprep.subr.bf16.mxu0 %v10609_v35  ;;  %v10795_v15 = vpack.c.bf16 %v4926_v11, %v4922_v33  ;;  %v10629_v35 = vpack.c.bf16 %v4933_v34, %v4929_v22  ;;  %v13186_v22 = vld [vmem:[#allocation11 + $0xf38] sm:$0xff]  ;;  %v4087_v33 = vld [vmem:[#allocation2 + $0x48] sm:$0xff] }
 0x3ae   :  { %10778 = vmatprep.subr.bf16.mxu1 %v10777_v58  ;;  %v10797_v58 = vpack.c.bf16 %v4935_v38, %v4931_v39 }
 0x3b0   :  { %10612 = vmatpush1.bf16.msra.mxu0 %v10611_v43  ;;  %v10631_v43 = vpack.c.bf16 %v4932_v42, %v4928_v41 }
 0x3b1   :  { %10780 = vmatpush1.bf16.msra.mxu1 %v10779_v48  ;;  %10614 = vmatprep.subr.bf16.mxu0 %v10613_v57  ;;  %v10799_v48 = vpack.c.bf16 %v4934_v45, %v4930_v23  ;;  %v10633_v57 = vpack.c.bf16 %v4941_v52, %v4937_v50 }
 0x3b2   :  { %10782 = vmatprep.subr.bf16.mxu1 %v10781_v44  ;;  %v10801_v44 = vpack.c.bf16 %v4943_v56, %v4939_v54 }
 0x3b4   :  { %10616 = vmatpush1.bf16.msra.mxu0 %v10615_v61  ;;  %v10635_v61 = vpack.c.bf16 %v4940_v36, %v4936_v46 }
 0x3b5   :  { %10784 = vmatpush1.bf16.msra.mxu1 %v10783_v16  ;;  %10618 = vmatprep.subr.bf16.mxu0 %v10617_v4  ;;  %v10803_v16 = vpack.c.bf16 %v4942_v55, %v4938_v1  ;;  %v10637_v4 = vpack.c.bf16 %v4949_v60, %v4945_v59 }
 0x3b6   :  { %10786 = vmatprep.subr.bf16.mxu1 %v10785_v9  ;;  %v13130_v9 = vrot.slane %v4101_v18, %v12878_v40 }
 0x3b8   :  { %10620 = vmatpush1.bf16.msra.mxu0 %v10619_v28  ;;  %v13132_v28 = vld [vmem:[#allocation11 + $0xe80] sm:$0xff] }
 0x3b9   :  { %10788 = vmatpush1.bf16.msra.mxu1 %v10787_v12  ;;  %10622 = vmatprep.subr.bf16.mxu0 %v10621_v53  ;;  %v13140_v12 = vrot.slane %v4101_v18, %v12882_v13  ;;  %v13149_v53 = vrot.slane %v4101_v18, %v12819_v30  ;;  %v10639_v21 = vpack.c.bf16 %v13134_v32, %v13132_v28  ;;  %v12275_v28 = vld [vmem:[#allocation2 + $0x70] sm:$0xff] }
 0x3ba   :  { %10790 = vmatprep.subr.bf16.mxu1 %v10789_v51 }
 0x3bc   :  { %10624 = vmatpush1.bf16.msra.mxu0 %v10623_v63  ;;  %v13157_v63 = vld [vmem:[#allocation11 + $0xec0] sm:$0xff] }
 0x3bd   :  { %10792 = vmatpush1.bf16.msra.mxu1 %v10791_v7  ;;  %10626 = vmatprep.subr.bf16.mxu0 %v10625_v24  ;;  %v13168_v24 = vld [vmem:[#allocation11 + $0xef0] sm:$0xff] }
 0x3be   :  { %10794 = vmatprep.subr.bf16.mxu1 %v10793_v47 }
 0x3c0   :  { %10628 = vmatpush1.bf16.msra.mxu0 %v10627_v62 }
 0x3c1   :  { %10796 = vmatpush1.bf16.msra.mxu1 %v10795_v15  ;;  %10630 = vmatprep.subr.bf16.mxu0 %v10629_v35  ;;  %v13184_v15 = vld [vmem:[#allocation11 + $0xf18] sm:$0xff] }
 0x3c2   :  { %10798 = vmatprep.subr.bf16.mxu1 %v10797_v58 }
 0x3c4   :  { %10632 = vmatpush1.bf16.msra.mxu0 %v10631_v43 }
 0x3c5   :  { %10800 = vmatpush1.bf16.msra.mxu1 %v10799_v48  ;;  %10634 = vmatprep.subr.bf16.mxu0 %v10633_v57 }
 0x3c6   :  { %10802 = vmatprep.subr.bf16.mxu1 %v10801_v44 }
 0x3c8   :  { %10636 = vmatpush1.bf16.msra.mxu0 %v10635_v61 }
 0x3c9   :  { %10804 = vmatpush1.bf16.msra.mxu1 %v10803_v16  ;;  %10638 = vmatprep.subr.bf16.mxu0 %v10637_v4 }
 0x3ca   :  { %10806 = vmatprep.subr.bf16.mxu1 %v10805_v6 }
 0x45d   :  { %v3779_v51 = vpop.f32.mrb[16].mxu0 }
 0x45e   :  { %v13164_v7 = vadd.f32 %v13130_v9, %v3779_v51  ;;  %v4046_v19 = vpop.f32.mrb[8].mxu1  ;;  %v3781_v8 = vpop.f32.mrb[17].mxu0 }
 0x45f   :  { %v13175_v0 = vadd.f32 %v13137_v10, %v4046_v19  ;;  %v13178_v47 = vadd.f32 %v13140_v12, %v3781_v8  ;;  %v4048_v62 = vpop.f32.mrb[9].mxu1 }
 0x460   :  { %v4139_v34 = vmul.f32 %v13164_v7, %v13164_v7  ;;  %v13191_v39 = vadd.f32 %v13149_v53, %v4048_v62 }
 0x461   :  { %v4141_v41 = vmul.f32 %v13175_v0, %v13175_v0  ;;  %v4140_v42 = vmul.f32 %v13178_v47, %v13178_v47  ;;  %v3785_v58 = vpop.f32.mrb[18].mxu0 }
 0x462   :  { %v4155_v45 = vmul.f32 %v4139_v34, %v13164_v7  ;;  %v4142_v48 = vmul.f32 %v13191_v39, %v13191_v39  ;;  %v13209_v50 = vadd.f32 %v13130_v9, %v3785_v58  ;;  %v4052_v52 = vpop.f32.mrb[10].mxu1  ;;  %v3787_v54 = vpop.f32.mrb[19].mxu0 }
 0x463   :  { %v4157_v56 = vmul.f32 %v4141_v41, %v13175_v0  ;;  %v4156_v46 = vmul.f32 %v4140_v42, %v13178_v47  ;;  %v13216_v36 = vadd.f32 %v13137_v10, %v4052_v52  ;;  %v13219_v44 = vadd.f32 %v13140_v12, %v3787_v54  ;;  %v4054_v61 = vpop.f32.mrb[11].mxu1 }
 0x464   :  { %v4171_v1 = vmul.f32 0.044715, %v4155_v45  ;;  %v4158_v55 = vmul.f32 %v4142_v48, %v13191_v39  ;;  %v4143_v16 = vmul.f32 %v13209_v50, %v13209_v50  ;;  %v13225_v59 = vadd.f32 %v13149_v53, %v4054_v61 }
 0x465   :  { %v4173_v60 = vmul.f32 0.044715, %v4157_v56  ;;  %v4172_v20 = vmul.f32 0.044715, %v4156_v46  ;;  %v4145_v4 = vmul.f32 %v13216_v36, %v13216_v36  ;;  %v4144_v5 = vmul.f32 %v13219_v44, %v13219_v44  ;;  %v3791_v6 = vpop.f32.mrb[20].mxu0 }
 0x466   :  { %v4187_v18 = vadd.f32 %v4171_v1, %v13164_v7  ;;  %v4174_v51 = vmul.f32 0.044715, %v4158_v55  ;;  %v4159_v19 = vmul.f32 %v4143_v16, %v13209_v50  ;;  %v4146_v8 = vmul.f32 %v13225_v59, %v13225_v59  ;;  %v4058_v62 = vpop.f32.mrb[12].mxu1  ;;  %v3793_v34 = vpop.f32.mrb[21].mxu0 }
 0x467   :  { %v4189_v41 = vadd.f32 %v4173_v60, %v13175_v0  ;;  %v4188_v42 = vadd.f32 %v4172_v20, %v13178_v47  ;;  %v4161_v58 = vmul.f32 %v4145_v4, %v13216_v36  ;;  %v4160_v45 = vmul.f32 %v4144_v5, %v13219_v44  ;;  %v4060_v48 = vpop.f32.mrb[13].mxu1 }
 0x468   :  { %v4203_v52 = vmul.f32 0.7978846, %v4187_v18  ;;  %v4190_v54 = vadd.f32 %v4174_v51, %v13191_v39  ;;  %v4175_v56 = vmul.f32 0.044715, %v4159_v19  ;;  %v4162_v46 = vmul.f32 %v4146_v8, %v13225_v59 }
 0x469   :  { %v4205_v61 = vmul.f32 0.7978846, %v4189_v41  ;;  %v4204_v1 = vmul.f32 0.7978846, %v4188_v42  ;;  %v4177_v55 = vmul.f32 0.044715, %v4161_v58  ;;  %v13242_v16 = vadd.f32 %v13130_v9, %v3791_v6 }
 0x46a   :  { %12197 = vtanh.f32 %v4203_v52  ;;  %v4206_v60 = vmul.f32 0.7978846, %v4190_v54  ;;  %v4191_v20 = vadd.f32 %v4175_v56, %v13209_v50  ;;  %v4176_v4 = vmul.f32 0.044715, %v4160_v45  ;;  %v3797_v57 = vpop.f32.mrb[22].mxu0  ;;  %v4064_v5 = vpop.f32.mrb[14].mxu1 }
 0x46b   :  { %12199 = vtanh.f32 %v4205_v61  ;;  %v4193_v18 = vadd.f32 %v4177_v55, %v13216_v36  ;;  %v4178_v51 = vmul.f32 0.044715, %v4162_v46  ;;  %v4147_v19 = vmul.f32 %v13242_v16, %v13242_v16  ;;  %v3799_v8 = vpop.f32.mrb[23].mxu0  ;;  %v4066_v41 = vpop.f32.mrb[15].mxu1 }
 0x46c   :  { %12201 = vtanh.f32 %v4204_v1  ;;  %v4207_v42 = vmul.f32 0.7978846, %v4191_v20  ;;  %v4192_v6 = vadd.f32 %v4176_v4, %v13219_v44  ;;  %v13250_v58 = vadd.f32 %v13137_v10, %v4058_v62 }
 0x46d   :  { %12203 = vtanh.f32 %v4206_v60  ;;  %v4209_v45 = vmul.f32 0.7978846, %v4193_v18  ;;  %v4194_v52 = vadd.f32 %v4178_v51, %v13225_v59  ;;  %v4163_v54 = vmul.f32 %v4147_v19, %v13242_v16 }
 0x46e   :  { %12205 = vtanh.f32 %v4207_v42  ;;  %v4208_v56 = vmul.f32 0.7978846, %v4192_v6  ;;  %v4149_v46 = vmul.f32 %v13250_v58, %v13250_v58  ;;  %v13257_v61 = vadd.f32 %v13140_v12, %v3793_v34 }
 0x46f   :  { %12207 = vtanh.f32 %v4209_v45  ;;  %v4210_v1 = vmul.f32 0.7978846, %v4194_v52  ;;  %v4179_v55 = vmul.f32 0.044715, %v4163_v54  ;;  %v13260_v62 = vadd.f32 %v13149_v53, %v4060_v48 }
 0x470   :  { %12209 = vtanh.f32 %v4208_v56  ;;  %v4165_v60 = vmul.f32 %v4149_v46, %v13250_v58  ;;  %v4148_v20 = vmul.f32 %v13257_v61, %v13257_v61  ;;  %v13266_v4 = vadd.f32 %v13130_v9, %v3797_v57 }
 0x471   :  { %12211 = vtanh.f32 %v4210_v1  ;;  %v4195_v18 = vadd.f32 %v4179_v55, %v13242_v16  ;;  %v4150_v34 = vmul.f32 %v13260_v62, %v13260_v62  ;;  %v13272_v51 = vadd.f32 %v13137_v10, %v4064_v5 }
 0x472   :  { %v4181_v48 = vmul.f32 0.044715, %v4165_v60  ;;  %v4164_v19 = vmul.f32 %v4148_v20, %v13257_v61  ;;  %v4151_v42 = vmul.f32 %v13266_v4, %v13266_v4  ;;  %v13278_v6 = vadd.f32 %v13140_v12, %v3799_v8 }
 0x473   :  { %v4211_v9 = vmul.f32 0.7978846, %v4195_v18  ;;  %v4166_v57 = vmul.f32 %v4150_v34, %v13260_v62  ;;  %v4153_v45 = vmul.f32 %v13272_v51, %v13272_v51  ;;  %v13284_v52 = vadd.f32 %v13149_v53, %v4066_v41 }
 0x474   :  { %v12198_v10 = vpop.eup %12197  ;;  %v4197_v5 = vadd.f32 %v4181_v48, %v13250_v58  ;;  %v4180_v54 = vmul.f32 0.044715, %v4164_v19  ;;  %v4167_v56 = vmul.f32 %v4151_v42, %v13266_v4  ;;  %v13290_v46 = vmul.f32 %v13278_v6, %v13278_v6 }
 0x475   :  { %v12200_v12 = vpop.eup %12199  ;;  %v4235_v8 = vadd.f32 1.0, %v12198_v10  ;;  %12213 = vtanh.f32 %v4211_v9  ;;  %v4182_v1 = vmul.f32 0.044715, %v4166_v57  ;;  %v4169_v55 = vmul.f32 %v4153_v45, %v13272_v51 }
 0x476   :  { %v12202_v60 = vpop.eup %12201  ;;  %v4237_v20 = vadd.f32 1.0, %v12200_v12  ;;  %v4213_v53 = vmul.f32 0.7978846, %v4197_v5  ;;  %v4196_v41 = vadd.f32 %v4180_v54, %v13257_v61  ;;  %v4183_v18 = vmul.f32 0.044715, %v4167_v56  ;;  %v4085_v54 = vld [vmem:[#allocation2 + $0x38] sm:$0xff] }
 0x477   :  { %v12204_v34 = vpop.eup %12203  ;;  %v4251_v48 = vmul.f32 0.5, %v4235_v8  ;;  %v4236_v19 = vadd.f32 1.0, %v12202_v60  ;;  %v4198_v42 = vadd.f32 %v4182_v1, %v13260_v62  ;;  %v4185_v23 = vmul.f32 0.044715, %v4169_v55 }
 0x478   :  { %v12206_v43 = vpop.eup %12205  ;;  %v4253_v38 = vmul.f32 0.5, %v4237_v20  ;;  %v4238_v35 = vadd.f32 1.0, %v12204_v34  ;;  %12215 = vtanh.f32 %v4213_v53  ;;  %v4212_v9 = vmul.f32 0.7978846, %v4196_v41 }
 0x479   :  { %v12208_v57 = vpop.eup %12207  ;;  %v4267_v45 = vmul.f32 %v4251_v48, %v13164_v7  ;;  %v4252_v10 = vmul.f32 0.5, %v4236_v19  ;;  %v4239_v12 = vadd.f32 1.0, %v12206_v43  ;;  %v4214_v5 = vmul.f32 0.7978846, %v4198_v42  ;;  %v4086_v7 = vld [vmem:[#allocation2 + $0x40] sm:$0xff] }
 0x47a   :  { %v12210_v11 = vpop.eup %12209  ;;  %v4269_v56 = vmul.f32 %v4253_v38, %v13175_v0  ;;  %v4254_v8 = vmul.f32 0.5, %v4238_v35  ;;  %v4241_v60 = vadd.f32 1.0, %v12208_v57  ;;  %12217 = vtanh.f32 %v4212_v9  ;;  %v4088_v0 = vld [vmem:[#allocation2 + $0x50] sm:$0xff] }
 0x47b   :  { %v12212_v1 = vpop.eup %12211  ;;  %v4283_v55 = vadd.f32 %v4267_v45, %v4085_v54  ;;  %v4268_v20 = vmul.f32 %v4252_v10, %v13178_v47  ;;  %v4255_v53 = vmul.f32 0.5, %v4239_v12  ;;  %v4240_v41 = vadd.f32 1.0, %v12210_v11  ;;  %v4089_v11 = vld [vmem:[#allocation2 + $0x68] sm:$0xff]  ;;  %v13305_v57 = vld [vmem:[#allocation2 + $0x30] sm:$0xff]  ;;  %v4091_v10 = vld [vmem:[#allocation2 + $0x78] sm:$0xff] }
 0x47c   :  { %v13298_v34 = vadd.f32 %v4269_v56, %v4087_v33  ;;  %v4270_v43 = vmul.f32 %v4254_v8, %v13191_v39  ;;  %v4257_v48 = vmul.f32 0.5, %v4241_v60  ;;  %v4242_v19 = vadd.f32 1.0, %v12212_v1  ;;  %v13318_v54 = vld [vmem:[#allocation11 + $0xf20] sm:$0xff] }
 0x47d   :  { %4299 = vst [vmem:[#allocation2 + $0x38] sm:$0xff] %v4283_v55  ;;  %v4284_v42 = vadd.f32 %v4268_v20, %v4086_v7  ;;  %v4271_v35 = vmul.f32 %v4255_v53, %v13209_v50  ;;  %v4256_v38 = vmul.f32 0.5, %v4240_v41  ;;  %12219 = vtanh.f32 %v4214_v5  ;;  %5226 = vmatprep.mubr.f32.mxu0 %v4283_v55  ;;  %5493 = vmatprep.mubr.f32.mxu1 %v4283_v55  ;;  %v13331_v20 = vld [vmem:[#allocation11 + $0xf30] sm:$0xff]  ;;  %v4969_v7 = vld [vmem:[#allocation11 + $0xf48] sm:$0xff] }
 0x47e   :  { %4301 = vst [vmem:[#allocation2 + $0x48] sm:$0xff] %v13298_v34  ;;  %v4286_v47 = vadd.f32 %v4270_v43, %v4088_v0  ;;  %v4273_v33 = vmul.f32 %v4257_v48, %v13216_v36  ;;  %v4258_v9 = vmul.f32 0.5, %v4242_v19  ;;  %v4199_v39 = vadd.f32 %v4183_v18, %v13266_v4  ;;  %5227 = vmatmul.mubr.f32.vlgmr.msra.gmra.mrb[24].mxu0 %v13305_v57  ;;  %v13316_v18 = vld [vmem:[#allocation11 + $0xf00] sm:$0xff]  ;;  %v4973_v43 = vld [vmem:[#allocation11 + $0xf68] sm:$0xff]  ;;  %v4971_v48 = vld [vmem:[#allocation11 + $0xf58] sm:$0xff] }
 0x47f   :  { %5494 = vmatmul.mubr.f32.vlgmr.msra.gmra.mrb[16].mxu1 %v13305_v57  ;;  %v12214_v50 = vpop.eup %12213  ;;  %4300 = vst [vmem:[#allocation2 + $0x40] sm:$0xff] %v4284_v42  ;;  %v4287_v45 = vadd.f32 %v4271_v35, %v4089_v11  ;;  %v4272_v12 = vmul.f32 %v4256_v38, %v13219_v44  ;;  %v4201_v5 = vadd.f32 %v4185_v23, %v13272_v51  ;;  %v4972_v38 = vld [vmem:[#allocation11 + $0xf60] sm:$0xff]  ;;  %v4093_v11 = vld [vmem:[#allocation2 + $0xf8] sm:$0xff] }
 0x480   :  { %v4168_v36 = vmul.f32 %v13290_v46, %v13278_v6  ;;  %10640 = vmatpush1.bf16.msra.mxu0 %v10639_v21  ;;  %4302 = vst [vmem:[#allocation2 + $0x50] sm:$0xff] %v4286_v47  ;;  %v4289_v56 = vadd.f32 %v4273_v33, %v4091_v10  ;;  %v4274_v8 = vmul.f32 %v4258_v9, %v13225_v59  ;;  %v4243_v60 = vadd.f32 1.0, %v12214_v50  ;;  %v13329_v59 = vld [vmem:[#allocation11 + $0xf10] sm:$0xff]  ;;  %v4981_v50 = vld [vmem:[#allocation11 + $0xfa8] sm:$0xff] }
 0x481   :  { %v4215_v1 = vmul.f32 0.7978846, %v4199_v39  ;;  %v14696_v23 = vpack.c.bf16 %v13144_v25, %v13142_v49  ;;  %v14697_v44 = vpack.c.bf16 %v13151_v14, %v13146_v37  ;;  %4303 = vst [vmem:[#allocation2 + $0x68] sm:$0xff] %v4287_v45  ;;  %v4288_v32 = vadd.f32 %v12275_v28, %v4272_v12  ;;  %5232 = vmatprep.mubr.f32.mxu0 %v4287_v45  ;;  %v12276_v25 = vld [vmem:[#allocation2 + $0x80] sm:$0xff]  ;;  %v4976_v28 = vld [vmem:[#allocation11 + $0xf80] sm:$0xff] }
 0x482   :  { %v4217_v21 = vmul.f32 0.7978846, %v4201_v5  ;;  %v4184_v46 = vmul.f32 0.044715, %v4168_v36  ;;  %v4154_v55 = vmul.f32 %v13284_v52, %v13284_v52  ;;  %5499 = vmatprep.mubr.f32.mxu1 %v4287_v45  ;;  %v12216_v49 = vpop.eup %12215  ;;  %4305 = vst [vmem:[#allocation2 + $0x78] sm:$0xff] %v4289_v56  ;;  %v4290_v53 = vadd.f32 %v12276_v25, %v4274_v8  ;;  %5233 = vmatmul.mubr.f32.gmra.mrb[26].mxu0 %v13305_v57 }
 0x483   :  { %10808 = vmatpush1.bf16.msra.mxu1 %v14696_v23  ;;  %10642 = vmatprep.subr.bf16.mxu0 %v14697_v44  ;;  %v4259_v37 = vmul.f32 0.5, %v4243_v60  ;;  %12221 = vtanh.f32 %v4215_v1  ;;  %v14698_v14 = vpack.c.bf16 %v13155_v17, %v13153_v31  ;;  %v10647_v41 = vpack.c.bf16 %v13318_v54, %v13316_v18  ;;  %4304 = vst [vmem:[#allocation2 + $0x70] sm:$0xff] %v4288_v32  ;;  %v4975_v31 = vld [vmem:[#allocation11 + $0xf78] sm:$0xff]  ;;  %v4968_v17 = vld [vmem:[#allocation11 + $0xf40] sm:$0xff]  ;;  %v4970_v60 = vld [vmem:[#allocation11 + $0xf50] sm:$0xff] }
 0x484   :  { %v4245_v19 = vadd.f32 1.0, %v12216_v49  ;;  %12223 = vtanh.f32 %v4217_v21  ;;  %v4200_v42 = vadd.f32 %v4184_v46, %v13278_v6  ;;  %v4170_v0 = vmul.f32 %v4154_v55, %v13284_v52  ;;  %5500 = vmatmul.mubr.f32.gmra.mrb[18].mxu1 %v13305_v57  ;;  %v12218_v47 = vpop.eup %12217  ;;  %4306 = vst [vmem:[#allocation2 + $0x80] sm:$0xff] %v4290_v53  ;;  %v4974_v1 = vld [vmem:[#allocation11 + $0xf70] sm:$0xff]  ;;  %v4979_v23 = vld [vmem:[#allocation11 + $0xf98] sm:$0xff]  ;;  %v4980_v32 = vld [vmem:[#allocation11 + $0xfa0] sm:$0xff] }
 0x485   :  { %10810 = vmatprep.subr.bf16.mxu1 %v14698_v14  ;;  %v14699_v35 = vpack.c.bf16 %v13159_v2, %v13157_v63  ;;  %v4275_v33 = vmul.f32 %v4259_v37, %v13242_v16  ;;  %v14700_v9 = vpack.c.bf16 %v13168_v24, %v13161_v3  ;;  %v14701_v39 = vpack.c.bf16 %v13172_v27, %v13170_v26  ;;  %v4977_v2 = vld [vmem:[#allocation11 + $0xf88] sm:$0xff]  ;;  %v4095_v3 = vld [vmem:[#allocation2 + $0x108] sm:$0xff] }
 0x486   :  { %v10815_v63 = vpack.c.bf16 %v13331_v20, %v13329_v59  ;;  %v4261_v45 = vmul.f32 0.5, %v4245_v19  ;;  %v4244_v10 = vadd.f32 1.0, %v12218_v47  ;;  %v4216_v12 = vmul.f32 0.7978846, %v4200_v42  ;;  %v4985_v55 = vld [vmem:[#allocation11 + $0xfc8] sm:$0xff]  ;;  %v4094_v20 = vld [vmem:[#allocation2 + $0x100] sm:$0xff] }
 0x487   :  { %10644 = vmatpush1.bf16.msra.mxu0 %v14699_v35  ;;  %10812 = vmatpush1.bf16.msra.mxu1 %v14700_v9  ;;  %v4186_v5 = vmul.f32 0.044715, %v4170_v0  ;;  %v14702_v16 = vpack.c.bf16 %v13186_v22, %v13184_v15  ;;  %v4291_v36 = vadd.f32 %v4275_v33, %v4093_v11  ;;  %v10649_v24 = vpack.c.bf16 %v4973_v43, %v4969_v7  ;;  %v12220_v26 = vpop.eup %12219  ;;  %v4983_v22 = vld [vmem:[#allocation11 + $0xfb8] sm:$0xff]  ;;  %v4989_v59 = vld [vmem:[#allocation11 + $0xfe8] sm:$0xff]  ;;  %v4984_v0 = vld [vmem:[#allocation11 + $0xfc0] sm:$0xff] }
 0x488   :  { %10646 = vmatprep.subr.bf16.mxu0 %v14701_v39  ;;  %v10817_v18 = vpack.c.bf16 %v4975_v31, %v4971_v48  ;;  %v10651_v54 = vpack.c.bf16 %v4972_v38, %v4968_v17  ;;  %v4277_v27 = vmul.f32 %v4261_v45, %v13250_v58  ;;  %v4260_v56 = vmul.f32 0.5, %v4244_v10  ;;  %v4987_v7 = vld [vmem:[#allocation11 + $0xfd8] sm:$0xff]  ;;  %v4988_v35 = vld [vmem:[#allocation11 + $0xfe0] sm:$0xff]  ;;  %v4096_v17 = vld [vmem:[#allocation2 + $0x110] sm:$0xff] }
 0x489   :  { %10814 = vmatprep.subr.bf16.mxu1 %v14702_v16  ;;  %12225 = vtanh.f32 %v4216_v12  ;;  %v4202_v8 = vadd.f32 %v4186_v5, %v13284_v52  ;;  %4307 = vst [vmem:[#allocation2 + $0xf8] sm:$0xff] %v4291_v36  ;;  %v4246_v44 = vadd.f32 1.0, %v12220_v26  ;;  %5238 = vmatprep.mubr.f32.mxu0 %v4291_v36  ;;  %v10653_v15 = vpack.c.bf16 %v4981_v50, %v4977_v2  ;;  %v4991_v42 = vld [vmem:[#allocation11 + $0xff8] sm:$0xff]  ;;  %v4993_v47 = vld [vmem:[#allocation11 + $0x1008] sm:$0xff]  ;;  %v4097_v50 = vld [vmem:[#allocation2 + $0x128] sm:$0xff] }
 0x48a   :  { %5505 = vmatprep.mubr.f32.mxu1 %v4291_v36  ;;  %v4293_v21 = vadd.f32 %v4277_v27, %v4095_v3  ;;  %v4276_v46 = vmul.f32 %v4260_v56, %v13257_v61  ;;  %5239 = vmatmul.mubr.f32.gmra.mrb[28].mxu0 %v13305_v57  ;;  %v10819_v25 = vpack.c.bf16 %v4974_v1, %v4970_v60  ;;  %v4978_v61 = vld [vmem:[#allocation11 + $0xf90] sm:$0xff]  ;;  %v4997_v11 = vld [vmem:[#allocation11 + $0x1028] sm:$0xff]  ;;  %v4995_v3 = vld [vmem:[#allocation11 + $0x1018] sm:$0xff] }
 0x48b   :  { %10648 = vmatpush1.bf16.msra.mxu0 %v10647_v41  ;;  %v4218_v58 = vmul.f32 0.7978846, %v4202_v8  ;;  %5506 = vmatmul.mubr.f32.gmra.mrb[20].mxu1 %v13305_v57  ;;  %v4262_v49 = vmul.f32 0.5, %v4246_v44  ;;  %v10821_v37 = vpack.c.bf16 %v4983_v22, %v4979_v23  ;;  %v10655_v14 = vpack.c.bf16 %v4980_v32, %v4976_v28  ;;  %v4982_v41 = vld [vmem:[#allocation11 + $0xfb0] sm:$0xff]  ;;  %v4999_v27 = vld [vmem:[#allocation11 + $0x1038] sm:$0xff]  ;;  %v5001_v56 = vld [vmem:[#allocation11 + $0x1048] sm:$0xff] }
 0x48c   :  { %10816 = vmatpush1.bf16.msra.mxu1 %v10815_v63  ;;  %10650 = vmatprep.subr.bf16.mxu0 %v10649_v24  ;;  %4309 = vst [vmem:[#allocation2 + $0x108] sm:$0xff] %v4293_v21  ;;  %v4292_v53 = vadd.f32 %v4276_v46, %v4094_v20  ;;  %v10657_v19 = vpack.c.bf16 %v4989_v59, %v4985_v55  ;;  %v4986_v10 = vld [vmem:[#allocation11 + $0xfd0] sm:$0xff]  ;;  %v4992_v24 = vld [vmem:[#allocation11 + $0x1000] sm:$0xff]  ;;  %v5005_v8 = vld [vmem:[#allocation11 + $0x1068] sm:$0xff] }
 0x48d   :  { %12227 = vtanh.f32 %v4218_v58  ;;  %10818 = vmatprep.subr.bf16.mxu1 %v10817_v18  ;;  %v12222_v43 = vpop.eup %12221  ;;  %v4278_v48 = vmul.f32 %v4262_v49, %v13260_v62  ;;  %v10823_v39 = vpack.c.bf16 %v4982_v41, %v4978_v61  ;;  %v10825_v2 = vpack.c.bf16 %v4991_v42, %v4987_v7  ;;  %v4990_v12 = vld [vmem:[#allocation11 + $0xff0] sm:$0xff]  ;;  %v4996_v18 = vld [vmem:[#allocation11 + $0x1020] sm:$0xff]  ;;  %v5003_v46 = vld [vmem:[#allocation11 + $0x1058] sm:$0xff] }
 0x48e   :  { %v12224_v31 = vpop.eup %12223  ;;  %4308 = vst [vmem:[#allocation2 + $0x100] sm:$0xff] %v4292_v53  ;;  %v4247_v38 = vadd.f32 1.0, %v12222_v43  ;;  %v10659_v62 = vpack.c.bf16 %v4988_v35, %v4984_v0  ;;  %v10661_v5 = vpack.c.bf16 %v4997_v11, %v4993_v47  ;;  %v4099_v1 = vld [vmem:[#allocation2 + $0x138] sm:$0xff]  ;;  %v10665_v21 = vpack.c.bf16 %v5005_v8, %v5001_v56  ;;  %v5000_v58 = vld [vmem:[#allocation11 + $0x1040] sm:$0xff]  ;;  %v5007_v49 = vld [vmem:[#allocation11 + $0x1078] sm:$0xff] }
 0x48f   :  { %10652 = vmatpush1.bf16.msra.mxu0 %v10651_v54  ;;  %v4294_v33 = vadd.f32 %v4278_v48, %v4096_v17  ;;  %v4249_v9 = vadd.f32 1.0, %v12224_v31  ;;  %v4994_v22 = vld [vmem:[#allocation11 + $0x1010] sm:$0xff]  ;;  %v5004_v55 = vld [vmem:[#allocation11 + $0x1060] sm:$0xff]  ;;  %v5013_v53 = vld [vmem:[#allocation11 + $0x10a8] sm:$0xff] }
 0x490   :  { %10654 = vmatprep.subr.bf16.mxu0 %v10653_v15  ;;  %10820 = vmatpush1.bf16.msra.mxu1 %v10819_v25  ;;  %v4263_v63 = vmul.f32 0.5, %v4247_v38  ;;  %v10827_v15 = vpack.c.bf16 %v4990_v12, %v4986_v10  ;;  %v4998_v28 = vld [vmem:[#allocation11 + $0x1030] sm:$0xff]  ;;  %v5009_v25 = vld [vmem:[#allocation11 + $0x1088] sm:$0xff]  ;;  %v5008_v42 = vld [vmem:[#allocation11 + $0x1080] sm:$0xff] }
 0x491   :  { %10822 = vmatprep.subr.bf16.mxu1 %v10821_v37  ;;  %4310 = vst [vmem:[#allocation2 + $0x110] sm:$0xff] %v4294_v33  ;;  %v4265_v45 = vmul.f32 0.5, %v4249_v9  ;;  %v4098_v37 = vld [vmem:[#allocation2 + $0x130] sm:$0xff]  ;;  %v10831_v41 = vpack.c.bf16 %v4998_v28, %v4994_v22  ;;  %v5002_v7 = vld [vmem:[#allocation11 + $0x1050] sm:$0xff]  ;;  %v10669_v48 = vpack.c.bf16 %v5013_v53, %v5009_v25  ;;  %v5012_v0 = vld [vmem:[#allocation11 + $0x10a0] sm:$0xff] }
 0x492   :  { %v4279_v36 = vmul.f32 %v4263_v63, %v13266_v4  ;;  %v10663_v4 = vpack.c.bf16 %v4996_v18, %v4992_v24  ;;  %v5006_v43 = vld [vmem:[#allocation11 + $0x1070] sm:$0xff]  ;;  %v5015_v35 = vld [vmem:[#allocation11 + $0x10b8] sm:$0xff]  ;;  %v5017_v31 = vld [vmem:[#allocation11 + $0x10c8] sm:$0xff]  ;;  %v10671_v33 = vpack.c.bf16 %v5012_v0, %v5008_v42 }
 0x493   :  { %10656 = vmatpush1.bf16.msra.mxu0 %v10655_v14  ;;  %v12226_v16 = vpop.eup %12225  ;;  %v4281_v54 = vmul.f32 %v4265_v45, %v13272_v51  ;;  %v10829_v51 = vpack.c.bf16 %v4999_v27, %v4995_v3  ;;  %v5021_v17 = vld [vmem:[#allocation11 + $0x10e8] sm:$0xff]  ;;  %v12277_v38 = vld [vmem:[#allocation2 + $0x140] sm:$0xff]  ;;  %v10835_v11 = vpack.c.bf16 %v5006_v43, %v5002_v7  ;;  %v5010_v9 = vld [vmem:[#allocation11 + $0x1090] sm:$0xff] }
 0x494   :  { %10658 = vmatprep.subr.bf16.mxu0 %v10657_v19  ;;  %v4248_v26 = vadd.f32 1.0, %v12226_v16  ;;  %10824 = vmatpush1.bf16.msra.mxu1 %v10823_v39  ;;  %v4295_v60 = vadd.f32 %v4279_v36, %v4097_v50  ;;  %v5011_v19 = vld [vmem:[#allocation11 + $0x1098] sm:$0xff]  ;;  %v5014_v39 = vld [vmem:[#allocation11 + $0x10b0] sm:$0xff]  ;;  %v5016_v50 = vld [vmem:[#allocation11 + $0x10c0] sm:$0xff] }
 0x495   :  { %10826 = vmatprep.subr.bf16.mxu1 %v10825_v2  ;;  %v13365_v23 = vadd.f32 %v4281_v54, %v4099_v1  ;;  %v10837_v63 = vpack.c.bf16 %v5015_v35, %v5011_v19  ;;  %v10673_v2 = vpack.c.bf16 %v5021_v17, %v5017_v31  ;;  %v5020_v45 = vld [vmem:[#allocation11 + $0x10e0] sm:$0xff]  ;;  %v5025_v10 = vld [vmem:[#allocation11 + $0x1108] sm:$0xff]  ;;  %v5018_v36 = vld [vmem:[#allocation11 + $0x10d0] sm:$0xff] }
 0x496   :  { %v4264_v44 = vmul.f32 0.5, %v4248_v26  ;;  %4311 = vst [vmem:[#allocation2 + $0x128] sm:$0xff] %v4295_v60  ;;  %5244 = vmatprep.mubr.f32.mxu0 %v4295_v60  ;;  %5511 = vmatprep.mubr.f32.mxu1 %v4295_v60  ;;  %v5029_v12 = vld [vmem:[#allocation11 + $0x1128] sm:$0xff]  ;;  %v10675_v16 = vpack.c.bf16 %v5020_v45, %v5016_v50  ;;  %v5022_v3 = vld [vmem:[#allocation11 + $0x10f0] sm:$0xff]  ;;  %v5027_v54 = vld [vmem:[#allocation11 + $0x1118] sm:$0xff] }
 0x497   :  { %10660 = vmatpush1.bf16.msra.mxu0 %v10659_v62  ;;  %v12228_v32 = vpop.eup %12227  ;;  %4313 = vst [vmem:[#allocation2 + $0x138] sm:$0xff] %v13365_v23  ;;  %5512 = vmatmul.mubr.f32.gmra.mrb[22].mxu1 %v13305_v57  ;;  %v5019_v62 = vld [vmem:[#allocation11 + $0x10d8] sm:$0xff]  ;;  %v10677_v18 = vpack.c.bf16 %v5029_v12, %v5025_v10  ;;  %v5024_v26 = vld [vmem:[#allocation11 + $0x1100] sm:$0xff]  ;;  %v5033_v8 = vld [vmem:[#allocation11 + $0x1148] sm:$0xff]  ;;  %v10843_v1 = vpack.c.bf16 %v5022_v3, %v5018_v36 }
 0x498   :  { %10662 = vmatprep.subr.bf16.mxu0 %v10661_v5  ;;  %v4280_v59 = vmul.f32 %v4264_v44, %v13278_v6  ;;  %v4250_v20 = vadd.f32 1.0, %v12228_v32  ;;  %5245 = vmatmul.mubr.f32.gmra.mrb[30].mxu0 %v13305_v57  ;;  %v10667_v6 = vpack.c.bf16 %v5004_v55, %v5000_v58  ;;  %v10833_v57 = vpack.c.bf16 %v5007_v49, %v5003_v46  ;;  %v5028_v27 = vld [vmem:[#allocation11 + $0x1120] sm:$0xff]  ;;  %v5031_v56 = vld [vmem:[#allocation11 + $0x1138] sm:$0xff]  ;;  %v5037_v60 = vld [vmem:[#allocation11 + $0x1168] sm:$0xff] }
 0x499   :  { %5315 = vmatprep.mubr.f32.mxu0 %v13298_v34  ;;  %5582 = vmatprep.mubr.f32.mxu1 %v13298_v34  ;;  %v10839_v5 = vpack.c.bf16 %v5014_v39, %v5010_v9  ;;  %v10679_v44 = vpack.c.bf16 %v5028_v27, %v5024_v26  ;;  %v10845_v22 = vpack.c.bf16 %v5031_v56, %v5027_v54  ;;  %v5035_v32 = vld [vmem:[#allocation11 + $0x1158] sm:$0xff]  ;;  %v5041_v58 = vld [vmem:[#allocation11 + $0x1188] sm:$0xff]  ;;  %v5034_v49 = vld [vmem:[#allocation11 + $0x1150] sm:$0xff] }
 0x49a   :  { %v13373_v14 = vadd.f32 %v4280_v59, %v4098_v37  ;;  %v4266_v61 = vmul.f32 0.5, %v4250_v20  ;;  %10828 = vmatpush1.bf16.msra.mxu1 %v10827_v15  ;;  %v5026_v15 = vld [vmem:[#allocation11 + $0x1110] sm:$0xff]  ;;  %v10681_v28 = vpack.c.bf16 %v5037_v60, %v5033_v8  ;;  %v5039_v46 = vld [vmem:[#allocation11 + $0x1178] sm:$0xff]  ;;  %v5045_v55 = vld [vmem:[#allocation11 + $0x11a8] sm:$0xff] }
 0x49b   :  { %10664 = vmatpush1.bf16.msra.mxu0 %v10663_v4  ;;  %10830 = vmatprep.subr.bf16.mxu1 %v10829_v51  ;;  %v5030_v4 = vld [vmem:[#allocation11 + $0x1130] sm:$0xff]  ;;  %v5032_v51 = vld [vmem:[#allocation11 + $0x1140] sm:$0xff]  ;;  %v10849_v53 = vpack.c.bf16 %v5039_v46, %v5035_v32  ;;  %v10685_v37 = vpack.c.bf16 %v5045_v55, %v5041_v58  ;;  %v5047_v7 = vld [vmem:[#allocation11 + $0x11b8] sm:$0xff] }
 0x49c   :  { %10666 = vmatprep.subr.bf16.mxu0 %v10665_v21  ;;  %4312 = vst [vmem:[#allocation2 + $0x130] sm:$0xff] %v13373_v14  ;;  %v4282_v34 = vmul.f32 %v4266_v61, %v13284_v52  ;;  %v5023_v52 = vld [vmem:[#allocation11 + $0x10f8] sm:$0xff]  ;;  %v5036_v21 = vld [vmem:[#allocation11 + $0x1160] sm:$0xff]  ;;  %v10847_v59 = vpack.c.bf16 %v5030_v4, %v5026_v15  ;;  %v5038_v25 = vld [vmem:[#allocation11 + $0x1170] sm:$0xff] }
 0x49d   :  { %v10841_v24 = vpack.c.bf16 %v5023_v52, %v5019_v62  ;;  %v10683_v20 = vpack.c.bf16 %v5036_v21, %v5032_v51  ;;  %v5043_v61 = vld [vmem:[#allocation11 + $0x1198] sm:$0xff]  ;;  %v5049_v43 = vld [vmem:[#allocation11 + $0x11c8] sm:$0xff]  ;;  %v5042_v42 = vld [vmem:[#allocation11 + $0x1190] sm:$0xff] }
 0x49e   :  { %v4298_v47 = vadd.f32 %v12277_v38, %v4282_v34  ;;  %10832 = vmatpush1.bf16.msra.mxu1 %v10831_v41  ;;  %v5040_v41 = vld [vmem:[#allocation11 + $0x1180] sm:$0xff]  ;;  %v5046_v0 = vld [vmem:[#allocation11 + $0x11b0] sm:$0xff]  ;;  %v10853_v34 = vpack.c.bf16 %v5047_v7, %v5043_v61  ;;  %v5051_v31 = vld [vmem:[#allocation11 + $0x11d8] sm:$0xff] }
 0x49f   :  { %10668 = vmatpush1.bf16.msra.mxu0 %v10667_v6  ;;  %10834 = vmatprep.subr.bf16.mxu1 %v10833_v57  ;;  %v5044_v6 = vld [vmem:[#allocation11 + $0x11a0] sm:$0xff]  ;;  %v5053_v57 = vld [vmem:[#allocation11 + $0x11e8] sm:$0xff]  ;;  %v10855_v9 = vpack.c.bf16 %v5046_v0, %v5042_v42  ;;  %v5059_v45 = vld [vmem:[#allocation11 + $0x1218] sm:$0xff] }
 0x4a0   :  { %10670 = vmatprep.subr.bf16.mxu0 %v10669_v48  ;;  %4314 = vst [vmem:[#allocation2 + $0x140] sm:$0xff] %v4298_v47  ;;  %v10851_v48 = vpack.c.bf16 %v5038_v25, %v5034_v49  ;;  %v10687_v19 = vpack.c.bf16 %v5044_v6, %v5040_v41  ;;  %v10689_v35 = vpack.c.bf16 %v5053_v57, %v5049_v43  ;;  %v5048_v17 = vld [vmem:[#allocation11 + $0x11c0] sm:$0xff]  ;;  %v5055_v47 = vld [vmem:[#allocation11 + $0x11f8] sm:$0xff]  ;;  %v5070_v32 = vld [vmem:[#allocation11 + $0x1270] sm:$0xff] }
 0x4a1   :  { %v5052_v38 = vld [vmem:[#allocation11 + $0x11e0] sm:$0xff]  ;;  %v10857_v62 = vpack.c.bf16 %v5055_v47, %v5051_v31  ;;  %v5063_v12 = vld [vmem:[#allocation11 + $0x1238] sm:$0xff]  ;;  %v5078_v61 = vld [vmem:[#allocation11 + $0x12b0] sm:$0xff] }
 0x4a2   :  { %10836 = vmatpush1.bf16.msra.mxu1 %v10835_v11  ;;  %v5057_v11 = vld [vmem:[#allocation11 + $0x1208] sm:$0xff]  ;;  %v10691_v39 = vpack.c.bf16 %v5052_v38, %v5048_v17  ;;  %v5056_v52 = vld [vmem:[#allocation11 + $0x1200] sm:$0xff]  ;;  %v10861_v54 = vpack.c.bf16 %v5063_v12, %v5059_v45  ;;  %v5067_v27 = vld [vmem:[#allocation11 + $0x1258] sm:$0xff] }
 0x4a3   :  { %10672 = vmatpush1.bf16.msra.mxu0 %v10671_v33  ;;  %10838 = vmatprep.subr.bf16.mxu1 %v10837_v63  ;;  %v5061_v33 = vld [vmem:[#allocation11 + $0x1228] sm:$0xff]  ;;  %v5050_v63 = vld [vmem:[#allocation11 + $0x11d0] sm:$0xff]  ;;  %v5060_v10 = vld [vmem:[#allocation11 + $0x1220] sm:$0xff] }
 0x4a4   :  { %10674 = vmatprep.subr.bf16.mxu0 %v10673_v2  ;;  %v5054_v2 = vld [vmem:[#allocation11 + $0x11f0] sm:$0xff]  ;;  %v10693_v50 = vpack.c.bf16 %v5061_v33, %v5057_v11  ;;  %v10695_v3 = vpack.c.bf16 %v5060_v10, %v5056_v52  ;;  %v5064_v56 = vld [vmem:[#allocation11 + $0x1240] sm:$0xff]  ;;  %v5071_v60 = vld [vmem:[#allocation11 + $0x1278] sm:$0xff] }
 0x4a5   :  { %v10859_v36 = vpack.c.bf16 %v5054_v2, %v5050_v63  ;;  %v5068_v8 = vld [vmem:[#allocation11 + $0x1260] sm:$0xff]  ;;  %v5075_v21 = vld [vmem:[#allocation11 + $0x1298] sm:$0xff]  ;;  %v4806_v57 = vld [vmem:[#allocation2 + $0x78] sm:$0xff] }
 0x4a6   :  { %10840 = vmatpush1.bf16.msra.mxu1 %v10839_v5  ;;  %v5065_v5 = vld [vmem:[#allocation11 + $0x1248] sm:$0xff]  ;;  %v10699_v4 = vpack.c.bf16 %v5068_v8, %v5064_v56  ;;  %v5079_v46 = vld [vmem:[#allocation11 + $0x12b8] sm:$0xff]  ;;  %v5072_v58 = vld [vmem:[#allocation11 + $0x1280] sm:$0xff] }
 0x4a7   :  { %10676 = vmatpush1.bf16.msra.mxu0 %v10675_v16  ;;  %10842 = vmatprep.subr.bf16.mxu1 %v10841_v24  ;;  %v5069_v16 = vld [vmem:[#allocation11 + $0x1268] sm:$0xff]  ;;  %v5058_v24 = vld [vmem:[#allocation11 + $0x1210] sm:$0xff]  ;;  %v5076_v55 = vld [vmem:[#allocation11 + $0x12a0] sm:$0xff]  ;;  %v10869_v25 = vpack.c.bf16 %v5079_v46, %v5075_v21 }
 0x4a8   :  { %10678 = vmatprep.subr.bf16.mxu0 %v10677_v18  ;;  %v5062_v18 = vld [vmem:[#allocation11 + $0x1230] sm:$0xff]  ;;  %v10697_v26 = vpack.c.bf16 %v5069_v16, %v5065_v5  ;;  %v4323_v41 = vld [vmem:[#allocation2 + $0x40] sm:$0xff]  ;;  %v5089_v31 = vld [vmem:[#allocation11 + $0x1308] sm:$0xff] }
 0x4a9   :  { %v10863_v15 = vpack.c.bf16 %v5062_v18, %v5058_v24  ;;  %v5083_v7 = vld [vmem:[#allocation11 + $0x12d8] sm:$0xff]  ;;  %v5082_v0 = vld [vmem:[#allocation11 + $0x12d0] sm:$0xff]  ;;  %v5093_v17 = vld [vmem:[#allocation11 + $0x1328] sm:$0xff] }
 0x4aa   :  { %10844 = vmatpush1.bf16.msra.mxu1 %v10843_v1  ;;  %v5073_v1 = vld [vmem:[#allocation11 + $0x1288] sm:$0xff]  ;;  %v5087_v43 = vld [vmem:[#allocation11 + $0x12f8] sm:$0xff]  ;;  %v4342_v63 = vld [vmem:[#allocation2 + $0x108] sm:$0xff] }
 0x4ab   :  { %10680 = vmatpush1.bf16.msra.mxu0 %v10679_v44  ;;  %10846 = vmatprep.subr.bf16.mxu1 %v10845_v22  ;;  %v5077_v44 = vld [vmem:[#allocation11 + $0x12a8] sm:$0xff]  ;;  %v10865_v22 = vpack.c.bf16 %v5071_v60, %v5067_v27  ;;  %v5091_v11 = vld [vmem:[#allocation11 + $0x1318] sm:$0xff]  ;;  %v5094_v52 = vld [vmem:[#allocation11 + $0x1330] sm:$0xff] }
 0x4ac   :  { %10682 = vmatprep.subr.bf16.mxu0 %v10681_v28  ;;  %v5066_v28 = vld [vmem:[#allocation11 + $0x1250] sm:$0xff]  ;;  %v10701_v51 = vpack.c.bf16 %v5077_v44, %v5073_v1  ;;  %v4805_v38 = vld [vmem:[#allocation2 + $0x70] sm:$0xff]  ;;  %v5095_v33 = vld [vmem:[#allocation11 + $0x1338] sm:$0xff] }
 0x4ad   :  { %v10867_v49 = vpack.c.bf16 %v5070_v32, %v5066_v28  ;;  %v10877_v45 = vpack.c.bf16 %v5095_v33, %v5091_v11  ;;  %v5097_v10 = vld [vmem:[#allocation11 + $0x1348] sm:$0xff]  ;;  %v4341_v5 = vld [vmem:[#allocation2 + $0x100] sm:$0xff]  ;;  %v5096_v24 = vld [vmem:[#allocation11 + $0x1340] sm:$0xff] }
 0x4ae   :  { %10848 = vmatpush1.bf16.msra.mxu1 %v10847_v59  ;;  %v5081_v59 = vld [vmem:[#allocation11 + $0x12c8] sm:$0xff]  ;;  %v5100_v18 = vld [vmem:[#allocation11 + $0x1360] sm:$0xff]  ;;  %v5098_v60 = vld [vmem:[#allocation11 + $0x1350] sm:$0xff] }
 0x4af   :  { %10684 = vmatpush1.bf16.msra.mxu0 %v10683_v20  ;;  %10850 = vmatprep.subr.bf16.mxu1 %v10849_v53  ;;  %v5085_v20 = vld [vmem:[#allocation11 + $0x12e8] sm:$0xff]  ;;  %v10703_v53 = vpack.c.bf16 %v5076_v55, %v5072_v58  ;;  %v5102_v1 = vld [vmem:[#allocation11 + $0x1370] sm:$0xff]  ;;  %v10715_v44 = vpack.c.bf16 %v5100_v18, %v5096_v24  ;;  %v5104_v28 = vld [vmem:[#allocation11 + $0x1380] sm:$0xff] }
 0x4b0   :  { %10686 = vmatprep.subr.bf16.mxu0 %v10685_v37  ;;  %v5074_v37 = vld [vmem:[#allocation11 + $0x1290] sm:$0xff]  ;;  %v10705_v6 = vpack.c.bf16 %v5085_v20, %v5081_v59  ;;  %v5101_v12 = vld [vmem:[#allocation11 + $0x1368] sm:$0xff]  ;;  %v5108_v32 = vld [vmem:[#allocation11 + $0x13a0] sm:$0xff]  ;;  %v10883_v21 = vpack.c.bf16 %v5102_v1, %v5098_v60 }
 0x4b1   :  { %v10871_v42 = vpack.c.bf16 %v5078_v61, %v5074_v37  ;;  %v5109_v27 = vld [vmem:[#allocation11 + $0x13a8] sm:$0xff]  ;;  %v10713_v56 = vpack.c.bf16 %v5101_v12, %v5097_v10  ;;  %v5106_v59 = vld [vmem:[#allocation11 + $0x1390] sm:$0xff]  ;;  %v5116_v61 = vld [vmem:[#allocation11 + $0x13e0] sm:$0xff] }
 0x4b2   :  { %10852 = vmatpush1.bf16.msra.mxu1 %v10851_v48  ;;  %v5080_v48 = vld [vmem:[#allocation11 + $0x12c0] sm:$0xff]  ;;  %v5113_v46 = vld [vmem:[#allocation11 + $0x13c8] sm:$0xff]  ;;  %v5110_v20 = vld [vmem:[#allocation11 + $0x13b0] sm:$0xff] }
 0x4b3   :  { %10688 = vmatpush1.bf16.msra.mxu0 %v10687_v19  ;;  %10854 = vmatprep.subr.bf16.mxu1 %v10853_v34  ;;  %v5084_v19 = vld [vmem:[#allocation11 + $0x12e0] sm:$0xff]  ;;  %v10873_v34 = vpack.c.bf16 %v5087_v43, %v5083_v7  ;;  %v5117_v58 = vld [vmem:[#allocation11 + $0x13e8] sm:$0xff]  ;;  %v5122_v11 = vld [vmem:[#allocation11 + $0x1410] sm:$0xff] }
 0x4b4   :  { %10690 = vmatprep.subr.bf16.mxu0 %v10689_v35  ;;  %v5086_v35 = vld [vmem:[#allocation11 + $0x12f0] sm:$0xff]  ;;  %v10707_v47 = vpack.c.bf16 %v5084_v19, %v5080_v48  ;;  %v10721_v37 = vpack.c.bf16 %v5117_v58, %v5113_v46  ;;  %v5125_v7 = vld [vmem:[#allocation11 + $0x1428] sm:$0xff]  ;;  %v5143_v24 = vld [vmem:[#allocation11 + $0x14b8] sm:$0xff] }
 0x4b5   :  { %v10875_v2 = vpack.c.bf16 %v5086_v35, %v5082_v0  ;;  %v5118_v48 = vld [vmem:[#allocation11 + $0x13f0] sm:$0xff]  ;;  %v5127_v0 = vld [vmem:[#allocation11 + $0x1438] sm:$0xff]  ;;  %v5124_v35 = vld [vmem:[#allocation11 + $0x1420] sm:$0xff] }
 0x4b6   :  { %10856 = vmatpush1.bf16.msra.mxu1 %v10855_v9  ;;  %v5088_v9 = vld [vmem:[#allocation11 + $0x1300] sm:$0xff]  ;;  %v5126_v33 = vld [vmem:[#allocation11 + $0x1430] sm:$0xff]  ;;  %v5141_v10 = vld [vmem:[#allocation11 + $0x14a8] sm:$0xff] }
 0x4b7   :  { %10692 = vmatpush1.bf16.msra.mxu0 %v10691_v39  ;;  %10858 = vmatprep.subr.bf16.mxu1 %v10857_v62  ;;  %v5092_v39 = vld [vmem:[#allocation11 + $0x1320] sm:$0xff]  ;;  %v5090_v62 = vld [vmem:[#allocation11 + $0x1310] sm:$0xff]  ;;  %v4468_v46 = vld [vmem:[#allocation11 + $0x8] sm:$0xff] }
 0x4b8   :  { %10694 = vmatprep.subr.bf16.mxu0 %v10693_v50  ;;  %v10709_v50 = vpack.c.bf16 %v5093_v17, %v5089_v31  ;;  %v10711_v16 = vpack.c.bf16 %v5092_v39, %v5088_v9  ;;  %v5129_v17 = vld [vmem:[#allocation11 + $0x1448] sm:$0xff]  ;;  %v5131_v39 = vld [vmem:[#allocation11 + $0x1458] sm:$0xff]  ;;  %v5138_v1 = vld [vmem:[#allocation11 + $0x1490] sm:$0xff] }
 0x4b9   :  { %v4472_v58 = vld [vmem:[#allocation11 + $0x28] sm:$0xff] }
 0x4ba   :  { %10860 = vmatpush1.bf16.msra.mxu1 %v10859_v36  ;;  %v5099_v36 = vld [vmem:[#allocation11 + $0x1358] sm:$0xff] }
 0x4bb   :  { %10696 = vmatpush1.bf16.msra.mxu0 %v10695_v3  ;;  %10862 = vmatprep.subr.bf16.mxu1 %v10861_v54  ;;  %v5103_v3 = vld [vmem:[#allocation11 + $0x1378] sm:$0xff]  ;;  %v10879_v54 = vpack.c.bf16 %v5094_v52, %v5090_v62  ;;  %v5128_v62 = vld [vmem:[#allocation11 + $0x1440] sm:$0xff]  ;;  %v5137_v52 = vld [vmem:[#allocation11 + $0x1488] sm:$0xff] }
 0x4bc   :  { %10698 = vmatprep.subr.bf16.mxu0 %v10697_v26  ;;  %v5105_v26 = vld [vmem:[#allocation11 + $0x1388] sm:$0xff]  ;;  %v10881_v8 = vpack.c.bf16 %v5103_v3, %v5099_v36  ;;  %v5139_v3 = vld [vmem:[#allocation11 + $0x1498] sm:$0xff]  ;;  %v10733_v18 = vpack.c.bf16 %v5141_v10, %v5137_v52  ;;  %v4483_v52 = vld [vmem:[#allocation11 + $0x80] sm:$0xff] }
 0x4bd   :  { %v10901_v60 = vpack.c.bf16 %v5143_v24, %v5139_v3  ;;  %v4487_v10 = vld [vmem:[#allocation11 + $0xa0] sm:$0xff]  ;;  %v4485_v24 = vld [vmem:[#allocation11 + $0x90] sm:$0xff] }
 0x4be   :  { %10864 = vmatpush1.bf16.msra.mxu1 %v10863_v15  ;;  %v5107_v15 = vld [vmem:[#allocation11 + $0x1398] sm:$0xff] }
 0x4bf   :  { %10700 = vmatpush1.bf16.msra.mxu0 %v10699_v4  ;;  %10866 = vmatprep.subr.bf16.mxu1 %v10865_v22  ;;  %v5111_v4 = vld [vmem:[#allocation11 + $0x13b8] sm:$0xff]  ;;  %v10717_v22 = vpack.c.bf16 %v5109_v27, %v5105_v26  ;;  %v5140_v26 = vld [vmem:[#allocation11 + $0x14a0] sm:$0xff] }
 0x4c0   :  { %10702 = vmatprep.subr.bf16.mxu0 %v10701_v51  ;;  %v4326_v51 = vld [vmem:[#allocation2 + $0x58] sm:$0xff]  ;;  %v10885_v55 = vpack.c.bf16 %v5111_v4, %v5107_v15  ;;  %v5147_v4 = vld [vmem:[#allocation11 + $0x14d8] sm:$0xff] }
 0x4c2   :  { %5316 = vmatmul.mubr.f32.vlgmr.msra.gmra.mrb[24].mxu0 %v4323_v41  ;;  %10868 = vmatpush1.bf16.msra.mxu1 %v10867_v49  ;;  %v10719_v49 = vpack.c.bf16 %v5108_v32, %v5104_v28  ;;  %v5144_v32 = vld [vmem:[#allocation11 + $0x14c0] sm:$0xff] }
 0x4c3   :  { %5321 = vmatprep.mubr.f32.mxu0 %v4806_v57  ;;  %10870 = vmatprep.subr.bf16.mxu1 %v10869_v25  ;;  %v5115_v25 = vld [vmem:[#allocation11 + $0x13d8] sm:$0xff] }
 0x4c4   :  { %10704 = vmatpush1.bf16.msra.mxu0 %v10703_v53  ;;  %v5119_v53 = vld [vmem:[#allocation11 + $0x13f8] sm:$0xff] }
 0x4c5   :  { %10706 = vmatprep.subr.bf16.mxu0 %v10705_v6  ;;  %5583 = vmatmul.mubr.f32.vlgmr.msra.gmra.mrb[16].mxu1 %v4323_v41  ;;  %v10887_v41 = vpack.c.bf16 %v5110_v20, %v5106_v59  ;;  %v5121_v6 = vld [vmem:[#allocation11 + $0x1408] sm:$0xff]  ;;  %v10889_v43 = vpack.c.bf16 %v5119_v53, %v5115_v25  ;;  %v5146_v59 = vld [vmem:[#allocation11 + $0x14d0] sm:$0xff]  ;;  %v4470_v25 = vld [vmem:[#allocation11 + $0x18] sm:$0xff] }
 0x4c6   :  { %5322 = vmatmul.mubr.f32.gmra.mrb[26].mxu0 %v4805_v38  ;;  %5588 = vmatprep.mubr.f32.mxu1 %v4806_v57  ;;  %v5114_v57 = vld [vmem:[#allocation11 + $0x13d0] sm:$0xff]  ;;  %v4474_v53 = vld [vmem:[#allocation11 + $0x38] sm:$0xff] }
 0x4c7   :  { %10872 = vmatpush1.bf16.msra.mxu1 %v10871_v42  ;;  %5327 = vmatprep.mubr.f32.mxu0 %v4342_v63  ;;  %v5123_v42 = vld [vmem:[#allocation11 + $0x1418] sm:$0xff]  ;;  %v10891_v31 = vpack.c.bf16 %v5118_v48, %v5114_v57  ;;  %v5150_v20 = vld [vmem:[#allocation11 + $0x14f0] sm:$0xff] }
 0x4c8   :  { %10874 = vmatprep.subr.bf16.mxu1 %v10873_v34  ;;  %10708 = vmatpush1.bf16.msra.mxu0 %v10707_v47  ;;  %v5120_v34 = vld [vmem:[#allocation11 + $0x1400] sm:$0xff]  ;;  %v10893_v47 = vpack.c.bf16 %v5127_v0, %v5123_v42  ;;  %v4469_v57 = vld [vmem:[#allocation11 + $0x10] sm:$0xff]  ;;  %v4478_v42 = vld [vmem:[#allocation11 + $0x58] sm:$0xff] }
 0x4c9   :  { %5589 = vmatmul.mubr.f32.gmra.mrb[18].mxu1 %v4805_v38  ;;  %10710 = vmatprep.subr.bf16.mxu0 %v10709_v50  ;;  %v5133_v38 = vld [vmem:[#allocation11 + $0x1468] sm:$0xff]  ;;  %v10727_v9 = vpack.c.bf16 %v5124_v35, %v5120_v34  ;;  %v5132_v50 = vld [vmem:[#allocation11 + $0x1460] sm:$0xff]  ;;  %v4473_v48 = vld [vmem:[#allocation11 + $0x30] sm:$0xff] }
 0x4ca   :  { %5328 = vmatmul.mubr.f32.gmra.mrb[28].mxu0 %v4341_v5  ;;  %5594 = vmatprep.mubr.f32.mxu1 %v4342_v63  ;;  %v5135_v63 = vld [vmem:[#allocation11 + $0x1478] sm:$0xff]  ;;  %v10731_v36 = vpack.c.bf16 %v5132_v50, %v5128_v62  ;;  %v4475_v35 = vld [vmem:[#allocation11 + $0x40] sm:$0xff]  ;;  %v4344_v50 = vld [vmem:[#allocation2 + $0x118] sm:$0xff] }
 0x4cb   :  { %10876 = vmatpush1.bf16.msra.mxu1 %v10875_v2  ;;  %5333 = vmatprep.mubr.f32.mxu0 %v13365_v23  ;;  %v10729_v2 = vpack.c.bf16 %v5133_v38, %v5129_v17  ;;  %v10897_v12 = vpack.c.bf16 %v5135_v63, %v5131_v39  ;;  %v4482_v0 = vld [vmem:[#allocation11 + $0x78] sm:$0xff]  ;;  %v4325_v17 = vld [vmem:[#allocation2 + $0x50] sm:$0xff]  ;;  %v11079_v38 = vpack.c.bf16 %v4473_v48, %v4469_v57  ;;  %v4481_v39 = vld [vmem:[#allocation11 + $0x70] sm:$0xff] }
 0x4cc   :  { %10878 = vmatprep.subr.bf16.mxu1 %v10877_v45  ;;  %10712 = vmatpush1.bf16.msra.mxu0 %v10711_v16  ;;  %v10895_v45 = vpack.c.bf16 %v5126_v33, %v5122_v11  ;;  %v5134_v16 = vld [vmem:[#allocation11 + $0x1470] sm:$0xff]  ;;  %v4488_v11 = vld [vmem:[#allocation11 + $0xa8] sm:$0xff]  ;;  %v11081_v33 = vpack.c.bf16 %v4482_v0, %v4478_v42  ;;  %v4490_v62 = vld [vmem:[#allocation11 + $0xb8] sm:$0xff] }
 0x4cd   :  { %5595 = vmatmul.mubr.f32.gmra.mrb[20].mxu1 %v4341_v5  ;;  %10714 = vmatprep.subr.bf16.mxu0 %v10713_v56  ;;  %v5130_v5 = vld [vmem:[#allocation11 + $0x1450] sm:$0xff]  ;;  %v5145_v56 = vld [vmem:[#allocation11 + $0x14c8] sm:$0xff]  ;;  %v4510_v42 = vld [vmem:[#allocation11 + $0x158] sm:$0xff] }
 0x4ce   :  { %5334 = vmatmul.mubr.f32.gmra.mrb[30].mxu0 %v13373_v14  ;;  %5600 = vmatprep.mubr.f32.mxu1 %v13365_v23  ;;  %v5112_v23 = vld [vmem:[#allocation11 + $0x13c0] sm:$0xff]  ;;  %v10899_v27 = vpack.c.bf16 %v5134_v16, %v5130_v5  ;;  %v4492_v16 = vld [vmem:[#allocation11 + $0xc8] sm:$0xff]  ;;  %v4501_v57 = vld [vmem:[#allocation11 + $0x110] sm:$0xff] }
 0x4cf   :  { %10880 = vmatpush1.bf16.msra.mxu1 %v10879_v54  ;;  %8976 = vmatprep.mubr.msk.f32.mxu0 %vm140_vm3, %v4326_v51  ;;  %v10723_v19 = vpack.c.bf16 %v5116_v61, %v5112_v23  ;;  %v5136_v54 = vld [vmem:[#allocation11 + $0x1480] sm:$0xff]  ;;  %v4505_v48 = vld [vmem:[#allocation11 + $0x130] sm:$0xff]  ;;  %v4514_v0 = vld [vmem:[#allocation11 + $0x178] sm:$0xff] }
 0x4d0   :  { %10882 = vmatprep.subr.bf16.mxu1 %v10881_v8  ;;  %10716 = vmatpush1.bf16.msra.mxu0 %v10715_v44  ;;  %v5149_v8 = vld [vmem:[#allocation11 + $0x14e8] sm:$0xff]  ;;  %v5142_v44 = vld [vmem:[#allocation11 + $0x14b0] sm:$0xff]  ;;  %v10735_v15 = vpack.c.bf16 %v5140_v26, %v5136_v54  ;;  %v4467_v23 = vld [vmem:[#allocation11] sm:$0xff]  ;;  %v10919_v54 = vpack.c.bf16 %v4487_v10, %v4483_v52 }
 0x4d1   :  { %5601 = vmatmul.mubr.f32.gmra.mrb[22].mxu1 %v13373_v14  ;;  %10718 = vmatprep.subr.bf16.mxu0 %v10717_v22  ;;  %v10725_v14 = vpack.c.bf16 %v5125_v7, %v5121_v6  ;;  %v5151_v22 = vld [vmem:[#allocation11 + $0x14f8] sm:$0xff]  ;;  %v10737_v28 = vpack.c.bf16 %v5149_v8, %v5145_v56  ;;  %v4471_v61 = vld [vmem:[#allocation11 + $0x20] sm:$0xff]  ;;  %v4476_v6 = vld [vmem:[#allocation11 + $0x48] sm:$0xff] }
 0x4d2   :  { %8980 = vmatprep.mubr.msk.f32.mxu1 %vm140_vm3, %v4326_v51  ;;  %v5148_v51 = vld [vmem:[#allocation11 + $0x14e0] sm:$0xff]  ;;  %v4480_v7 = vld [vmem:[#allocation11 + $0x68] sm:$0xff]  ;;  %v4494_v26 = vld [vmem:[#allocation11 + $0xd8] sm:$0xff] }
 0x4d3   :  { %10884 = vmatpush1.bf16.msra.mxu1 %v10883_v21  ;;  %v10903_v21 = vpack.c.bf16 %v5142_v44, %v5138_v1  ;;  %v10913_v34 = vpack.c.bf16 %v4480_v7, %v4476_v6  ;;  %v4316_v56 = vld [vmem:[#allocation2 + $0x8] sm:$0x80]  ;;  %v4512_v6 = vld [vmem:[#allocation11 + $0x168] sm:$0xff] }
 0x4d4   :  { %10886 = vmatprep.subr.bf16.mxu1 %v10885_v55  ;;  %10720 = vmatpush1.bf16.msra.mxu0 %v10719_v49  ;;  %v10905_v55 = vpack.c.bf16 %v5151_v22, %v5147_v4  ;;  %v10739_v49 = vpack.c.bf16 %v5148_v51, %v5144_v32  ;;  %v4814_v8 = vld [vmem:[#allocation2 + $0x148] sm:$0xff]  ;;  %v4500_v22 = vld [vmem:[#allocation11 + $0x108] sm:$0xff]  ;;  %v4390_v51 = vrot.slane %v4316_v56, 7 }
 0x4d5   :  { %10722 = vmatprep.subr.bf16.mxu0 %v10721_v37  ;;  %v10909_v37 = vpack.c.bf16 %v4472_v58, %v4468_v46  ;;  %v4491_v1 = vld [vmem:[#allocation11 + $0xc0] sm:$0xff]  ;;  %v4493_v58 = vld [vmem:[#allocation11 + $0xd0] sm:$0xff]  ;;  %v4524_v52 = vld [vmem:[#allocation11 + $0x1c8] sm:$0xff] }
 0x4d6   :  { %v4495_v44 = vld [vmem:[#allocation11 + $0xe0] sm:$0xff]  ;;  %v4528_v10 = vld [vmem:[#allocation11 + $0x1e8] sm:$0xff] }
 0x4d7   :  { %10888 = vmatpush1.bf16.msra.mxu1 %v10887_v41  ;;  %v10907_v41 = vpack.c.bf16 %v5150_v20, %v5146_v59  ;;  %v10923_v59 = vpack.c.bf16 %v4495_v44, %v4491_v1  ;;  %v4502_v20 = vld [vmem:[#allocation11 + $0x118] sm:$0xff]  ;;  %v4532_v56 = vld [vmem:[#allocation11 + $0x208] sm:$0xff]  ;;  %v4525_v1 = vld [vmem:[#allocation11 + $0x1d0] sm:$0xff] }
 0x4d8   :  { %10890 = vmatprep.subr.bf16.mxu1 %v10889_v43  ;;  %10724 = vmatpush1.bf16.msra.mxu0 %v10723_v19  ;;  %v11077_v43 = vpack.c.bf16 %v4474_v53, %v4470_v25  ;;  %v10911_v19 = vpack.c.bf16 %v4471_v61, %v4467_v23  ;;  %v4499_v53 = vld [vmem:[#allocation11 + $0x100] sm:$0xff]  ;;  %v4813_v23 = vld [vmem:[#allocation2 + $0x140] sm:$0xff]  ;;  %v4529_v44 = vld [vmem:[#allocation11 + $0x1f0] sm:$0xff] }
 0x4d9   :  { %10726 = vmatprep.subr.bf16.mxu0 %v10725_v14  ;;  %v4808_v14 = vld [vmem:[#allocation2 + $0x88] sm:$0xff] }
 0x4db   :  { %10892 = vmatpush1.bf16.msra.mxu1 %v10891_v31  ;;  %v4479_v31 = vld [vmem:[#allocation11 + $0x60] sm:$0xff] }
 0x4dc   :  { %10894 = vmatprep.subr.bf16.mxu1 %v10893_v47  ;;  %10728 = vmatpush1.bf16.msra.mxu0 %v10727_v9  ;;  %v4484_v47 = vld [vmem:[#allocation11 + $0x88] sm:$0xff]  ;;  %v4477_v9 = vld [vmem:[#allocation11 + $0x50] sm:$0xff]  ;;  %v10915_v63 = vpack.c.bf16 %v4479_v31, %v4475_v35  ;;  %v4511_v35 = vld [vmem:[#allocation11 + $0x160] sm:$0xff]  ;;  %v11095_v31 = vpack.c.bf16 %v4505_v48, %v4501_v57 }
 0x4dd   :  { %10730 = vmatprep.subr.bf16.mxu0 %v10729_v2  ;;  %v4486_v2 = vld [vmem:[#allocation11 + $0x98] sm:$0xff]  ;;  %v11083_v5 = vpack.c.bf16 %v4481_v39, %v4477_v9  ;;  %v4552_v57 = vld [vmem:[#allocation11 + $0x2a8] sm:$0xff] }
 0x4de   :  { %v11085_v3 = vpack.c.bf16 %v4490_v62, %v4486_v2  ;;  %v4518_v39 = vld [vmem:[#allocation11 + $0x198] sm:$0xff]  ;;  %v4515_v62 = vld [vmem:[#allocation11 + $0x180] sm:$0xff] }
 0x4df   :  { %10896 = vmatpush1.bf16.msra.mxu1 %v10895_v45  ;;  %v10917_v45 = vpack.c.bf16 %v4488_v11, %v4484_v47  ;;  %v11097_v47 = vpack.c.bf16 %v4514_v0, %v4510_v42  ;;  %v4509_v11 = vld [vmem:[#allocation11 + $0x150] sm:$0xff] }
 0x4e0   :  { %10898 = vmatprep.subr.bf16.mxu1 %v10897_v12  ;;  %10732 = vmatpush1.bf16.msra.mxu0 %v10731_v36  ;;  %v4807_v12 = vld [vmem:[#allocation2 + $0x80] sm:$0xff]  ;;  %v4496_v36 = vld [vmem:[#allocation11 + $0xe8] sm:$0xff]  ;;  %v4545_v42 = vld [vmem:[#allocation11 + $0x270] sm:$0xff] }
 0x4e1   :  { %10734 = vmatprep.subr.bf16.mxu0 %v10733_v18  ;;  %v4489_v18 = vld [vmem:[#allocation11 + $0xb0] sm:$0xff] }
 0x4e2   :  { %v11087_v4 = vpack.c.bf16 %v4489_v18, %v4485_v24  ;;  %v4530_v24 = vld [vmem:[#allocation11 + $0x1f8] sm:$0xff]  ;;  %v10937_v18 = vpack.c.bf16 %v4528_v10, %v4524_v52  ;;  %v4559_v52 = vld [vmem:[#allocation11 + $0x2e0] sm:$0xff] }
 0x4e3   :  { %10900 = vmatpush1.bf16.msra.mxu1 %v10899_v27  ;;  %v4498_v27 = vld [vmem:[#allocation11 + $0xf8] sm:$0xff] }
 0x4e4   :  { %10902 = vmatprep.subr.bf16.mxu1 %v10901_v60  ;;  %10736 = vmatpush1.bf16.msra.mxu0 %v10735_v15  ;;  %v10921_v60 = vpack.c.bf16 %v4496_v36, %v4492_v16  ;;  %v4343_v15 = vld [vmem:[#allocation2 + $0x110] sm:$0xff]  ;;  %v11089_v32 = vpack.c.bf16 %v4498_v27, %v4494_v26  ;;  %v4521_v16 = vld [vmem:[#allocation11 + $0x1b0] sm:$0xff]  ;;  %v4527_v26 = vld [vmem:[#allocation11 + $0x1e0] sm:$0xff] }
 0x4e5   :  { %10738 = vmatprep.subr.bf16.mxu0 %v10737_v28  ;;  %v4504_v28 = vld [vmem:[#allocation11 + $0x128] sm:$0xff] }
 0x4e6   :  { %v10925_v25 = vpack.c.bf16 %v4504_v28, %v4500_v22  ;;  %v4538_v22 = vld [vmem:[#allocation11 + $0x238] sm:$0xff] }
 0x4e7   :  { %10904 = vmatpush1.bf16.msra.mxu1 %v10903_v21  ;;  %v13387_v21 = vld [vmem:[#allocation2 + $0x38] sm:$0xff] }
 0x4e8   :  { %10906 = vmatprep.subr.bf16.mxu1 %v10905_v55  ;;  %10740 = vmatpush1.bf16.msra.mxu0 %v10739_v49  ;;  %v4391_v46 = vrot.slane %v13387_v21, 7  ;;  %v4497_v55 = vld [vmem:[#allocation11 + $0xf0] sm:$0xff]  ;;  %v4506_v49 = vld [vmem:[#allocation11 + $0x138] sm:$0xff] }
 0x4e9   :  { %10910 = vmatprep.subr.bf16.mxu0 %v10909_v37  ;;  %v4503_v37 = vld [vmem:[#allocation11 + $0x120] sm:$0xff]  ;;  %v11091_v61 = vpack.c.bf16 %v4497_v55, %v4493_v58  ;;  %v11107_v58 = vpack.c.bf16 %v4529_v44, %v4525_v1  ;;  %v4540_v55 = vld [vmem:[#allocation11 + $0x248] sm:$0xff] }
 0x4ea   :  { %v4392_v7 = vsel %vm1185_vm4, %v4390_v51, %v4391_v46  ;;  %v4535_v51 = vld [vmem:[#allocation11 + $0x220] sm:$0xff]  ;;  %v4576_v1 = vld [vmem:[#allocation11 + $0x368] sm:$0xff] }
 0x4eb   :  { %10908 = vmatpush1.bf16.msra.mxu1 %v10907_v41  ;;  %5405 = vmatmul.mubr.f32.vlgmr.msra.gmra.mrb[24].mxu0 %v4325_v17  ;;  %v4508_v41 = vld [vmem:[#allocation11 + $0x148] sm:$0xff] }
 0x4ec   :  { %11078 = vmatprep.subr.bf16.mxu1 %v11077_v43  ;;  %10912 = vmatpush1.bf16.msra.mxu0 %v10911_v19  ;;  %v11093_v43 = vpack.c.bf16 %v4506_v49, %v4502_v20  ;;  %v10927_v19 = vpack.c.bf16 %v4503_v37, %v4499_v53  ;;  %v4533_v49 = vld [vmem:[#allocation11 + $0x210] sm:$0xff]  ;;  %v4542_v37 = vld [vmem:[#allocation11 + $0x258] sm:$0xff] }
 0x4ed   :  { %8977 = vmatprep.mubr.msk.f32.mxu0 %vm140_vm3, %v4808_v14  ;;  %10914 = vmatprep.subr.bf16.mxu0 %v10913_v34  ;;  %v4507_v34 = vld [vmem:[#allocation11 + $0x140] sm:$0xff] }
 0x4ee   :  { %5672 = vmatmul.mubr.f32.vlgmr.msra.gmra.mrb[16].mxu1 %v4325_v17  ;;  %v4516_v17 = vld [vmem:[#allocation11 + $0x188] sm:$0xff]  ;;  %v10931_v9 = vpack.c.bf16 %v4511_v35, %v4507_v34  ;;  %v4554_v34 = vld [vmem:[#allocation11 + $0x2b8] sm:$0xff] }
 0x4ef   :  { %11080 = vmatpush1.bf16.msra.mxu1 %v11079_v38  ;;  %8981 = vmatprep.mubr.msk.f32.mxu1 %vm140_vm3, %v4808_v14  ;;  %v10929_v14 = vpack.c.bf16 %v4512_v6, %v4508_v41  ;;  %v4520_v38 = vld [vmem:[#allocation11 + $0x1a8] sm:$0xff]  ;;  %v4539_v41 = vld [vmem:[#allocation11 + $0x240] sm:$0xff] }
 0x4f0   :  { %5411 = vmatmul.mubr.f32.gmra.mrb[26].mxu0 %v4807_v12  ;;  %11082 = vmatprep.subr.bf16.mxu1 %v11081_v33  ;;  %v4513_v33 = vld [vmem:[#allocation11 + $0x170] sm:$0xff]  ;;  %v10933_v2 = vpack.c.bf16 %v4520_v38, %v4516_v17  ;;  %v4543_v6 = vld [vmem:[#allocation11 + $0x260] sm:$0xff] }
 0x4f1   :  { %10916 = vmatpush1.bf16.msra.mxu0 %v10915_v63  ;;  %8978 = vmatprep.mubr.msk.f32.mxu0 %vm140_vm3, %v4344_v50  ;;  %v4522_v63 = vld [vmem:[#allocation11 + $0x1b8] sm:$0xff]  ;;  %v10947_v0 = vpack.c.bf16 %v4543_v6, %v4539_v41  ;;  %v4551_v17 = vld [vmem:[#allocation11 + $0x2a0] sm:$0xff] }
 0x4f2   :  { %5678 = vmatmul.mubr.f32.gmra.mrb[18].mxu1 %v4807_v12  ;;  %10918 = vmatprep.subr.bf16.mxu0 %v10917_v45  ;;  %v11099_v45 = vpack.c.bf16 %v4513_v33, %v4509_v11  ;;  %v11101_v12 = vpack.c.bf16 %v4522_v63, %v4518_v39  ;;  %v4560_v11 = vld [vmem:[#allocation11 + $0x2e8] sm:$0xff]  ;;  %v4553_v39 = vld [vmem:[#allocation11 + $0x2b0] sm:$0xff]  ;;  %v4586_v41 = vld [vmem:[#allocation11 + $0x3b8] sm:$0xff] }
 0x4f3   :  { %11084 = vmatpush1.bf16.msra.mxu1 %v11083_v5  ;;  %8982 = vmatprep.mubr.msk.f32.mxu1 %vm140_vm3, %v4344_v50  ;;  %v4519_v50 = vld [vmem:[#allocation11 + $0x1a0] sm:$0xff]  ;;  %v4517_v5 = vld [vmem:[#allocation11 + $0x190] sm:$0xff] }
 0x4f4   :  { %5417 = vmatmul.mubr.f32.gmra.mrb[28].mxu0 %v4343_v15  ;;  %11086 = vmatprep.subr.bf16.mxu1 %v11085_v3  ;;  %v10935_v36 = vpack.c.bf16 %v4519_v50, %v4515_v62  ;;  %v4526_v3 = vld [vmem:[#allocation11 + $0x1d8] sm:$0xff]  ;;  %v11103_v27 = vpack.c.bf16 %v4521_v16, %v4517_v5  ;;  %v4568_v5 = vld [vmem:[#allocation11 + $0x328] sm:$0xff] }
 0x4f5   :  { %10920 = vmatpush1.bf16.msra.mxu0 %v10919_v54  ;;  %8979 = vmatprep.mubr.msk.f32.mxu0 %vm140_vm3, %v4814_v8  ;;  %v4523_v54 = vld [vmem:[#allocation11 + $0x1c0] sm:$0xff]  ;;  %v4562_v62 = vld [vmem:[#allocation11 + $0x2f8] sm:$0xff] }
 0x4f6   :  { %5684 = vmatmul.mubr.f32.gmra.mrb[20].mxu1 %v4343_v15  ;;  %10922 = vmatprep.subr.bf16.mxu0 %v10921_v60  ;;  %v11105_v60 = vpack.c.bf16 %v4530_v24, %v4526_v3  ;;  %v10939_v15 = vpack.c.bf16 %v4527_v26, %v4523_v54  ;;  %v4561_v3 = vld [vmem:[#allocation11 + $0x2f0] sm:$0xff]  ;;  %v4570_v54 = vld [vmem:[#allocation11 + $0x338] sm:$0xff] }
 0x4f7   :  { %11088 = vmatpush1.bf16.msra.mxu1 %v11087_v4  ;;  %8983 = vmatprep.mubr.msk.f32.mxu1 %vm140_vm3, %v4814_v8  ;;  %v4536_v8 = vld [vmem:[#allocation11 + $0x228] sm:$0xff]  ;;  %v4534_v4 = vld [vmem:[#allocation11 + $0x218] sm:$0xff] }
 0x4f8   :  { %5423 = vmatmul.mubr.f32.gmra.mrb[30].mxu0 %v4813_v23  ;;  %11090 = vmatprep.subr.bf16.mxu1 %v11089_v32  ;;  %v10941_v28 = vpack.c.bf16 %v4536_v8, %v4532_v56  ;;  %v4531_v32 = vld [vmem:[#allocation11 + $0x200] sm:$0xff]  ;;  %v11109_v20 = vpack.c.bf16 %v4538_v22, %v4534_v4  ;;  %v4569_v4 = vld [vmem:[#allocation11 + $0x330] sm:$0xff] }
 0x4f9   :  { %10924 = vmatpush1.bf16.msra.mxu0 %v10923_v59  ;;  %5768 = vmatprep.mubr.f32.mxu0 %v4392_v7  ;;  %v4544_v59 = vld [vmem:[#allocation11 + $0x268] sm:$0xff]  ;;  %v10943_v53 = vpack.c.bf16 %v4535_v51, %v4531_v32  ;;  %v4567_v56 = vld [vmem:[#allocation11 + $0x320] sm:$0xff]  ;;  %v4578_v32 = vld [vmem:[#allocation11 + $0x378] sm:$0xff] }
 0x4fa   :  { %5690 = vmatmul.mubr.f32.gmra.mrb[22].mxu1 %v4813_v23  ;;  %10926 = vmatprep.subr.bf16.mxu0 %v10925_v25  ;;  %v4537_v25 = vld [vmem:[#allocation11 + $0x230] sm:$0xff]  ;;  %v4546_v23 = vld [vmem:[#allocation11 + $0x278] sm:$0xff] }
 0x4fb   :  { %11092 = vmatpush1.bf16.msra.mxu1 %v11091_v61  ;;  %6035 = vmatprep.mubr.f32.mxu1 %v4392_v7  ;;  %v10945_v61 = vpack.c.bf16 %v4544_v59, %v4540_v55  ;;  %v11111_v7 = vpack.c.bf16 %v4537_v25, %v4533_v49  ;;  %v11113_v48 = vpack.c.bf16 %v4546_v23, %v4542_v37  ;;  %v4575_v55 = vld [vmem:[#allocation11 + $0x360] sm:$0xff]  ;;  %v4584_v49 = vld [vmem:[#allocation11 + $0x3a8] sm:$0xff]  ;;  %v4577_v37 = vld [vmem:[#allocation11 + $0x370] sm:$0xff] }
 0x4fc   :  { %11094 = vmatprep.subr.bf16.mxu1 %v11093_v43  ;;  %v4548_v43 = vld [vmem:[#allocation11 + $0x288] sm:$0xff] }
 0x4fd   :  { %10928 = vmatpush1.bf16.msra.mxu0 %v10927_v19  ;;  %v4541_v19 = vld [vmem:[#allocation11 + $0x250] sm:$0xff]  ;;  %v10949_v35 = vpack.c.bf16 %v4552_v57, %v4548_v43  ;;  %v4583_v43 = vld [vmem:[#allocation11 + $0x3a0] sm:$0xff] }
 0x4fe   :  { %10930 = vmatprep.subr.bf16.mxu0 %v10929_v14  ;;  %v4550_v14 = vld [vmem:[#allocation11 + $0x298] sm:$0xff]  ;;  %v11115_v38 = vpack.c.bf16 %v4545_v42, %v4541_v19  ;;  %v4592_v19 = vld [vmem:[#allocation11 + $0x3e8] sm:$0xff] }
 0x4ff   :  { %11096 = vmatpush1.bf16.msra.mxu1 %v11095_v31  ;;  %v4547_v31 = vld [vmem:[#allocation11 + $0x280] sm:$0xff]  ;;  %v11117_v33 = vpack.c.bf16 %v4554_v34, %v4550_v14  ;;  %v4585_v14 = vld [vmem:[#allocation11 + $0x3b0] sm:$0xff] }
 0x500   :  { %11098 = vmatprep.subr.bf16.mxu1 %v11097_v47  ;;  %v4556_v47 = vld [vmem:[#allocation11 + $0x2c8] sm:$0xff]  ;;  %v10951_v63 = vpack.c.bf16 %v4551_v17, %v4547_v31  ;;  %v4594_v31 = vld [vmem:[#allocation11 + $0x3f8] sm:$0xff] }
 0x501   :  { %10932 = vmatpush1.bf16.msra.mxu0 %v10931_v9  ;;  %v4549_v9 = vld [vmem:[#allocation11 + $0x290] sm:$0xff]  ;;  %v10953_v50 = vpack.c.bf16 %v4560_v11, %v4556_v47  ;;  %v4591_v47 = vld [vmem:[#allocation11 + $0x3e0] sm:$0xff]  ;;  %v4315_v11 = vld [vmem:[#allocation2] sm:$0x80] }
 0x502   :  { %10934 = vmatprep.subr.bf16.mxu0 %v10933_v2  ;;  %v4558_v2 = vld [vmem:[#allocation11 + $0x2d8] sm:$0xff]  ;;  %v11119_v10 = vpack.c.bf16 %v4553_v39, %v4549_v9  ;;  %v4596_v9 = vld [vmem:[#allocation11 + $0x408] sm:$0xff] }
 0x503   :  { %11100 = vmatpush1.bf16.msra.mxu1 %v11099_v45  ;;  %v4555_v45 = vld [vmem:[#allocation11 + $0x2c0] sm:$0xff]  ;;  %v11121_v16 = vpack.c.bf16 %v4562_v62, %v4558_v2  ;;  %v4600_v39 = vld [vmem:[#allocation11 + $0x428] sm:$0xff]  ;;  %v4589_v2 = vld [vmem:[#allocation11 + $0x3d0] sm:$0xff] }
 0x504   :  { %11102 = vmatprep.subr.bf16.mxu1 %v11101_v12  ;;  %v4564_v12 = vld [vmem:[#allocation11 + $0x308] sm:$0xff]  ;;  %v10955_v24 = vpack.c.bf16 %v4559_v52, %v4555_v45  ;;  %v4593_v62 = vld [vmem:[#allocation11 + $0x3f0] sm:$0xff] }
 0x505   :  { %10936 = vmatpush1.bf16.msra.mxu0 %v10935_v36  ;;  %v4557_v36 = vld [vmem:[#allocation11 + $0x2d0] sm:$0xff]  ;;  %v10957_v26 = vpack.c.bf16 %v4568_v5, %v4564_v12  ;;  %v4598_v12 = vld [vmem:[#allocation11 + $0x418] sm:$0xff] }
 0x506   :  { %10938 = vmatprep.subr.bf16.mxu0 %v10937_v18  ;;  %v4566_v18 = vld [vmem:[#allocation11 + $0x318] sm:$0xff]  ;;  %v11123_v8 = vpack.c.bf16 %v4561_v3, %v4557_v36  ;;  %v10973_v36 = vpack.c.bf16 %v4600_v39, %v4596_v9  ;;  %v4595_v3 = vld [vmem:[#allocation11 + $0x400] sm:$0xff]  ;;  %v4617_v9 = vld [vmem:[#allocation11 + $0x4b0] sm:$0xff] }
 0x507   :  { %11104 = vmatpush1.bf16.msra.mxu1 %v11103_v27  ;;  %v4563_v27 = vld [vmem:[#allocation11 + $0x300] sm:$0xff]  ;;  %v11125_v44 = vpack.c.bf16 %v4570_v54, %v4566_v18  ;;  %v4602_v5 = vld [vmem:[#allocation11 + $0x438] sm:$0xff]  ;;  %v11139_v54 = vpack.c.bf16 %v4593_v62, %v4589_v2 }
 0x508   :  { %11106 = vmatprep.subr.bf16.mxu1 %v11105_v60  ;;  %v4572_v60 = vld [vmem:[#allocation11 + $0x348] sm:$0xff]  ;;  %v10959_v22 = vpack.c.bf16 %v4567_v56, %v4563_v27  ;;  %v4327_v18 = vld [vmem:[#allocation2 + $0x60] sm:$0x7f]  ;;  %v11141_v56 = vpack.c.bf16 %v4602_v5, %v4598_v12  ;;  %v4619_v12 = vld [vmem:[#allocation11 + $0x4c0] sm:$0xff] }
 0x509   :  { %10940 = vmatpush1.bf16.msra.mxu0 %v10939_v15  ;;  %v4565_v15 = vld [vmem:[#allocation11 + $0x310] sm:$0xff]  ;;  %v10961_v51 = vpack.c.bf16 %v4576_v1, %v4572_v60  ;;  %v4608_v27 = vld [vmem:[#allocation11 + $0x468] sm:$0xff]  ;;  %v4622_v62 = vld [vmem:[#allocation11 + $0x4d8] sm:$0xff] }
 0x50a   :  { %10942 = vmatprep.subr.bf16.mxu0 %v10941_v28  ;;  %v4574_v28 = vld [vmem:[#allocation11 + $0x358] sm:$0xff]  ;;  %v11127_v59 = vpack.c.bf16 %v4569_v4, %v4565_v15  ;;  %v4597_v60 = vld [vmem:[#allocation11 + $0x410] sm:$0xff]  ;;  %v4405_v4 = vrot.slane %v4327_v18, 7  ;;  %v4623_v5 = vld [vmem:[#allocation11 + $0x4e0] sm:$0xff] }
 0x50b   :  { %11108 = vmatpush1.bf16.msra.mxu1 %v11107_v58  ;;  %v4571_v58 = vld [vmem:[#allocation11 + $0x340] sm:$0xff]  ;;  %v11129_v25 = vpack.c.bf16 %v4578_v32, %v4574_v28  ;;  %v4601_v1 = vld [vmem:[#allocation11 + $0x430] sm:$0xff]  ;;  %v4610_v28 = vld [vmem:[#allocation11 + $0x478] sm:$0xff] }
 0x50c   :  { %11110 = vmatprep.subr.bf16.mxu1 %v11109_v20  ;;  %v4580_v20 = vld [vmem:[#allocation11 + $0x388] sm:$0xff]  ;;  %v10963_v23 = vpack.c.bf16 %v4575_v55, %v4571_v58  ;;  %v4334_v32 = vld [vmem:[#allocation2 + $0xc8] sm:$0x80] }
 0x50d   :  { %10944 = vmatpush1.bf16.msra.mxu0 %v10943_v53  ;;  %v4573_v53 = vld [vmem:[#allocation11 + $0x350] sm:$0xff]  ;;  %v10965_v6 = vpack.c.bf16 %v4584_v49, %v4580_v20  ;;  %v4603_v58 = vld [vmem:[#allocation11 + $0x440] sm:$0xff]  ;;  %v11143_v20 = vpack.c.bf16 %v4601_v1, %v4597_v60  ;;  %v4612_v49 = vld [vmem:[#allocation11 + $0x488] sm:$0xff]  ;;  %v10987_v1 = vpack.c.bf16 %v4623_v5, %v4619_v12 }
 0x50e   :  { %10946 = vmatprep.subr.bf16.mxu0 %v10945_v61  ;;  %v4582_v61 = vld [vmem:[#allocation11 + $0x398] sm:$0xff]  ;;  %v11131_v57 = vpack.c.bf16 %v4577_v37, %v4573_v53  ;;  %v4607_v55 = vld [vmem:[#allocation11 + $0x460] sm:$0xff]  ;;  %v4653_v12 = vld [vmem:[#allocation11 + $0x5d0] sm:$0xff] }
 0x50f   :  { %11112 = vmatpush1.bf16.msra.mxu1 %v11111_v7  ;;  %v4579_v7 = vld [vmem:[#allocation11 + $0x380] sm:$0xff]  ;;  %v11133_v42 = vpack.c.bf16 %v4586_v41, %v4582_v61  ;;  %v12280_v61 = vld [vmem:[#allocation2 + $0xf8] sm:$0xff] }
 0x510   :  { %11114 = vmatprep.subr.bf16.mxu1 %v11113_v48  ;;  %v4588_v48 = vld [vmem:[#allocation11 + $0x3c8] sm:$0xff]  ;;  %v10967_v34 = vpack.c.bf16 %v4583_v43, %v4579_v7  ;;  %v4421_v41 = vrot.slane %v12280_v61, 7  ;;  %v4609_v7 = vld [vmem:[#allocation11 + $0x470] sm:$0xff]  ;;  %v4639_v61 = vld [vmem:[#allocation11 + $0x560] sm:$0xff] }
 0x511   :  { %10948 = vmatpush1.bf16.msra.mxu0 %v10947_v0  ;;  %v4581_v0 = vld [vmem:[#allocation11 + $0x390] sm:$0xff]  ;;  %v10969_v17 = vpack.c.bf16 %v4592_v19, %v4588_v48  ;;  %v4614_v19 = vld [vmem:[#allocation11 + $0x498] sm:$0xff] }
 0x512   :  { %10950 = vmatprep.subr.bf16.mxu0 %v10949_v35  ;;  %v4590_v35 = vld [vmem:[#allocation11 + $0x3d8] sm:$0xff]  ;;  %v4657_v5 = vld [vmem:[#allocation11 + $0x5f0] sm:$0xff] }
 0x513   :  { %11116 = vmatpush1.bf16.msra.mxu1 %v11115_v38  ;;  %v4587_v38 = vld [vmem:[#allocation11 + $0x3c0] sm:$0xff] }
 0x514   :  { %11118 = vmatprep.subr.bf16.mxu1 %v11117_v33  ;;  %v11135_v33 = vpack.c.bf16 %v4585_v14, %v4581_v0  ;;  %v10971_v52 = vpack.c.bf16 %v4591_v47, %v4587_v38  ;;  %v4346_v0 = vld [vmem:[#allocation2 + $0x128] sm:$0x7f] }
 0x515   :  { %10952 = vmatpush1.bf16.msra.mxu0 %v10951_v63  ;;  %v11137_v63 = vpack.c.bf16 %v4594_v31, %v4590_v35  ;;  %v4615_v14 = vld [vmem:[#allocation11 + $0x4a0] sm:$0xff]  ;;  %v4620_v31 = vld [vmem:[#allocation11 + $0x4c8] sm:$0xff] }
 0x516   :  { %10954 = vmatprep.subr.bf16.mxu0 %v10953_v50  ;;  %v12279_v50 = vld [vmem:[#allocation2 + $0x30] sm:$0xff] }
 0x517   :  { %11120 = vmatpush1.bf16.msra.mxu1 %v11119_v10  ;;  %v13395_v45 = vrot.slane %v12279_v50, 7  ;;  %v4387_v10 = vrot.slane %v4315_v11, 7  ;;  %v4437_v11 = vrot.slane %v4346_v0, 7  ;;  %v4626_v50 = vld [vmem:[#allocation11 + $0x4f8] sm:$0xff] }
 0x518   :  { %11122 = vmatprep.subr.bf16.mxu1 %v11121_v16  ;;  %v4328_v16 = vld [vmem:[#allocation2 + $0x68] sm:$0x7f]  ;;  %v11153_v18 = vpack.c.bf16 %v4626_v50, %v4622_v62  ;;  %v4650_v0 = vld [vmem:[#allocation11 + $0x5b8] sm:$0xff]  ;;  %v4660_v50 = vld [vmem:[#allocation11 + $0x608] sm:$0xff] }
 0x519   :  { %10956 = vmatpush1.bf16.msra.mxu0 %v10955_v24  ;;  %v4599_v24 = vld [vmem:[#allocation11 + $0x420] sm:$0xff]  ;;  %v4406_v43 = vsel %vm1185_vm4, %v13395_v45, %v4405_v4 }
 0x51a   :  { %10958 = vmatprep.subr.bf16.mxu0 %v10957_v26  ;;  %v4604_v26 = vld [vmem:[#allocation11 + $0x448] sm:$0xff]  ;;  %v10975_v15 = vpack.c.bf16 %v4599_v24, %v4595_v3  ;;  %v4438_v24 = vsel %vm1185_vm4, %v4421_v41, %v4437_v11 }
 0x51b   :  { %11124 = vmatpush1.bf16.msra.mxu1 %v11123_v8  ;;  %v4407_v8 = vrot.slane %v4328_v16, 7  ;;  %v4632_v3 = vld [vmem:[#allocation11 + $0x528] sm:$0xff] }
 0x51c   :  { %11126 = vmatprep.subr.bf16.mxu1 %v11125_v44  ;;  %v4389_v44 = vsel %vm1185_vm4, %v4387_v10, %v13395_v45 }
 0x51d   :  { %10960 = vmatpush1.bf16.msra.mxu0 %v10959_v22  ;;  %v4606_v22 = vld [vmem:[#allocation11 + $0x458] sm:$0xff]  ;;  %v4408_v53 = vsel %vm1185_vm4, %v4391_v46, %v4407_v8  ;;  %v4611_v46 = vld [vmem:[#allocation11 + $0x480] sm:$0xff]  ;;  %v4625_v8 = vld [vmem:[#allocation11 + $0x4f0] sm:$0xff] }
 0x51e   :  { %10962 = vmatprep.subr.bf16.mxu0 %v10961_v51  ;;  %v10977_v51 = vpack.c.bf16 %v4608_v27, %v4604_v26  ;;  %v11145_v37 = vpack.c.bf16 %v4610_v28, %v4606_v22  ;;  %v13408_v26 = vld [vmem:[#allocation2 + $0x48] sm:$0xff] }
 0x51f   :  { %11128 = vmatpush1.bf16.msra.mxu1 %v11127_v59  ;;  %v4333_v59 = vld [vmem:[#allocation2 + $0xc0] sm:$0x80]  ;;  %v4397_v27 = vrot.slane %v13408_v26, 7  ;;  %v4627_v22 = vld [vmem:[#allocation11 + $0x500] sm:$0xff] }
 0x520   :  { %11130 = vmatprep.subr.bf16.mxu1 %v11129_v25  ;;  %v4616_v25 = vld [vmem:[#allocation11 + $0x4a8] sm:$0xff]  ;;  %v4417_v48 = vrot.slane %v4333_v59, 7  ;;  %v4631_v28 = vld [vmem:[#allocation11 + $0x520] sm:$0xff]  ;;  %v4629_v59 = vld [vmem:[#allocation11 + $0x510] sm:$0xff] }
 0x521   :  { %10964 = vmatpush1.bf16.msra.mxu0 %v10963_v23  ;;  %v4420_v23 = vrot.slane %v4334_v32, 7  ;;  %v10981_v21 = vpack.c.bf16 %v4616_v25, %v4612_v49  ;;  %v10991_v49 = vpack.c.bf16 %v4631_v28, %v4627_v22  ;;  %v4638_v25 = vld [vmem:[#allocation11 + $0x558] sm:$0xff]  ;;  %v4743_v26 = vld [vmem:[#allocation11 + $0x8a0] sm:$0xff] }
 0x522   :  { %10966 = vmatprep.subr.bf16.mxu0 %v10965_v6  ;;  %v4605_v6 = vld [vmem:[#allocation11 + $0x450] sm:$0xff]  ;;  %v4419_v39 = vsel %vm1185_vm4, %v4417_v48, %v13395_v45  ;;  %v4670_v22 = vld [vmem:[#allocation11 + $0x658] sm:$0xff] }
 0x523   :  { %11132 = vmatpush1.bf16.msra.mxu1 %v11131_v57  ;;  %v10979_v57 = vpack.c.bf16 %v4607_v55, %v4603_v58  ;;  %v11147_v35 = vpack.c.bf16 %v4609_v7, %v4605_v6  ;;  %v4422_v38 = vsel %vm1185_vm4, %v4420_v23, %v4421_v41  ;;  %v4640_v58 = vld [vmem:[#allocation11 + $0x568] sm:$0xff]  ;;  %v4635_v23 = vld [vmem:[#allocation11 + $0x540] sm:$0xff]  ;;  %v4641_v48 = vld [vmem:[#allocation11 + $0x570] sm:$0xff] }
 0x524   :  { %11134 = vmatprep.subr.bf16.mxu1 %v11133_v42  ;;  %v4618_v42 = vld [vmem:[#allocation11 + $0x4b8] sm:$0xff]  ;;  %v4644_v6 = vld [vmem:[#allocation11 + $0x588] sm:$0xff] }
 0x525   :  { %10968 = vmatpush1.bf16.msra.mxu0 %v10967_v34  ;;  %v4345_v34 = vld [vmem:[#allocation2 + $0x120] sm:$0x7f]  ;;  %v11149_v47 = vpack.c.bf16 %v4618_v42, %v4614_v19  ;;  %v4648_v7 = vld [vmem:[#allocation11 + $0x5a8] sm:$0xff]  ;;  %v10995_v19 = vpack.c.bf16 %v4639_v61, %v4635_v23 }
 0x526   :  { %10970 = vmatprep.subr.bf16.mxu0 %v10969_v17  ;;  %v4624_v17 = vld [vmem:[#allocation11 + $0x4e8] sm:$0xff]  ;;  %v4435_v2 = vrot.slane %v4345_v34, 7  ;;  %v4646_v42 = vld [vmem:[#allocation11 + $0x598] sm:$0xff] }
 0x527   :  { %11136 = vmatpush1.bf16.msra.mxu1 %v11135_v33  ;;  %v4613_v33 = vld [vmem:[#allocation11 + $0x490] sm:$0xff]  ;;  %v10985_v10 = vpack.c.bf16 %v4624_v17, %v4620_v31  ;;  %v4656_v31 = vld [vmem:[#allocation11 + $0x5e8] sm:$0xff]  ;;  %v11165_v17 = vpack.c.bf16 %v4650_v0, %v4646_v42  ;;  %v4674_v28 = vld [vmem:[#allocation11 + $0x678] sm:$0xff] }
 0x528   :  { %11138 = vmatprep.subr.bf16.mxu1 %v11137_v63  ;;  %v10983_v63 = vpack.c.bf16 %v4615_v14, %v4611_v46  ;;  %v11151_v16 = vpack.c.bf16 %v4617_v9, %v4613_v33  ;;  %v4436_v60 = vsel %vm1185_vm4, %v13395_v45, %v4435_v2  ;;  %v4643_v46 = vld [vmem:[#allocation11 + $0x580] sm:$0xff]  ;;  %v4654_v33 = vld [vmem:[#allocation11 + $0x5d8] sm:$0xff]  ;;  %v4681_v42 = vld [vmem:[#allocation11 + $0x6b0] sm:$0xff] }
 0x529   :  { %10972 = vmatpush1.bf16.msra.mxu0 %v10971_v52  ;;  %v4318_v52 = vld [vmem:[#allocation2 + $0x18] sm:$0x80]  ;;  %v4647_v14 = vld [vmem:[#allocation11 + $0x5a0] sm:$0xff]  ;;  %v4658_v9 = vld [vmem:[#allocation11 + $0x5f8] sm:$0xff] }
 0x52a   :  { %10974 = vmatprep.subr.bf16.mxu0 %v10973_v36  ;;  %v4628_v36 = vld [vmem:[#allocation11 + $0x508] sm:$0xff]  ;;  %v10999_v11 = vpack.c.bf16 %v4647_v14, %v4643_v46  ;;  %v4655_v2 = vld [vmem:[#allocation11 + $0x5e0] sm:$0xff]  ;;  %v4682_v23 = vld [vmem:[#allocation11 + $0x6b8] sm:$0xff] }
 0x52b   :  { %11140 = vmatpush1.bf16.msra.mxu1 %v11139_v54  ;;  %v4396_v54 = vrot.slane %v4318_v52, 7  ;;  %v10989_v4 = vpack.c.bf16 %v4632_v3, %v4628_v36  ;;  %v4664_v52 = vld [vmem:[#allocation11 + $0x628] sm:$0xff]  ;;  %v4662_v36 = vld [vmem:[#allocation11 + $0x618] sm:$0xff] }
 0x52c   :  { %5769 = vmatmul.mubr.f32.vlgmr.msra.gmra.mrb[24].mxu0 %v4389_v44  ;;  %11142 = vmatprep.subr.bf16.mxu1 %v11141_v56  ;;  %v4621_v56 = vld [vmem:[#allocation11 + $0x4d0] sm:$0xff]  ;;  %v4666_v3 = vld [vmem:[#allocation11 + $0x638] sm:$0xff] }
 0x52d   :  { %5774 = vmatprep.mubr.f32.mxu0 %v4408_v53  ;;  %10976 = vmatpush1.bf16.msra.mxu0 %v10975_v15  ;;  %v4634_v15 = vld [vmem:[#allocation11 + $0x538] sm:$0xff]  ;;  %v11155_v32 = vpack.c.bf16 %v4625_v8, %v4621_v56  ;;  %v4398_v55 = vsel %vm1185_vm4, %v4396_v54, %v4397_v27  ;;  %v4663_v54 = vld [vmem:[#allocation11 + $0x620] sm:$0xff]  ;;  %v11171_v56 = vpack.c.bf16 %v4657_v5, %v4653_v12  ;;  %v4668_v8 = vld [vmem:[#allocation11 + $0x648] sm:$0xff] }
 0x52e   :  { %6036 = vmatmul.mubr.f32.vlgmr.msra.gmra.mrb[16].mxu1 %v4389_v44  ;;  %10978 = vmatprep.subr.bf16.mxu0 %v10977_v51  ;;  %v4630_v44 = vld [vmem:[#allocation11 + $0x518] sm:$0xff]  ;;  %v4636_v51 = vld [vmem:[#allocation11 + $0x548] sm:$0xff] }
 0x52f   :  { %6041 = vmatprep.mubr.f32.mxu1 %v4408_v53  ;;  %11144 = vmatpush1.bf16.msra.mxu1 %v11143_v20  ;;  %v11157_v45 = vpack.c.bf16 %v4634_v15, %v4630_v44  ;;  %v4633_v20 = vld [vmem:[#allocation11 + $0x530] sm:$0xff]  ;;  %v4642_v53 = vld [vmem:[#allocation11 + $0x578] sm:$0xff]  ;;  %v4704_v12 = vld [vmem:[#allocation11 + $0x768] sm:$0xff] }
 0x530   :  { %5775 = vmatmul.mubr.f32.gmra.mrb[26].mxu0 %v4406_v43  ;;  %11146 = vmatprep.subr.bf16.mxu1 %v11145_v37  ;;  %v10993_v37 = vpack.c.bf16 %v4640_v58, %v4636_v51  ;;  %v11159_v41 = vpack.c.bf16 %v4633_v20, %v4629_v59  ;;  %v4661_v44 = vld [vmem:[#allocation11 + $0x610] sm:$0xff]  ;;  %v4667_v51 = vld [vmem:[#allocation11 + $0x640] sm:$0xff]  ;;  %v4680_v59 = vld [vmem:[#allocation11 + $0x6a8] sm:$0xff]  ;;  %v11177_v20 = vpack.c.bf16 %v4674_v28, %v4670_v22 }
 0x531   :  { %5780 = vmatprep.mubr.f32.mxu0 %v4422_v38  ;;  %10980 = vmatpush1.bf16.msra.mxu0 %v10979_v57  ;;  %v4637_v57 = vld [vmem:[#allocation11 + $0x550] sm:$0xff]  ;;  %v4671_v58 = vld [vmem:[#allocation11 + $0x660] sm:$0xff]  ;;  %v4690_v46 = vld [vmem:[#allocation11 + $0x6f8] sm:$0xff] }
 0x532   :  { %6042 = vmatmul.mubr.f32.gmra.mrb[18].mxu1 %v4406_v43  ;;  %10982 = vmatprep.subr.bf16.mxu0 %v10981_v21  ;;  %v11161_v43 = vpack.c.bf16 %v4642_v53, %v4638_v25  ;;  %v10997_v21 = vpack.c.bf16 %v4648_v7, %v4644_v6  ;;  %v11163_v34 = vpack.c.bf16 %v4641_v48, %v4637_v57  ;;  %v4665_v15 = vld [vmem:[#allocation11 + $0x630] sm:$0xff]  ;;  %v4679_v6 = vld [vmem:[#allocation11 + $0x6a0] sm:$0xff]  ;;  %v4688_v57 = vld [vmem:[#allocation11 + $0x6e8] sm:$0xff] }
 0x533   :  { %6047 = vmatprep.mubr.f32.mxu1 %v4422_v38  ;;  %11148 = vmatpush1.bf16.msra.mxu1 %v11147_v35  ;;  %v4652_v35 = vld [vmem:[#allocation11 + $0x5c8] sm:$0xff]  ;;  %v4645_v38 = vld [vmem:[#allocation11 + $0x590] sm:$0xff]  ;;  %v11011_v53 = vpack.c.bf16 %v4671_v58, %v4667_v51  ;;  %v4714_v51 = vld [vmem:[#allocation11 + $0x7b8] sm:$0xff] }
 0x534   :  { %5781 = vmatmul.mubr.f32.gmra.mrb[28].mxu0 %v4419_v39  ;;  %11150 = vmatprep.subr.bf16.mxu1 %v11149_v47  ;;  %v4649_v47 = vld [vmem:[#allocation11 + $0x5b0] sm:$0xff] }
 0x535   :  { %5786 = vmatprep.mubr.f32.mxu0 %v4438_v24  ;;  %10984 = vmatpush1.bf16.msra.mxu0 %v10983_v63  ;;  %v4651_v63 = vld [vmem:[#allocation11 + $0x5c0] sm:$0xff]  ;;  %v11167_v62 = vpack.c.bf16 %v4649_v47, %v4645_v38  ;;  %v4673_v25 = vld [vmem:[#allocation11 + $0x670] sm:$0xff]  ;;  %v4696_v38 = vld [vmem:[#allocation11 + $0x728] sm:$0xff] }
 0x536   :  { %6048 = vmatmul.mubr.f32.gmra.mrb[20].mxu1 %v4419_v39  ;;  %10986 = vmatprep.subr.bf16.mxu0 %v10985_v10  ;;  %v11001_v39 = vpack.c.bf16 %v4656_v31, %v4652_v35  ;;  %v11169_v10 = vpack.c.bf16 %v4658_v9, %v4654_v33  ;;  %v4687_v35 = vld [vmem:[#allocation11 + $0x6e0] sm:$0xff]  ;;  %v4689_v33 = vld [vmem:[#allocation11 + $0x6f0] sm:$0xff] }
 0x537   :  { %6053 = vmatprep.mubr.f32.mxu1 %v4438_v24  ;;  %11152 = vmatpush1.bf16.msra.mxu1 %v11151_v16  ;;  %v11003_v16 = vpack.c.bf16 %v4655_v2, %v4651_v63  ;;  %v11005_v24 = vpack.c.bf16 %v4664_v52, %v4660_v50  ;;  %v4698_v63 = vld [vmem:[#allocation11 + $0x738] sm:$0xff]  ;;  %v4695_v50 = vld [vmem:[#allocation11 + $0x720] sm:$0xff]  ;;  %v4705_v22 = vld [vmem:[#allocation11 + $0x770] sm:$0xff] }
 0x538   :  { %5787 = vmatmul.mubr.f32.gmra.mrb[30].mxu0 %v4436_v60  ;;  %11154 = vmatprep.subr.bf16.mxu1 %v11153_v18  ;;  %v4659_v18 = vld [vmem:[#allocation11 + $0x600] sm:$0xff] }
 0x539   :  { %10988 = vmatpush1.bf16.msra.mxu0 %v10987_v1  ;;  %5857 = vmatprep.mubr.f32.mxu0 %v4398_v55  ;;  %v11173_v1 = vpack.c.bf16 %v4666_v3, %v4662_v36  ;;  %v4697_v36 = vld [vmem:[#allocation11 + $0x730] sm:$0xff] }
 0x53a   :  { %6054 = vmatmul.mubr.f32.gmra.mrb[22].mxu1 %v4436_v60  ;;  %10990 = vmatprep.subr.bf16.mxu0 %v10989_v4  ;;  %v4672_v60 = vld [vmem:[#allocation11 + $0x668] sm:$0xff]  ;;  %v11007_v4 = vpack.c.bf16 %v4663_v54, %v4659_v18  ;;  %v4706_v18 = vld [vmem:[#allocation11 + $0x778] sm:$0xff] }
 0x53b   :  { %11156 = vmatpush1.bf16.msra.mxu1 %v11155_v32  ;;  %6124 = vmatprep.mubr.f32.mxu1 %v4398_v55  ;;  %v11009_v32 = vpack.c.bf16 %v4672_v60, %v4668_v8  ;;  %v11175_v55 = vpack.c.bf16 %v4665_v15, %v4661_v44  ;;  %v4703_v8 = vld [vmem:[#allocation11 + $0x760] sm:$0xff]  ;;  %v4712_v44 = vld [vmem:[#allocation11 + $0x7a8] sm:$0xff] }
 0x53c   :  { %11158 = vmatprep.subr.bf16.mxu1 %v11157_v45  ;;  %v4676_v45 = vld [vmem:[#allocation11 + $0x688] sm:$0xff] }
 0x53d   :  { %10992 = vmatpush1.bf16.msra.mxu0 %v10991_v49  ;;  %v4669_v49 = vld [vmem:[#allocation11 + $0x650] sm:$0xff]  ;;  %v11013_v61 = vpack.c.bf16 %v4680_v59, %v4676_v45  ;;  %v4711_v45 = vld [vmem:[#allocation11 + $0x7a0] sm:$0xff] }
 0x53e   :  { %10994 = vmatprep.subr.bf16.mxu0 %v10993_v37  ;;  %v4678_v37 = vld [vmem:[#allocation11 + $0x698] sm:$0xff]  ;;  %v11179_v7 = vpack.c.bf16 %v4673_v25, %v4669_v49  ;;  %v4720_v49 = vld [vmem:[#allocation11 + $0x7e8] sm:$0xff] }
 0x53f   :  { %11160 = vmatpush1.bf16.msra.mxu1 %v11159_v41  ;;  %v4675_v41 = vld [vmem:[#allocation11 + $0x680] sm:$0xff]  ;;  %v11181_v48 = vpack.c.bf16 %v4682_v23, %v4678_v37  ;;  %v4713_v37 = vld [vmem:[#allocation11 + $0x7b0] sm:$0xff] }
 0x540   :  { %11162 = vmatprep.subr.bf16.mxu1 %v11161_v43  ;;  %v4684_v43 = vld [vmem:[#allocation11 + $0x6c8] sm:$0xff]  ;;  %v11015_v0 = vpack.c.bf16 %v4679_v6, %v4675_v41  ;;  %v4722_v41 = vld [vmem:[#allocation11 + $0x7f8] sm:$0xff] }
 0x541   :  { %10996 = vmatpush1.bf16.msra.mxu0 %v10995_v19  ;;  %v4677_v19 = vld [vmem:[#allocation11 + $0x690] sm:$0xff]  ;;  %v11017_v14 = vpack.c.bf16 %v4688_v57, %v4684_v43  ;;  %v4719_v43 = vld [vmem:[#allocation11 + $0x7e0] sm:$0xff] }
 0x542   :  { %10998 = vmatprep.subr.bf16.mxu0 %v10997_v21  ;;  %v4686_v21 = vld [vmem:[#allocation11 + $0x6d8] sm:$0xff]  ;;  %v11183_v31 = vpack.c.bf16 %v4681_v42, %v4677_v19  ;;  %v4728_v19 = vld [vmem:[#allocation11 + $0x828] sm:$0xff] }
 0x543   :  { %11164 = vmatpush1.bf16.msra.mxu1 %v11163_v34  ;;  %v4683_v34 = vld [vmem:[#allocation11 + $0x6c0] sm:$0xff]  ;;  %v11185_v47 = vpack.c.bf16 %v4690_v46, %v4686_v21  ;;  %v4721_v21 = vld [vmem:[#allocation11 + $0x7f0] sm:$0xff]  ;;  %v4317_v46 = vld [vmem:[#allocation2 + $0x10] sm:$0x80] }
 0x544   :  { %11166 = vmatprep.subr.bf16.mxu1 %v11165_v17  ;;  %v4692_v17 = vld [vmem:[#allocation11 + $0x708] sm:$0xff]  ;;  %v11019_v9 = vpack.c.bf16 %v4687_v35, %v4683_v34  ;;  %v4726_v34 = vld [vmem:[#allocation11 + $0x818] sm:$0xff] }
 0x545   :  { %11000 = vmatpush1.bf16.msra.mxu0 %v10999_v11  ;;  %v4685_v11 = vld [vmem:[#allocation11 + $0x6d0] sm:$0xff]  ;;  %v11021_v2 = vpack.c.bf16 %v4696_v38, %v4692_v17  ;;  %v4730_v35 = vld [vmem:[#allocation11 + $0x838] sm:$0xff]  ;;  %v4723_v38 = vld [vmem:[#allocation11 + $0x800] sm:$0xff] }
 0x546   :  { %11002 = vmatprep.subr.bf16.mxu0 %v11001_v39  ;;  %v4694_v39 = vld [vmem:[#allocation11 + $0x718] sm:$0xff]  ;;  %v11187_v52 = vpack.c.bf16 %v4689_v33, %v4685_v11 }
 0x547   :  { %11168 = vmatpush1.bf16.msra.mxu1 %v11167_v62  ;;  %v4691_v62 = vld [vmem:[#allocation11 + $0x700] sm:$0xff]  ;;  %v11189_v5 = vpack.c.bf16 %v4698_v63, %v4694_v39  ;;  %v12282_v11 = vld [vmem:[#allocation2 + $0x40] sm:$0xff]  ;;  %v4393_v39 = vrot.slane %v4317_v46, 7  ;;  %v4732_v63 = vld [vmem:[#allocation11 + $0x848] sm:$0xff] }
 0x548   :  { %11170 = vmatprep.subr.bf16.mxu1 %v11169_v10  ;;  %v4700_v10 = vld [vmem:[#allocation11 + $0x748] sm:$0xff]  ;;  %v11023_v3 = vpack.c.bf16 %v4695_v50, %v4691_v62  ;;  %v4394_v33 = vrot.slane %v12282_v11, 7  ;;  %v11205_v62 = vpack.c.bf16 %v4730_v35, %v4726_v34  ;;  %v4754_v34 = vld [vmem:[#allocation11 + $0x8f8] sm:$0xff]  ;;  %v13422_v35 = vld [vmem:[#allocation2 + $0x58] sm:$0xff] }
 0x549   :  { %11004 = vmatpush1.bf16.msra.mxu0 %v11003_v16  ;;  %v4693_v16 = vld [vmem:[#allocation11 + $0x710] sm:$0xff]  ;;  %v11025_v54 = vpack.c.bf16 %v4704_v12, %v4700_v10  ;;  %v4329_v12 = vld [vmem:[#allocation2 + $0x70] sm:$0x7f] }
 0x54a   :  { %11006 = vmatprep.subr.bf16.mxu0 %v11005_v24  ;;  %v4702_v24 = vld [vmem:[#allocation11 + $0x758] sm:$0xff]  ;;  %v11191_v60 = vpack.c.bf16 %v4697_v36, %v4693_v16  ;;  %v4729_v10 = vld [vmem:[#allocation11 + $0x830] sm:$0xff] }
 0x54b   :  { %11172 = vmatpush1.bf16.msra.mxu1 %v11171_v56  ;;  %v4699_v56 = vld [vmem:[#allocation11 + $0x740] sm:$0xff]  ;;  %v11193_v15 = vpack.c.bf16 %v4706_v18, %v4702_v24  ;;  %v4734_v16 = vld [vmem:[#allocation11 + $0x858] sm:$0xff] }
 0x54c   :  { %11174 = vmatprep.subr.bf16.mxu1 %v11173_v1  ;;  %v4708_v1 = vld [vmem:[#allocation11 + $0x788] sm:$0xff]  ;;  %v11027_v28 = vpack.c.bf16 %v4703_v8, %v4699_v56  ;;  %v4738_v36 = vld [vmem:[#allocation11 + $0x878] sm:$0xff]  ;;  %v4731_v18 = vld [vmem:[#allocation11 + $0x840] sm:$0xff]  ;;  %v4395_v56 = vsel %vm1185_vm4, %v4393_v39, %v4394_v33 }
 0x54d   :  { %11008 = vmatpush1.bf16.msra.mxu0 %v11007_v4  ;;  %v4701_v4 = vld [vmem:[#allocation11 + $0x750] sm:$0xff]  ;;  %v11029_v58 = vpack.c.bf16 %v4712_v44, %v4708_v1  ;;  %v4740_v1 = vld [vmem:[#allocation11 + $0x888] sm:$0xff] }
 0x54e   :  { %11010 = vmatprep.subr.bf16.mxu0 %v11009_v32  ;;  %v4710_v32 = vld [vmem:[#allocation11 + $0x798] sm:$0xff]  ;;  %v11195_v59 = vpack.c.bf16 %v4705_v22, %v4701_v4  ;;  %v4744_v44 = vld [vmem:[#allocation11 + $0x8a8] sm:$0xff]  ;;  %v11209_v4 = vpack.c.bf16 %v4738_v36, %v4734_v16 }
 0x54f   :  { %11176 = vmatpush1.bf16.msra.mxu1 %v11175_v55  ;;  %v4707_v55 = vld [vmem:[#allocation11 + $0x780] sm:$0xff]  ;;  %v11197_v25 = vpack.c.bf16 %v4714_v51, %v4710_v32  ;;  %v4733_v51 = vld [vmem:[#allocation11 + $0x850] sm:$0xff]  ;;  %v4762_v16 = vld [vmem:[#allocation11 + $0x938] sm:$0xff] }
 0x550   :  { %11178 = vmatprep.subr.bf16.mxu1 %v11177_v20  ;;  %v4716_v20 = vld [vmem:[#allocation11 + $0x7c8] sm:$0xff]  ;;  %v11031_v23 = vpack.c.bf16 %v4711_v45, %v4707_v55 }
 0x551   :  { %11012 = vmatpush1.bf16.msra.mxu0 %v11011_v53  ;;  %v4709_v53 = vld [vmem:[#allocation11 + $0x790] sm:$0xff]  ;;  %v11033_v6 = vpack.c.bf16 %v4720_v49, %v4716_v20  ;;  %v4335_v55 = vld [vmem:[#allocation2 + $0xd0] sm:$0x80]  ;;  %v4746_v20 = vld [vmem:[#allocation11 + $0x8b8] sm:$0xff] }
 0x552   :  { %11014 = vmatprep.subr.bf16.mxu0 %v11013_v61  ;;  %v4718_v61 = vld [vmem:[#allocation11 + $0x7d8] sm:$0xff]  ;;  %v11199_v57 = vpack.c.bf16 %v4713_v37, %v4709_v53  ;;  %v4348_v49 = vld [vmem:[#allocation2 + $0x138] sm:$0x7f]  ;;  %v4739_v53 = vld [vmem:[#allocation11 + $0x880] sm:$0xff] }
 0x553   :  { %11180 = vmatpush1.bf16.msra.mxu1 %v11179_v7  ;;  %v4715_v7 = vld [vmem:[#allocation11 + $0x7c0] sm:$0xff]  ;;  %v11201_v42 = vpack.c.bf16 %v4722_v41, %v4718_v61  ;;  %v12284_v61 = vld [vmem:[#allocation2 + $0x100] sm:$0xff]  ;;  %v11047_v46 = vpack.c.bf16 %v4743_v26, %v4739_v53 }
 0x554   :  { %11182 = vmatprep.subr.bf16.mxu1 %v11181_v48  ;;  %v4724_v48 = vld [vmem:[#allocation11 + $0x808] sm:$0xff]  ;;  %v4424_v41 = vrot.slane %v12284_v61, 7  ;;  %v4774_v26 = vld [vmem:[#allocation11 + $0x998] sm:$0xff]  ;;  %v4775_v61 = vld [vmem:[#allocation11 + $0x9a0] sm:$0xff] }
 0x555   :  { %11016 = vmatpush1.bf16.msra.mxu0 %v11015_v0  ;;  %v4717_v0 = vld [vmem:[#allocation11 + $0x7d0] sm:$0xff]  ;;  %v11037_v17 = vpack.c.bf16 %v4728_v19, %v4724_v48  ;;  %v4441_v19 = vrot.slane %v4348_v49, 7 }
 0x556   :  { %11018 = vmatprep.subr.bf16.mxu0 %v11017_v14  ;;  %v11035_v14 = vpack.c.bf16 %v4719_v43, %v4715_v7  ;;  %v4752_v7 = vld [vmem:[#allocation11 + $0x8e8] sm:$0xff]  ;;  %v4320_v43 = vld [vmem:[#allocation2 + $0x28] sm:$0x80]  ;;  %v4765_v49 = vld [vmem:[#allocation11 + $0x950] sm:$0xff] }
 0x557   :  { %11184 = vmatpush1.bf16.msra.mxu1 %v11183_v31  ;;  %v4330_v31 = vld [vmem:[#allocation2 + $0x78] sm:$0x7f]  ;;  %v4402_v11 = vrot.slane %v4320_v43, 7 }
 0x558   :  { %11186 = vmatprep.subr.bf16.mxu1 %v11185_v47  ;;  %v4727_v47 = vld [vmem:[#allocation11 + $0x820] sm:$0xff]  ;;  %v4411_v50 = vrot.slane %v4330_v31, 7  ;;  %v4403_v31 = vrot.slane %v13422_v35, 7  ;;  %v4337_v35 = vld [vmem:[#allocation2 + $0xe0] sm:$0x80] }
 0x559   :  { %11020 = vmatpush1.bf16.msra.mxu0 %v11019_v9  ;;  %v11203_v9 = vpack.c.bf16 %v4721_v21, %v4717_v0  ;;  %v4745_v0 = vld [vmem:[#allocation11 + $0x8b0] sm:$0xff]  ;;  %v4347_v21 = vld [vmem:[#allocation2 + $0x130] sm:$0x7f] }
 0x55a   :  { %11022 = vmatprep.subr.bf16.mxu0 %v11021_v2  ;;  %v4736_v2 = vld [vmem:[#allocation11 + $0x868] sm:$0xff]  ;;  %v4439_v39 = vrot.slane %v4347_v21, 7 }
 0x55b   :  { %11188 = vmatpush1.bf16.msra.mxu1 %v11187_v52  ;;  %v4725_v52 = vld [vmem:[#allocation11 + $0x810] sm:$0xff]  ;;  %v11041_v24 = vpack.c.bf16 %v4736_v2, %v4732_v63  ;;  %v4756_v63 = vld [vmem:[#allocation11 + $0x908] sm:$0xff] }
 0x55c   :  { %11190 = vmatprep.subr.bf16.mxu1 %v11189_v5  ;;  %v11039_v5 = vpack.c.bf16 %v4727_v47, %v4723_v38  ;;  %v11207_v8 = vpack.c.bf16 %v4729_v10, %v4725_v52  ;;  %v4747_v38 = vld [vmem:[#allocation11 + $0x8c0] sm:$0xff]  ;;  %v4760_v2 = vld [vmem:[#allocation11 + $0x928] sm:$0xff]  ;;  %v4749_v52 = vld [vmem:[#allocation11 + $0x8d0] sm:$0xff] }
 0x55d   :  { %11024 = vmatpush1.bf16.msra.mxu0 %v11023_v3  ;;  %v4336_v3 = vld [vmem:[#allocation2 + $0xd8] sm:$0x80]  ;;  %v4751_v47 = vld [vmem:[#allocation11 + $0x8e0] sm:$0xff]  ;;  %v11053_v36 = vpack.c.bf16 %v4760_v2, %v4756_v63  ;;  %v4794_v63 = vld [vmem:[#allocation11 + $0xa38] sm:$0xff] }
 0x55e   :  { %11026 = vmatprep.subr.bf16.mxu0 %v11025_v54  ;;  %v4735_v54 = vld [vmem:[#allocation11 + $0x860] sm:$0xff]  ;;  %v4426_v22 = vrot.slane %v4336_v3, 7  ;;  %v4753_v10 = vld [vmem:[#allocation11 + $0x8f0] sm:$0xff] }
 0x55f   :  { %11192 = vmatpush1.bf16.msra.mxu1 %v11191_v60  ;;  %v4409_v60 = vrot.slane %v4329_v12, 7  ;;  %v11043_v45 = vpack.c.bf16 %v4735_v54, %v4731_v18  ;;  %v11051_v12 = vpack.c.bf16 %v4751_v47, %v4747_v38  ;;  %v4755_v3 = vld [vmem:[#allocation11 + $0x900] sm:$0xff]  ;;  %v4404_v18 = vsel %vm1185_vm4, %v4402_v11, %v4403_v31  ;;  %v4792_v38 = vld [vmem:[#allocation11 + $0xa28] sm:$0xff]  ;;  %v4781_v11 = vld [vmem:[#allocation11 + $0x9d0] sm:$0xff] }
 0x560   :  { %11194 = vmatprep.subr.bf16.mxu1 %v11193_v15  ;;  %v4412_v15 = vsel %vm1185_vm4, %v4397_v27, %v4411_v50  ;;  %v4440_v54 = vsel %vm1185_vm4, %v4424_v41, %v4439_v39  ;;  %v4790_v39 = vld [vmem:[#allocation11 + $0xa18] sm:$0xff] }
 0x561   :  { %11028 = vmatpush1.bf16.msra.mxu0 %v11027_v28  ;;  %v12283_v28 = vld [vmem:[#allocation2 + $0x108] sm:$0xff]  ;;  %v4410_v27 = vsel %vm1185_vm4, %v4394_v33, %v4409_v60  ;;  %v4768_v60 = vld [vmem:[#allocation11 + $0x968] sm:$0xff] }
 0x562   :  { %11030 = vmatprep.subr.bf16.mxu0 %v11029_v58  ;;  %v4427_v32 = vrot.slane %v12283_v28, 7  ;;  %v4737_v58 = vld [vmem:[#allocation11 + $0x870] sm:$0xff]  ;;  %v4770_v28 = vld [vmem:[#allocation11 + $0x978] sm:$0xff] }
 0x563   :  { %11196 = vmatpush1.bf16.msra.mxu1 %v11195_v59  ;;  %v4742_v59 = vld [vmem:[#allocation11 + $0x898] sm:$0xff]  ;;  %v11211_v37 = vpack.c.bf16 %v4737_v58, %v4733_v51  ;;  %v4763_v51 = vld [vmem:[#allocation11 + $0x940] sm:$0xff] }
 0x564   :  { %11198 = vmatprep.subr.bf16.mxu1 %v11197_v25  ;;  %v11045_v25 = vpack.c.bf16 %v4744_v44, %v4740_v1  ;;  %v11213_v48 = vpack.c.bf16 %v4746_v20, %v4742_v59  ;;  %v4757_v44 = vld [vmem:[#allocation11 + $0x910] sm:$0xff]  ;;  %v4767_v58 = vld [vmem:[#allocation11 + $0x960] sm:$0xff]  ;;  %v4776_v59 = vld [vmem:[#allocation11 + $0x9a8] sm:$0xff] }
 0x565   :  { %11032 = vmatpush1.bf16.msra.mxu0 %v11031_v23  ;;  %v4423_v23 = vrot.slane %v4335_v55, 7  ;;  %v11059_v53 = vpack.c.bf16 %v4767_v58, %v4763_v51  ;;  %v6394_v58 = vld [vmem:[#allocation11 + $0x1518] sm:$0xff] }
 0x566   :  { %11034 = vmatprep.subr.bf16.mxu0 %v11033_v6  ;;  %v4748_v6 = vld [vmem:[#allocation11 + $0x8c8] sm:$0xff] }
 0x567   :  { %11200 = vmatpush1.bf16.msra.mxu1 %v11199_v57  ;;  %v4428_v57 = vsel %vm1185_vm4, %v4426_v22, %v4427_v32  ;;  %v4425_v33 = vsel %vm1185_vm4, %v4423_v23, %v4424_v41  ;;  %v4766_v22 = vld [vmem:[#allocation11 + $0x958] sm:$0xff]  ;;  %v4771_v23 = vld [vmem:[#allocation11 + $0x980] sm:$0xff] }
 0x568   :  { %11202 = vmatprep.subr.bf16.mxu1 %v11201_v42  ;;  %v4741_v42 = vld [vmem:[#allocation11 + $0x890] sm:$0xff]  ;;  %v11225_v20 = vpack.c.bf16 %v4770_v28, %v4766_v22 }
 0x569   :  { %11036 = vmatpush1.bf16.msra.mxu0 %v11035_v14  ;;  %v4750_v14 = vld [vmem:[#allocation11 + $0x8d8] sm:$0xff]  ;;  %v4797_v22 = vld [vmem:[#allocation11 + $0xa50] sm:$0xff] }
 0x56a   :  { %11038 = vmatprep.subr.bf16.mxu0 %v11037_v17  ;;  %v11049_v17 = vpack.c.bf16 %v4752_v7, %v4748_v6  ;;  %v11217_v50 = vpack.c.bf16 %v4754_v34, %v4750_v14  ;;  %v4780_v6 = vld [vmem:[#allocation11 + $0x9c8] sm:$0xff]  ;;  %v4783_v14 = vld [vmem:[#allocation11 + $0x9e0] sm:$0xff]  ;;  %v4801_v28 = vld [vmem:[#allocation11 + $0xa70] sm:$0xff] }
 0x56b   :  { %11204 = vmatpush1.bf16.msra.mxu1 %v11203_v9  ;;  %v11215_v9 = vpack.c.bf16 %v4745_v0, %v4741_v42  ;;  %v4784_v7 = vld [vmem:[#allocation11 + $0x9e8] sm:$0xff]  ;;  %v4782_v42 = vld [vmem:[#allocation11 + $0x9d8] sm:$0xff] }
 0x56c   :  { %5858 = vmatmul.mubr.f32.vlgmr.msra.gmra.mrb[24].mxu0 %v4395_v56  ;;  %11206 = vmatprep.subr.bf16.mxu1 %v11205_v62  ;;  %v4442_v62 = vsel %vm1185_vm4, %v4427_v32, %v4441_v19  ;;  %v11063_v19 = vpack.c.bf16 %v4775_v61, %v4771_v23  ;;  %v4786_v0 = vld [vmem:[#allocation11 + $0x9f8] sm:$0xff]  ;;  %v11065_v21 = vpack.c.bf16 %v4784_v7, %v4780_v6  ;;  %v6404_v23 = vld [vmem:[#allocation11 + $0x1568] sm:$0xff]  ;;  %v4338_v61 = vld [vmem:[#allocation2 + $0xe8] sm:$0x80] }
 0x56d   :  { %5863 = vmatprep.mubr.f32.mxu0 %v4412_v15  ;;  %11040 = vmatpush1.bf16.msra.mxu0 %v11039_v5  ;;  %v4758_v5 = vld [vmem:[#allocation11 + $0x918] sm:$0xff]  ;;  %v11233_v47 = vpack.c.bf16 %v4786_v0, %v4782_v42  ;;  %v6393_v6 = vld [vmem:[#allocation11 + $0x1510] sm:$0xff] }
 0x56e   :  { %6125 = vmatmul.mubr.f32.vlgmr.msra.gmra.mrb[16].mxu1 %v4395_v56  ;;  %11042 = vmatprep.subr.bf16.mxu0 %v11041_v24  ;;  %v4759_v24 = vld [vmem:[#allocation11 + $0x920] sm:$0xff]  ;;  %v11219_v56 = vpack.c.bf16 %v4753_v10, %v4749_v52  ;;  %v11221_v1 = vpack.c.bf16 %v4762_v16, %v4758_v5  ;;  %v4796_v10 = vld [vmem:[#allocation11 + $0xa48] sm:$0xff]  ;;  %v11237_v5 = vpack.c.bf16 %v4794_v63, %v4790_v39  ;;  %v4789_v16 = vld [vmem:[#allocation11 + $0xa10] sm:$0xff] }
 0x56f   :  { %6130 = vmatprep.mubr.f32.mxu1 %v4412_v15  ;;  %11208 = vmatpush1.bf16.msra.mxu1 %v11207_v8  ;;  %v4764_v8 = vld [vmem:[#allocation11 + $0x948] sm:$0xff]  ;;  %v4761_v15 = vld [vmem:[#allocation11 + $0x930] sm:$0xff]  ;;  %v4350_v39 = vld [vmem:[#allocation2 + $0x148] sm:$0x7f] }
 0x570   :  { %5864 = vmatmul.mubr.f32.gmra.mrb[26].mxu0 %v4410_v27  ;;  %11210 = vmatprep.subr.bf16.mxu1 %v11209_v4  ;;  %v11055_v4 = vpack.c.bf16 %v4759_v24, %v4755_v3  ;;  %v11057_v32 = vpack.c.bf16 %v4768_v60, %v4764_v8  ;;  %v11223_v55 = vpack.c.bf16 %v4761_v15, %v4757_v44  ;;  %v4798_v24 = vld [vmem:[#allocation11 + $0xa58] sm:$0xff]  ;;  %v4799_v8 = vld [vmem:[#allocation11 + $0xa60] sm:$0xff]  ;;  %v6396_v44 = vld [vmem:[#allocation11 + $0x1528] sm:$0xff] }
 0x571   :  { %5869 = vmatprep.mubr.f32.mxu0 %v4428_v57  ;;  %11044 = vmatpush1.bf16.msra.mxu0 %v11043_v45  ;;  %v4772_v45 = vld [vmem:[#allocation11 + $0x988] sm:$0xff]  ;;  %v4332_v15 = vld [vmem:[#allocation2 + $0x88] sm:$0x7f]  ;;  %v6397_v7 = vld [vmem:[#allocation11 + $0x1530] sm:$0xff] }
 0x572   :  { %6131 = vmatmul.mubr.f32.gmra.mrb[18].mxu1 %v4410_v27  ;;  %11046 = vmatprep.subr.bf16.mxu0 %v11045_v25  ;;  %v4769_v25 = vld [vmem:[#allocation11 + $0x970] sm:$0xff]  ;;  %v4778_v27 = vld [vmem:[#allocation11 + $0x9b8] sm:$0xff] }
 0x573   :  { %6136 = vmatprep.mubr.f32.mxu1 %v4428_v57  ;;  %11212 = vmatpush1.bf16.msra.mxu1 %v11211_v37  ;;  %v11061_v37 = vpack.c.bf16 %v4776_v59, %v4772_v45  ;;  %v11227_v41 = vpack.c.bf16 %v4769_v25, %v4765_v49  ;;  %v11229_v43 = vpack.c.bf16 %v4778_v27, %v4774_v26  ;;  %v4773_v57 = vld [vmem:[#allocation11 + $0x990] sm:$0xff]  ;;  %v6391_v59 = vld [vmem:[#allocation11 + $0x1500] sm:$0xff]  ;;  %v4415_v49 = vrot.slane %v4332_v15, 7  ;;  %v12286_v25 = vld [vmem:[#allocation2 + $0x50] sm:$0xff] }
 0x574   :  { %5870 = vmatmul.mubr.f32.gmra.mrb[28].mxu0 %v4425_v33  ;;  %11214 = vmatprep.subr.bf16.mxu1 %v11213_v48  ;;  %v4777_v48 = vld [vmem:[#allocation11 + $0x9b0] sm:$0xff]  ;;  %v11243_v26 = vpack.c.bf16 %v4801_v28, %v4797_v22  ;;  %v6418_v28 = vld [vmem:[#allocation11 + $0x15d8] sm:$0xff] }
 0x575   :  { %5875 = vmatprep.mubr.f32.mxu0 %v4442_v62  ;;  %11048 = vmatpush1.bf16.msra.mxu0 %v11047_v46  ;;  %v4779_v46 = vld [vmem:[#allocation11 + $0x9c0] sm:$0xff]  ;;  %v11231_v34 = vpack.c.bf16 %v4777_v48, %v4773_v57  ;;  %v6402_v48 = vld [vmem:[#allocation11 + $0x1558] sm:$0xff]  ;;  %v12287_v42 = vld [vmem:[#allocation2 + $0x118] sm:$0xff] }
 0x576   :  { %6137 = vmatmul.mubr.f32.gmra.mrb[20].mxu1 %v4425_v33  ;;  %11050 = vmatprep.subr.bf16.mxu0 %v11049_v17  ;;  %v4788_v17 = vld [vmem:[#allocation11 + $0xa08] sm:$0xff]  ;;  %v4785_v33 = vld [vmem:[#allocation11 + $0x9f0] sm:$0xff]  ;;  %v4433_v0 = vrot.slane %v12287_v42, 7  ;;  %v6427_v42 = vld [vmem:[#allocation11 + $0x1620] sm:$0xff] }
 0x577   :  { %6142 = vmatprep.mubr.f32.mxu1 %v4442_v62  ;;  %11216 = vmatpush1.bf16.msra.mxu1 %v11215_v9  ;;  %v11067_v9 = vpack.c.bf16 %v4783_v14, %v4779_v46  ;;  %v11069_v2 = vpack.c.bf16 %v4792_v38, %v4788_v17  ;;  %v4787_v62 = vld [vmem:[#allocation11 + $0xa00] sm:$0xff]  ;;  %v11235_v52 = vpack.c.bf16 %v4785_v33, %v4781_v11  ;;  %v4432_v17 = vrot.slane %v4338_v61, 7  ;;  %v6408_v33 = vld [vmem:[#allocation11 + $0x1588] sm:$0xff]  ;;  %v6413_v15 = vld [vmem:[#allocation11 + $0x15b0] sm:$0xff] }
 0x578   :  { %5876 = vmatmul.mubr.f32.gmra.mrb[30].mxu0 %v4440_v54  ;;  %11218 = vmatprep.subr.bf16.mxu1 %v11217_v50  ;;  %v4791_v50 = vld [vmem:[#allocation11 + $0xa20] sm:$0xff]  ;;  %v6417_v61 = vld [vmem:[#allocation11 + $0x15d0] sm:$0xff] }
 0x579   :  { %11052 = vmatpush1.bf16.msra.mxu0 %v11051_v12  ;;  %8984 = vmatprep.mubr.msk.f32.mxu0 %vm140_vm3, %v4404_v18  ;;  %v4800_v12 = vld [vmem:[#allocation11 + $0xa68] sm:$0xff]  ;;  %v11071_v3 = vpack.c.bf16 %v4791_v50, %v4787_v62  ;;  %v6399_v14 = vld [vmem:[#allocation11 + $0x1540] sm:$0xff]  ;;  %v6405_v62 = vld [vmem:[#allocation11 + $0x1570] sm:$0xff] }
 0x57a   :  { %6143 = vmatmul.mubr.f32.gmra.mrb[22].mxu1 %v4440_v54  ;;  %11054 = vmatprep.subr.bf16.mxu0 %v11053_v36  ;;  %v4793_v36 = vld [vmem:[#allocation11 + $0xa30] sm:$0xff]  ;;  %v11073_v54 = vpack.c.bf16 %v4800_v12, %v4796_v10  ;;  %v6410_v50 = vld [vmem:[#allocation11 + $0x1598] sm:$0xff]  ;;  %v4434_v10 = vsel %vm1185_vm4, %v4432_v17, %v4433_v0 }
 0x57b   :  { %11220 = vmatpush1.bf16.msra.mxu1 %v11219_v56  ;;  %8988 = vmatprep.mubr.msk.f32.mxu1 %vm140_vm3, %v4404_v18  ;;  %v4802_v18 = vld [vmem:[#allocation11 + $0xa78] sm:$0xff]  ;;  %v4795_v56 = vld [vmem:[#allocation11 + $0xa40] sm:$0xff]  ;;  %v11239_v60 = vpack.c.bf16 %v4793_v36, %v4789_v16  ;;  %v4445_v36 = vrot.slane %v4350_v39, 7 }
 0x57c   :  { %11222 = vmatprep.subr.bf16.mxu1 %v11221_v1  ;;  %v6392_v1 = vld [vmem:[#allocation11 + $0x1508] sm:$0xff]  ;;  %v11075_v51 = vpack.c.bf16 %v4799_v8, %v4795_v56  ;;  %v6411_v16 = vld [vmem:[#allocation11 + $0x15a0] sm:$0xff] }
 0x57d   :  { %11056 = vmatpush1.bf16.msra.mxu0 %v11055_v4  ;;  %v11241_v4 = vpack.c.bf16 %v4802_v18, %v4798_v24  ;;  %v11245_v45 = vpack.c.bf16 %v6396_v44, %v6392_v1  ;;  %v4429_v18 = vrot.slane %v4337_v35, 7  ;;  %v6416_v8 = vld [vmem:[#allocation11 + $0x15c8] sm:$0xff]  ;;  %v6409_v44 = vld [vmem:[#allocation11 + $0x1590] sm:$0xff] }
 0x57e   :  { %11058 = vmatprep.subr.bf16.mxu0 %v11057_v32  ;;  %v4319_v32 = vld [vmem:[#allocation2 + $0x20] sm:$0x80]  ;;  %v6440_v35 = vld [vmem:[#allocation11 + $0x1688] sm:$0xff] }
 0x57f   :  { %11224 = vmatpush1.bf16.msra.mxu1 %v11223_v55  ;;  %v6398_v55 = vld [vmem:[#allocation11 + $0x1538] sm:$0xff]  ;;  %v4399_v27 = vrot.slane %v4319_v32, 7 }
 0x580   :  { %11226 = vmatprep.subr.bf16.mxu1 %v11225_v20  ;;  %v6395_v20 = vld [vmem:[#allocation11 + $0x1520] sm:$0xff]  ;;  %v6422_v32 = vld [vmem:[#allocation11 + $0x15f8] sm:$0xff] }
 0x581   :  { %11060 = vmatpush1.bf16.msra.mxu0 %v11059_v53  ;;  %v4400_v53 = vrot.slane %v12286_v25, 7  ;;  %v11247_v57 = vpack.c.bf16 %v6395_v20, %v6391_v59  ;;  %v6419_v59 = vld [vmem:[#allocation11 + $0x15e0] sm:$0xff] }
 0x582   :  { %11062 = vmatprep.subr.bf16.mxu0 %v11061_v37  ;;  %v6400_v37 = vld [vmem:[#allocation11 + $0x1548] sm:$0xff] }
 0x583   :  { %11228 = vmatpush1.bf16.msra.mxu1 %v11227_v41  ;;  %v11413_v41 = vpack.c.bf16 %v6398_v55, %v6394_v58  ;;  %v11249_v46 = vpack.c.bf16 %v6404_v23, %v6400_v37  ;;  %v4401_v38 = vsel %vm1185_vm4, %v4399_v27, %v4400_v53  ;;  %v4446_v58 = vsel %vm1185_vm4, %v4433_v0, %v4445_v36  ;;  %v6428_v27 = vld [vmem:[#allocation11 + $0x1628] sm:$0xff] }
 0x584   :  { %11230 = vmatprep.subr.bf16.mxu1 %v11229_v43  ;;  %v4331_v43 = vld [vmem:[#allocation2 + $0x80] sm:$0x7f]  ;;  %v11425_v37 = vpack.c.bf16 %v6422_v32, %v6418_v28  ;;  %v6447_v28 = vld [vmem:[#allocation11 + $0x16c0] sm:$0xff] }
 0x585   :  { %11064 = vmatpush1.bf16.msra.mxu0 %v11063_v19  ;;  %v6406_v19 = vld [vmem:[#allocation11 + $0x1578] sm:$0xff]  ;;  %v4413_v11 = vrot.slane %v4331_v43, 7  ;;  %v6451_v32 = vld [vmem:[#allocation11 + $0x16e0] sm:$0xff] }
 0x586   :  { %11066 = vmatprep.subr.bf16.mxu0 %v11065_v21  ;;  %v4416_v21 = vsel %vm1185_vm4, %v4403_v31, %v4415_v49  ;;  %v11417_v63 = vpack.c.bf16 %v6406_v19, %v6402_v48  ;;  %v11423_v49 = vpack.c.bf16 %v6413_v15, %v6409_v44  ;;  %v6430_v43 = vld [vmem:[#allocation11 + $0x1638] sm:$0xff]  ;;  %v6423_v19 = vld [vmem:[#allocation11 + $0x1600] sm:$0xff] }
 0x587   :  { %11232 = vmatpush1.bf16.msra.mxu1 %v11231_v34  ;;  %v6403_v34 = vld [vmem:[#allocation11 + $0x1560] sm:$0xff]  ;;  %v6450_v15 = vld [vmem:[#allocation11 + $0x16d8] sm:$0xff] }
 0x588   :  { %11234 = vmatprep.subr.bf16.mxu1 %v11233_v47  ;;  %v11415_v47 = vpack.c.bf16 %v6397_v7, %v6393_v6  ;;  %v11251_v31 = vpack.c.bf16 %v6403_v34, %v6399_v14  ;;  %v6426_v7 = vld [vmem:[#allocation11 + $0x1618] sm:$0xff]  ;;  %v6436_v14 = vld [vmem:[#allocation11 + $0x1668] sm:$0xff] }
 0x589   :  { %11068 = vmatpush1.bf16.msra.mxu0 %v11067_v9  ;;  %v6412_v9 = vld [vmem:[#allocation11 + $0x15a8] sm:$0xff]  ;;  %v11429_v17 = vpack.c.bf16 %v6430_v43, %v6426_v7 }
 0x58a   :  { %11070 = vmatprep.subr.bf16.mxu0 %v11069_v2  ;;  %v6401_v2 = vld [vmem:[#allocation11 + $0x1550] sm:$0xff]  ;;  %v11253_v12 = vpack.c.bf16 %v6412_v9, %v6408_v33  ;;  %v6434_v33 = vld [vmem:[#allocation11 + $0x1658] sm:$0xff]  ;;  %v6468_v7 = vld [vmem:[#allocation11 + $0x1768] sm:$0xff] }
 0x58b   :  { %11236 = vmatpush1.bf16.msra.mxu1 %v11235_v52  ;;  %v6414_v52 = vld [vmem:[#allocation11 + $0x15b8] sm:$0xff]  ;;  %v11419_v24 = vpack.c.bf16 %v6405_v62, %v6401_v2  ;;  %v6435_v2 = vld [vmem:[#allocation11 + $0x1660] sm:$0xff] }
 0x58c   :  { %11238 = vmatprep.subr.bf16.mxu1 %v11237_v5  ;;  %v6407_v5 = vld [vmem:[#allocation11 + $0x1580] sm:$0xff]  ;;  %v11421_v1 = vpack.c.bf16 %v6414_v52, %v6410_v50  ;;  %v6438_v9 = vld [vmem:[#allocation11 + $0x1678] sm:$0xff]  ;;  %v6433_v52 = vld [vmem:[#allocation11 + $0x1650] sm:$0xff] }
 0x58d   :  { %11072 = vmatpush1.bf16.msra.mxu0 %v11071_v3  ;;  %v4414_v3 = vsel %vm1185_vm4, %v4400_v53, %v4413_v11  ;;  %v11255_v22 = vpack.c.bf16 %v6411_v16, %v6407_v5  ;;  %v6239_v53 = vld [vmem:[#allocation2 + $0x38] sm:$0xfe]  ;;  %v11263_v11 = vpack.c.bf16 %v6427_v42, %v6423_v19  ;;  %v11433_v50 = vpack.c.bf16 %v6438_v9, %v6434_v33  ;;  %v6442_v5 = vld [vmem:[#allocation11 + $0x1698] sm:$0xff] }
 0x58e   :  { %11074 = vmatprep.subr.bf16.mxu0 %v11073_v54  ;;  %v12288_v54 = vld [vmem:[#allocation2 + $0x110] sm:$0xff]  ;;  %v6446_v16 = vld [vmem:[#allocation11 + $0x16b8] sm:$0xff]  ;;  %v6469_v33 = vld [vmem:[#allocation11 + $0x1770] sm:$0xff] }
 0x58f   :  { %11240 = vmatpush1.bf16.msra.mxu1 %v11239_v60  ;;  %v4430_v56 = vrot.slane %v12288_v54, 7  ;;  %v6420_v60 = vld [vmem:[#allocation11 + $0x15e8] sm:$0xff]  ;;  %v6466_v42 = vld [vmem:[#allocation11 + $0x1758] sm:$0xff] }
 0x590   :  { %11242 = vmatprep.subr.bf16.mxu1 %v11241_v4  ;;  %v4349_v4 = vld [vmem:[#allocation2 + $0x140] sm:$0x7f]  ;;  %v11257_v55 = vpack.c.bf16 %v6420_v60, %v6416_v8  ;;  %v6448_v54 = vld [vmem:[#allocation11 + $0x16c8] sm:$0xff]  ;;  %v11437_v8 = vpack.c.bf16 %v6446_v16, %v6442_v5  ;;  %v6441_v60 = vld [vmem:[#allocation11 + $0x1690] sm:$0xff] }
 0x591   :  { %11076 = vmatpush1.bf16.msra.mxu0 %v11075_v51  ;;  %v13442_v51 = vld [vmem:[#allocation2 + $0x68] sm:$0xff]  ;;  %v4431_v20 = vsel %vm1185_vm4, %v4429_v18, %v4430_v56  ;;  %v4443_v25 = vrot.slane %v4349_v4, 7  ;;  %v6454_v4 = vld [vmem:[#allocation11 + $0x16f8] sm:$0xff]  ;;  %v6477_v5 = vld [vmem:[#allocation11 + $0x17b0] sm:$0xff] }
 0x592   :  { %11246 = vmatprep.subr.bf16.mxu0 %v11245_v45  ;;  %v6415_v45 = vld [vmem:[#allocation11 + $0x15c0] sm:$0xff]  ;;  %v6314_v23 = vrot.slane %v13442_v51, 1 }
 0x593   :  { %11244 = vmatpush1.bf16.msra.mxu1 %v11243_v26  ;;  %v6424_v26 = vld [vmem:[#allocation11 + $0x1608] sm:$0xff]  ;;  %v11259_v6 = vpack.c.bf16 %v6419_v59, %v6415_v45  ;;  %v4444_v0 = vsel %vm1185_vm4, %v4430_v56, %v4443_v25  ;;  %v11441_v59 = vpack.c.bf16 %v6454_v4, %v6450_v15  ;;  %v11275_v25 = vpack.c.bf16 %v6451_v32, %v6447_v28  ;;  %v6485_v15 = vld [vmem:[#allocation11 + $0x17f0] sm:$0xff]  ;;  %v6494_v28 = vld [vmem:[#allocation11 + $0x1838] sm:$0xff] }
 0x594   :  { %5947 = vmatmul.mubr.f32.vlgmr.msra.gmra.mrb[24].mxu0 %v4401_v38  ;;  %11414 = vmatprep.subr.bf16.mxu1 %v11413_v41  ;;  %v6421_v41 = vld [vmem:[#allocation11 + $0x15f0] sm:$0xff]  ;;  %v11261_v48 = vpack.c.bf16 %v6428_v27, %v6424_v26  ;;  %v6452_v56 = vld [vmem:[#allocation11 + $0x16e8] sm:$0xff]  ;;  %v6462_v26 = vld [vmem:[#allocation11 + $0x1738] sm:$0xff] }
 0x595   :  { %11248 = vmatpush1.bf16.msra.mxu0 %v11247_v57  ;;  %8985 = vmatprep.mubr.msk.f32.mxu0 %vm140_vm3, %v4416_v21  ;;  %v6313_v57 = vrot.slane %v6239_v53, 1  ;;  %v6460_v45 = vld [vmem:[#allocation11 + $0x1728] sm:$0xff]  ;;  %v6458_v53 = vld [vmem:[#allocation11 + $0x1718] sm:$0xff] }
 0x596   :  { %6214 = vmatmul.mubr.f32.vlgmr.msra.gmra.mrb[16].mxu1 %v4401_v38  ;;  %11250 = vmatprep.subr.bf16.mxu0 %v11249_v46  ;;  %v6432_v46 = vld [vmem:[#allocation11 + $0x1648] sm:$0xff]  ;;  %v6425_v38 = vld [vmem:[#allocation11 + $0x1610] sm:$0xff]  ;;  %v11445_v43 = vpack.c.bf16 %v6462_v26, %v6458_v53 }
 0x597   :  { %11416 = vmatpush1.bf16.msra.mxu1 %v11415_v47  ;;  %8989 = vmatprep.mubr.msk.f32.mxu1 %vm140_vm3, %v4416_v21  ;;  %v11427_v21 = vpack.c.bf16 %v6421_v41, %v6417_v61  ;;  %v6315_v34 = vsel %vm3109_vm5, %v6313_v57, %v6314_v23  ;;  %v6429_v47 = vld [vmem:[#allocation11 + $0x1630] sm:$0xff]  ;;  %v11265_v39 = vpack.c.bf16 %v6436_v14, %v6432_v46  ;;  %v6459_v61 = vld [vmem:[#allocation11 + $0x1720] sm:$0xff] }
 0x598   :  { %5953 = vmatmul.mubr.f32.gmra.mrb[26].mxu0 %v4414_v3  ;;  %11418 = vmatprep.subr.bf16.mxu1 %v11417_v63  ;;  %v6431_v63 = vld [vmem:[#allocation11 + $0x1640] sm:$0xff]  ;;  %v11431_v62 = vpack.c.bf16 %v6429_v47, %v6425_v38  ;;  %v6457_v57 = vld [vmem:[#allocation11 + $0x1710] sm:$0xff]  ;;  %v6476_v38 = vld [vmem:[#allocation11 + $0x17a8] sm:$0xff] }
 0x599   :  { %11252 = vmatpush1.bf16.msra.mxu0 %v11251_v31  ;;  %8986 = vmatprep.mubr.msk.f32.mxu0 %vm140_vm3, %v4434_v10  ;;  %v6444_v31 = vld [vmem:[#allocation11 + $0x16a8] sm:$0xff]  ;;  %v6463_v46 = vld [vmem:[#allocation11 + $0x1740] sm:$0xff]  ;;  %v6493_v53 = vld [vmem:[#allocation11 + $0x1830] sm:$0xff] }
 0x59a   :  { %6220 = vmatmul.mubr.f32.gmra.mrb[18].mxu1 %v4414_v3  ;;  %11254 = vmatprep.subr.bf16.mxu0 %v11253_v12  ;;  %v11267_v12 = vpack.c.bf16 %v6435_v2, %v6431_v63  ;;  %v11269_v36 = vpack.c.bf16 %v6444_v31, %v6440_v35  ;;  %v6439_v3 = vld [vmem:[#allocation11 + $0x1680] sm:$0xff]  ;;  %v6478_v63 = vld [vmem:[#allocation11 + $0x17b8] sm:$0xff] }
 0x59b   :  { %11420 = vmatpush1.bf16.msra.mxu1 %v11419_v24  ;;  %8990 = vmatprep.mubr.msk.f32.mxu1 %vm140_vm3, %v4434_v10  ;;  %v6437_v10 = vld [vmem:[#allocation11 + $0x1670] sm:$0xff]  ;;  %v6443_v24 = vld [vmem:[#allocation11 + $0x16a0] sm:$0xff] }
 0x59c   :  { %5959 = vmatmul.mubr.f32.gmra.mrb[28].mxu0 %v4431_v20  ;;  %11422 = vmatprep.subr.bf16.mxu1 %v11421_v1  ;;  %v11435_v18 = vpack.c.bf16 %v6437_v10, %v6433_v52  ;;  %v6445_v1 = vld [vmem:[#allocation11 + $0x16b0] sm:$0xff]  ;;  %v11271_v44 = vpack.c.bf16 %v6443_v24, %v6439_v3  ;;  %v6467_v14 = vld [vmem:[#allocation11 + $0x1760] sm:$0xff]  ;;  %v6484_v52 = vld [vmem:[#allocation11 + $0x17e8] sm:$0xff] }
 0x59d   :  { %11256 = vmatpush1.bf16.msra.mxu0 %v11255_v22  ;;  %8987 = vmatprep.mubr.msk.f32.mxu0 %vm140_vm3, %v4446_v58  ;;  %v11273_v22 = vpack.c.bf16 %v6452_v56, %v6448_v54  ;;  %v11283_v9 = vpack.c.bf16 %v6467_v14, %v6463_v46  ;;  %v6475_v35 = vld [vmem:[#allocation11 + $0x17a0] sm:$0xff]  ;;  %v6486_v3 = vld [vmem:[#allocation11 + $0x17f8] sm:$0xff] }
 0x59e   :  { %6226 = vmatmul.mubr.f32.gmra.mrb[20].mxu1 %v4431_v20  ;;  %11258 = vmatprep.subr.bf16.mxu0 %v11257_v55  ;;  %v6456_v55 = vld [vmem:[#allocation11 + $0x1708] sm:$0xff]  ;;  %v6449_v20 = vld [vmem:[#allocation11 + $0x16d0] sm:$0xff]  ;;  %v6483_v54 = vld [vmem:[#allocation11 + $0x17e0] sm:$0xff] }
 0x59f   :  { %11424 = vmatpush1.bf16.msra.mxu1 %v11423_v49  ;;  %8991 = vmatprep.mubr.msk.f32.mxu1 %vm140_vm3, %v4446_v58  ;;  %v11439_v58 = vpack.c.bf16 %v6445_v1, %v6441_v60  ;;  %v6453_v49 = vld [vmem:[#allocation11 + $0x16f0] sm:$0xff]  ;;  %v11277_v27 = vpack.c.bf16 %v6460_v45, %v6456_v55  ;;  %v6492_v60 = vld [vmem:[#allocation11 + $0x1828] sm:$0xff]  ;;  %v6491_v55 = vld [vmem:[#allocation11 + $0x1820] sm:$0xff] }
 0x5a0   :  { %5965 = vmatmul.mubr.f32.gmra.mrb[30].mxu0 %v4444_v0  ;;  %11426 = vmatprep.subr.bf16.mxu1 %v11425_v37  ;;  %v6455_v37 = vld [vmem:[#allocation11 + $0x1700] sm:$0xff]  ;;  %v11443_v41 = vpack.c.bf16 %v6453_v49, %v6449_v20  ;;  %v6500_v20 = vld [vmem:[#allocation11 + $0x1868] sm:$0xff]  ;;  %v6510_v46 = vld [vmem:[#allocation11 + $0x18b8] sm:$0xff] }
 0x5a1   :  { %11260 = vmatpush1.bf16.msra.mxu0 %v11259_v6  ;;  %6799 = vmatprep.mubr.f32.mxu0 %v6315_v34  ;;  %v6464_v6 = vld [vmem:[#allocation11 + $0x1748] sm:$0xff]  ;;  %v11279_v19 = vpack.c.bf16 %v6459_v61, %v6455_v37  ;;  %v6502_v37 = vld [vmem:[#allocation11 + $0x1878] sm:$0xff] }
 0x5a2   :  { %6232 = vmatmul.mubr.f32.gmra.mrb[22].mxu1 %v4444_v0  ;;  %11262 = vmatprep.subr.bf16.mxu0 %v11261_v48  ;;  %v6461_v48 = vld [vmem:[#allocation11 + $0x1730] sm:$0xff]  ;;  %v6470_v0 = vld [vmem:[#allocation11 + $0x1778] sm:$0xff] }
 0x5a3   :  { %11428 = vmatpush1.bf16.msra.mxu1 %v11427_v21  ;;  %7066 = vmatprep.mubr.f32.mxu1 %v6315_v34  ;;  %v11281_v21 = vpack.c.bf16 %v6468_v7, %v6464_v6  ;;  %v11447_v34 = vpack.c.bf16 %v6461_v48, %v6457_v57  ;;  %v11449_v47 = vpack.c.bf16 %v6470_v0, %v6466_v42  ;;  %v6499_v6 = vld [vmem:[#allocation11 + $0x1860] sm:$0xff]  ;;  %v6508_v57 = vld [vmem:[#allocation11 + $0x18a8] sm:$0xff]  ;;  %v6501_v42 = vld [vmem:[#allocation11 + $0x1870] sm:$0xff] }
 0x5a4   :  { %11430 = vmatprep.subr.bf16.mxu1 %v11429_v17  ;;  %v6472_v17 = vld [vmem:[#allocation11 + $0x1788] sm:$0xff] }
 0x5a5   :  { %11264 = vmatpush1.bf16.msra.mxu0 %v11263_v11  ;;  %v6465_v11 = vld [vmem:[#allocation11 + $0x1750] sm:$0xff]  ;;  %v11285_v2 = vpack.c.bf16 %v6476_v38, %v6472_v17  ;;  %v6507_v17 = vld [vmem:[#allocation11 + $0x18a0] sm:$0xff] }
 0x5a6   :  { %11266 = vmatprep.subr.bf16.mxu0 %v11265_v39  ;;  %v6474_v39 = vld [vmem:[#allocation11 + $0x1798] sm:$0xff]  ;;  %v11451_v31 = vpack.c.bf16 %v6469_v33, %v6465_v11  ;;  %v6516_v11 = vld [vmem:[#allocation11 + $0x18e8] sm:$0xff] }
 0x5a7   :  { %11432 = vmatpush1.bf16.msra.mxu1 %v11431_v62  ;;  %v6471_v62 = vld [vmem:[#allocation11 + $0x1780] sm:$0xff]  ;;  %v11453_v10 = vpack.c.bf16 %v6478_v63, %v6474_v39  ;;  %v6509_v39 = vld [vmem:[#allocation11 + $0x18b0] sm:$0xff] }
 0x5a8   :  { %11434 = vmatprep.subr.bf16.mxu1 %v11433_v50  ;;  %v6480_v50 = vld [vmem:[#allocation11 + $0x17c8] sm:$0xff]  ;;  %v11287_v16 = vpack.c.bf16 %v6475_v35, %v6471_v62  ;;  %v6518_v62 = vld [vmem:[#allocation11 + $0x18f8] sm:$0xff] }
 0x5a9   :  { %11268 = vmatpush1.bf16.msra.mxu0 %v11267_v12  ;;  %v6473_v12 = vld [vmem:[#allocation11 + $0x1790] sm:$0xff]  ;;  %v11289_v24 = vpack.c.bf16 %v6484_v52, %v6480_v50  ;;  %v6515_v50 = vld [vmem:[#allocation11 + $0x18e0] sm:$0xff]  ;;  %v6238_v52 = vld [vmem:[#allocation2 + $0x30] sm:$0xfe] }
 0x5aa   :  { %11270 = vmatprep.subr.bf16.mxu0 %v11269_v36  ;;  %v6482_v36 = vld [vmem:[#allocation11 + $0x17d8] sm:$0xff]  ;;  %v11455_v56 = vpack.c.bf16 %v6477_v5, %v6473_v12  ;;  %v6520_v12 = vld [vmem:[#allocation11 + $0x1908] sm:$0xff] }
 0x5ab   :  { %11436 = vmatpush1.bf16.msra.mxu1 %v11435_v18  ;;  %v6479_v18 = vld [vmem:[#allocation11 + $0x17c0] sm:$0xff]  ;;  %v11457_v1 = vpack.c.bf16 %v6486_v3, %v6482_v36  ;;  %v6524_v5 = vld [vmem:[#allocation11 + $0x1928] sm:$0xff]  ;;  %v6513_v36 = vld [vmem:[#allocation11 + $0x18d0] sm:$0xff] }
 0x5ac   :  { %11438 = vmatprep.subr.bf16.mxu1 %v11437_v8  ;;  %v6488_v8 = vld [vmem:[#allocation11 + $0x1808] sm:$0xff]  ;;  %v11291_v4 = vpack.c.bf16 %v6483_v54, %v6479_v18  ;;  %v6517_v3 = vld [vmem:[#allocation11 + $0x18f0] sm:$0xff]  ;;  %v6310_v18 = vrot.slane %v6238_v52, 1 }
 0x5ad   :  { %11272 = vmatpush1.bf16.msra.mxu0 %v11271_v44  ;;  %v6481_v44 = vld [vmem:[#allocation11 + $0x17d0] sm:$0xff]  ;;  %v11293_v32 = vpack.c.bf16 %v6492_v60, %v6488_v8  ;;  %v12289_v54 = vld [vmem:[#allocation2 + $0x30] sm:$0xff]  ;;  %v6522_v8 = vld [vmem:[#allocation11 + $0x1918] sm:$0xff] }
 0x5ae   :  { %11274 = vmatprep.subr.bf16.mxu0 %v11273_v22  ;;  %v6490_v22 = vld [vmem:[#allocation11 + $0x1818] sm:$0xff]  ;;  %v11459_v45 = vpack.c.bf16 %v6485_v15, %v6481_v44  ;;  %v11309_v44 = vpack.c.bf16 %v6524_v5, %v6520_v12  ;;  %v6519_v15 = vld [vmem:[#allocation11 + $0x1900] sm:$0xff]  ;;  %v6541_v12 = vld [vmem:[#allocation11 + $0x19b0] sm:$0xff] }
 0x5af   :  { %11440 = vmatpush1.bf16.msra.mxu1 %v11439_v58  ;;  %v6487_v58 = vld [vmem:[#allocation11 + $0x1800] sm:$0xff]  ;;  %v11461_v49 = vpack.c.bf16 %v6494_v28, %v6490_v22  ;;  %v6526_v60 = vld [vmem:[#allocation11 + $0x1938] sm:$0xff]  ;;  %v6250_v22 = vld [vmem:[#allocation2 + $0x90] sm:$0x1]  ;;  %v11475_v28 = vpack.c.bf16 %v6517_v3, %v6513_v36 }
 0x5b0   :  { %11442 = vmatprep.subr.bf16.mxu1 %v11441_v59  ;;  %v6496_v59 = vld [vmem:[#allocation11 + $0x1848] sm:$0xff]  ;;  %v11295_v26 = vpack.c.bf16 %v6491_v55, %v6487_v58  ;;  %v11477_v55 = vpack.c.bf16 %v6526_v60, %v6522_v8  ;;  %v6546_v3 = vld [vmem:[#allocation11 + $0x19d8] sm:$0xff]  ;;  %v6543_v8 = vld [vmem:[#allocation11 + $0x19c0] sm:$0xff] }
 0x5b1   :  { %11276 = vmatpush1.bf16.msra.mxu0 %v11275_v25  ;;  %v6489_v25 = vld [vmem:[#allocation11 + $0x1810] sm:$0xff]  ;;  %v11297_v61 = vpack.c.bf16 %v6500_v20, %v6496_v59  ;;  %v6532_v58 = vld [vmem:[#allocation11 + $0x1968] sm:$0xff]  ;;  %v6547_v60 = vld [vmem:[#allocation11 + $0x19e0] sm:$0xff] }
 0x5b2   :  { %11278 = vmatprep.subr.bf16.mxu0 %v11277_v27  ;;  %v6498_v27 = vld [vmem:[#allocation11 + $0x1858] sm:$0xff]  ;;  %v11463_v7 = vpack.c.bf16 %v6493_v53, %v6489_v25  ;;  %v6521_v59 = vld [vmem:[#allocation11 + $0x1910] sm:$0xff]  ;;  %v6328_v53 = vrot.slane %v6250_v22, 1 }
 0x5b3   :  { %11444 = vmatpush1.bf16.msra.mxu1 %v11443_v41  ;;  %v6495_v41 = vld [vmem:[#allocation11 + $0x1840] sm:$0xff]  ;;  %v11465_v48 = vpack.c.bf16 %v6502_v37, %v6498_v27  ;;  %v6525_v20 = vld [vmem:[#allocation11 + $0x1930] sm:$0xff]  ;;  %v6534_v27 = vld [vmem:[#allocation11 + $0x1978] sm:$0xff] }
 0x5b4   :  { %11446 = vmatprep.subr.bf16.mxu1 %v11445_v43  ;;  %v6504_v43 = vld [vmem:[#allocation11 + $0x1888] sm:$0xff]  ;;  %v11299_v0 = vpack.c.bf16 %v6499_v6, %v6495_v41  ;;  %v13458_v37 = vld [vmem:[#allocation2 + $0x128] sm:$0xff] }
 0x5b5   :  { %11280 = vmatpush1.bf16.msra.mxu0 %v11279_v19  ;;  %v6497_v19 = vld [vmem:[#allocation11 + $0x1850] sm:$0xff]  ;;  %v11301_v14 = vpack.c.bf16 %v6508_v57, %v6504_v43  ;;  %v6527_v41 = vld [vmem:[#allocation11 + $0x1940] sm:$0xff]  ;;  %v11479_v43 = vpack.c.bf16 %v6525_v20, %v6521_v59  ;;  %v11323_v59 = vpack.c.bf16 %v6547_v60, %v6543_v8  ;;  %v6554_v20 = vld [vmem:[#allocation11 + $0x1a18] sm:$0xff] }
 0x5b6   :  { %11282 = vmatprep.subr.bf16.mxu0 %v11281_v21  ;;  %v6506_v21 = vld [vmem:[#allocation11 + $0x1898] sm:$0xff]  ;;  %v11467_v38 = vpack.c.bf16 %v6501_v42, %v6497_v19  ;;  %v6531_v6 = vld [vmem:[#allocation11 + $0x1960] sm:$0xff]  ;;  %v6257_v57 = vld [vmem:[#allocation2 + $0xf8] sm:$0xfe] }
 0x5b7   :  { %11448 = vmatpush1.bf16.msra.mxu1 %v11447_v34  ;;  %v6503_v34 = vld [vmem:[#allocation11 + $0x1880] sm:$0xff]  ;;  %v11469_v33 = vpack.c.bf16 %v6510_v46, %v6506_v21  ;;  %v6540_v19 = vld [vmem:[#allocation11 + $0x19a8] sm:$0xff]  ;;  %v6344_v21 = vrot.slane %v13458_v37, 1  ;;  %v6529_v46 = vld [vmem:[#allocation11 + $0x1950] sm:$0xff]  ;;  %v6343_v51 = vrot.slane %v6257_v57, 1 }
 0x5b8   :  { %11450 = vmatprep.subr.bf16.mxu1 %v11449_v47  ;;  %v6512_v47 = vld [vmem:[#allocation11 + $0x18c8] sm:$0xff]  ;;  %v11303_v63 = vpack.c.bf16 %v6507_v17, %v6503_v34  ;;  %v11315_v17 = vpack.c.bf16 %v6531_v6, %v6527_v41  ;;  %v6577_v60 = vld [vmem:[#allocation11 + $0x1ad0] sm:$0xff] }
 0x5b9   :  { %11284 = vmatpush1.bf16.msra.mxu0 %v11283_v9  ;;  %v6505_v9 = vld [vmem:[#allocation11 + $0x1890] sm:$0xff]  ;;  %v11305_v35 = vpack.c.bf16 %v6516_v11, %v6512_v47  ;;  %v6538_v47 = vld [vmem:[#allocation11 + $0x1998] sm:$0xff]  ;;  %v6564_v41 = vld [vmem:[#allocation11 + $0x1a68] sm:$0xff] }
 0x5ba   :  { %11286 = vmatprep.subr.bf16.mxu0 %v11285_v2  ;;  %v6514_v2 = vld [vmem:[#allocation11 + $0x18d8] sm:$0xff] }
 0x5bb   :  { %11452 = vmatpush1.bf16.msra.mxu1 %v11451_v31  ;;  %v6511_v31 = vld [vmem:[#allocation11 + $0x18c0] sm:$0xff]  ;;  %v6542_v11 = vld [vmem:[#allocation11 + $0x19b8] sm:$0xff] }
 0x5bc   :  { %11454 = vmatprep.subr.bf16.mxu1 %v11453_v10  ;;  %v11471_v10 = vpack.c.bf16 %v6509_v39, %v6505_v9  ;;  %v6539_v39 = vld [vmem:[#allocation11 + $0x19a0] sm:$0xff] }
 0x5bd   :  { %11288 = vmatpush1.bf16.msra.mxu0 %v11287_v16  ;;  %v11473_v16 = vpack.c.bf16 %v6518_v62, %v6514_v2  ;;  %v6544_v62 = vld [vmem:[#allocation11 + $0x19c8] sm:$0xff] }
 0x5be   :  { %11290 = vmatprep.subr.bf16.mxu0 %v11289_v24  ;;  %v11307_v24 = vpack.c.bf16 %v6515_v50, %v6511_v31  ;;  %v6345_v31 = vsel %vm3109_vm5, %v6343_v51, %v6344_v21  ;;  %v11485_v50 = vpack.c.bf16 %v6542_v11, %v6538_v47  ;;  %v6565_v47 = vld [vmem:[#allocation11 + $0x1a70] sm:$0xff]  ;;  %v6574_v51 = vld [vmem:[#allocation11 + $0x1ab8] sm:$0xff] }
 0x5bf   :  { %11456 = vmatpush1.bf16.msra.mxu1 %v11455_v56  ;;  %v13454_v56 = vrot.slane %v12289_v54, 1 }
 0x5c0   :  { %11458 = vmatprep.subr.bf16.mxu1 %v11457_v1  ;;  %v6251_v1 = vld [vmem:[#allocation2 + $0x98] sm:$0x1] }
 0x5c1   :  { %11292 = vmatpush1.bf16.msra.mxu0 %v11291_v4  ;;  %v6523_v4 = vld [vmem:[#allocation11 + $0x1920] sm:$0xff]  ;;  %v6329_v34 = vsel %vm3109_vm5, %v13454_v56, %v6328_v53 }
 0x5c2   :  { %11294 = vmatprep.subr.bf16.mxu0 %v11293_v32  ;;  %v6528_v32 = vld [vmem:[#allocation11 + $0x1948] sm:$0xff]  ;;  %v11311_v25 = vpack.c.bf16 %v6523_v4, %v6519_v15 }
 0x5c3   :  { %11460 = vmatpush1.bf16.msra.mxu1 %v11459_v45  ;;  %v6330_v45 = vrot.slane %v6251_v1, 1  ;;  %v6552_v15 = vld [vmem:[#allocation11 + $0x1a08] sm:$0xff] }
 0x5c4   :  { %11462 = vmatprep.subr.bf16.mxu1 %v11461_v49  ;;  %v6312_v49 = vsel %vm3109_vm5, %v6310_v18, %v13454_v56  ;;  %v13469_v18 = vld [vmem:[#allocation2 + $0x78] sm:$0xff]  ;;  %v6556_v4 = vld [vmem:[#allocation11 + $0x1a28] sm:$0xff] }
 0x5c5   :  { %11296 = vmatpush1.bf16.msra.mxu0 %v11295_v26  ;;  %v6530_v26 = vld [vmem:[#allocation11 + $0x1958] sm:$0xff]  ;;  %v6331_v42 = vsel %vm3109_vm5, %v6314_v23, %v6330_v45  ;;  %v6535_v23 = vld [vmem:[#allocation11 + $0x1980] sm:$0xff]  ;;  %v11325_v53 = vpack.c.bf16 %v6556_v4, %v6552_v15 }
 0x5c6   :  { %11298 = vmatprep.subr.bf16.mxu0 %v11297_v61  ;;  %v11313_v61 = vpack.c.bf16 %v6532_v58, %v6528_v32  ;;  %v6320_v32 = vrot.slane %v13469_v18, 1  ;;  %v6545_v58 = vld [vmem:[#allocation11 + $0x19d0] sm:$0xff]  ;;  %v6586_v15 = vld [vmem:[#allocation11 + $0x1b18] sm:$0xff]  ;;  %v6663_v18 = vld [vmem:[#allocation11 + $0x1d80] sm:$0xff] }
 0x5c7   :  { %11464 = vmatpush1.bf16.msra.mxu1 %v11463_v7  ;;  %v6256_v7 = vld [vmem:[#allocation2 + $0xf0] sm:$0xfe]  ;;  %v6590_v4 = vld [vmem:[#allocation11 + $0x1b38] sm:$0xff] }
 0x5c8   :  { %11466 = vmatprep.subr.bf16.mxu1 %v11465_v48  ;;  %v6536_v48 = vld [vmem:[#allocation11 + $0x1988] sm:$0xff] }
 0x5c9   :  { %11300 = vmatpush1.bf16.msra.mxu0 %v11299_v0  ;;  %v11481_v0 = vpack.c.bf16 %v6534_v27, %v6530_v26  ;;  %v11317_v9 = vpack.c.bf16 %v6540_v19, %v6536_v48  ;;  %v6551_v26 = vld [vmem:[#allocation11 + $0x1a00] sm:$0xff]  ;;  %v6562_v48 = vld [vmem:[#allocation11 + $0x1a58] sm:$0xff] }
 0x5ca   :  { %11302 = vmatprep.subr.bf16.mxu0 %v11301_v14  ;;  %v6533_v14 = vld [vmem:[#allocation11 + $0x1970] sm:$0xff]  ;;  %v6555_v27 = vld [vmem:[#allocation11 + $0x1a20] sm:$0xff]  ;;  %v6566_v19 = vld [vmem:[#allocation11 + $0x1a78] sm:$0xff] }
 0x5cb   :  { %11468 = vmatpush1.bf16.msra.mxu1 %v11467_v38  ;;  %v6340_v38 = vrot.slane %v6256_v7, 1  ;;  %v11483_v2 = vpack.c.bf16 %v6533_v14, %v6529_v46  ;;  %v6553_v7 = vld [vmem:[#allocation11 + $0x1a10] sm:$0xff]  ;;  %v11327_v57 = vpack.c.bf16 %v6555_v27, %v6551_v26  ;;  %v6568_v14 = vld [vmem:[#allocation11 + $0x1a88] sm:$0xff]  ;;  %v6594_v26 = vld [vmem:[#allocation11 + $0x1b58] sm:$0xff] }
 0x5cc   :  { %11470 = vmatprep.subr.bf16.mxu1 %v11469_v33  ;;  %v6269_v33 = vld [vmem:[#allocation2 + $0x158] sm:$0x1]  ;;  %v6598_v27 = vld [vmem:[#allocation11 + $0x1b78] sm:$0xff] }
 0x5cd   :  { %11304 = vmatpush1.bf16.msra.mxu0 %v11303_v63  ;;  %v6268_v63 = vld [vmem:[#allocation2 + $0x150] sm:$0x1]  ;;  %v6360_v52 = vrot.slane %v6269_v33, 1  ;;  %v6342_v5 = vsel %vm3109_vm5, %v6340_v38, %v13454_v56  ;;  %v6561_v38 = vld [vmem:[#allocation11 + $0x1a50] sm:$0xff]  ;;  %v6570_v33 = vld [vmem:[#allocation11 + $0x1a98] sm:$0xff] }
 0x5ce   :  { %11306 = vmatprep.subr.bf16.mxu0 %v11305_v35  ;;  %v6548_v35 = vld [vmem:[#allocation11 + $0x19e8] sm:$0xff]  ;;  %v6358_v36 = vrot.slane %v6268_v63, 1  ;;  %v11499_v63 = vpack.c.bf16 %v6565_v47, %v6561_v38 }
 0x5cf   :  { %11472 = vmatpush1.bf16.msra.mxu1 %v11471_v10  ;;  %v6537_v10 = vld [vmem:[#allocation11 + $0x1990] sm:$0xff]  ;;  %v11321_v54 = vpack.c.bf16 %v6548_v35, %v6544_v62  ;;  %v6361_v22 = vsel %vm3109_vm5, %v6344_v21, %v6360_v52  ;;  %v6563_v21 = vld [vmem:[#allocation11 + $0x1a60] sm:$0xff]  ;;  %v6580_v62 = vld [vmem:[#allocation11 + $0x1ae8] sm:$0xff]  ;;  %v11501_v35 = vpack.c.bf16 %v6574_v51, %v6570_v33 }
 0x5d0   :  { %11474 = vmatprep.subr.bf16.mxu1 %v11473_v16  ;;  %v11319_v16 = vpack.c.bf16 %v6539_v39, %v6535_v23  ;;  %v11487_v1 = vpack.c.bf16 %v6541_v12, %v6537_v10  ;;  %v6359_v45 = vsel %vm3109_vm5, %v13454_v56, %v6358_v36  ;;  %v6567_v23 = vld [vmem:[#allocation11 + $0x1a80] sm:$0xff]  ;;  %v6578_v10 = vld [vmem:[#allocation11 + $0x1ad8] sm:$0xff]  ;;  %v6612_v38 = vld [vmem:[#allocation11 + $0x1be8] sm:$0xff] }
 0x5d1   :  { %11308 = vmatpush1.bf16.msra.mxu0 %v11307_v24  ;;  %v6550_v24 = vld [vmem:[#allocation11 + $0x19f8] sm:$0xff]  ;;  %v6571_v39 = vld [vmem:[#allocation11 + $0x1aa0] sm:$0xff]  ;;  %v6605_v33 = vld [vmem:[#allocation11 + $0x1bb0] sm:$0xff] }
 0x5d2   :  { %11310 = vmatprep.subr.bf16.mxu0 %v11309_v44  ;;  %v6241_v44 = vld [vmem:[#allocation2 + $0x48] sm:$0xfe]  ;;  %v11335_v52 = vpack.c.bf16 %v6571_v39, %v6567_v23  ;;  %v6582_v12 = vld [vmem:[#allocation11 + $0x1af8] sm:$0xff] }
 0x5d3   :  { %11476 = vmatpush1.bf16.msra.mxu1 %v11475_v28  ;;  %v11489_v28 = vpack.c.bf16 %v6550_v24, %v6546_v3  ;;  %v6579_v36 = vld [vmem:[#allocation11 + $0x1ae0] sm:$0xff]  ;;  %v6584_v24 = vld [vmem:[#allocation11 + $0x1b08] sm:$0xff]  ;;  %v11505_v8 = vpack.c.bf16 %v6582_v12, %v6578_v10  ;;  %v6614_v23 = vld [vmem:[#allocation11 + $0x1bf8] sm:$0xff] }
 0x5d4   :  { %6800 = vmatmul.mubr.f32.vlgmr.msra.gmra.mrb[24].mxu0 %v6312_v49  ;;  %11478 = vmatprep.subr.bf16.mxu1 %v11477_v55  ;;  %v6549_v55 = vld [vmem:[#allocation11 + $0x19f0] sm:$0xff] }
 0x5d5   :  { %6805 = vmatprep.mubr.f32.mxu0 %v6331_v42  ;;  %11312 = vmatpush1.bf16.msra.mxu0 %v11311_v25  ;;  %v6319_v25 = vrot.slane %v6241_v44, 1  ;;  %v11491_v37 = vpack.c.bf16 %v6549_v55, %v6545_v58  ;;  %v6587_v58 = vld [vmem:[#allocation11 + $0x1b20] sm:$0xff]  ;;  %v6613_v10 = vld [vmem:[#allocation11 + $0x1bf0] sm:$0xff] }
 0x5d6   :  { %7067 = vmatmul.mubr.f32.vlgmr.msra.gmra.mrb[16].mxu1 %v6312_v49  ;;  %11314 = vmatprep.subr.bf16.mxu0 %v11313_v61  ;;  %v6558_v49 = vld [vmem:[#allocation11 + $0x1a38] sm:$0xff]  ;;  %v6560_v61 = vld [vmem:[#allocation11 + $0x1a48] sm:$0xff] }
 0x5d7   :  { %7072 = vmatprep.mubr.f32.mxu1 %v6331_v42  ;;  %11480 = vmatpush1.bf16.msra.mxu1 %v11479_v43  ;;  %v6321_v56 = vsel %vm3109_vm5, %v6319_v25, %v6320_v32  ;;  %v11493_v6 = vpack.c.bf16 %v6558_v49, %v6554_v20  ;;  %v6557_v43 = vld [vmem:[#allocation11 + $0x1a30] sm:$0xff]  ;;  %v11329_v42 = vpack.c.bf16 %v6564_v41, %v6560_v61  ;;  %v6591_v61 = vld [vmem:[#allocation11 + $0x1b40] sm:$0xff] }
 0x5d8   :  { %6806 = vmatmul.mubr.f32.gmra.mrb[26].mxu0 %v6329_v34  ;;  %11482 = vmatprep.subr.bf16.mxu1 %v11481_v0  ;;  %v6559_v0 = vld [vmem:[#allocation11 + $0x1a40] sm:$0xff]  ;;  %v11495_v46 = vpack.c.bf16 %v6557_v43, %v6553_v7  ;;  %v11509_v20 = vpack.c.bf16 %v6590_v4, %v6586_v15  ;;  %v6585_v49 = vld [vmem:[#allocation11 + $0x1b10] sm:$0xff]  ;;  %v6604_v7 = vld [vmem:[#allocation11 + $0x1ba8] sm:$0xff]  ;;  %v11513_v43 = vpack.c.bf16 %v6598_v27, %v6594_v26 }
 0x5d9   :  { %6811 = vmatprep.mubr.f32.mxu0 %v6345_v31  ;;  %11316 = vmatpush1.bf16.msra.mxu0 %v11315_v17  ;;  %v11497_v17 = vpack.c.bf16 %v6566_v19, %v6562_v48  ;;  %v11331_v11 = vpack.c.bf16 %v6563_v21, %v6559_v0  ;;  %v6589_v25 = vld [vmem:[#allocation11 + $0x1b30] sm:$0xff]  ;;  %v6595_v41 = vld [vmem:[#allocation11 + $0x1b60] sm:$0xff]  ;;  %v6606_v0 = vld [vmem:[#allocation11 + $0x1bb8] sm:$0xff] }
 0x5da   :  { %7073 = vmatmul.mubr.f32.gmra.mrb[18].mxu1 %v6329_v34  ;;  %11318 = vmatprep.subr.bf16.mxu0 %v11317_v9  ;;  %v6572_v34 = vld [vmem:[#allocation11 + $0x1aa8] sm:$0xff]  ;;  %v6597_v48 = vld [vmem:[#allocation11 + $0x1b70] sm:$0xff]  ;;  %v11347_v19 = vpack.c.bf16 %v6595_v41, %v6591_v61  ;;  %v6638_v61 = vld [vmem:[#allocation11 + $0x1cb8] sm:$0xff] }
 0x5db   :  { %7078 = vmatprep.mubr.f32.mxu1 %v6345_v31  ;;  %11484 = vmatpush1.bf16.msra.mxu1 %v11483_v2  ;;  %v11333_v9 = vpack.c.bf16 %v6572_v34, %v6568_v14  ;;  %v6576_v2 = vld [vmem:[#allocation11 + $0x1ac8] sm:$0xff]  ;;  %v6569_v31 = vld [vmem:[#allocation11 + $0x1a90] sm:$0xff]  ;;  %v6603_v14 = vld [vmem:[#allocation11 + $0x1ba0] sm:$0xff] }
 0x5dc   :  { %6812 = vmatmul.mubr.f32.gmra.mrb[28].mxu0 %v6342_v5  ;;  %11486 = vmatprep.subr.bf16.mxu1 %v11485_v50  ;;  %v6573_v50 = vld [vmem:[#allocation11 + $0x1ab0] sm:$0xff] }
 0x5dd   :  { %6817 = vmatprep.mubr.f32.mxu0 %v6361_v22  ;;  %11320 = vmatpush1.bf16.msra.mxu0 %v11319_v16  ;;  %v6575_v16 = vld [vmem:[#allocation11 + $0x1ac0] sm:$0xff]  ;;  %v11503_v3 = vpack.c.bf16 %v6573_v50, %v6569_v31  ;;  %v6620_v31 = vld [vmem:[#allocation11 + $0x1c28] sm:$0xff]  ;;  %v6621_v15 = vld [vmem:[#allocation11 + $0x1c30] sm:$0xff] }
 0x5de   :  { %7079 = vmatmul.mubr.f32.gmra.mrb[20].mxu1 %v6342_v5  ;;  %11322 = vmatprep.subr.bf16.mxu0 %v11321_v54  ;;  %v11337_v5 = vpack.c.bf16 %v6580_v62, %v6576_v2  ;;  %v6588_v54 = vld [vmem:[#allocation11 + $0x1b28] sm:$0xff]  ;;  %v11339_v44 = vpack.c.bf16 %v6579_v36, %v6575_v16  ;;  %v6611_v2 = vld [vmem:[#allocation11 + $0x1be0] sm:$0xff]  ;;  %v6622_v16 = vld [vmem:[#allocation11 + $0x1c38] sm:$0xff] }
 0x5df   :  { %7084 = vmatprep.mubr.f32.mxu1 %v6361_v22  ;;  %11488 = vmatpush1.bf16.msra.mxu1 %v11487_v1  ;;  %v6581_v1 = vld [vmem:[#allocation11 + $0x1af0] sm:$0xff]  ;;  %v11341_v22 = vpack.c.bf16 %v6588_v54, %v6584_v24  ;;  %v6619_v24 = vld [vmem:[#allocation11 + $0x1c20] sm:$0xff] }
 0x5e0   :  { %6818 = vmatmul.mubr.f32.gmra.mrb[30].mxu0 %v6359_v45  ;;  %11490 = vmatprep.subr.bf16.mxu1 %v11489_v28  ;;  %v6583_v28 = vld [vmem:[#allocation11 + $0x1b00] sm:$0xff]  ;;  %v11507_v55 = vpack.c.bf16 %v6581_v1, %v6577_v60  ;;  %v6628_v60 = vld [vmem:[#allocation11 + $0x1c68] sm:$0xff]  ;;  %v6629_v26 = vld [vmem:[#allocation11 + $0x1c70] sm:$0xff] }
 0x5e1   :  { %11324 = vmatpush1.bf16.msra.mxu0 %v11323_v59  ;;  %6888 = vmatprep.mubr.f32.mxu0 %v6321_v56  ;;  %v6596_v59 = vld [vmem:[#allocation11 + $0x1b68] sm:$0xff] }
 0x5e2   :  { %7085 = vmatmul.mubr.f32.gmra.mrb[22].mxu1 %v6359_v45  ;;  %11326 = vmatprep.subr.bf16.mxu0 %v11325_v53  ;;  %v6592_v45 = vld [vmem:[#allocation11 + $0x1b48] sm:$0xff]  ;;  %v11343_v53 = vpack.c.bf16 %v6587_v58, %v6583_v28  ;;  %v6630_v28 = vld [vmem:[#allocation11 + $0x1c78] sm:$0xff] }
 0x5e3   :  { %11492 = vmatpush1.bf16.msra.mxu1 %v11491_v37  ;;  %7155 = vmatprep.mubr.f32.mxu1 %v6321_v56  ;;  %v11345_v37 = vpack.c.bf16 %v6596_v59, %v6592_v45  ;;  %v11511_v56 = vpack.c.bf16 %v6589_v25, %v6585_v49  ;;  %v6627_v45 = vld [vmem:[#allocation11 + $0x1c60] sm:$0xff]  ;;  %v6636_v49 = vld [vmem:[#allocation11 + $0x1ca8] sm:$0xff] }
 0x5e4   :  { %11494 = vmatprep.subr.bf16.mxu1 %v11493_v6  ;;  %v6600_v6 = vld [vmem:[#allocation11 + $0x1b88] sm:$0xff] }
 0x5e5   :  { %11328 = vmatpush1.bf16.msra.mxu0 %v11327_v57  ;;  %v6593_v57 = vld [vmem:[#allocation11 + $0x1b50] sm:$0xff]  ;;  %v11349_v21 = vpack.c.bf16 %v6604_v7, %v6600_v6  ;;  %v6635_v6 = vld [vmem:[#allocation11 + $0x1ca0] sm:$0xff] }
 0x5e6   :  { %11330 = vmatprep.subr.bf16.mxu0 %v11329_v42  ;;  %v6602_v42 = vld [vmem:[#allocation11 + $0x1b98] sm:$0xff]  ;;  %v11515_v34 = vpack.c.bf16 %v6597_v48, %v6593_v57  ;;  %v6644_v57 = vld [vmem:[#allocation11 + $0x1ce8] sm:$0xff] }
 0x5e7   :  { %11496 = vmatpush1.bf16.msra.mxu1 %v11495_v46  ;;  %v6599_v46 = vld [vmem:[#allocation11 + $0x1b80] sm:$0xff]  ;;  %v11517_v47 = vpack.c.bf16 %v6606_v0, %v6602_v42  ;;  %v6637_v42 = vld [vmem:[#allocation11 + $0x1cb0] sm:$0xff] }
 0x5e8   :  { %11498 = vmatprep.subr.bf16.mxu1 %v11497_v17  ;;  %v6608_v17 = vld [vmem:[#allocation11 + $0x1bc8] sm:$0xff]  ;;  %v11351_v51 = vpack.c.bf16 %v6603_v14, %v6599_v46  ;;  %v6646_v46 = vld [vmem:[#allocation11 + $0x1cf8] sm:$0xff] }
 0x5e9   :  { %11332 = vmatpush1.bf16.msra.mxu0 %v11331_v11  ;;  %v6601_v11 = vld [vmem:[#allocation11 + $0x1b90] sm:$0xff]  ;;  %v11353_v39 = vpack.c.bf16 %v6612_v38, %v6608_v17  ;;  %v6643_v17 = vld [vmem:[#allocation11 + $0x1ce0] sm:$0xff] }
 0x5ea   :  { %11334 = vmatprep.subr.bf16.mxu0 %v11333_v9  ;;  %v6610_v9 = vld [vmem:[#allocation11 + $0x1bd8] sm:$0xff]  ;;  %v11519_v62 = vpack.c.bf16 %v6605_v33, %v6601_v11  ;;  %v6652_v11 = vld [vmem:[#allocation11 + $0x1d28] sm:$0xff] }
 0x5eb   :  { %11500 = vmatpush1.bf16.msra.mxu1 %v11499_v63  ;;  %v6607_v63 = vld [vmem:[#allocation11 + $0x1bc0] sm:$0xff]  ;;  %v11521_v50 = vpack.c.bf16 %v6614_v23, %v6610_v9  ;;  %v6645_v9 = vld [vmem:[#allocation11 + $0x1cf0] sm:$0xff]  ;;  %v13478_v23 = vld [vmem:[#allocation2 + $0x70] sm:$0xff] }
 0x5ec   :  { %11502 = vmatprep.subr.bf16.mxu1 %v11501_v35  ;;  %v6616_v35 = vld [vmem:[#allocation11 + $0x1c08] sm:$0xff]  ;;  %v11355_v12 = vpack.c.bf16 %v6611_v2, %v6607_v63  ;;  %v6650_v63 = vld [vmem:[#allocation11 + $0x1d18] sm:$0xff] }
 0x5ed   :  { %11336 = vmatpush1.bf16.msra.mxu0 %v11335_v52  ;;  %v6609_v52 = vld [vmem:[#allocation11 + $0x1bd0] sm:$0xff]  ;;  %v11357_v36 = vpack.c.bf16 %v6620_v31, %v6616_v35  ;;  %v6654_v2 = vld [vmem:[#allocation11 + $0x1d38] sm:$0xff] }
 0x5ee   :  { %11338 = vmatprep.subr.bf16.mxu0 %v11337_v5  ;;  %v6618_v5 = vld [vmem:[#allocation11 + $0x1c18] sm:$0xff]  ;;  %v11523_v54 = vpack.c.bf16 %v6613_v10, %v6609_v52  ;;  %v6651_v52 = vld [vmem:[#allocation11 + $0x1d20] sm:$0xff] }
 0x5ef   :  { %11504 = vmatpush1.bf16.msra.mxu1 %v11503_v3  ;;  %v6615_v3 = vld [vmem:[#allocation11 + $0x1c00] sm:$0xff]  ;;  %v11525_v1 = vpack.c.bf16 %v6622_v16, %v6618_v5  ;;  %v6240_v35 = vld [vmem:[#allocation2 + $0x40] sm:$0xfe]  ;;  %v6656_v5 = vld [vmem:[#allocation11 + $0x1d48] sm:$0xff] }
 0x5f0   :  { %11506 = vmatprep.subr.bf16.mxu1 %v11505_v8  ;;  %v6624_v8 = vld [vmem:[#allocation11 + $0x1c48] sm:$0xff]  ;;  %v11359_v4 = vpack.c.bf16 %v6619_v24, %v6615_v3  ;;  %v6649_v24 = vld [vmem:[#allocation11 + $0x1d10] sm:$0xff] }
 0x5f1   :  { %11340 = vmatpush1.bf16.msra.mxu0 %v11339_v44  ;;  %v6617_v44 = vld [vmem:[#allocation11 + $0x1c10] sm:$0xff]  ;;  %v11361_v58 = vpack.c.bf16 %v6628_v60, %v6624_v8  ;;  %v6660_v16 = vld [vmem:[#allocation11 + $0x1d68] sm:$0xff]  ;;  %v6252_v8 = vld [vmem:[#allocation2 + $0xa0] sm:$0x1]  ;;  %v6316_v60 = vrot.slane %v6240_v35, 1 }
 0x5f2   :  { %11342 = vmatprep.subr.bf16.mxu0 %v11341_v22  ;;  %v6626_v22 = vld [vmem:[#allocation11 + $0x1c58] sm:$0xff]  ;;  %v11527_v59 = vpack.c.bf16 %v6621_v15, %v6617_v44  ;;  %v6671_v35 = vld [vmem:[#allocation11 + $0x1dc0] sm:$0xff] }
 0x5f3   :  { %11508 = vmatpush1.bf16.msra.mxu1 %v11507_v55  ;;  %v6623_v55 = vld [vmem:[#allocation11 + $0x1c40] sm:$0xff]  ;;  %v11529_v25 = vpack.c.bf16 %v6630_v28, %v6626_v22  ;;  %v6658_v44 = vld [vmem:[#allocation11 + $0x1d58] sm:$0xff]  ;;  %v11377_v22 = vpack.c.bf16 %v6660_v16, %v6656_v5  ;;  %v6680_v16 = vld [vmem:[#allocation11 + $0x1e08] sm:$0xff] }
 0x5f4   :  { %11510 = vmatprep.subr.bf16.mxu1 %v11509_v20  ;;  %v6632_v20 = vld [vmem:[#allocation11 + $0x1c88] sm:$0xff]  ;;  %v11363_v27 = vpack.c.bf16 %v6627_v45, %v6623_v55  ;;  %v6662_v15 = vld [vmem:[#allocation11 + $0x1d78] sm:$0xff]  ;;  %v6655_v28 = vld [vmem:[#allocation11 + $0x1d40] sm:$0xff] }
 0x5f5   :  { %11344 = vmatpush1.bf16.msra.mxu0 %v11343_v53  ;;  %v6625_v53 = vld [vmem:[#allocation11 + $0x1c50] sm:$0xff]  ;;  %v11365_v41 = vpack.c.bf16 %v6636_v49, %v6632_v20  ;;  %v6259_v20 = vld [vmem:[#allocation2 + $0x108] sm:$0xfe]  ;;  %v6664_v49 = vld [vmem:[#allocation11 + $0x1d88] sm:$0xff] }
 0x5f6   :  { %11346 = vmatprep.subr.bf16.mxu0 %v11345_v37  ;;  %v6634_v37 = vld [vmem:[#allocation11 + $0x1c98] sm:$0xff]  ;;  %v11531_v7 = vpack.c.bf16 %v6629_v26, %v6625_v53  ;;  %v6271_v53 = vld [vmem:[#allocation2 + $0x168] sm:$0x1] }
 0x5f7   :  { %11512 = vmatpush1.bf16.msra.mxu1 %v11511_v56  ;;  %v6631_v56 = vld [vmem:[#allocation11 + $0x1c80] sm:$0xff]  ;;  %v11533_v48 = vpack.c.bf16 %v6638_v61, %v6634_v37  ;;  %v6657_v61 = vld [vmem:[#allocation11 + $0x1d50] sm:$0xff] }
 0x5f8   :  { %11514 = vmatprep.subr.bf16.mxu1 %v11513_v43  ;;  %v6640_v43 = vld [vmem:[#allocation11 + $0x1cc8] sm:$0xff]  ;;  %v11367_v0 = vpack.c.bf16 %v6635_v6, %v6631_v56 }
 0x5f9   :  { %11348 = vmatpush1.bf16.msra.mxu0 %v11347_v19  ;;  %v6633_v19 = vld [vmem:[#allocation11 + $0x1c90] sm:$0xff]  ;;  %v11369_v14 = vpack.c.bf16 %v6644_v57, %v6640_v43  ;;  %v13488_v56 = vld [vmem:[#allocation2 + $0x130] sm:$0xff]  ;;  %v6666_v43 = vld [vmem:[#allocation11 + $0x1d98] sm:$0xff] }
 0x5fa   :  { %11350 = vmatprep.subr.bf16.mxu0 %v11349_v21  ;;  %v6642_v21 = vld [vmem:[#allocation11 + $0x1cd8] sm:$0xff]  ;;  %v11535_v38 = vpack.c.bf16 %v6637_v42, %v6633_v19  ;;  %v6667_v42 = vld [vmem:[#allocation11 + $0x1da0] sm:$0xff] }
 0x5fb   :  { %11516 = vmatpush1.bf16.msra.mxu1 %v11515_v34  ;;  %v6639_v34 = vld [vmem:[#allocation11 + $0x1cc0] sm:$0xff]  ;;  %v11537_v33 = vpack.c.bf16 %v6646_v46, %v6642_v21  ;;  %v6670_v57 = vld [vmem:[#allocation11 + $0x1db8] sm:$0xff]  ;;  %v6347_v46 = vrot.slane %v13488_v56, 1 }
 0x5fc   :  { %11518 = vmatprep.subr.bf16.mxu1 %v11517_v47  ;;  %v6648_v47 = vld [vmem:[#allocation11 + $0x1d08] sm:$0xff] }
 0x5fd   :  { %11352 = vmatpush1.bf16.msra.mxu0 %v11351_v51  ;;  %v6641_v51 = vld [vmem:[#allocation11 + $0x1cd0] sm:$0xff]  ;;  %v11373_v31 = vpack.c.bf16 %v6652_v11, %v6648_v47  ;;  %v11549_v47 = vpack.c.bf16 %v6670_v57, %v6666_v43  ;;  %v6364_v11 = vrot.slane %v6271_v53, 1 }
 0x5fe   :  { %11354 = vmatprep.subr.bf16.mxu0 %v11353_v39  ;;  %v11371_v39 = vpack.c.bf16 %v6643_v17, %v6639_v34  ;;  %v11539_v10 = vpack.c.bf16 %v6645_v9, %v6641_v51  ;;  %v6243_v34 = vld [vmem:[#allocation2 + $0x58] sm:$0xfe]  ;;  %v13492_v17 = vld [vmem:[#allocation2 + $0x88] sm:$0xff]  ;;  %v6270_v9 = vld [vmem:[#allocation2 + $0x160] sm:$0x1] }
 0x5ff   :  { %11520 = vmatpush1.bf16.msra.mxu1 %v11519_v62  ;;  %v6253_v62 = vld [vmem:[#allocation2 + $0xa8] sm:$0x1]  ;;  %v6669_v51 = vld [vmem:[#allocation11 + $0x1db0] sm:$0xff]  ;;  %v6362_v5 = vrot.slane %v6270_v9, 1  ;;  %v6710_v9 = vld [vmem:[#allocation11 + $0x1ef8] sm:$0xff] }
 0x600   :  { %11522 = vmatprep.subr.bf16.mxu1 %v11521_v50  ;;  %v6647_v50 = vld [vmem:[#allocation11 + $0x1d00] sm:$0xff]  ;;  %v6334_v3 = vrot.slane %v6253_v62, 1  ;;  %v6689_v57 = vld [vmem:[#allocation11 + $0x1e50] sm:$0xff] }
 0x601   :  { %11356 = vmatpush1.bf16.msra.mxu0 %v11355_v12  ;;  %v6317_v12 = vrot.slane %v13478_v23, 1 }
 0x602   :  { %11358 = vmatprep.subr.bf16.mxu0 %v11357_v36  ;;  %v11541_v36 = vpack.c.bf16 %v6654_v2, %v6650_v63  ;;  %v6335_v26 = vsel %vm3109_vm5, %v6320_v32, %v6334_v3  ;;  %v6672_v32 = vld [vmem:[#allocation11 + $0x1dc8] sm:$0xff]  ;;  %v6674_v63 = vld [vmem:[#allocation11 + $0x1dd8] sm:$0xff] }
 0x603   :  { %11524 = vmatpush1.bf16.msra.mxu1 %v11523_v54  ;;  %v6653_v54 = vld [vmem:[#allocation11 + $0x1d30] sm:$0xff]  ;;  %v6318_v55 = vsel %vm3109_vm5, %v6316_v60, %v6317_v12  ;;  %v6678_v2 = vld [vmem:[#allocation11 + $0x1df8] sm:$0xff] }
 0x604   :  { %11526 = vmatprep.subr.bf16.mxu1 %v11525_v1  ;;  %v11375_v1 = vpack.c.bf16 %v6651_v52, %v6647_v50  ;;  %v11543_v45 = vpack.c.bf16 %v6653_v54, %v6649_v24  ;;  %v6325_v50 = vrot.slane %v6243_v34, 1  ;;  %v6326_v52 = vrot.slane %v13492_v17, 1  ;;  %v6673_v54 = vld [vmem:[#allocation11 + $0x1dd0] sm:$0xff]  ;;  %v6708_v34 = vld [vmem:[#allocation11 + $0x1ee8] sm:$0xff] }
 0x605   :  { %11360 = vmatpush1.bf16.msra.mxu0 %v11359_v4  ;;  %v13481_v4 = vld [vmem:[#allocation2 + $0x138] sm:$0xff]  ;;  %v11553_v24 = vpack.c.bf16 %v6678_v2, %v6674_v63  ;;  %v6707_v63 = vld [vmem:[#allocation11 + $0x1ee0] sm:$0xff] }
 0x606   :  { %11362 = vmatprep.subr.bf16.mxu0 %v11361_v58  ;;  %v6659_v58 = vld [vmem:[#allocation11 + $0x1d60] sm:$0xff]  ;;  %v6350_v37 = vrot.slane %v13481_v4, 1 }
 0x607   :  { %11528 = vmatpush1.bf16.msra.mxu1 %v11527_v59  ;;  %v6332_v59 = vrot.slane %v6252_v8, 1  ;;  %v11379_v6 = vpack.c.bf16 %v6659_v58, %v6655_v28  ;;  %v6677_v8 = vld [vmem:[#allocation11 + $0x1df0] sm:$0xff]  ;;  %v6679_v4 = vld [vmem:[#allocation11 + $0x1e00] sm:$0xff]  ;;  %v6327_v28 = vsel %vm3109_vm5, %v6325_v50, %v6326_v52  ;;  %v6363_v58 = vsel %vm3109_vm5, %v6347_v46, %v6362_v5  ;;  %v6714_v5 = vld [vmem:[#allocation11 + $0x1f18] sm:$0xff] }
 0x608   :  { %11530 = vmatprep.subr.bf16.mxu1 %v11529_v25  ;;  %v6668_v25 = vld [vmem:[#allocation11 + $0x1da8] sm:$0xff]  ;;  %v6365_v3 = vsel %vm3109_vm5, %v6350_v37, %v6364_v11  ;;  %v6701_v11 = vld [vmem:[#allocation11 + $0x1eb0] sm:$0xff] }
 0x609   :  { %11364 = vmatpush1.bf16.msra.mxu0 %v11363_v27  ;;  %v11545_v27 = vpack.c.bf16 %v6662_v15, %v6658_v44  ;;  %v11381_v19 = vpack.c.bf16 %v6668_v25, %v6664_v49  ;;  %v6686_v44 = vld [vmem:[#allocation11 + $0x1e38] sm:$0xff]  ;;  %v6681_v49 = vld [vmem:[#allocation11 + $0x1e10] sm:$0xff] }
 0x60a   :  { %11366 = vmatprep.subr.bf16.mxu0 %v11365_v41  ;;  %v6661_v41 = vld [vmem:[#allocation11 + $0x1d70] sm:$0xff] }
 0x60b   :  { %11532 = vmatpush1.bf16.msra.mxu1 %v11531_v7  ;;  %v6258_v7 = vld [vmem:[#allocation2 + $0x100] sm:$0xfe]  ;;  %v11547_v21 = vpack.c.bf16 %v6661_v41, %v6657_v61  ;;  %v6685_v25 = vld [vmem:[#allocation11 + $0x1e30] sm:$0xff]  ;;  %v6687_v61 = vld [vmem:[#allocation11 + $0x1e40] sm:$0xff] }
 0x60c   :  { %11534 = vmatprep.subr.bf16.mxu1 %v11533_v48  ;;  %v6349_v48 = vrot.slane %v6259_v20, 1  ;;  %v6346_v23 = vrot.slane %v6258_v7, 1  ;;  %v6691_v41 = vld [vmem:[#allocation11 + $0x1e60] sm:$0xff]  ;;  %v11559_v56 = vpack.c.bf16 %v6685_v25, %v6681_v49  ;;  %v6700_v7 = vld [vmem:[#allocation11 + $0x1ea8] sm:$0xff]  ;;  %v6705_v50 = vld [vmem:[#allocation11 + $0x1ed0] sm:$0xff] }
 0x60d   :  { %11368 = vmatpush1.bf16.msra.mxu0 %v11367_v0  ;;  %v6333_v0 = vsel %vm3109_vm5, %v6317_v12, %v6332_v59  ;;  %v6692_v59 = vld [vmem:[#allocation11 + $0x1e68] sm:$0xff]  ;;  %v6721_v25 = vld [vmem:[#allocation11 + $0x1f50] sm:$0xff] }
 0x60e   :  { %11370 = vmatprep.subr.bf16.mxu0 %v11369_v14  ;;  %v6676_v14 = vld [vmem:[#allocation11 + $0x1de8] sm:$0xff] }
 0x60f   :  { %11536 = vmatpush1.bf16.msra.mxu1 %v11535_v38  ;;  %v6351_v38 = vsel %vm3109_vm5, %v6349_v48, %v6350_v37  ;;  %v11385_v62 = vpack.c.bf16 %v6676_v14, %v6672_v32  ;;  %v6693_v48 = vld [vmem:[#allocation11 + $0x1e70] sm:$0xff]  ;;  %v6704_v14 = vld [vmem:[#allocation11 + $0x1ec8] sm:$0xff] }
 0x610   :  { %11538 = vmatprep.subr.bf16.mxu1 %v11537_v33  ;;  %v6665_v33 = vld [vmem:[#allocation11 + $0x1d90] sm:$0xff] }
 0x611   :  { %11372 = vmatpush1.bf16.msra.mxu0 %v11371_v39  ;;  %v11383_v39 = vpack.c.bf16 %v6667_v42, %v6663_v18  ;;  %v11551_v12 = vpack.c.bf16 %v6669_v51, %v6665_v33  ;;  %v6698_v18 = vld [vmem:[#allocation11 + $0x1e98] sm:$0xff] }
 0x612   :  { %11374 = vmatprep.subr.bf16.mxu0 %v11373_v31  ;;  %v6675_v31 = vld [vmem:[#allocation11 + $0x1de0] sm:$0xff]  ;;  %v6702_v42 = vld [vmem:[#allocation11 + $0x1eb8] sm:$0xff] }
 0x613   :  { %11540 = vmatpush1.bf16.msra.mxu1 %v11539_v10  ;;  %v6348_v10 = vsel %vm3109_vm5, %v6346_v23, %v6347_v46  ;;  %v11387_v60 = vpack.c.bf16 %v6675_v31, %v6671_v35  ;;  %v11563_v46 = vpack.c.bf16 %v6693_v48, %v6689_v57  ;;  %v6706_v51 = vld [vmem:[#allocation11 + $0x1ed8] sm:$0xff]  ;;  %v11401_v23 = vpack.c.bf16 %v6708_v34, %v6704_v14  ;;  %v6716_v35 = vld [vmem:[#allocation11 + $0x1f28] sm:$0xff] }
 0x614   :  { %6889 = vmatmul.mubr.f32.vlgmr.msra.gmra.mrb[24].mxu0 %v6318_v55  ;;  %11542 = vmatprep.subr.bf16.mxu1 %v11541_v36  ;;  %v6684_v36 = vld [vmem:[#allocation11 + $0x1e28] sm:$0xff]  ;;  %v11569_v31 = vpack.c.bf16 %v6710_v9, %v6706_v51 }
 0x615   :  { %6894 = vmatprep.mubr.f32.mxu0 %v6335_v26  ;;  %11376 = vmatpush1.bf16.msra.mxu0 %v11375_v1  ;;  %v6682_v1 = vld [vmem:[#allocation11 + $0x1e18] sm:$0xff]  ;;  %v11389_v15 = vpack.c.bf16 %v6684_v36, %v6680_v16  ;;  %v6260_v14 = vld [vmem:[#allocation2 + $0x110] sm:$0xfe] }
 0x616   :  { %7156 = vmatmul.mubr.f32.vlgmr.msra.gmra.mrb[16].mxu1 %v6318_v55  ;;  %11378 = vmatprep.subr.bf16.mxu0 %v11377_v22  ;;  %v6683_v22 = vld [vmem:[#allocation11 + $0x1e20] sm:$0xff]  ;;  %v11555_v55 = vpack.c.bf16 %v6677_v8, %v6673_v54  ;;  %v11557_v20 = vpack.c.bf16 %v6686_v44, %v6682_v1  ;;  %v6718_v16 = vld [vmem:[#allocation11 + $0x1f38] sm:$0xff]  ;;  %v6720_v8 = vld [vmem:[#allocation11 + $0x1f48] sm:$0xff] }
 0x617   :  { %7161 = vmatprep.mubr.f32.mxu1 %v6335_v26  ;;  %11544 = vmatpush1.bf16.msra.mxu1 %v11543_v45  ;;  %v6688_v45 = vld [vmem:[#allocation11 + $0x1e48] sm:$0xff]  ;;  %v11391_v53 = vpack.c.bf16 %v6683_v22, %v6679_v4  ;;  %v6690_v26 = vld [vmem:[#allocation11 + $0x1e58] sm:$0xff]  ;;  %v11573_v1 = vpack.c.bf16 %v6718_v16, %v6714_v5  ;;  %v6713_v44 = vld [vmem:[#allocation11 + $0x1f10] sm:$0xff] }
 0x618   :  { %6895 = vmatmul.mubr.f32.gmra.mrb[26].mxu0 %v6333_v0  ;;  %11546 = vmatprep.subr.bf16.mxu1 %v11545_v27  ;;  %v6694_v27 = vld [vmem:[#allocation11 + $0x1e78] sm:$0xff]  ;;  %v11393_v37 = vpack.c.bf16 %v6692_v59, %v6688_v45  ;;  %v6723_v45 = vld [vmem:[#allocation11 + $0x1f60] sm:$0xff] }
 0x619   :  { %6900 = vmatprep.mubr.f32.mxu0 %v6351_v38  ;;  %11380 = vmatpush1.bf16.msra.mxu0 %v11379_v6  ;;  %v6696_v6 = vld [vmem:[#allocation11 + $0x1e88] sm:$0xff]  ;;  %v11561_v43 = vpack.c.bf16 %v6694_v27, %v6690_v26  ;;  %v6722_v22 = vld [vmem:[#allocation11 + $0x1f58] sm:$0xff]  ;;  %v9033_v5 = vld [vmem:[%s14693_s7 + $0x3a8] sm:$0xff] }
 0x61a   :  { %7162 = vmatmul.mubr.f32.gmra.mrb[18].mxu1 %v6333_v0  ;;  %11382 = vmatprep.subr.bf16.mxu0 %v11381_v19  ;;  %v11395_v19 = vpack.c.bf16 %v6691_v41, %v6687_v61  ;;  %v11397_v32 = vpack.c.bf16 %v6700_v7, %v6696_v6  ;;  %v6695_v0 = vld [vmem:[#allocation11 + $0x1e80] sm:$0xff]  ;;  %v13504_v26 = vld [vmem:[#allocation2 + $0x80] sm:$0xff]  ;;  %v6261_v6 = vld [vmem:[#allocation2 + $0x118] sm:$0xfe] }
 0x61b   :  { %7167 = vmatprep.mubr.f32.mxu1 %v6351_v38  ;;  %11548 = vmatpush1.bf16.msra.mxu1 %v11547_v21  ;;  %v6699_v21 = vld [vmem:[#allocation11 + $0x1ea0] sm:$0xff]  ;;  %v11565_v38 = vpack.c.bf16 %v6702_v42, %v6698_v18 }
 0x61c   :  { %6901 = vmatmul.mubr.f32.gmra.mrb[28].mxu0 %v6348_v10  ;;  %11550 = vmatprep.subr.bf16.mxu1 %v11549_v47  ;;  %v6697_v47 = vld [vmem:[#allocation11 + $0x1e90] sm:$0xff]  ;;  %v11399_v33 = vpack.c.bf16 %v6699_v21, %v6695_v0  ;;  %v6267_v7 = vld [vmem:[#allocation2 + $0x148] sm:$0xff]  ;;  %v6266_v21 = vld [vmem:[#allocation2 + $0x140] sm:$0xff] }
 0x61d   :  { %6906 = vmatprep.mubr.f32.mxu0 %v6365_v3  ;;  %11384 = vmatpush1.bf16.msra.mxu0 %v11383_v39  ;;  %v6703_v39 = vld [vmem:[#allocation11 + $0x1ec0] sm:$0xff]  ;;  %v11567_v2 = vpack.c.bf16 %v6701_v11, %v6697_v47  ;;  %v6356_v18 = vrot.slane %v6267_v7, 1  ;;  %v6273_v0 = vld [vmem:[#allocation2 + $0x178] sm:$0x1]  ;;  %v6352_v47 = vrot.slane %v6260_v14, 1  ;;  %v9054_v7 = vld [vmem:[%s14693_s7 + $0x450] sm:$0xff] }
 0x61e   :  { %7168 = vmatmul.mubr.f32.gmra.mrb[20].mxu1 %v6348_v10  ;;  %11386 = vmatprep.subr.bf16.mxu0 %v11385_v62  ;;  %v6712_v62 = vld [vmem:[#allocation11 + $0x1f08] sm:$0xff]  ;;  %v6709_v10 = vld [vmem:[#allocation11 + $0x1ef0] sm:$0xff]  ;;  %v6368_v34 = vrot.slane %v6273_v0, 1  ;;  %v9025_v14 = vld [vmem:[%s14693_s7 + $0x368] sm:$0xff] }
 0x61f   :  { %7173 = vmatprep.mubr.f32.mxu1 %v6365_v3  ;;  %11552 = vmatpush1.bf16.msra.mxu1 %v11551_v12  ;;  %v11403_v12 = vpack.c.bf16 %v6707_v63, %v6703_v39  ;;  %v11405_v36 = vpack.c.bf16 %v6716_v35, %v6712_v62  ;;  %v6711_v3 = vld [vmem:[#allocation11 + $0x1f00] sm:$0xff]  ;;  %v11571_v54 = vpack.c.bf16 %v6709_v10, %v6705_v50  ;;  %v9048_v63 = vld [vmem:[%s14693_s7 + $0x420] sm:$0xff]  ;;  %v9039_v0 = vld [vmem:[%s14693_s7 + $0x3d8] sm:$0xff] }
 0x620   :  { %6907 = vmatmul.mubr.f32.gmra.mrb[30].mxu0 %v6363_v58  ;;  %11554 = vmatprep.subr.bf16.mxu1 %v11553_v24  ;;  %v6715_v24 = vld [vmem:[#allocation11 + $0x1f20] sm:$0xff]  ;;  %v6369_v11 = vsel %vm3109_vm5, %v6356_v18, %v6368_v34  ;;  %v9000_v35 = vld [vmem:[%s14693_s7 + $0x2a0] sm:$0xff] }
 0x621   :  { %11388 = vmatpush1.bf16.msra.mxu0 %v11387_v60  ;;  %8992 = vmatprep.mubr.msk.f32.mxu0 %vm140_vm3, %v6327_v28  ;;  %v6724_v60 = vld [vmem:[#allocation11 + $0x1f68] sm:$0xff]  ;;  %v11407_v4 = vpack.c.bf16 %v6715_v24, %v6711_v3  ;;  %v9017_v39 = vld [vmem:[%s14693_s7 + $0x328] sm:$0xff]  ;;  %v9019_v3 = vld [vmem:[%s14693_s7 + $0x338] sm:$0xff] }
 0x622   :  { %7174 = vmatmul.mubr.f32.gmra.mrb[22].mxu1 %v6363_v58  ;;  %11390 = vmatprep.subr.bf16.mxu0 %v11389_v15  ;;  %v6717_v15 = vld [vmem:[#allocation11 + $0x1f30] sm:$0xff]  ;;  %v11409_v58 = vpack.c.bf16 %v6724_v60, %v6720_v8  ;;  %v9049_v62 = vld [vmem:[%s14693_s7 + $0x428] sm:$0xff]  ;;  %v9050_v24 = vld [vmem:[%s14693_s7 + $0x430] sm:$0xff] }
 0x623   :  { %11556 = vmatpush1.bf16.msra.mxu1 %v11555_v55  ;;  %8996 = vmatprep.mubr.msk.f32.mxu1 %vm140_vm3, %v6327_v28  ;;  %v6726_v28 = vld [vmem:[#allocation11 + $0x1f78] sm:$0xff]  ;;  %v6719_v55 = vld [vmem:[#allocation11 + $0x1f40] sm:$0xff]  ;;  %v11575_v59 = vpack.c.bf16 %v6717_v15, %v6713_v44  ;;  %v11613_v50 = vpack.c.bf16 %v9049_v62, %v9048_v63  ;;  %v9051_v8 = vld [vmem:[%s14693_s7 + $0x438] sm:$0xff] }
 0x624   :  { %11558 = vmatprep.subr.bf16.mxu1 %v11557_v20  ;;  %v6255_v20 = vld [vmem:[#allocation2 + $0xb8] sm:$0x1]  ;;  %v11577_v49 = vpack.c.bf16 %v6726_v28, %v6722_v22  ;;  %v11411_v27 = vpack.c.bf16 %v6723_v45, %v6719_v55  ;;  %v9002_v60 = vld [vmem:[%s14693_s7 + $0x2b0] sm:$0xff]  ;;  %v11617_v44 = vpack.c.bf16 %v9051_v8, %v9050_v24  ;;  %v9021_v55 = vld [vmem:[%s14693_s7 + $0x348] sm:$0xff] }
 0x625   :  { %11392 = vmatpush1.bf16.msra.mxu0 %v11391_v53  ;;  %v6725_v53 = vld [vmem:[#allocation11 + $0x1f70] sm:$0xff]  ;;  %v6338_v61 = vrot.slane %v6255_v20, 1  ;;  %v9052_v45 = vld [vmem:[%s14693_s7 + $0x440] sm:$0xff]  ;;  %v9053_v20 = vld [vmem:[%s14693_s7 + $0x448] sm:$0xff] }
 0x626   :  { %11394 = vmatprep.subr.bf16.mxu0 %v11393_v37  ;;  %v6242_v37 = vld [vmem:[#allocation2 + $0x50] sm:$0xfe]  ;;  %v11579_v41 = vpack.c.bf16 %v6725_v53, %v6721_v25  ;;  %v9035_v22 = vld [vmem:[%s14693_s7 + $0x3b8] sm:$0xff]  ;;  %v9005_v25 = vld [vmem:[%s14693_s7 + $0x2c8] sm:$0xff]  ;;  %v11621_v53 = vpack.c.bf16 %v9053_v20, %v9052_v45 }
 0x627   :  { %11560 = vmatpush1.bf16.msra.mxu1 %v11559_v56  ;;  %v6323_v56 = vrot.slane %v13504_v26, 1  ;;  %v6322_v57 = vrot.slane %v6242_v37, 1  ;;  %v6339_v48 = vsel %vm3109_vm5, %v6326_v52, %v6338_v61  ;;  %v6353_v52 = vrot.slane %v6266_v21, 1  ;;  %v9036_v37 = vld [vmem:[%s14693_s7 + $0x3c0] sm:$0xff]  ;;  %v9037_v61 = vld [vmem:[%s14693_s7 + $0x3c8] sm:$0xff]  ;;  %v9027_v63 = vld [vmem:[%s14693_s7 + $0x378] sm:$0xff] }
 0x628   :  { %11562 = vmatprep.subr.bf16.mxu1 %v11561_v43  ;;  %v6254_v43 = vld [vmem:[#allocation2 + $0xb0] sm:$0x1]  ;;  %v9056_v34 = vld [vmem:[%s14693_s7 + $0x460] sm:$0xff]  ;;  %v9029_v24 = vld [vmem:[%s14693_s7 + $0x388] sm:$0xff] }
 0x629   :  { %11396 = vmatpush1.bf16.msra.mxu0 %v11395_v19  ;;  %v6355_v19 = vrot.slane %v6261_v6, 1  ;;  %v6324_v42 = vsel %vm3109_vm5, %v6322_v57, %v6323_v56  ;;  %v9023_v6 = vld [vmem:[%s14693_s7 + $0x358] sm:$0xff] }
 0x62a   :  { %11398 = vmatprep.subr.bf16.mxu0 %v11397_v32  ;;  %v6336_v32 = vrot.slane %v6254_v43, 1  ;;  %v9055_v57 = vld [vmem:[%s14693_s7 + $0x458] sm:$0xff] }
 0x62b   :  { %11564 = vmatpush1.bf16.msra.mxu1 %v11563_v46  ;;  %v6357_v46 = vsel %vm3109_vm5, %v6355_v19, %v6356_v18  ;;  %v9007_v19 = vld [vmem:[%s14693_s7 + $0x2d8] sm:$0xff]  ;;  %v11625_v18 = vpack.c.bf16 %v9055_v57, %v9054_v7  ;;  %v7684_v7 = vld [vmem:[%s14693_s7 + $0x88] sm:$0xff]  ;;  %v12492_v57 = vmov 0.0|0.0  }
 0x62c   :  { %11566 = vmatprep.subr.bf16.mxu1 %v11565_v38  ;;  %v6337_v17 = vsel %vm3109_vm5, %v6323_v56, %v6336_v32  ;;  %v6272_v38 = vld [vmem:[#allocation2 + $0x170] sm:$0x1]  ;;  %v9031_v45 = vld [vmem:[%s14693_s7 + $0x398] sm:$0xff] }
 0x62d   :  { %11400 = vmatpush1.bf16.msra.mxu0 %v11399_v33  ;;  %v6354_v33 = vsel %vm3109_vm5, %v6352_v47, %v6353_v52  ;;  %v6366_v51 = vrot.slane %v6272_v38, 1  ;;  %v9022_v56 = vld [vmem:[%s14693_s7 + $0x350] sm:$0xff]  ;;  %v9008_v38 = vld [vmem:[%s14693_s7 + $0x2e0] sm:$0xff]  ;;  %v9009_v47 = vld [vmem:[%s14693_s7 + $0x2e8] sm:$0xff] }
 0x62e   :  { %11402 = vmatprep.subr.bf16.mxu0 %v11401_v23  ;;  %v9016_v23 = vld [vmem:[%s14693_s7 + $0x320] sm:$0xff]  ;;  %v11593_v43 = vpack.c.bf16 %v9023_v6, %v9022_v56  ;;  %v9038_v32 = vld [vmem:[%s14693_s7 + $0x3d0] sm:$0xff] }
 0x62f   :  { %11568 = vmatpush1.bf16.msra.mxu1 %v11567_v2  ;;  %v6367_v9 = vsel %vm3109_vm5, %v6353_v52, %v6366_v51  ;;  %v11581_v2 = vpack.c.bf16 %v9017_v39, %v9016_v23  ;;  %v11627_v21 = vpack.c.bf16 %v9039_v0, %v9038_v32  ;;  %v9057_v52 = vld [vmem:[%s14693_s7 + $0x468] sm:$0xff]  ;;  %v9040_v51 = vld [vmem:[%s14693_s7 + $0x3e0] sm:$0xff]  ;;  %v9026_v39 = vld [vmem:[%s14693_s7 + $0x370] sm:$0xff] }
 0x630   :  { %11570 = vmatprep.subr.bf16.mxu1 %v11569_v31  ;;  %v9001_v31 = vld [vmem:[%s14693_s7 + $0x2a8] sm:$0xff]  ;;  %v11601_v62 = vpack.c.bf16 %v9027_v63, %v9026_v39  ;;  %v7683_v56 = vld [vmem:[%s14693_s7 + $0x80] sm:$0xff]  ;;  %v13794_v39 = vld [vmem:[%s14693_s7 + $0x18] sm:$0xff] }
 0x631   :  { %11404 = vmatpush1.bf16.msra.mxu0 %v11403_v12  ;;  %v11583_v10 = vpack.c.bf16 %v9001_v31, %v9000_v35  ;;  %v9032_v12 = vld [vmem:[%s14693_s7 + $0x3a0] sm:$0xff]  ;;  %v9059_v35 = vld [vmem:[%s14693_s7 + $0x478] sm:$0xff]  ;;  %v9010_v31 = vld [vmem:[%s14693_s7 + $0x2f0] sm:$0xff] }
 0x632   :  { %11406 = vmatprep.subr.bf16.mxu0 %v11405_v36  ;;  %v11615_v16 = vpack.c.bf16 %v9033_v5, %v9032_v12  ;;  %v9018_v36 = vld [vmem:[%s14693_s7 + $0x330] sm:$0xff] }
 0x633   :  { %11572 = vmatpush1.bf16.msra.mxu1 %v11571_v54  ;;  %v11585_v54 = vpack.c.bf16 %v9019_v3, %v9018_v36  ;;  %v9042_v5 = vld [vmem:[%s14693_s7 + $0x3f0] sm:$0xff]  ;;  %v9028_v3 = vld [vmem:[%s14693_s7 + $0x380] sm:$0xff] }
 0x634   :  { %11574 = vmatprep.subr.bf16.mxu1 %v11573_v1  ;;  %v9003_v1 = vld [vmem:[%s14693_s7 + $0x2b8] sm:$0xff]  ;;  %v11605_v8 = vpack.c.bf16 %v9029_v24, %v9028_v3 }
 0x635   :  { %11408 = vmatpush1.bf16.msra.mxu0 %v11407_v4  ;;  %v11587_v15 = vpack.c.bf16 %v9003_v1, %v9002_v60  ;;  %v9034_v4 = vld [vmem:[%s14693_s7 + $0x3b0] sm:$0xff]  ;;  %v9061_v60 = vld [vmem:[%s14693_s7 + $0x488] sm:$0xff]  ;;  %v9012_v1 = vld [vmem:[%s14693_s7 + $0x300] sm:$0xff] }
 0x636   :  { %11410 = vmatprep.subr.bf16.mxu0 %v11409_v58  ;;  %v11619_v28 = vpack.c.bf16 %v9035_v22, %v9034_v4  ;;  %v9020_v58 = vld [vmem:[%s14693_s7 + $0x340] sm:$0xff] }
 0x637   :  { %11576 = vmatpush1.bf16.msra.mxu1 %v11575_v59  ;;  %v11589_v59 = vpack.c.bf16 %v9021_v55, %v9020_v58  ;;  %v9044_v22 = vld [vmem:[%s14693_s7 + $0x400] sm:$0xff]  ;;  %v9030_v55 = vld [vmem:[%s14693_s7 + $0x390] sm:$0xff] }
 0x638   :  { %11578 = vmatprep.subr.bf16.mxu1 %v11577_v49  ;;  %v9004_v49 = vld [vmem:[%s14693_s7 + $0x2c0] sm:$0xff]  ;;  %v11609_v20 = vpack.c.bf16 %v9031_v45, %v9030_v55 }
 0x639   :  { %11412 = vmatpush1.bf16.msra.mxu0 %v11411_v27  ;;  %v11591_v27 = vpack.c.bf16 %v9005_v25, %v9004_v49  ;;  %v9063_v49 = vld [vmem:[%s14693_s7 + $0x498] sm:$0xff]  ;;  %v9014_v25 = vld [vmem:[%s14693_s7 + $0x310] sm:$0xff] }
 0x63a   :  { %11582 = vmatprep.subr.bf16.mxu0 %v11581_v2  ;;  %v9058_v2 = vld [vmem:[%s14693_s7 + $0x470] sm:$0xff] }
 0x63b   :  { %11580 = vmatpush1.bf16.msra.mxu1 %v11579_v41  ;;  %v11623_v41 = vpack.c.bf16 %v9037_v61, %v9036_v37  ;;  %v9046_v61 = vld [vmem:[%s14693_s7 + $0x410] sm:$0xff] }
 0x63c   :  { %6978 = vmatmul.mubr.f32.vlgmr.msra.gmra.mrb[24].mxu0 %v6324_v42  ;;  %11614 = vmatprep.subr.bf16.mxu1 %v11613_v50  ;;  %v9011_v50 = vld [vmem:[%s14693_s7 + $0x2f8] sm:$0xff] }
 0x63d   :  { %8993 = vmatprep.mubr.msk.f32.mxu0 %vm140_vm3, %v6339_v48  ;;  %11584 = vmatpush3.bf16.msra.mxu0 %v11583_v10  ;;  %v11633_v10 = vpack.c.bf16 %v9059_v35, %v9058_v2  ;;  %v11603_v12 = vpack.c.bf16 %v9011_v50, %v9010_v31 }
 0x63e   :  { %7245 = vmatmul.mubr.f32.vlgmr.msra.gmra.mrb[16].mxu1 %v6324_v42  ;;  %11586 = vmatprep.subr.bf16.mxu0 %v11585_v54  ;;  %v9060_v54 = vld [vmem:[%s14693_s7 + $0x480] sm:$0xff] }
 0x63f   :  { %8997 = vmatprep.mubr.msk.f32.mxu1 %vm140_vm3, %v6339_v48  ;;  %11616 = vmatpush3.bf16.msra.mxu1 %v11615_v16  ;;  %v9006_v48 = vld [vmem:[%s14693_s7 + $0x2d0] sm:$0xff]  ;;  %v9043_v16 = vld [vmem:[%s14693_s7 + $0x3f8] sm:$0xff] }
 0x640   :  { %6984 = vmatmul.mubr.f32.gmra.mrb[26].mxu0 %v6337_v17  ;;  %11618 = vmatprep.subr.bf16.mxu1 %v11617_v44  ;;  %v11595_v42 = vpack.c.bf16 %v9007_v19, %v9006_v48  ;;  %v11635_v36 = vpack.c.bf16 %v9043_v16, %v9042_v5  ;;  %v9013_v44 = vld [vmem:[%s14693_s7 + $0x308] sm:$0xff] }
 0x641   :  { %8994 = vmatprep.mubr.msk.f32.mxu0 %vm140_vm3, %v6357_v46  ;;  %11588 = vmatpush3.bf16.msra.mxu0 %v11587_v15  ;;  %v11637_v15 = vpack.c.bf16 %v9061_v60, %v9060_v54  ;;  %v11607_v4 = vpack.c.bf16 %v9013_v44, %v9012_v1  ;;  %v7301_v48 = vld [vmem:[#allocation12] sm:$0xf] }
 0x642   :  { %7251 = vmatmul.mubr.f32.gmra.mrb[18].mxu1 %v6337_v17  ;;  %11590 = vmatprep.subr.bf16.mxu0 %v11589_v59  ;;  %v9062_v59 = vld [vmem:[%s14693_s7 + $0x490] sm:$0xff]  ;;  %v13722_v19 = vrot.slane %v7301_v48, %v12878_v40  ;;  %v13731_v0 = vrot.slane %v7301_v48, %v12819_v30  ;;  %v13741_v40 = vld [vmem:[%s14693_s7 + $0x4a8] sm:$0xff] }
 0x643   :  { %8998 = vmatprep.mubr.msk.f32.mxu1 %vm140_vm3, %v6357_v46  ;;  %11620 = vmatpush3.bf16.msra.mxu1 %v11619_v28  ;;  %v9024_v46 = vld [vmem:[%s14693_s7 + $0x360] sm:$0xff]  ;;  %v9045_v28 = vld [vmem:[%s14693_s7 + $0x408] sm:$0xff] }
 0x644   :  { %6990 = vmatmul.mubr.f32.gmra.mrb[28].mxu0 %v6354_v33  ;;  %11622 = vmatprep.subr.bf16.mxu1 %v11621_v53  ;;  %v11597_v17 = vpack.c.bf16 %v9025_v14, %v9024_v46  ;;  %v11639_v58 = vpack.c.bf16 %v9045_v28, %v9044_v22  ;;  %v9015_v53 = vld [vmem:[%s14693_s7 + $0x318] sm:$0xff]  ;;  %v13754_v46 = vld [vmem:[%s14693_s7 + $0x8] sm:$0xff]  ;;  %v13759_v14 = vld [vmem:[%s14693_s7 + $0x90] sm:$0xff] }
 0x645   :  { %8995 = vmatprep.mubr.msk.f32.mxu0 %vm140_vm3, %v6369_v11  ;;  %11592 = vmatpush3.bf16.msra.mxu0 %v11591_v27  ;;  %v11641_v27 = vpack.c.bf16 %v9063_v49, %v9062_v59  ;;  %v11611_v37 = vpack.c.bf16 %v9015_v53, %v9014_v25 }
 0x646   :  { %7257 = vmatmul.mubr.f32.gmra.mrb[20].mxu1 %v6354_v33  ;;  %11594 = vmatprep.subr.bf16.mxu0 %v11593_v43  ;;  %v11599_v33 = vpack.c.bf16 %v9009_v47, %v9008_v38  ;;  %v11675_v43 = vpack.c.bf16 %v7684_v7, %v7683_v56  ;;  %v13772_v38 = vld [vmem:[%s14693_s7 + $0x4b0] sm:$0xff]  ;;  %v13777_v47 = vld [vmem:[%s14693_s7 + $0x4b8] sm:$0xff] }
 0x647   :  { %8999 = vmatprep.mubr.msk.f32.mxu1 %vm140_vm3, %v6369_v11  ;;  %11624 = vmatpush3.bf16.msra.mxu1 %v11623_v41  ;;  %v11629_v11 = vpack.c.bf16 %v9057_v52, %v9056_v34  ;;  %v9047_v41 = vld [vmem:[%s14693_s7 + $0x418] sm:$0xff]  ;;  %v11649_v16 = vpack.c.bf16 %v13777_v47, %v13772_v38  ;;  %v9070_v47 = vld [vmem:[%s14693_s7 + $0x4d0] sm:$0xff] }
 0x648   :  { %6996 = vmatmul.mubr.f32.gmra.mrb[30].mxu0 %v6367_v9  ;;  %11626 = vmatprep.subr.bf16.mxu1 %v11625_v18  ;;  %v11643_v6 = vpack.c.bf16 %v9047_v41, %v9046_v61  ;;  %v13725_v18 = vrot.slane %v7301_v48, %v12882_v13  ;;  %v13746_v13 = vld [vmem:[%s14693_s7] sm:$0xff]  ;;  %v13764_v34 = vld [vmem:[%s14693_s7 + $0x98] sm:$0xff] }
 0x649   :  { %11596 = vmatpush3.bf16.msra.mxu0 %v11595_v42  ;;  %v13728_v42 = vrot.slane %v7301_v48, %v12814_v29  ;;  %v11677_v35 = vpack.c.bf16 %v13754_v46, %v13746_v13  ;;  %v11679_v31 = vpack.c.bf16 %v13764_v34, %v13759_v14  ;;  %v7689_v14 = vld [vmem:[%s14693_s7 + $0xb0] sm:$0xff]  ;;  %v7690_v34 = vld [vmem:[%s14693_s7 + $0xb8] sm:$0xff] }
 0x64a   :  { %7263 = vmatmul.mubr.f32.gmra.mrb[22].mxu1 %v6367_v9  ;;  %v9041_v9 = vld [vmem:[%s14693_s7 + $0x3e8] sm:$0xff]  ;;  %11598 = vmatprep.subr.bf16.mxu0 %v11597_v17 }
 0x64b   :  { %11628 = vmatpush3.bf16.msra.mxu1 %v11627_v21  ;;  %v11631_v23 = vpack.c.bf16 %v9041_v9, %v9040_v51  ;;  %v13736_v21 = vld [vmem:[%s14693_s7 + $0x4a0] sm:$0xff] }
 0x64c   :  { %11630 = vmatprep.subr.bf16.mxu1 %v11629_v11  ;;  %v11646_v9 = vpack.c.bf16 %v13741_v40, %v13736_v21  ;;  %v9068_v40 = vld [vmem:[%s14693_s7 + $0x4c0] sm:$0xff] }
 0x64d   :  { %11600 = vmatpush3.bf16.msra.mxu0 %v11599_v33 }
 0x64e   :  { %11602 = vmatprep.subr.bf16.mxu0 %v11601_v62 }
 0x64f   :  { %11632 = vmatpush3.bf16.msra.mxu1 %v11631_v23  ;;  %v13789_v23 = vld [vmem:[%s14693_s7 + $0x10] sm:$0xff] }
 0x650   :  { %11634 = vmatprep.subr.bf16.mxu1 %v11633_v10 }
 0x651   :  { %11604 = vmatpush3.bf16.msra.mxu0 %v11603_v12 }
 0x652   :  { %11606 = vmatprep.subr.bf16.mxu0 %v11605_v8  ;;  %v11681_v8 = vpack.c.bf16 %v13794_v39, %v13789_v23  ;;  %v7674_v23 = vld [vmem:[%s14693_s7 + $0x38] sm:$0xff]  ;;  %v7691_v39 = vld [vmem:[%s14693_s7 + $0xc0] sm:$0xff] }
 0x653   :  { %11636 = vmatpush3.bf16.msra.mxu1 %v11635_v36 }
 0x654   :  { %11638 = vmatprep.subr.bf16.mxu1 %v11637_v15 }
 0x655   :  { %11608 = vmatpush3.bf16.msra.mxu0 %v11607_v4 }
 0x656   :  { %11610 = vmatprep.subr.bf16.mxu0 %v11609_v20 }
 0x657   :  { %11640 = vmatpush3.bf16.msra.mxu1 %v11639_v58 }
 0x658   :  { %11642 = vmatprep.subr.bf16.mxu1 %v11641_v27 }
 0x659   :  { %11612 = vmatpush3.bf16.msra.mxu0 %v11611_v37 }
 0x65a   :  { %11645 = vmatprep.subr.bf16.mxu0 %v12492_v57 }
 0x65b   :  { %11644 = vmatpush3.bf16.msra.mxu1 %v11643_v6 }
 0x65c   :  { %11676 = vmatprep.subr.bf16.mxu1 %v11675_v43 }
 0x70f   :  { %v6979_v32 = vpop.f32.mrb[24].mxu0 }
 0x710   :  { %v13749_v29 = vadd.f32 %v13722_v19, %v6979_v32  ;;  %v6981_v30 = vpop.f32.mrb[25].mxu0 }
 0x711   :  { %v7246_v17 = vpop.f32.mrb[16].mxu1  ;;  %v13767_v52 = vadd.f32 %v13725_v18, %v6981_v30 }
 0x712   :  { %v7339_v11 = vmul.f32 %v13749_v29, %v13749_v29  ;;  %v13782_v33 = vadd.f32 %v13728_v42, %v7246_v17  ;;  %v7248_v51 = vpop.f32.mrb[17].mxu1 }
 0x713   :  { %v7340_v63 = vmul.f32 %v13767_v52, %v13767_v52  ;;  %v13799_v2 = vadd.f32 %v13731_v0, %v7248_v51  ;;  %v6985_v62 = vpop.f32.mrb[26].mxu0 }
 0x714   :  { %v7355_v50 = vmul.f32 %v7339_v11, %v13749_v29  ;;  %v7341_v10 = vmul.f32 %v13782_v33, %v13782_v33  ;;  %v13809_v12 = vadd.f32 %v13722_v19, %v6985_v62  ;;  %v6987_v5 = vpop.f32.mrb[27].mxu0 }
 0x715   :  { %v7356_v36 = vmul.f32 %v7340_v63, %v13767_v52  ;;  %v7342_v3 = vmul.f32 %v13799_v2, %v13799_v2  ;;  %v7252_v24 = vpop.f32.mrb[18].mxu1  ;;  %v13817_v54 = vadd.f32 %v13725_v18, %v6987_v5 }
 0x716   :  { %v7371_v60 = vmul.f32 0.044715, %v7355_v50  ;;  %v7357_v1 = vmul.f32 %v7341_v10, %v13782_v33  ;;  %v7343_v44 = vmul.f32 %v13809_v12, %v13809_v12  ;;  %v13825_v15 = vadd.f32 %v13728_v42, %v7252_v24  ;;  %v7254_v4 = vpop.f32.mrb[19].mxu1 }
 0x717   :  { %v7372_v22 = vmul.f32 0.044715, %v7356_v36  ;;  %v7358_v28 = vmul.f32 %v7342_v3, %v13799_v2  ;;  %v7344_v58 = vmul.f32 %v13817_v54, %v13817_v54  ;;  %v13831_v55 = vadd.f32 %v13731_v0, %v7254_v4  ;;  %v6991_v45 = vpop.f32.mrb[28].mxu0 }
 0x718   :  { %v7387_v59 = vadd.f32 %v7371_v60, %v13749_v29  ;;  %v7373_v20 = vmul.f32 0.044715, %v7357_v1  ;;  %v7359_v49 = vmul.f32 %v7343_v44, %v13809_v12  ;;  %v7345_v25 = vmul.f32 %v13825_v15, %v13825_v15  ;;  %v6993_v53 = vpop.f32.mrb[29].mxu0 }
 0x719   :  { %v7388_v27 = vadd.f32 %v7372_v22, %v13767_v52  ;;  %v7374_v37 = vmul.f32 0.044715, %v7358_v28  ;;  %v7360_v61 = vmul.f32 %v7344_v58, %v13817_v54  ;;  %v7346_v41 = vmul.f32 %v13831_v55, %v13831_v55  ;;  %v7258_v56 = vpop.f32.mrb[20].mxu1 }
 0x71a   :  { %v7403_v6 = vmul.f32 0.7978846, %v7387_v59  ;;  %v7389_v7 = vadd.f32 %v7373_v20, %v13782_v33  ;;  %v7375_v43 = vmul.f32 0.044715, %v7359_v49  ;;  %v7361_v48 = vmul.f32 %v7345_v25, %v13825_v15  ;;  %v7260_v32 = vpop.f32.mrb[21].mxu1 }
 0x71b   :  { %v7404_v30 = vmul.f32 0.7978846, %v7388_v27  ;;  %v7390_v17 = vadd.f32 %v7374_v37, %v13799_v2  ;;  %v7376_v11 = vmul.f32 0.044715, %v7360_v61  ;;  %v7362_v51 = vmul.f32 %v7346_v41, %v13831_v55  ;;  %v6997_v63 = vpop.f32.mrb[30].mxu0 }
 0x71c   :  { %12229 = vtanh.f32 %v7403_v6  ;;  %v7405_v62 = vmul.f32 0.7978846, %v7389_v7  ;;  %v7391_v50 = vadd.f32 %v7375_v43, %v13809_v12  ;;  %v7377_v10 = vmul.f32 0.044715, %v7361_v48  ;;  %v6999_v5 = vpop.f32.mrb[31].mxu0 }
 0x71d   :  { %12231 = vtanh.f32 %v7404_v30  ;;  %v7406_v36 = vmul.f32 0.7978846, %v7390_v17  ;;  %v7392_v3 = vadd.f32 %v7376_v11, %v13817_v54  ;;  %v7378_v24 = vmul.f32 0.044715, %v7362_v51  ;;  %v7264_v60 = vpop.f32.mrb[22].mxu1 }
 0x71e   :  { %12233 = vtanh.f32 %v7405_v62  ;;  %v7407_v1 = vmul.f32 0.7978846, %v7391_v50  ;;  %v7393_v44 = vadd.f32 %v7377_v10, %v13825_v15  ;;  %v13849_v4 = vadd.f32 %v13722_v19, %v6991_v45  ;;  %v7266_v22 = vpop.f32.mrb[23].mxu1 }
 0x71f   :  { %12235 = vtanh.f32 %v7406_v36  ;;  %v7408_v28 = vmul.f32 0.7978846, %v7392_v3  ;;  %v7394_v58 = vadd.f32 %v7378_v24, %v13831_v55  ;;  %v13853_v59 = vadd.f32 %v13728_v42, %v7258_v56 }
 0x720   :  { %12237 = vtanh.f32 %v7407_v1  ;;  %v7409_v20 = vmul.f32 0.7978846, %v7393_v44  ;;  %v7347_v49 = vmul.f32 %v13849_v4, %v13849_v4  ;;  %v13858_v25 = vadd.f32 %v13725_v18, %v6993_v53 }
 0x721   :  { %12239 = vtanh.f32 %v7408_v28  ;;  %v7410_v27 = vmul.f32 0.7978846, %v7394_v58  ;;  %v7349_v45 = vmul.f32 %v13853_v59, %v13853_v59  ;;  %v13863_v37 = vadd.f32 %v13731_v0, %v7260_v32 }
 0x722   :  { %12241 = vtanh.f32 %v7409_v20  ;;  %v7363_v61 = vmul.f32 %v7347_v49, %v13849_v4  ;;  %v7348_v41 = vmul.f32 %v13858_v25, %v13858_v25  ;;  %v13869_v56 = vadd.f32 %v13722_v19, %v6997_v63 }
 0x723   :  { %12243 = vtanh.f32 %v7410_v27  ;;  %v7365_v53 = vmul.f32 %v7349_v45, %v13853_v59  ;;  %v7350_v6 = vmul.f32 %v13863_v37, %v13863_v37  ;;  %v13875_v7 = vadd.f32 %v13728_v42, %v7264_v60 }
 0x724   :  { %v7379_v43 = vmul.f32 0.044715, %v7363_v61  ;;  %v7364_v48 = vmul.f32 %v7348_v41, %v13858_v25  ;;  %v7351_v32 = vmul.f32 %v13869_v56, %v13869_v56  ;;  %v13881_v30 = vadd.f32 %v13725_v18, %v6999_v5 }
 0x725   :  { %v7381_v19 = vmul.f32 0.044715, %v7365_v53  ;;  %v7366_v17 = vmul.f32 %v7350_v6, %v13863_v37  ;;  %v7353_v11 = vmul.f32 %v13875_v7, %v13875_v7  ;;  %v13887_v51 = vadd.f32 %v13731_v0, %v7266_v22 }
 0x726   :  { %v12230_v42 = vpop.eup %12229  ;;  %v7395_v63 = vadd.f32 %v7379_v43, %v13849_v4  ;;  %v7380_v62 = vmul.f32 0.044715, %v7364_v48  ;;  %v7367_v50 = vmul.f32 %v7351_v32, %v13869_v56  ;;  %v13893_v10 = vmul.f32 %v13881_v30, %v13881_v30 }
 0x727   :  { %v12232_v18 = vpop.eup %12231  ;;  %v7435_v5 = vadd.f32 1.0, %v12230_v42  ;;  %v7397_v36 = vadd.f32 %v7381_v19, %v13853_v59  ;;  %v7382_v3 = vmul.f32 0.044715, %v7366_v17  ;;  %v7369_v24 = vmul.f32 %v7353_v11, %v13875_v7  ;;  %v7285_v17 = vld [vmem:[#allocation2 + $0x38] sm:$0xff] }
 0x728   :  { %v12234_v60 = vpop.eup %12233  ;;  %v7436_v0 = vadd.f32 1.0, %v12232_v18  ;;  %v7411_v1 = vmul.f32 0.7978846, %v7395_v63  ;;  %v7396_v44 = vadd.f32 %v7380_v62, %v13858_v25  ;;  %v7383_v22 = vmul.f32 0.044715, %v7367_v50 }
 0x729   :  { %v12236_v28 = vpop.eup %12235  ;;  %v7451_v58 = vmul.f32 0.5, %v7435_v5  ;;  %v7437_v20 = vadd.f32 1.0, %v12234_v60  ;;  %v7413_v49 = vmul.f32 0.7978846, %v7397_v36  ;;  %v7398_v27 = vadd.f32 %v7382_v3, %v13863_v37  ;;  %v7286_v5 = vld [vmem:[#allocation2 + $0x40] sm:$0xff]  ;;  %v7287_v60 = vld [vmem:[#allocation2 + $0x48] sm:$0xff] }
 0x72a   :  { %v12238_v45 = vpop.eup %12237  ;;  %v7452_v61 = vmul.f32 0.5, %v7436_v0  ;;  %v7438_v41 = vadd.f32 1.0, %v12236_v28  ;;  %12245 = vtanh.f32 %v7411_v1  ;;  %v7412_v53 = vmul.f32 0.7978846, %v7396_v44  ;;  %v7288_v28 = vld [vmem:[#allocation2 + $0x50] sm:$0xff] }
 0x72b   :  { %v12240_v6 = vpop.eup %12239  ;;  %v7467_v43 = vmul.f32 %v7451_v58, %v13749_v29  ;;  %v7453_v48 = vmul.f32 0.5, %v7437_v20  ;;  %v7439_v32 = vadd.f32 1.0, %v12238_v45  ;;  %12247 = vtanh.f32 %v7413_v49  ;;  %v7289_v45 = vld [vmem:[#allocation2 + $0x68] sm:$0xff] }
 0x72c   :  { %v12242_v19 = vpop.eup %12241  ;;  %v7468_v11 = vmul.f32 %v7452_v61, %v13767_v52  ;;  %v7454_v42 = vmul.f32 0.5, %v7438_v41  ;;  %v7440_v63 = vadd.f32 1.0, %v12240_v6  ;;  %12249 = vtanh.f32 %v7412_v53  ;;  %v13917_v53 = vld [vmem:[#allocation2 + $0x30] sm:$0xff] }
 0x72d   :  { %v12244_v62 = vpop.eup %12243  ;;  %v13901_v50 = vadd.f32 %v7467_v43, %v7285_v17  ;;  %v7469_v18 = vmul.f32 %v7453_v48, %v13782_v33  ;;  %v7455_v36 = vmul.f32 0.5, %v7439_v32  ;;  %v7441_v3 = vadd.f32 1.0, %v12242_v19  ;;  %v7291_v43 = vld [vmem:[#allocation2 + $0x78] sm:$0xff] }
 0x72e   :  { %v13904_v29 = vadd.f32 %v7468_v11, %v7286_v5  ;;  %v7470_v0 = vmul.f32 %v7454_v42, %v13799_v2  ;;  %v7456_v1 = vmul.f32 0.5, %v7440_v63  ;;  %v7442_v44 = vadd.f32 1.0, %v12244_v62  ;;  %v7672_v11 = vld [vmem:[%s14693_s7 + $0x28] sm:$0xff] }
 0x72f   :  { %7499 = vst [vmem:[#allocation2 + $0x38] sm:$0xff] %v13901_v50  ;;  %v13908_v52 = vadd.f32 %v7469_v18, %v7287_v60  ;;  %v7471_v58 = vmul.f32 %v7455_v36, %v13809_v12  ;;  %v7457_v20 = vmul.f32 0.5, %v7441_v3  ;;  %v7414_v49 = vmul.f32 0.7978846, %v7398_v27  ;;  %7922 = vmatprep.mubr.f32.mxu0 %v13901_v50 }
 0x730   :  { %7500 = vst [vmem:[#allocation2 + $0x40] sm:$0xff] %v13904_v29  ;;  %v13913_v33 = vadd.f32 %v7470_v0, %v7288_v28  ;;  %v7472_v2 = vmul.f32 %v7456_v1, %v13817_v54  ;;  %v7458_v61 = vmul.f32 0.5, %v7442_v44  ;;  %v7399_v41 = vadd.f32 %v7383_v22, %v13869_v56  ;;  %7923 = vmatmul.mubr.f32.vlgmr.msra.gmra.mrb[32].mxu0 %v13917_v53  ;;  %v7687_v54 = vld [vmem:[%s14693_s7 + $0xa0] sm:$0xff]  ;;  %v7688_v22 = vld [vmem:[%s14693_s7 + $0xa8] sm:$0xff]  ;;  %v7293_v44 = vld [vmem:[#allocation2 + $0xf8] sm:$0xff] }
 0x731   :  { %7501 = vst [vmem:[#allocation2 + $0x48] sm:$0xff] %v13908_v52  ;;  %v7487_v12 = vadd.f32 %v7471_v58, %v7289_v45  ;;  %v7473_v27 = vmul.f32 %v7457_v20, %v13825_v15  ;;  %12251 = vtanh.f32 %v7414_v49  ;;  %v7385_v6 = vmul.f32 0.044715, %v7369_v24  ;;  %8007 = vmatprep.mubr.f32.mxu1 %v13908_v52  ;;  %11647 = vmatpush1.bf16.msra.mxu0 %v11646_v9  ;;  %v12291_v15 = vld [vmem:[#allocation2 + $0x70] sm:$0xff]  ;;  %v9069_v9 = vld [vmem:[%s14693_s7 + $0x4c8] sm:$0xff] }
 0x732   :  { %7502 = vst [vmem:[#allocation2 + $0x50] sm:$0xff] %v13913_v33  ;;  %v7488_v48 = vadd.f32 %v12291_v15, %v7472_v2  ;;  %v7474_v24 = vmul.f32 %v7458_v61, %v13831_v55  ;;  %v7415_v32 = vmul.f32 0.7978846, %v7399_v41  ;;  %v7368_v21 = vmul.f32 %v13893_v10, %v13881_v30  ;;  %8008 = vmatmul.mubr.f32.vlgmr.msra.gmra.mrb[24].mxu1 %v13904_v29  ;;  %v7671_v10 = vld [vmem:[%s14693_s7 + $0x20] sm:$0xff]  ;;  %v7673_v41 = vld [vmem:[%s14693_s7 + $0x30] sm:$0xff] }
 0x733   :  { %11648 = vmatprep.subr.bf16.mxu0 %v12492_v57  ;;  %7503 = vst [vmem:[#allocation2 + $0x68] sm:$0xff] %v7487_v12  ;;  %v7489_v19 = vadd.f32 %v7473_v27, %v7291_v43  ;;  %v7401_v55 = vadd.f32 %v7385_v6, %v13875_v7  ;;  %v7354_v17 = vmul.f32 %v13887_v51, %v13887_v51  ;;  %v9073_v27 = vld [vmem:[%s14693_s7 + $0x4e8] sm:$0xff] }
 0x734   :  { %11678 = vmatpush3.bf16.msra.mxu1 %v11677_v35  ;;  %7927 = vmatprep.mubr.f32.mxu0 %v7487_v12  ;;  %v12246_v42 = vpop.eup %12245  ;;  %7504 = vst [vmem:[#allocation2 + $0x70] sm:$0xff] %v7488_v48  ;;  %v13957_v63 = vadd.f32 %v7474_v24, %v13504_v26  ;;  %12253 = vtanh.f32 %v7415_v32  ;;  %v7384_v62 = vmul.f32 0.044715, %v7368_v21  ;;  %v11683_v13 = vpack.c.bf16 %v7688_v22, %v7687_v54  ;;  %v9072_v12 = vld [vmem:[%s14693_s7 + $0x4e0] sm:$0xff]  ;;  %v7295_v22 = vld [vmem:[#allocation2 + $0x108] sm:$0xff] }
 0x735   :  { %11680 = vmatprep.subr.bf16.mxu1 %v11679_v31  ;;  %7928 = vmatmul.mubr.f32.gmra.mrb[34].mxu0 %v13917_v53  ;;  %v12248_v46 = vpop.eup %12247  ;;  %7505 = vst [vmem:[#allocation2 + $0x78] sm:$0xff] %v7489_v19  ;;  %v7443_v35 = vadd.f32 1.0, %v12246_v42  ;;  %v7417_v18 = vmul.f32 0.7978846, %v7401_v55  ;;  %v7370_v5 = vmul.f32 %v7354_v17, %v13887_v51  ;;  %v11652_v26 = vpack.c.bf16 %v9069_v9, %v9068_v40  ;;  %v7693_v55 = vld [vmem:[%s14693_s7 + $0xd0] sm:$0xff] }
 0x736   :  { %8012 = vmatprep.mubr.f32.mxu1 %v7489_v19  ;;  %11650 = vmatpush1.bf16.msra.mxu0 %v11649_v16  ;;  %v12250_v31 = vpop.eup %12249  ;;  %7506 = vst [vmem:[#allocation2 + $0x80] sm:$0xff] %v13957_v63  ;;  %v7445_v36 = vadd.f32 1.0, %v12248_v46  ;;  %v7400_v3 = vadd.f32 %v7384_v62, %v13881_v30  ;;  %v11685_v38 = vpack.c.bf16 %v7672_v11, %v7671_v10  ;;  %v9071_v16 = vld [vmem:[%s14693_s7 + $0x4d8] sm:$0xff]  ;;  %v7676_v19 = vld [vmem:[%s14693_s7 + $0x48] sm:$0xff]  ;;  %v9074_v42 = vld [vmem:[%s14693_s7 + $0x4f0] sm:$0xff] }
 0x737   :  { %8013 = vmatmul.mubr.f32.gmra.mrb[26].mxu1 %v7488_v48  ;;  %11651 = vmatprep.subr.bf16.mxu0 %v12492_v57  ;;  %v7459_v60 = vmul.f32 0.5, %v7443_v35  ;;  %v7444_v0 = vadd.f32 1.0, %v12250_v31  ;;  %12255 = vtanh.f32 %v7417_v18  ;;  %v7386_v1 = vmul.f32 0.044715, %v7370_v5  ;;  %v7294_v48 = vld [vmem:[#allocation2 + $0x100] sm:$0xff]  ;;  %v7694_v11 = vld [vmem:[%s14693_s7 + $0xd8] sm:$0xff] }
 0x738   :  { %11682 = vmatpush3.bf16.msra.mxu1 %v11681_v8  ;;  %v7461_v28 = vmul.f32 0.5, %v7445_v36  ;;  %v7416_v58 = vmul.f32 0.7978846, %v7400_v3  ;;  %v11687_v20 = vpack.c.bf16 %v7690_v34, %v7689_v14  ;;  %v11655_v61 = vpack.c.bf16 %v9071_v16, %v9070_v47  ;;  %v9075_v62 = vld [vmem:[%s14693_s7 + $0x4f8] sm:$0xff]  ;;  %v7296_v46 = vld [vmem:[#allocation2 + $0x110] sm:$0xff]  ;;  %v7696_v47 = vld [vmem:[%s14693_s7 + $0xe8] sm:$0xff] }
 0x739   :  { %11684 = vmatprep.subr.bf16.mxu1 %v11683_v13  ;;  %v7475_v49 = vmul.f32 %v7459_v60, %v13849_v4  ;;  %v7460_v45 = vmul.f32 0.5, %v7444_v0  ;;  %v7402_v2 = vadd.f32 %v7386_v1, %v13887_v51  ;;  %v7692_v4 = vld [vmem:[%s14693_s7 + $0xc8] sm:$0xff]  ;;  %v11689_v32 = vpack.c.bf16 %v7674_v23, %v7673_v41  ;;  %v7677_v31 = vld [vmem:[%s14693_s7 + $0x50] sm:$0xff]  ;;  %v7678_v36 = vld [vmem:[%s14693_s7 + $0x58] sm:$0xff] }
 0x73a   :  { %11653 = vmatpush1.bf16.msra.mxu0 %v11652_v26  ;;  %v7477_v8 = vmul.f32 %v7461_v28, %v13853_v59  ;;  %12257 = vtanh.f32 %v7416_v58  ;;  %v11691_v40 = vpack.c.bf16 %v7692_v4, %v7691_v39  ;;  %v11658_v9 = vpack.c.bf16 %v9073_v27, %v9072_v12  ;;  %v9076_v16 = vld [vmem:[%s14693_s7 + $0x500] sm:$0xff]  ;;  %v9077_v60 = vld [vmem:[%s14693_s7 + $0x508] sm:$0xff]  ;;  %v7697_v39 = vld [vmem:[%s14693_s7 + $0xf0] sm:$0xff] }
 0x73b   :  { %11654 = vmatprep.subr.bf16.mxu0 %v12492_v57  ;;  %v12252_v6 = vpop.eup %12251  ;;  %v14007_v54 = vadd.f32 %v7475_v49, %v7293_v44  ;;  %v7476_v59 = vmul.f32 %v7460_v45, %v13858_v25  ;;  %v7418_v43 = vmul.f32 0.7978846, %v7402_v2  ;;  %v7675_v25 = vld [vmem:[%s14693_s7 + $0x40] sm:$0xff]  ;;  %v11695_v14 = vpack.c.bf16 %v7694_v11, %v7693_v55  ;;  %v7297_v44 = vld [vmem:[#allocation2 + $0x128] sm:$0xff]  ;;  %v9078_v27 = vld [vmem:[%s14693_s7 + $0x510] sm:$0xff] }
 0x73c   :  { %11686 = vmatpush3.bf16.msra.mxu1 %v11685_v38  ;;  %v14010_v15 = vadd.f32 %v7477_v8, %v7295_v22  ;;  %v7446_v24 = vadd.f32 1.0, %v12252_v6  ;;  %v11693_v18 = vpack.c.bf16 %v7676_v19, %v7675_v25  ;;  %v11661_v34 = vpack.c.bf16 %v9075_v62, %v9074_v42  ;;  %v7516_v23 = vld [vmem:[#allocation2 + $0x8] sm:$0x80]  ;;  %v7698_v8 = vld [vmem:[%s14693_s7 + $0xf8] sm:$0xff]  ;;  %v7681_v25 = vld [vmem:[%s14693_s7 + $0x70] sm:$0xff] }
 0x73d   :  { %11688 = vmatprep.subr.bf16.mxu1 %v11687_v20  ;;  %7507 = vst [vmem:[#allocation2 + $0xf8] sm:$0xff] %v14007_v54  ;;  %v14013_v21 = vadd.f32 %v7476_v59, %v7294_v48  ;;  %12259 = vtanh.f32 %v7418_v43  ;;  %7932 = vmatprep.mubr.f32.mxu0 %v14007_v54  ;;  %v11697_v58 = vpack.c.bf16 %v7678_v36, %v7677_v31  ;;  %v12292_v6 = vld [vmem:[#allocation2 + $0x138] sm:$0xff]  ;;  %v7515_v55 = vld [vmem:[#allocation2] sm:$0x80]  ;;  %v7716_v11 = vld [vmem:[%s14693_s7 + $0x188] sm:$0xff] }
 0x73e   :  { %11656 = vmatpush1.bf16.msra.mxu0 %v11655_v61  ;;  %v12254_v17 = vpop.eup %12253  ;;  %7509 = vst [vmem:[#allocation2 + $0x108] sm:$0xff] %v14010_v15  ;;  %v7462_v10 = vmul.f32 0.5, %v7446_v24  ;;  %8017 = vmatprep.mubr.f32.mxu1 %v14010_v15  ;;  %v11664_v2 = vpack.c.bf16 %v9077_v60, %v9076_v16  ;;  %v7679_v61 = vld [vmem:[%s14693_s7 + $0x60] sm:$0xff]  ;;  %v14085_v48 = vld [vmem:[#allocation2 + $0x58] sm:$0xff]  ;;  %v12293_v42 = vld [vmem:[#allocation2 + $0x130] sm:$0xff] }
 0x73f   :  { %7933 = vmatmul.mubr.f32.gmra.mrb[36].mxu0 %v13917_v53  ;;  %7508 = vst [vmem:[#allocation2 + $0x100] sm:$0xff] %v14013_v21  ;;  %v7447_v13 = vadd.f32 1.0, %v12254_v17  ;;  %8018 = vmatmul.mubr.f32.gmra.mrb[28].mxu1 %v14013_v21  ;;  %v7682_v19 = vld [vmem:[%s14693_s7 + $0x78] sm:$0xff]  ;;  %v7699_v36 = vld [vmem:[%s14693_s7 + $0x100] sm:$0xff]  ;;  %v7717_v16 = vld [vmem:[%s14693_s7 + $0x190] sm:$0xff] }
 0x740   :  { %11657 = vmatprep.subr.bf16.mxu0 %v12492_v57  ;;  %v7478_v35 = vmul.f32 %v7462_v10, %v13863_v37  ;;  %11690 = vmatpush3.bf16.msra.mxu1 %v11689_v32  ;;  %v7695_v37 = vld [vmem:[%s14693_s7 + $0xe0] sm:$0xff]  ;;  %v7591_v32 = vrot.slane %v13901_v50, 7  ;;  %v7718_v60 = vld [vmem:[%s14693_s7 + $0x198] sm:$0xff] }
 0x741   :  { %v12256_v5 = vpop.eup %12255  ;;  %v7463_v26 = vmul.f32 0.5, %v7447_v13  ;;  %11692 = vmatprep.subr.bf16.mxu1 %v11691_v40  ;;  %v11699_v45 = vpack.c.bf16 %v7696_v47, %v7695_v37  ;;  %v7590_v40 = vrot.slane %v7516_v23, 7  ;;  %v7715_v10 = vld [vmem:[%s14693_s7 + $0x180] sm:$0xff] }
 0x742   :  { %11659 = vmatpush1.bf16.msra.mxu0 %v11658_v9  ;;  %v14050_v3 = vadd.f32 %v7478_v35, %v7296_v46  ;;  %v7449_v38 = vadd.f32 1.0, %v12256_v5  ;;  %v11703_v9 = vpack.c.bf16 %v7698_v8, %v7697_v39  ;;  %v9080_v13 = vld [vmem:[%s14693_s7 + $0x520] sm:$0xff]  ;;  %v9081_v46 = vld [vmem:[%s14693_s7 + $0x528] sm:$0xff]  ;;  %v11705_v5 = vpack.c.bf16 %v7682_v19, %v7681_v25  ;;  %v7722_v25 = vld [vmem:[%s14693_s7 + $0x1b8] sm:$0xff] }
 0x743   :  { %11660 = vmatprep.subr.bf16.mxu0 %v12492_v57  ;;  %v7479_v0 = vmul.f32 %v7463_v26, %v13869_v56  ;;  %v7680_v56 = vld [vmem:[%s14693_s7 + $0x68] sm:$0xff]  ;;  %v7587_v26 = vrot.slane %v7515_v55, 7  ;;  %v11707_v31 = vpack.c.bf16 %v7716_v11, %v7715_v10  ;;  %v12294_v37 = vld [vmem:[#allocation2 + $0x140] sm:$0xff]  ;;  %v11670_v47 = vpack.c.bf16 %v9081_v46, %v9080_v13  ;;  %v7734_v10 = vld [vmem:[%s14693_s7 + $0x218] sm:$0xff] }
 0x744   :  { %v12258_v1 = vpop.eup %12257  ;;  %7510 = vst [vmem:[#allocation2 + $0x110] sm:$0xff] %v14050_v3  ;;  %v7465_v28 = vmul.f32 0.5, %v7449_v38  ;;  %11694 = vmatpush3.bf16.msra.mxu1 %v11693_v18  ;;  %v11701_v43 = vpack.c.bf16 %v7680_v56, %v7679_v61  ;;  %v14112_v18 = vrot.slane %v13917_v53, 7  ;;  %v7702_v61 = vld [vmem:[%s14693_s7 + $0x118] sm:$0xff]  ;;  %v7533_v56 = vld [vmem:[#allocation2 + $0xc0] sm:$0x80] }
 0x745   :  { %v7495_v20 = vadd.f32 %v7479_v0, %v7297_v44  ;;  %v7448_v49 = vadd.f32 1.0, %v12258_v1  ;;  %11696 = vmatprep.subr.bf16.mxu1 %v11695_v14  ;;  %v7528_v14 = vld [vmem:[#allocation2 + $0x68] sm:$0x7f]  ;;  %v9082_v1 = vld [vmem:[%s14693_s7 + $0x530] sm:$0xff]  ;;  %v9083_v44 = vld [vmem:[%s14693_s7 + $0x538] sm:$0xff]  ;;  %v7621_v8 = vrot.slane %v14007_v54, 7 }
 0x746   :  { %11662 = vmatpush1.bf16.msra.mxu0 %v11661_v34  ;;  %v7481_v41 = vmul.f32 %v7465_v28, %v13875_v7  ;;  %v9079_v7 = vld [vmem:[%s14693_s7 + $0x518] sm:$0xff]  ;;  %v7592_v34 = vsel %vm1185_vm4, %v7590_v40, %v7591_v32  ;;  %v7607_v0 = vrot.slane %v7528_v14, 7  ;;  %v7589_v28 = vsel %vm1185_vm4, %v7587_v26, %v14112_v18  ;;  %v7719_v23 = vld [vmem:[%s14693_s7 + $0x1a0] sm:$0xff]  ;;  %v7720_v39 = vld [vmem:[%s14693_s7 + $0x1a8] sm:$0xff] }
 0x747   :  { %11663 = vmatprep.subr.bf16.mxu0 %v12492_v57  ;;  %v12260_v4 = vpop.eup %12259  ;;  %7511 = vst [vmem:[#allocation2 + $0x128] sm:$0xff] %v7495_v20  ;;  %v7464_v12 = vmul.f32 0.5, %v7448_v49  ;;  %7937 = vmatprep.mubr.f32.mxu0 %v7495_v20  ;;  %v7534_v49 = vld [vmem:[#allocation2 + $0xc8] sm:$0x80]  ;;  %v7617_v50 = vrot.slane %v7533_v56, 7  ;;  %v7723_v14 = vld [vmem:[%s14693_s7 + $0x1c0] sm:$0xff] }
 0x748   :  { %v7497_v22 = vadd.f32 %v12292_v6, %v7481_v41  ;;  %v7450_v59 = vadd.f32 1.0, %v12260_v4  ;;  %7938 = vmatmul.mubr.f32.gmra.mrb[38].mxu0 %v13917_v53  ;;  %11698 = vmatpush3.bf16.msra.mxu1 %v11697_v58  ;;  %v7527_v53 = vld [vmem:[#allocation2 + $0x60] sm:$0x7f]  ;;  %v11673_v41 = vpack.c.bf16 %v9083_v44, %v9082_v1  ;;  %v7608_v4 = vsel %vm1185_vm4, %v7591_v32, %v7607_v0  ;;  %v7518_v13 = vld [vmem:[#allocation2 + $0x18] sm:$0x80] }
 0x749   :  { %v7480_v24 = vmul.f32 %v7464_v12, %v13881_v30  ;;  %11700 = vmatprep.subr.bf16.mxu1 %v11699_v45  ;;  %v11667_v30 = vpack.c.bf16 %v9079_v7, %v9078_v27  ;;  %9084 = vmatprep.mubr.msk.f32.mxu0 %vm140_vm3, %v14085_v48  ;;  %v7605_v20 = vrot.slane %v7527_v53, 7  ;;  %v11711_v45 = vpack.c.bf16 %v7718_v60, %v7717_v16  ;;  %v7731_v27 = vld [vmem:[%s14693_s7 + $0x200] sm:$0xff]  ;;  %v7732_v7 = vld [vmem:[%s14693_s7 + $0x208] sm:$0xff]  ;;  %v14208_v53 = vld [vmem:[#allocation2 + $0x118] sm:$0xff] }
 0x74a   :  { %11665 = vmatpush1.bf16.msra.mxu0 %v11664_v2  ;;  %7513 = vst [vmem:[#allocation2 + $0x138] sm:$0xff] %v7497_v22  ;;  %v7466_v17 = vmul.f32 0.5, %v7450_v59  ;;  %8022 = vmatprep.mubr.f32.mxu1 %v7497_v22  ;;  %v7701_v2 = vld [vmem:[%s14693_s7 + $0x110] sm:$0xff]  ;;  %v7620_v12 = vrot.slane %v7534_v49, 7  ;;  %v11715_v59 = vpack.c.bf16 %v7720_v39, %v7719_v23  ;;  %v7545_v32 = vld [vmem:[#allocation2 + $0x120] sm:$0x7f]  ;;  %v11740_v40 = vpack.c.bf16 %v7732_v7, %v7731_v27 }
 0x74b   :  { %11666 = vmatprep.subr.bf16.mxu0 %v12492_v57  ;;  %v7496_v62 = vadd.f32 %v12293_v42, %v7480_v24  ;;  %v7606_v54 = vsel %vm1185_vm4, %v14112_v18, %v7605_v20  ;;  %v11713_v6 = vpack.c.bf16 %v7702_v61, %v7701_v2  ;;  %v7704_v24 = vld [vmem:[%s14693_s7 + $0x128] sm:$0xff]  ;;  %v7619_v11 = vsel %vm1185_vm4, %v7617_v50, %v14112_v18  ;;  %v7707_v44 = vld [vmem:[%s14693_s7 + $0x140] sm:$0xff]  ;;  %v7737_v2 = vld [vmem:[%s14693_s7 + $0x230] sm:$0xff] }
 0x74c   :  { %v7482_v35 = vmul.f32 %v7466_v17, %v13887_v51  ;;  %11702 = vmatpush3.bf16.msra.mxu1 %v11701_v43  ;;  %v7700_v51 = vld [vmem:[%s14693_s7 + $0x108] sm:$0xff]  ;;  %v7703_v43 = vld [vmem:[%s14693_s7 + $0x120] sm:$0xff]  ;;  %v7622_v19 = vsel %vm1185_vm4, %v7620_v12, %v7621_v8  ;;  %v7603_v20 = vrot.slane %v14085_v48, 7  ;;  %v7738_v61 = vld [vmem:[%s14693_s7 + $0x238] sm:$0xff] }
 0x74d   :  { %7512 = vst [vmem:[#allocation2 + $0x130] sm:$0xff] %v7496_v62  ;;  %8023 = vmatmul.mubr.f32.gmra.mrb[30].mxu1 %v7496_v62  ;;  %11704 = vmatprep.subr.bf16.mxu1 %v11703_v9  ;;  %v11709_v58 = vpack.c.bf16 %v7700_v51, %v7699_v36  ;;  %v7721_v9 = vld [vmem:[%s14693_s7 + $0x1b0] sm:$0xff]  ;;  %v14180_v17 = vld [vmem:[#allocation2 + $0x88] sm:$0xff]  ;;  %v11717_v42 = vpack.c.bf16 %v7704_v24, %v7703_v43  ;;  %v7635_v62 = vrot.slane %v7545_v32, 7  ;;  %v7596_v51 = vrot.slane %v7518_v13, 7  ;;  %v7727_v12 = vld [vmem:[%s14693_s7 + $0x1e0] sm:$0xff] }
 0x74e   :  { %v14123_v38 = vadd.f32 %v12294_v37, %v7482_v35  ;;  %8185 = vmatprep.mubr.f32.mxu1 %v7592_v34  ;;  %11668 = vmatpush1.bf16.msra.mxu0 %v11667_v30  ;;  %v7546_v22 = vld [vmem:[#allocation2 + $0x128] sm:$0x7f]  ;;  %v7733_v30 = vld [vmem:[%s14693_s7 + $0x210] sm:$0xff]  ;;  %v11719_v46 = vpack.c.bf16 %v7722_v25, %v7721_v9  ;;  %v7735_v37 = vld [vmem:[%s14693_s7 + $0x220] sm:$0xff] }
 0x74f   :  { %11669 = vmatprep.subr.bf16.mxu0 %v12492_v57  ;;  %v7637_v55 = vrot.slane %v7546_v22, 7  ;;  %v7705_v35 = vld [vmem:[%s14693_s7 + $0x130] sm:$0xff]  ;;  %v11743_v26 = vpack.c.bf16 %v7734_v10, %v7733_v30  ;;  %v7724_v34 = vld [vmem:[%s14693_s7 + $0x1c8] sm:$0xff]  ;;  %v7636_v16 = vsel %vm1185_vm4, %v14112_v18, %v7635_v62  ;;  %v7739_v7 = vld [vmem:[%s14693_s7 + $0x240] sm:$0xff] }
 0x750   :  { %7514 = vst [vmem:[#allocation2 + $0x140] sm:$0xff] %v14123_v38  ;;  %11706 = vmatpush3.bf16.msra.mxu1 %v11705_v5  ;;  %v7706_v5 = vld [vmem:[%s14693_s7 + $0x138] sm:$0xff]  ;;  %v7520_v0 = vld [vmem:[#allocation2 + $0x28] sm:$0x80]  ;;  %v11723_v1 = vpack.c.bf16 %v7724_v34, %v7723_v14  ;;  %v7725_v18 = vld [vmem:[%s14693_s7 + $0x1d0] sm:$0xff] }
 0x751   :  { %11708 = vmatprep.subr.bf16.mxu1 %v11707_v31  ;;  %v7597_v31 = vrot.slane %v13908_v52, 7  ;;  %v7638_v36 = vsel %vm1185_vm4, %v7621_v8, %v7637_v55  ;;  %v11721_v60 = vpack.c.bf16 %v7706_v5, %v7705_v35  ;;  %v7602_v56 = vrot.slane %v7520_v0, 7  ;;  %v7709_v39 = vld [vmem:[%s14693_s7 + $0x150] sm:$0xff]  ;;  %v7710_v8 = vld [vmem:[%s14693_s7 + $0x158] sm:$0xff]  ;;  %v7728_v27 = vld [vmem:[%s14693_s7 + $0x1e8] sm:$0xff] }
 0x752   :  { %11671 = vmatpush1.bf16.msra.mxu0 %v11670_v47  ;;  %v7736_v47 = vld [vmem:[%s14693_s7 + $0x228] sm:$0xff]  ;;  %v11729_v50 = vpack.c.bf16 %v7710_v8, %v7709_v39  ;;  %v11731_v22 = vpack.c.bf16 %v7728_v27, %v7727_v12  ;;  %v7729_v32 = vld [vmem:[%s14693_s7 + $0x1f0] sm:$0xff]  ;;  %v7742_v9 = vld [vmem:[%s14693_s7 + $0x258] sm:$0xff] }
 0x753   :  { %8186 = vmatmul.mubr.f32.vlgmr.msra.gmra.mrb[32].mxu1 %v7589_v28  ;;  %11672 = vmatprep.subr.bf16.mxu0 %v12492_v57  ;;  %v7708_v28 = vld [vmem:[%s14693_s7 + $0x148] sm:$0xff]  ;;  %v7598_v49 = vsel %vm1185_vm4, %v7596_v51, %v7597_v31  ;;  %v7713_v55 = vld [vmem:[%s14693_s7 + $0x170] sm:$0xff]  ;;  %v7714_v30 = vld [vmem:[%s14693_s7 + $0x178] sm:$0xff] }
 0x754   :  { %8190 = vmatprep.mubr.f32.mxu1 %v7608_v4  ;;  %11710 = vmatpush3.bf16.msra.mxu1 %v11709_v58  ;;  %v11746_v58 = vpack.c.bf16 %v7736_v47, %v7735_v37  ;;  %v11749_v4 = vpack.c.bf16 %v7738_v61, %v7737_v2  ;;  %v7712_v43 = vld [vmem:[%s14693_s7 + $0x168] sm:$0xff]  ;;  %v7517_v62 = vld [vmem:[#allocation2 + $0x10] sm:$0x80]  ;;  %v7743_v13 = vld [vmem:[%s14693_s7 + $0x260] sm:$0xff]  ;;  %v11737_v35 = vpack.c.bf16 %v7714_v30, %v7713_v55 }
 0x755   :  { %11712 = vmatprep.subr.bf16.mxu1 %v11711_v45  ;;  %v14238_v45 = vld [vmem:[#allocation2 + $0x148] sm:$0xff]  ;;  %v7530_v5 = vld [vmem:[#allocation2 + $0x78] sm:$0x7f]  ;;  %v9092_v14 = vld [vmem:[%s14693_s7 + $0x540] sm:$0xff]  ;;  %v7593_v51 = vrot.slane %v7517_v62, 7 }
 0x756   :  { %11674 = vmatpush1.bf16.msra.mxu0 %v11673_v41  ;;  %v11725_v41 = vpack.c.bf16 %v7708_v28, %v7707_v44  ;;  %v9093_v34 = vld [vmem:[%s14693_s7 + $0x548] sm:$0xff]  ;;  %v9110_v47 = vld [vmem:[%s14693_s7 + $0x5d0] sm:$0xff]  ;;  %v7536_v28 = vld [vmem:[#allocation2 + $0xd8] sm:$0x80] }
 0x757   :  { %8191 = vmatmul.mubr.f32.gmra.mrb[34].mxu1 %v7606_v54  ;;  %11739 = vmatprep.subr.bf16.mxu0 %v12492_v57  ;;  %v7740_v54 = vld [vmem:[%s14693_s7 + $0x248] sm:$0xff]  ;;  %v7529_v0 = vld [vmem:[#allocation2 + $0x70] sm:$0x7f]  ;;  %v11771_v44 = vpack.c.bf16 %v9093_v34, %v9092_v14  ;;  %v7626_v8 = vrot.slane %v7536_v28, 7  ;;  %v7747_v12 = vld [vmem:[%s14693_s7 + $0x280] sm:$0xff] }
 0x758   :  { %8195 = vmatprep.mubr.f32.mxu1 %v7622_v19  ;;  %11714 = vmatpush3.bf16.msra.mxu1 %v11713_v6  ;;  %v7604_v6 = vsel %vm1185_vm4, %v7602_v56, %v7603_v20  ;;  %v11752_v24 = vpack.c.bf16 %v7740_v54, %v7739_v7  ;;  %v7609_v2 = vrot.slane %v7529_v0, 7  ;;  %v9112_v56 = vld [vmem:[%s14693_s7 + $0x5e0] sm:$0xff]  ;;  %v7748_v27 = vld [vmem:[%s14693_s7 + $0x288] sm:$0xff]  ;;  %v7548_v7 = vld [vmem:[#allocation2 + $0x138] sm:$0x7f]  ;;  %v7600_v0 = vrot.slane %v13913_v33, 7 }
 0x759   :  { %8093 = vmatmul.mubr.f32.vlgmr.msra.gmra.mrb[40].mxu0 %v13913_v33  ;;  %11716 = vmatprep.subr.bf16.mxu1 %v11715_v59  ;;  %v7711_v59 = vld [vmem:[%s14693_s7 + $0x160] sm:$0xff]  ;;  %v9097_v54 = vld [vmem:[%s14693_s7 + $0x568] sm:$0xff]  ;;  %v9099_v62 = vld [vmem:[%s14693_s7 + $0x578] sm:$0xff] }
 0x75a   :  { %11741 = vmatpush1.bf16.msra.mxu0 %v11740_v40  ;;  %9085 = vmatprep.mubr.msk.f32.mxu0 %vm140_vm3, %v14180_v17  ;;  %v7741_v40 = vld [vmem:[%s14693_s7 + $0x250] sm:$0xff]  ;;  %v11733_v25 = vpack.c.bf16 %v7712_v43, %v7711_v59  ;;  %v11764_v59 = vpack.c.bf16 %v7748_v27, %v7747_v12  ;;  %v14380_v55 = vld [vmem:[#allocation2 + $0x68] sm:$0xff]  ;;  %v9116_v14 = vld [vmem:[%s14693_s7 + $0x600] sm:$0xff] }
 0x75b   :  { %8196 = vmatmul.mubr.f32.gmra.mrb[36].mxu1 %v7619_v11  ;;  %11742 = vmatprep.subr.bf16.mxu0 %v12492_v57  ;;  %v11755_v10 = vpack.c.bf16 %v7742_v9, %v7741_v40  ;;  %v9108_v11 = vld [vmem:[%s14693_s7 + $0x5c0] sm:$0xff]  ;;  %v9114_v43 = vld [vmem:[%s14693_s7 + $0x5f0] sm:$0xff]  ;;  %v7750_v9 = vld [vmem:[%s14693_s7 + $0x298] sm:$0xff] }
 0x75c   :  { %8200 = vmatprep.mubr.f32.mxu1 %v7638_v36  ;;  %11718 = vmatpush3.bf16.msra.mxu1 %v11717_v42  ;;  %v9109_v42 = vld [vmem:[%s14693_s7 + $0x5c8] sm:$0xff]  ;;  %v7594_v36 = vrot.slane %v13904_v29, 7  ;;  %v7746_v29 = vld [vmem:[%s14693_s7 + $0x278] sm:$0xff]  ;;  %v7547_v40 = vld [vmem:[#allocation2 + $0x130] sm:$0x7f] }
 0x75d   :  { %8098 = vmatmul.mubr.f32.gmra.mrb[42].mxu0 %v13957_v63  ;;  %11720 = vmatprep.subr.bf16.mxu1 %v11719_v46  ;;  %v7726_v63 = vld [vmem:[%s14693_s7 + $0x1d8] sm:$0xff]  ;;  %v7744_v46 = vld [vmem:[%s14693_s7 + $0x268] sm:$0xff]  ;;  %v9100_v33 = vld [vmem:[%s14693_s7 + $0x580] sm:$0xff] }
 0x75e   :  { %11744 = vmatpush1.bf16.msra.mxu0 %v11743_v26  ;;  %9086 = vmatprep.mubr.msk.f32.mxu0 %vm140_vm3, %v14208_v53  ;;  %v11727_v23 = vpack.c.bf16 %v7726_v63, %v7725_v18  ;;  %v11769_v26 = vpack.c.bf16 %v9109_v42, %v9108_v11  ;;  %v11758_v37 = vpack.c.bf16 %v7744_v46, %v7743_v13  ;;  %v9094_v18 = vld [vmem:[%s14693_s7 + $0x550] sm:$0xff]  ;;  %v9095_v63 = vld [vmem:[%s14693_s7 + $0x558] sm:$0xff]  ;;  %v9141_v30 = vld [vmem:[%s14693_s7 + $0x6c8] sm:$0xff] }
 0x75f   :  { %8201 = vmatmul.mubr.f32.gmra.mrb[38].mxu1 %v7636_v16  ;;  %11745 = vmatprep.subr.bf16.mxu0 %v12492_v57  ;;  %v9111_v16 = vld [vmem:[%s14693_s7 + $0x5d8] sm:$0xff]  ;;  %v9098_v42 = vld [vmem:[%s14693_s7 + $0x570] sm:$0xff]  ;;  %v7519_v13 = vld [vmem:[#allocation2 + $0x20] sm:$0x80] }
 0x760   :  { %11722 = vmatpush3.bf16.msra.mxu1 %v11721_v60  ;;  %8270 = vmatprep.mubr.f32.mxu1 %v7598_v49  ;;  %v7611_v60 = vrot.slane %v7530_v5, 7  ;;  %v7595_v49 = vsel %vm1185_vm4, %v7593_v51, %v7594_v36  ;;  %v9117_v34 = vld [vmem:[%s14693_s7 + $0x608] sm:$0xff]  ;;  %v8452_v51 = vrot.slane %v14380_v55, 1  ;;  %v9143_v28 = vld [vmem:[%s14693_s7 + $0x6d8] sm:$0xff]  ;;  %v9126_v12 = vld [vmem:[%s14693_s7 + $0x650] sm:$0xff] }
 0x761   :  { %8103 = vmatmul.mubr.f32.gmra.mrb[44].mxu0 %v14050_v3  ;;  %11724 = vmatprep.subr.bf16.mxu1 %v11723_v1  ;;  %v7745_v1 = vld [vmem:[%s14693_s7 + $0x270] sm:$0xff]  ;;  %v9127_v27 = vld [vmem:[%s14693_s7 + $0x658] sm:$0xff]  ;;  %v9144_v48 = vld [vmem:[%s14693_s7 + $0x6e0] sm:$0xff] }
 0x762   :  { %11747 = vmatpush1.bf16.msra.mxu0 %v11746_v58  ;;  %9087 = vmatprep.mubr.msk.f32.mxu0 %vm140_vm3, %v14238_v45  ;;  %v11773_v58 = vpack.c.bf16 %v9111_v16, %v9110_v47  ;;  %v11761_v61 = vpack.c.bf16 %v7746_v29, %v7745_v1  ;;  %v7612_v39 = vsel %vm1185_vm4, %v7597_v31, %v7611_v60  ;;  %v9096_v31 = vld [vmem:[%s14693_s7 + $0x560] sm:$0xff]  ;;  %v9125_v16 = vld [vmem:[%s14693_s7 + $0x648] sm:$0xff]  ;;  %v7599_v29 = vrot.slane %v7519_v13, 7 }
 0x763   :  { %11748 = vmatprep.subr.bf16.mxu0 %v12492_v57  ;;  %v9124_v47 = vld [vmem:[%s14693_s7 + $0x640] sm:$0xff]  ;;  %v11783_v1 = vpack.c.bf16 %v9099_v62, %v9098_v42  ;;  %v9146_v42 = vld [vmem:[%s14693_s7 + $0x6f0] sm:$0xff]  ;;  %v9147_v62 = vld [vmem:[%s14693_s7 + $0x6f8] sm:$0xff] }
 0x764   :  { %11726 = vmatpush3.bf16.msra.mxu1 %v11725_v41  ;;  %v9113_v41 = vld [vmem:[%s14693_s7 + $0x5e8] sm:$0xff] }
 0x765   :  { %8108 = vmatmul.mubr.f32.gmra.mrb[46].mxu0 %v14123_v38  ;;  %11728 = vmatprep.subr.bf16.mxu1 %v11727_v23  ;;  %v7730_v38 = vld [vmem:[%s14693_s7 + $0x1f8] sm:$0xff]  ;;  %v7627_v23 = vrot.slane %v14010_v15, 7  ;;  %v11775_v15 = vpack.c.bf16 %v9095_v63, %v9094_v18  ;;  %v11777_v52 = vpack.c.bf16 %v9113_v41, %v9112_v56  ;;  %v11785_v63 = vpack.c.bf16 %v9117_v34, %v9116_v14 }
 0x766   :  { %11750 = vmatpush1.bf16.msra.mxu0 %v11749_v4  ;;  %9088 = vmatprep.mubr.msk.f32.mxu0 %vm140_vm3, %v7604_v6  ;;  %v11735_v19 = vpack.c.bf16 %v7730_v38, %v7729_v32  ;;  %v7535_v4 = vld [vmem:[#allocation2 + $0xd0] sm:$0x80]  ;;  %v7624_v6 = vrot.slane %v14013_v21, 7  ;;  %v7641_v38 = vrot.slane %v7548_v7, 7  ;;  %v11803_v41 = vpack.c.bf16 %v9125_v16, %v9124_v47  ;;  %v9123_v14 = vld [vmem:[%s14693_s7 + $0x638] sm:$0xff] }
 0x767   :  { %11751 = vmatprep.subr.bf16.mxu0 %v12492_v57  ;;  %v7749_v32 = vld [vmem:[%s14693_s7 + $0x290] sm:$0xff]  ;;  %v7628_v21 = vsel %vm1185_vm4, %v7626_v8, %v7627_v23  ;;  %v7601_v7 = vsel %vm1185_vm4, %v7599_v29, %v7600_v0  ;;  %v14488_v34 = vld [vmem:[#allocation2 + $0x78] sm:$0xff]  ;;  %v8379_v29 = vld [vmem:[#allocation2 + $0x48] sm:$0xfe] }
 0x768   :  { %11730 = vmatpush3.bf16.msra.mxu1 %v11729_v50  ;;  %v7610_v50 = vsel %vm1185_vm4, %v7594_v36, %v7609_v2  ;;  %v11767_v5 = vpack.c.bf16 %v7750_v9, %v7749_v32  ;;  %v7642_v36 = vsel %vm1185_vm4, %v7627_v23, %v7641_v38  ;;  %v7531_v2 = vld [vmem:[#allocation2 + $0x80] sm:$0x7f]  ;;  %v9118_v23 = vld [vmem:[%s14693_s7 + $0x610] sm:$0xff]  ;;  %v9121_v32 = vld [vmem:[%s14693_s7 + $0x628] sm:$0xff] }
 0x769   :  { %11732 = vmatprep.subr.bf16.mxu1 %v11731_v22  ;;  %v7623_v22 = vrot.slane %v7535_v4, 7  ;;  %v9129_v9 = vld [vmem:[%s14693_s7 + $0x668] sm:$0xff]  ;;  %v9130_v47 = vld [vmem:[%s14693_s7 + $0x670] sm:$0xff]  ;;  %v9131_v16 = vld [vmem:[%s14693_s7 + $0x678] sm:$0xff] }
 0x76a   :  { %11753 = vmatpush1.bf16.msra.mxu0 %v11752_v24  ;;  %v9115_v24 = vld [vmem:[%s14693_s7 + $0x5f8] sm:$0xff] }
 0x76b   :  { %11754 = vmatprep.subr.bf16.mxu0 %v12492_v57  ;;  %v11781_v11 = vpack.c.bf16 %v9115_v24, %v9114_v43  ;;  %v7625_v46 = vsel %vm1185_vm4, %v7623_v22, %v7624_v6  ;;  %v9103_v22 = vld [vmem:[%s14693_s7 + $0x598] sm:$0xff]  ;;  %v11807_v43 = vpack.c.bf16 %v9127_v27, %v9126_v12  ;;  %v9120_v24 = vld [vmem:[%s14693_s7 + $0x620] sm:$0xff] }
 0x76c   :  { %11734 = vmatpush3.bf16.msra.mxu1 %v11733_v25  ;;  %v9140_v25 = vld [vmem:[%s14693_s7 + $0x6c0] sm:$0xff]  ;;  %v11793_v13 = vpack.c.bf16 %v9121_v32, %v9120_v24  ;;  %v8389_v27 = vld [vmem:[#allocation2 + $0x98] sm:$0x1] }
 0x76d   :  { %11736 = vmatprep.subr.bf16.mxu1 %v11735_v19  ;;  %v11779_v19 = vpack.c.bf16 %v9097_v54, %v9096_v31  ;;  %v7613_v31 = vrot.slane %v7531_v2, 7  ;;  %v7550_v54 = vld [vmem:[#allocation2 + $0x148] sm:$0x7f]  ;;  %v11815_v2 = vpack.c.bf16 %v9131_v16, %v9130_v47  ;;  %v8406_v47 = vld [vmem:[#allocation2 + $0x150] sm:$0x1] }
 0x76e   :  { %11756 = vmatpush1.bf16.msra.mxu0 %v11755_v10  ;;  %v7532_v10 = vld [vmem:[#allocation2 + $0x88] sm:$0x7f] }
 0x76f   :  { %11757 = vmatprep.subr.bf16.mxu0 %v12492_v57  ;;  %v7615_v60 = vrot.slane %v7532_v10, 7 }
 0x770   :  { %11738 = vmatpush3.bf16.msra.mxu1 %v11737_v35  ;;  %v7639_v35 = vrot.slane %v7547_v40, 7  ;;  %v9128_v40 = vld [vmem:[%s14693_s7 + $0x660] sm:$0xff] }
 0x771   :  { %11770 = vmatprep.subr.bf16.mxu1 %v11769_v26  ;;  %v8377_v26 = vld [vmem:[#allocation2 + $0x38] sm:$0xfe] }
 0x772   :  { %11759 = vmatpush1.bf16.msra.mxu0 %v11758_v37  ;;  %v11801_v37 = vpack.c.bf16 %v9141_v30, %v9140_v25  ;;  %v8451_v18 = vrot.slane %v8377_v26, 1  ;;  %v7640_v56 = vsel %vm1185_vm4, %v7624_v6, %v7639_v35  ;;  %v7645_v25 = vrot.slane %v7550_v54, 7  ;;  %v7549_v35 = vld [vmem:[#allocation2 + $0x140] sm:$0x7f]  ;;  %v9122_v26 = vld [vmem:[%s14693_s7 + $0x630] sm:$0xff] }
 0x773   :  { %8271 = vmatmul.mubr.f32.vlgmr.msra.gmra.mrb[40].mxu1 %v7595_v49  ;;  %11760 = vmatprep.subr.bf16.mxu0 %v12492_v57  ;;  %v9101_v49 = vld [vmem:[%s14693_s7 + $0x588] sm:$0xff]  ;;  %v7614_v30 = vsel %vm1185_vm4, %v7600_v0, %v7613_v31  ;;  %v9156_v31 = vld [vmem:[%s14693_s7 + $0x740] sm:$0xff] }
 0x774   :  { %8275 = vmatprep.mubr.f32.mxu1 %v7612_v39  ;;  %11772 = vmatpush3.bf16.msra.mxu1 %v11771_v44  ;;  %v9142_v44 = vld [vmem:[%s14693_s7 + $0x6d0] sm:$0xff]  ;;  %v9119_v39 = vld [vmem:[%s14693_s7 + $0x618] sm:$0xff]  ;;  %v8453_v8 = vsel %vm3109_vm5, %v8451_v18, %v8452_v51 }
 0x775   :  { %11774 = vmatprep.subr.bf16.mxu1 %v11773_v58  ;;  %v7538_v58 = vld [vmem:[#allocation2 + $0xe8] sm:$0x80]  ;;  %v11805_v4 = vpack.c.bf16 %v9143_v28, %v9142_v44  ;;  %v11789_v6 = vpack.c.bf16 %v9119_v39, %v9118_v23  ;;  %v9148_v44 = vld [vmem:[%s14693_s7 + $0x700] sm:$0xff]  ;;  %v9106_v18 = vld [vmem:[%s14693_s7 + $0x5b0] sm:$0xff] }
 0x776   :  { %11762 = vmatpush1.bf16.msra.mxu0 %v11761_v61  ;;  %v7633_v61 = vrot.slane %v14208_v53, 7  ;;  %v7616_v53 = vsel %vm1185_vm4, %v7603_v20, %v7615_v60  ;;  %v9145_v20 = vld [vmem:[%s14693_s7 + $0x6e8] sm:$0xff] }
 0x777   :  { %8276 = vmatmul.mubr.f32.gmra.mrb[42].mxu1 %v7610_v50  ;;  %11763 = vmatprep.subr.bf16.mxu0 %v12492_v57  ;;  %v9102_v50 = vld [vmem:[%s14693_s7 + $0x590] sm:$0xff]  ;;  %v11809_v38 = vpack.c.bf16 %v9145_v20, %v9144_v48  ;;  %v9149_v28 = vld [vmem:[%s14693_s7 + $0x708] sm:$0xff] }
 0x778   :  { %8280 = vmatprep.mubr.f32.mxu1 %v7628_v21  ;;  %11776 = vmatpush3.bf16.msra.mxu1 %v11775_v15  ;;  %v7632_v15 = vrot.slane %v7538_v58, 7  ;;  %v11791_v10 = vpack.c.bf16 %v9103_v22, %v9102_v50  ;;  %v11797_v58 = vpack.c.bf16 %v9123_v14, %v9122_v26  ;;  %v9133_v23 = vld [vmem:[%s14693_s7 + $0x688] sm:$0xff]  ;;  %v8388_v20 = vld [vmem:[#allocation2 + $0x90] sm:$0x1]  ;;  %v9155_v26 = vld [vmem:[%s14693_s7 + $0x738] sm:$0xff] }
 0x779   :  { %11778 = vmatprep.subr.bf16.mxu1 %v11777_v52  ;;  %v11787_v52 = vpack.c.bf16 %v9101_v49, %v9100_v33  ;;  %v8458_v33 = vrot.slane %v14488_v34, 1  ;;  %v8376_v49 = vld [vmem:[#allocation2 + $0x30] sm:$0xfe]  ;;  %v9157_v48 = vld [vmem:[%s14693_s7 + $0x748] sm:$0xff]  ;;  %v8466_v32 = vrot.slane %v8388_v20, 1 }
 0x77a   :  { %11765 = vmatpush1.bf16.msra.mxu0 %v11764_v59  ;;  %v7537_v59 = vld [vmem:[#allocation2 + $0xe0] sm:$0x80]  ;;  %v7634_v21 = vsel %vm1185_vm4, %v7632_v15, %v7633_v61  ;;  %v9150_v15 = vld [vmem:[%s14693_s7 + $0x710] sm:$0xff]  ;;  %v11834_v24 = vpack.c.bf16 %v9157_v48, %v9156_v31  ;;  %v9165_v31 = vld [vmem:[%s14693_s7 + $0x788] sm:$0xff] }
 0x77b   :  { %8281 = vmatmul.mubr.f32.gmra.mrb[44].mxu1 %v7625_v46  ;;  %11766 = vmatprep.subr.bf16.mxu0 %v12492_v57  ;;  %v9105_v46 = vld [vmem:[%s14693_s7 + $0x5a8] sm:$0xff]  ;;  %v9134_v22 = vld [vmem:[%s14693_s7 + $0x690] sm:$0xff]  ;;  %v8390_v48 = vld [vmem:[#allocation2 + $0xa0] sm:$0x1] }
 0x77c   :  { %8285 = vmatprep.mubr.f32.mxu1 %v7642_v36  ;;  %11780 = vmatpush3.bf16.msra.mxu1 %v11779_v19  ;;  %v7630_v19 = vrot.slane %v14050_v3, 7  ;;  %v9104_v3 = vld [vmem:[%s14693_s7 + $0x5a0] sm:$0xff]  ;;  %v7646_v36 = vsel %vm1185_vm4, %v7633_v61, %v7645_v25  ;;  %v8457_v61 = vrot.slane %v8379_v29, 1  ;;  %v9159_v25 = vld [vmem:[%s14693_s7 + $0x758] sm:$0xff] }
 0x77d   :  { %11782 = vmatprep.subr.bf16.mxu1 %v11781_v11  ;;  %v7629_v11 = vrot.slane %v7537_v59, 7  ;;  %v11795_v0 = vpack.c.bf16 %v9105_v46, %v9104_v3  ;;  %v9135_v59 = vld [vmem:[%s14693_s7 + $0x698] sm:$0xff]  ;;  %v9137_v3 = vld [vmem:[%s14693_s7 + $0x6a8] sm:$0xff] }
 0x77e   :  { %11768 = vmatpush1.bf16.msra.mxu0 %v11767_v5  ;;  %v11811_v5 = vpack.c.bf16 %v9129_v9, %v9128_v40  ;;  %v9153_v40 = vld [vmem:[%s14693_s7 + $0x728] sm:$0xff]  ;;  %v9158_v9 = vld [vmem:[%s14693_s7 + $0x750] sm:$0xff] }
 0x77f   :  { %8286 = vmatmul.mubr.f32.gmra.mrb[46].mxu1 %v7640_v56  ;;  %11802 = vmatprep.subr.bf16.mxu0 %v11801_v37  ;;  %v11813_v37 = vpack.c.bf16 %v9147_v62, %v9146_v42  ;;  %v7631_v60 = vsel %vm1185_vm4, %v7629_v11, %v7630_v19  ;;  %v11817_v56 = vpack.c.bf16 %v9149_v28, %v9148_v44  ;;  %v9138_v44 = vld [vmem:[%s14693_s7 + $0x6b0] sm:$0xff]  ;;  %v9139_v28 = vld [vmem:[%s14693_s7 + $0x6b8] sm:$0xff] }
 0x780   :  { %11784 = vmatpush3.bf16.msra.mxu1 %v11783_v1  ;;  %8685 = vmatprep.mubr.f32.mxu1 %v8453_v8  ;;  %v7643_v1 = vrot.slane %v7549_v35, 7  ;;  %v11837_v35 = vpack.c.bf16 %v9159_v25, %v9158_v9  ;;  %v8396_v25 = vld [vmem:[#allocation2 + $0x100] sm:$0xfe] }
 0x781   :  { %8356 = vmatmul.mubr.f32.vlgmr.msra.gmra.mrb[48].mxu0 %v7601_v7  ;;  %11786 = vmatprep.subr.bf16.mxu1 %v11785_v63  ;;  %v9107_v63 = vld [vmem:[%s14693_s7 + $0x5b8] sm:$0xff] }
 0x782   :  { %11804 = vmatpush3.bf16.msra.mxu0 %v11803_v41  ;;  %9089 = vmatprep.mubr.msk.f32.mxu0 %vm140_vm3, %v7616_v53  ;;  %v9132_v41 = vld [vmem:[%s14693_s7 + $0x680] sm:$0xff]  ;;  %v7644_v39 = vsel %vm1185_vm4, %v7630_v19, %v7643_v1  ;;  %v11799_v8 = vpack.c.bf16 %v9107_v63, %v9106_v18  ;;  %v8448_v53 = vrot.slane %v8376_v49, 1  ;;  %v9151_v7 = vld [vmem:[%s14693_s7 + $0x718] sm:$0xff]  ;;  %v8394_v19 = vld [vmem:[#allocation2 + $0xf0] sm:$0xfe]  ;;  %v8496_v63 = vrot.slane %v8406_v47, 1 }
 0x783   :  { %11806 = vmatprep.subr.bf16.mxu0 %v11805_v4  ;;  %v12295_v4 = vld [vmem:[#allocation2 + $0x30] sm:$0xff]  ;;  %v11819_v54 = vpack.c.bf16 %v9133_v23, %v9132_v41  ;;  %v11821_v50 = vpack.c.bf16 %v9151_v7, %v9150_v15  ;;  %v8478_v55 = vrot.slane %v8394_v19, 1  ;;  %v8464_v41 = vrot.slane %v14180_v17, 1 }
 0x784   :  { %11788 = vmatpush3.bf16.msra.mxu1 %v11787_v52  ;;  %v14519_v12 = vrot.slane %v12295_v4, 1  ;;  %v8459_v52 = vsel %vm3109_vm5, %v8457_v61, %v8458_v33  ;;  %v9162_v49 = vld [vmem:[%s14693_s7 + $0x770] sm:$0xff]  ;;  %v11831_v23 = vpack.c.bf16 %v9139_v28, %v9138_v44 }
 0x785   :  { %8361 = vmatmul.mubr.f32.gmra.mrb[50].mxu0 %v7614_v30  ;;  %11790 = vmatprep.subr.bf16.mxu1 %v11789_v6  ;;  %v8468_v6 = vrot.slane %v8389_v27, 1  ;;  %v8395_v30 = vld [vmem:[#allocation2 + $0xf8] sm:$0xfe]  ;;  %v8384_v61 = vld [vmem:[#allocation2 + $0x70] sm:$0xff] }
 0x786   :  { %11808 = vmatpush3.bf16.msra.mxu0 %v11807_v43  ;;  %9090 = vmatprep.mubr.msk.f32.mxu0 %vm140_vm3, %v7634_v21  ;;  %v8450_v43 = vsel %vm3109_vm5, %v8448_v53, %v14519_v12  ;;  %v8401_v21 = vld [vmem:[#allocation2 + $0x128] sm:$0xff]  ;;  %v8467_v46 = vsel %vm3109_vm5, %v14519_v12, %v8466_v32  ;;  %v8481_v14 = vrot.slane %v8395_v30, 1  ;;  %v8378_v53 = vld [vmem:[#allocation2 + $0x40] sm:$0xfe]  ;;  %v8455_v27 = vrot.slane %v8384_v61, 1  ;;  %v9166_v32 = vld [vmem:[%s14693_s7 + $0x790] sm:$0xff] }
 0x787   :  { %11810 = vmatprep.subr.bf16.mxu0 %v11809_v38  ;;  %v9152_v38 = vld [vmem:[%s14693_s7 + $0x720] sm:$0xff]  ;;  %v8469_v11 = vsel %vm3109_vm5, %v8452_v51, %v8468_v6  ;;  %v8482_v42 = vrot.slane %v8401_v21, 1  ;;  %v9154_v51 = vld [vmem:[%s14693_s7 + $0x730] sm:$0xff]  ;;  %v8497_v15 = vsel %vm3109_vm5, %v14519_v12, %v8496_v63  ;;  %v8403_v6 = vld [vmem:[#allocation2 + $0x138] sm:$0xff] }
 0x788   :  { %11792 = vmatpush3.bf16.msra.mxu1 %v11791_v10  ;;  %v11823_v10 = vpack.c.bf16 %v9135_v59, %v9134_v22  ;;  %v11825_v62 = vpack.c.bf16 %v9153_v40, %v9152_v38  ;;  %v11829_v29 = vpack.c.bf16 %v9155_v26, %v9154_v51  ;;  %v8470_v22 = vrot.slane %v8390_v48, 1  ;;  %v8397_v59 = vld [vmem:[#allocation2 + $0x108] sm:$0xfe]  ;;  %v9167_v21 = vld [vmem:[%s14693_s7 + $0x798] sm:$0xff]  ;;  %v8402_v38 = vld [vmem:[#allocation2 + $0x130] sm:$0xff] }
 0x789   :  { %8366 = vmatmul.mubr.f32.gmra.mrb[52].mxu0 %v7631_v60  ;;  %11794 = vmatprep.subr.bf16.mxu1 %v11793_v13  ;;  %v9136_v13 = vld [vmem:[%s14693_s7 + $0x6a0] sm:$0xff]  ;;  %v8381_v60 = vld [vmem:[#allocation2 + $0x58] sm:$0xfe]  ;;  %v8409_v40 = vld [vmem:[#allocation2 + $0x168] sm:$0x1]  ;;  %v8487_v9 = vrot.slane %v8397_v59, 1  ;;  %v11849_v34 = vpack.c.bf16 %v9167_v21, %v9166_v32 }
 0x78a   :  { %11812 = vmatpush3.bf16.msra.mxu0 %v11811_v5  ;;  %9091 = vmatprep.mubr.msk.f32.mxu0 %vm140_vm3, %v7646_v36  ;;  %v8407_v5 = vld [vmem:[#allocation2 + $0x158] sm:$0x1]  ;;  %v9160_v36 = vld [vmem:[%s14693_s7 + $0x760] sm:$0xff]  ;;  %v11827_v16 = vpack.c.bf16 %v9137_v3, %v9136_v13  ;;  %v8471_v19 = vsel %vm3109_vm5, %v8455_v27, %v8470_v22  ;;  %v8485_v30 = vrot.slane %v8402_v38, 1  ;;  %v8484_v13 = vrot.slane %v8396_v25, 1 }
 0x78b   :  { %11814 = vmatprep.subr.bf16.mxu0 %v11813_v37  ;;  %v9161_v37 = vld [vmem:[%s14693_s7 + $0x768] sm:$0xff]  ;;  %v8498_v1 = vrot.slane %v8407_v5, 1  ;;  %v9170_v5 = vld [vmem:[%s14693_s7 + $0x7b0] sm:$0xff]  ;;  %v9171_v51 = vld [vmem:[%s14693_s7 + $0x7b8] sm:$0xff] }
 0x78c   :  { %11796 = vmatpush3.bf16.msra.mxu1 %v11795_v0  ;;  %v8483_v0 = vsel %vm3109_vm5, %v8481_v14, %v8482_v42  ;;  %v11840_v18 = vpack.c.bf16 %v9161_v37, %v9160_v36  ;;  %v8486_v3 = vsel %vm3109_vm5, %v8484_v13, %v8485_v30  ;;  %v11855_v14 = vpack.c.bf16 %v9171_v51, %v9170_v5  ;;  %v9172_v36 = vld [vmem:[%s14693_s7 + $0x7c0] sm:$0xff]  ;;  %v9173_v37 = vld [vmem:[%s14693_s7 + $0x7c8] sm:$0xff]  ;;  %v8380_v44 = vld [vmem:[#allocation2 + $0x50] sm:$0xfe] }
 0x78d   :  { %8371 = vmatmul.mubr.f32.gmra.mrb[54].mxu0 %v7644_v39  ;;  %11798 = vmatprep.subr.bf16.mxu1 %v11797_v58  ;;  %v8480_v58 = vsel %vm3109_vm5, %v8478_v55, %v14519_v12  ;;  %v8391_v39 = vld [vmem:[#allocation2 + $0xa8] sm:$0x1]  ;;  %v11858_v47 = vpack.c.bf16 %v9173_v37, %v9172_v36  ;;  %v8392_v63 = vld [vmem:[#allocation2 + $0xb0] sm:$0x1] }
 0x78e   :  { %11816 = vmatpush3.bf16.msra.mxu0 %v11815_v2  ;;  %8770 = vmatprep.mubr.f32.mxu0 %v8459_v52  ;;  %v9163_v2 = vld [vmem:[%s14693_s7 + $0x778] sm:$0xff]  ;;  %v8472_v7 = vrot.slane %v8391_v39, 1  ;;  %v9164_v52 = vld [vmem:[%s14693_s7 + $0x780] sm:$0xff]  ;;  %v8474_v39 = vrot.slane %v8392_v63, 1 }
 0x78f   :  { %11818 = vmatprep.subr.bf16.mxu0 %v11817_v56  ;;  %v8463_v56 = vrot.slane %v8381_v60, 1  ;;  %v11843_v4 = vpack.c.bf16 %v9163_v2, %v9162_v49  ;;  %v9175_v60 = vld [vmem:[%s14693_s7 + $0x7d8] sm:$0xff]  ;;  %v8460_v49 = vrot.slane %v8380_v44, 1 }
 0x790   :  { %11800 = vmatpush3.bf16.msra.mxu1 %v11799_v8  ;;  %v8499_v8 = vsel %vm3109_vm5, %v8482_v42, %v8498_v1  ;;  %v9169_v42 = vld [vmem:[%s14693_s7 + $0x7a8] sm:$0xff]  ;;  %v8386_v1 = vld [vmem:[#allocation2 + $0x80] sm:$0xff] }
 0x791   :  { %11833 = vmatprep.subr.bf16.mxu1 %v12492_v57  ;;  %v8465_v20 = vsel %vm3109_vm5, %v8463_v56, %v8464_v41  ;;  %v8494_v56 = vrot.slane %v14238_v45, 1 }
 0x792   :  { %11820 = vmatpush3.bf16.msra.mxu0 %v11819_v54  ;;  %v8454_v54 = vrot.slane %v8378_v53, 1 }
 0x793   :  { %8686 = vmatmul.mubr.f32.vlgmr.msra.gmra.mrb[48].mxu1 %v8450_v43  ;;  %11822 = vmatprep.subr.bf16.mxu0 %v11821_v50  ;;  %v11846_v50 = vpack.c.bf16 %v9165_v31, %v9164_v52  ;;  %v8473_v43 = vsel %vm3109_vm5, %v8458_v33, %v8472_v7 }
 0x794   :  { %8690 = vmatprep.mubr.f32.mxu1 %v8469_v11  ;;  %11835 = vmatpush1.bf16.msra.mxu1 %v11834_v24  ;;  %v8456_v12 = vsel %vm3109_vm5, %v8454_v54, %v8455_v27  ;;  %v8488_v24 = vrot.slane %v8403_v6, 1  ;;  %v9168_v11 = vld [vmem:[%s14693_s7 + $0x7a0] sm:$0xff] }
 0x795   :  { %11836 = vmatprep.subr.bf16.mxu1 %v12492_v57 }
 0x796   :  { %11824 = vmatpush3.bf16.msra.mxu0 %v11823_v10  ;;  %v8489_v33 = vsel %vm3109_vm5, %v8487_v9, %v8488_v24  ;;  %v8502_v10 = vrot.slane %v8409_v40, 1 }
 0x797   :  { %8691 = vmatmul.mubr.f32.gmra.mrb[50].mxu1 %v8467_v46  ;;  %11826 = vmatprep.subr.bf16.mxu0 %v11825_v62  ;;  %v8408_v62 = vld [vmem:[#allocation2 + $0x160] sm:$0x1]  ;;  %v11852_v46 = vpack.c.bf16 %v9169_v42, %v9168_v11 }
 0x798   :  { %8695 = vmatprep.mubr.f32.mxu1 %v8483_v0  ;;  %11838 = vmatpush1.bf16.msra.mxu1 %v11837_v35  ;;  %v8500_v35 = vrot.slane %v8408_v62, 1  ;;  %v8503_v55 = vsel %vm3109_vm5, %v8488_v24, %v8502_v10  ;;  %v8393_v0 = vld [vmem:[#allocation2 + $0xb8] sm:$0x1] }
 0x799   :  { %11839 = vmatprep.subr.bf16.mxu1 %v12492_v57  ;;  %v8476_v28 = vrot.slane %v8393_v0, 1 }
 0x79a   :  { %11828 = vmatpush3.bf16.msra.mxu0 %v11827_v16  ;;  %v8501_v26 = vsel %vm3109_vm5, %v8485_v30, %v8500_v35  ;;  %v9174_v16 = vld [vmem:[%s14693_s7 + $0x7d0] sm:$0xff]  ;;  %s12493_s7 = smov [#allocation15]  }
 0x79b   :  { %8696 = vmatmul.mubr.f32.gmra.mrb[52].mxu1 %v8480_v58  ;;  %11830 = vmatprep.subr.bf16.mxu0 %v11829_v29  ;;  %v11861_v29 = vpack.c.bf16 %v9175_v60, %v9174_v16  ;;  %v8461_v58 = vrot.slane %v8386_v1, 1  ;;  %v8477_v2 = vsel %vm3109_vm5, %v8464_v41, %v8476_v28  ;;  %v8410_v41 = vld [vmem:[#allocation2 + $0x170] sm:$0x1]  ;;  %s8901_s26 = sshll.u32 %s12493_s7, 4  ;;  %s8902_s26 = int_to_ptr.vmem [resolvable:$true] %s8901_s26 }
 0x79c   :  { %8700 = vmatprep.mubr.f32.mxu1 %v8499_v8  ;;  %11841 = vmatpush1.bf16.msra.mxu1 %v11840_v18  ;;  %v8399_v18 = vld [vmem:[#allocation2 + $0x118] sm:$0xfe]  ;;  %v8411_v8 = vld [vmem:[#allocation2 + $0x178] sm:$0x1]  ;;  %v8504_v31 = vrot.slane %v8410_v41, 1  ;;  %s12450_s27 = scalar_lea.vmem %s8902_s26, 512  ;;  %p12455_p1 = scmp.lt.s32.totalorder %s8902_s26, %s8902_s26 }
 0x79d   :  { %11842 = vmatprep.subr.bf16.mxu1 %v12492_v57  ;;  %v8493_v61 = vrot.slane %v8399_v18, 1  ;;  %v8506_v27 = vrot.slane %v8411_v8, 1  ;;  %p12451_p0 = scmp.ne.s32.totalorder %s8902_s26, %s12450_s27  ;;  %p12456_p2 = scmp.lt.s32.totalorder %s12450_s27, %s12450_s27 }
 0x79e   :  { %11832 = vmatpush3.bf16.msra.mxu0 %v11831_v23  ;;  %v8462_v23 = vsel %vm3109_vm5, %v8460_v49, %v8461_v58 }
 0x79f   :  { %8701 = vmatmul.mubr.f32.gmra.mrb[54].mxu1 %v8497_v15  ;;  %v8495_v53 = vsel %vm3109_vm5, %v8493_v61, %v8494_v56  ;;  %v8475_v15 = vsel %vm3109_vm5, %v8461_v58, %v8474_v39  ;;  %v8507_v7 = vsel %vm3109_vm5, %v8494_v56, %v8506_v27  ;;  %p12457_p3 = por %p12456_p2, %p12455_p1 }
 0x7a0   :  { %11844 = vmatpush1.bf16.msra.mxu1 %v11843_v4  ;;  %9176 = vmatprep.mubr.msk.f32.mxu1 %vm140_vm3, %v8465_v20  ;;  %v8398_v4 = vld [vmem:[#allocation2 + $0x110] sm:$0xfe] }
 0x7a1   :  { %8771 = vmatmul.mubr.f32.vlgmr.msra.gmra.mrb[56].mxu0 %v8456_v12  ;;  %11845 = vmatprep.subr.bf16.mxu1 %v12492_v57  ;;  %v8490_v45 = vrot.slane %v8398_v4, 1  ;;  %p12458_p4 = pnand %p12457_p3, %p12451_p0 }
 0x7a2   :  { %8775 = vmatprep.mubr.f32.mxu0 %v8473_v43 }
 0x7a4   :  { %11847 = vmatpush1.bf16.msra.mxu1 %v11846_v50 }
 0x7a5   :  { %8776 = vmatmul.mubr.f32.gmra.mrb[58].mxu0 %v8471_v19  ;;  %11848 = vmatprep.subr.bf16.mxu1 %v12492_v57 }
 0x7a6   :  { %8780 = vmatprep.mubr.f32.mxu0 %v8489_v33 }
 0x7a8   :  { %11850 = vmatpush1.bf16.msra.mxu1 %v11849_v34 }
 0x7a9   :  { %8781 = vmatmul.mubr.f32.gmra.mrb[60].mxu0 %v8486_v3  ;;  %11851 = vmatprep.subr.bf16.mxu1 %v12492_v57 }
 0x7aa   :  { %8785 = vmatprep.mubr.f32.mxu0 %v8503_v55 }
 0x7ac   :  { %11853 = vmatpush1.bf16.msra.mxu1 %v11852_v46 }
 0x7ad   :  { %8786 = vmatmul.mubr.f32.gmra.mrb[62].mxu0 %v8501_v26  ;;  %11854 = vmatprep.subr.bf16.mxu1 %v12492_v57 }
 0x7b0   :  { %11856 = vmatpush1.bf16.msra.mxu1 %v11855_v14 }
 0x7b1   :  { %11857 = vmatprep.subr.bf16.mxu1 %v12492_v57 }
 0x7b4   :  { %11859 = vmatpush1.bf16.msra.mxu1 %v11858_v47 }
 0x7b5   :  { %11860 = vmatprep.subr.bf16.mxu1 %v12492_v57  ;;  %v8404_v57 = vld [vmem:[#allocation2 + $0x140] sm:$0xff] }
 0x7b6   :  { %v8491_v17 = vrot.slane %v8404_v57, 1 }
 0x7b8   :  { %11862 = vmatpush1.bf16.msra.mxu1 %v11861_v29  ;;  %v8492_v52 = vsel %vm3109_vm5, %v8490_v45, %v8491_v17  ;;  %v8505_v48 = vsel %vm3109_vm5, %v8491_v17, %v8504_v31 }
 0x7bb   :  { %8856 = vmatmul.mubr.f32.vlgmr.msra.gmra.mrb[56].mxu1 %v8462_v23 }
 0x7bc   :  { %9177 = vmatprep.mubr.msk.f32.mxu1 %vm140_vm3, %v8477_v2 }
 0x7bf   :  { %8861 = vmatmul.mubr.f32.gmra.mrb[58].mxu1 %v8475_v15 }
 0x7c0   :  { %9178 = vmatprep.mubr.msk.f32.mxu1 %vm140_vm3, %v8495_v53 }
 0x7c3   :  { %8866 = vmatmul.mubr.f32.gmra.mrb[60].mxu1 %v8492_v52 }
 0x7c4   :  { %9179 = vmatprep.mubr.msk.f32.mxu1 %vm140_vm3, %v8507_v7 }
 0x7c7   :  { %8871 = vmatmul.mubr.f32.gmra.mrb[62].mxu1 %v8505_v48 }
 0x803   :  { %v9213_v20 = vpop.f32.mrb[32].mxu0 }
 0x804   :  { %v9214_v54 = vpop.f32.mrb[33].mxu0 }
 0x805   :  { %v9257_v6 = vpop.f32.mrb[24].mxu1  ;;  %v9215_v12 = vadd.f32 %v9214_v54, %v9213_v20 }
 0x806   :  { %v9258_v50 = vpop.f32.mrb[25].mxu1 }
 0x807   :  { %v9259_v22 = vadd.f32 %v9258_v50, %v9257_v6 }
 0x808   :  { %v9216_v59 = vpop.f32.mrb[34].mxu0 }
 0x809   :  { %v9217_v43 = vpop.f32.mrb[35].mxu0  ;;  %v8010_v21 = vadd.f32 %v9259_v22, %v9215_v12 }
 0x80a   :  { %v9260_v24 = vpop.f32.mrb[26].mxu1  ;;  %v9218_v32 = vadd.f32 %v9217_v43, %v9216_v59 }
 0x80b   :  { %v9261_v38 = vpop.f32.mrb[27].mxu1 }
 0x80c   :  { %v9262_v40 = vadd.f32 %v9261_v38, %v9260_v24 }
 0x80e   :  { %v8015_v9 = vadd.f32 %v9262_v40, %v9218_v32 }
 0x812   :  { %v9219_v25 = vpop.f32.mrb[36].mxu0  ;;  %v9263_v19 = vpop.f32.mrb[28].mxu1 }
 0x813   :  { %v9220_v34 = vpop.f32.mrb[37].mxu0  ;;  %v9264_v33 = vpop.f32.mrb[29].mxu1 }
 0x814   :  { %v9221_v30 = vadd.f32 %v9220_v34, %v9219_v25  ;;  %v9265_v10 = vadd.f32 %v9264_v33, %v9263_v19 }
 0x816   :  { %v8020_v11 = vadd.f32 %v9265_v10, %v9221_v30 }
 0x81b   :  { %v9222_v42 = vpop.f32.mrb[38].mxu0 }
 0x81c   :  { %v9223_v62 = vpop.f32.mrb[39].mxu0 }
 0x81d   :  { %v9224_v13 = vadd.f32 %v9223_v62, %v9222_v42 }
 0x820   :  { %v9266_v3 = vpop.f32.mrb[30].mxu1 }
 0x821   :  { %v9267_v46 = vpop.f32.mrb[31].mxu1 }
 0x822   :  { %v9268_v35 = vadd.f32 %v9267_v46, %v9266_v3 }
 0x824   :  { %v8025_v55 = vadd.f32 %v9268_v35, %v9224_v13 }
 0x826   :  { %v9301_v5 = vpop.f32.mrb[32].mxu1 }
 0x827   :  { %v9302_v51 = vpop.f32.mrb[33].mxu1 }
 0x828   :  { %v9303_v26 = vadd.f32 %v9302_v51, %v9301_v5 }
 0x82a   :  { %v9304_v14 = vpop.f32.mrb[34].mxu1 }
 0x82b   :  { %v9305_v36 = vpop.f32.mrb[35].mxu1 }
 0x82c   :  { %v8094_v37 = vpop.f32.mrb[40].mxu0  ;;  %v9306_v47 = vadd.f32 %v9305_v36, %v9304_v14 }
 0x82d   :  { %v8095_v16 = vadd.f32 %v8094_v37, %v8010_v21  ;;  %v8096_v60 = vpop.f32.mrb[41].mxu0 }
 0x82e   :  { %v9307_v0 = vpop.f32.mrb[36].mxu1 }
 0x82f   :  { %v8188_v1 = vadd.f32 %v9303_v26, %v8095_v16  ;;  %v9308_v29 = vpop.f32.mrb[37].mxu1 }
 0x830   :  { %v8099_v44 = vpop.f32.mrb[42].mxu0  ;;  %v9309_v28 = vadd.f32 %v9308_v29, %v9307_v0 }
 0x831   :  { %v8100_v58 = vadd.f32 %v8099_v44, %v8015_v9  ;;  %v8101_v18 = vpop.f32.mrb[43].mxu0 }
 0x832   :  { %v9310_v63 = vpop.f32.mrb[38].mxu1 }
 0x833   :  { %v8193_v49 = vadd.f32 %v9306_v47, %v8100_v58  ;;  %v9311_v2 = vpop.f32.mrb[39].mxu1 }
 0x834   :  { %v8104_v61 = vpop.f32.mrb[44].mxu0  ;;  %v9312_v56 = vadd.f32 %v9311_v2, %v9310_v63 }
 0x835   :  { %v8105_v23 = vadd.f32 %v8104_v61, %v8020_v11  ;;  %v8106_v39 = vpop.f32.mrb[45].mxu0 }
 0x837   :  { %v8198_v8 = vadd.f32 %v9309_v28, %v8105_v23 }
 0x838   :  { %v8109_v57 = vpop.f32.mrb[46].mxu0 }
 0x839   :  { %v8110_v53 = vadd.f32 %v8109_v57, %v8025_v55  ;;  %v8111_v4 = vpop.f32.mrb[47].mxu0 }
 0x83b   :  { %v8203_v27 = vadd.f32 %v9312_v56, %v8110_v53 }
 0x846   :  { %v9345_v15 = vpop.f32.mrb[40].mxu1 }
 0x847   :  { %v9346_v17 = vpop.f32.mrb[41].mxu1 }
 0x848   :  { %v9347_v41 = vadd.f32 %v9346_v17, %v9345_v15 }
 0x84a   :  { %v9348_v45 = vpop.f32.mrb[42].mxu1  ;;  %v8273_v7 = vadd.f32 %v9347_v41, %v8188_v1 }
 0x84b   :  { %v9349_v52 = vpop.f32.mrb[43].mxu1 }
 0x84c   :  { %v9350_v31 = vadd.f32 %v9349_v52, %v9348_v45 }
 0x84e   :  { %v9351_v48 = vpop.f32.mrb[44].mxu1  ;;  %v8278_v20 = vadd.f32 %v9350_v31, %v8193_v49 }
 0x84f   :  { %v9352_v54 = vpop.f32.mrb[45].mxu1 }
 0x850   :  { %v9353_v6 = vadd.f32 %v9352_v54, %v9351_v48 }
 0x852   :  { %v9354_v12 = vpop.f32.mrb[46].mxu1  ;;  %v8283_v50 = vadd.f32 %v9353_v6, %v8198_v8  ;;  %v9180_v8 = vld [vmem:[#allocation14] ss:$0 sm:$0xff] }
 0x853   :  { %v9355_v22 = vpop.f32.mrb[47].mxu1 }
 0x854   :  { %v9356_v59 = vadd.f32 %v9355_v22, %v9354_v12  ;;  %v8357_v43 = vpop.f32.mrb[48].mxu0 }
 0x855   :  { %v8358_v24 = vadd.f32 %v8357_v43, %v8273_v7  ;;  %v8359_v32 = vpop.f32.mrb[49].mxu0 }
 0x856   :  { %v8288_v21 = vadd.f32 %v9356_v59, %v8203_v27 }
 0x858   :  { %v8362_v38 = vpop.f32.mrb[50].mxu0 }
 0x859   :  { %v8363_v40 = vadd.f32 %v8362_v38, %v8278_v20  ;;  %v8364_v9 = vpop.f32.mrb[51].mxu0 }
 0x85c   :  { %v8367_v25 = vpop.f32.mrb[52].mxu0 }
 0x85d   :  { %v8368_v19 = vadd.f32 %v8367_v25, %v8283_v50  ;;  %v8369_v34 = vpop.f32.mrb[53].mxu0 }
 0x860   :  { %v8372_v30 = vpop.f32.mrb[54].mxu0 }
 0x861   :  { %v8373_v33 = vadd.f32 %v8372_v30, %v8288_v21  ;;  %v8374_v10 = vpop.f32.mrb[55].mxu0 }
 0x866   :  { %v9389_v11 = vpop.f32.mrb[48].mxu1 }
 0x867   :  { %v9390_v42 = vpop.f32.mrb[49].mxu1 }
 0x868   :  { %v9391_v62 = vadd.f32 %v9390_v42, %v9389_v11 }
 0x86a   :  { %v9392_v13 = vpop.f32.mrb[50].mxu1 }
 0x86b   :  { %v9393_v3 = vpop.f32.mrb[51].mxu1 }
 0x86c   :  { %v9394_v46 = vadd.f32 %v9393_v3, %v9392_v13 }
 0x86e   :  { %v9395_v35 = vpop.f32.mrb[52].mxu1 }
 0x86f   :  { %v9396_v55 = vpop.f32.mrb[53].mxu1 }
 0x870   :  { %v9397_v5 = vadd.f32 %v9396_v55, %v9395_v35 }
 0x872   :  { %v9398_v51 = vpop.f32.mrb[54].mxu1 }
 0x873   :  { %v9399_v26 = vpop.f32.mrb[55].mxu1 }
 0x874   :  { %v9433_v14 = vpop.f32.mrb[56].mxu0  ;;  %v9400_v36 = vadd.f32 %v9399_v26, %v9398_v51 }
 0x875   :  { %v9434_v37 = vpop.f32.mrb[57].mxu0 }
 0x876   :  { %v9435_v47 = vadd.f32 %v9434_v37, %v9433_v14 }
 0x878   :  { %v9436_v16 = vpop.f32.mrb[58].mxu0  ;;  %v8773_v60 = vadd.f32 %v9435_v47, %v9391_v62 }
 0x879   :  { %v9437_v0 = vpop.f32.mrb[59].mxu0 }
 0x87a   :  { %v9438_v1 = vadd.f32 %v9437_v0, %v9436_v16 }
 0x87c   :  { %v9439_v29 = vpop.f32.mrb[60].mxu0  ;;  %v8778_v44 = vadd.f32 %v9438_v1, %v9394_v46 }
 0x87d   :  { %v9440_v28 = vpop.f32.mrb[61].mxu0 }
 0x87e   :  { %v9441_v58 = vadd.f32 %v9440_v28, %v9439_v29 }
 0x880   :  { %v9442_v18 = vpop.f32.mrb[62].mxu0  ;;  %v8783_v63 = vadd.f32 %v9441_v58, %v9397_v5 }
 0x881   :  { %v9443_v49 = vpop.f32.mrb[63].mxu0 }
 0x882   :  { %v9444_v2 = vadd.f32 %v9443_v49, %v9442_v18 }
 0x884   :  { %v8788_v61 = vadd.f32 %v9444_v2, %v9400_v36 }
 0x88e   :  { %v8857_v56 = vpop.f32.mrb[56].mxu1 }
 0x88f   :  { %v8858_v23 = vadd.f32 %v8857_v56, %v8773_v60  ;;  %v8859_v39 = vpop.f32.mrb[57].mxu1 }
 0x891   :  { %v8876_v57 = vadd.f32 %v8858_v23, %v8358_v24 }
 0x892   :  { %v8862_v53 = vpop.f32.mrb[58].mxu1 }
 0x893   :  { %v8887_v4 = vadd.f32 %v9180_v8, %v8876_v57  ;;  %v8863_v27 = vadd.f32 %v8862_v53, %v8778_v44  ;;  %v8864_v15 = vpop.f32.mrb[59].mxu1 }
 0x895   :  { %8892 = vst.msk [vmem:[#allocation15] sm:$0xff] %vm8891_vm6, %v8887_v4  ;;  %v8877_v17 = vadd.f32 %v8863_v27, %v8363_v40 }
 0x896   :  { %v8867_v41 = vpop.f32.mrb[60].mxu1 }
 0x897   :  { %v8888_v45 = vadd.f32 %v9180_v8, %v8877_v17  ;;  %v8868_v7 = vadd.f32 %v8867_v41, %v8783_v63  ;;  %v8869_v52 = vpop.f32.mrb[61].mxu1 }
 0x899   :  { %8893 = vst.msk [vmem:[#allocation15 + $0x8] sm:$0xff] %vm8891_vm6, %v8888_v45  ;;  %v8878_v31 = vadd.f32 %v8868_v7, %v8368_v19 }
 0x89a   :  { %v8872_v48 = vpop.f32.mrb[62].mxu1 }
 0x89b   :  { %v8889_v20 = vadd.f32 %v9180_v8, %v8878_v31  ;;  %v8873_v54 = vadd.f32 %v8872_v48, %v8788_v61  ;;  %v8874_v6 = vpop.f32.mrb[63].mxu1 }
 0x89d   :  { %8894 = vst.msk [vmem:[#allocation15 + $0x10] sm:$0xff] %vm8891_vm6, %v8889_v20  ;;  %v8879_v12 = vadd.f32 %v8873_v54, %v8373_v33 }
 0x89f   :  { %v8890_v50 = vadd.f32 %v9180_v8, %v8879_v12 }
 0x8a1   :  { %8895 = vst.msk [vmem:[#allocation15 + $0x18] sm:$0xff] %vm8891_vm6, %v8890_v50 }
 0x8a2   :  { %12461 = shalt.err (!%p12458_p4)
}
 0x8a3   :  { %s12462_s30 = scalar_lea.hbm %s14695_s9, 512 }
 0x8a4   :  { %p12463_p5 = scmp.ne.s32.totalorder %s14695_s9, %s12462_s30  ;;  %p12466_p6 = scmp.lt.u32.totalorder %s12462_s30, %s14695_s9 }
 0x8a6   :  { %p12468_p7 = pnand %p12466_p6, %p12463_p5 }
 0x8a8   :  { %12471 = shalt.err (!%p12468_p7)
}
 0x8a9   :  { %s12494_s14 = smov 128   ;;  %s12495_s16 = smov 8  }
 0x8aa   :  { %8907 = dma.vmem_to_hbm [thread:$0]  %s8902_s26, 512, %s14695_s9, [#allocation5], %s12494_s14, %s12494_s14, %s12495_s16  }
 0x8ab   :  { %12480 = dma.done.wait [#allocation5], 512  }
 0x8ac   :  { %12481 = vsyncadd [#allocation5], 4294966784 }
 0x8ad   :  { %8911 = vsyncpa [#allocation4], 1 }
 0x8ae   :  { %8912 = vsyncpa [#allocation7], 1 }
 0x8af   :  { %8913 = vsyncpa [#allocation10], 1 }
 0x8b0   :  { %8914 = vsyncpa [#allocation13], 1 }
 0x8b1   :  { %8915 = vsyncpa [#allocation5], 1 }

</bundles_post_ra>
